<compile_context>
chip_gen: v5e
topology: v5e:2x2
jax: 0.10.0
libtpu: 0.0.40
codegen_flags: <defaults>
</compile_context>

<pallas_src>
import functools

import jax
import jax.numpy as jnp
import numpy as np
from jax import lax
from jax.experimental import pallas as pl
from jax.experimental.pallas import tpu as pltpu


def _rnn_lm_kernel(len_ref, xp_ref, whh_ref, wout_ref, bout_ref,
                   out_ref, h_ref, hs_ref, *, tc):
    """Grid = (batch blocks, time chunks, vocab tiles); last axis innermost.

    len_ref : (BB, 1)      int32  sequence lengths for this batch block
    xp_ref  : (BB, TC, H)  bf16   precomputed  x_t @ W_ih^T + (b_ih + b_hh)
    whh_ref : (H, H)       f32    W_hh^T (resident; constant index map)
    wout_ref: (H, TV)      f32    W_out^T vocab tile
    bout_ref: (1, TV)      f32    b_out vocab tile
    out_ref : (BB, TC, TV) f32    logits tile (batch-major)
    h_ref   : (BB, H)      f32    carried hidden state (scratch)
    hs_ref  : (BB, TC, H)  f32    masked hidden states of the chunk (scratch)
    """
    c = pl.program_id(1)          # time-chunk index (sequential recurrence)
    v = pl.program_id(2)          # vocab-tile index (innermost)

    @pl.when(jnp.logical_and(c == 0, v == 0))
    def _():                      # new batch block -> reset hidden state
        h_ref[...] = jnp.zeros(h_ref.shape, h_ref.dtype)

    # The tanh recurrence only runs once per (batch block, time chunk); the
    # vocab axis reuses the hidden states cached in hs_ref.
    @pl.when(v == 0)
    def _():
        whh = whh_ref[...]                                   # (H, H) f32
        lens = len_ref[...]                                  # (BB, 1) int32
        t0 = c * tc
        # Hoisted validity mask for the whole chunk: (BB, TC) bool.
        t_idx = t0 + lax.broadcasted_iota(jnp.int32, (1, tc), 1)
        valid_all = t_idx < lens

        h = h_ref[...]                                       # (BB, H) f32
        for tt in range(tc):                                 # static, unrolled
            xp_t = xp_ref[:, tt, :].astype(jnp.float32)      # (BB, H)
            h_new = jnp.tanh(
                xp_t + jnp.dot(h, whh, preferred_element_type=jnp.float32))
            valid = valid_all[:, tt:tt + 1]                  # (BB, 1) bool
            # pad_packed_sequence semantics: padded positions emit zero hidden.
            hs_ref[:, tt, :] = jnp.where(valid, h_new, 0.0)
            # packed-sequence semantics: h stops evolving past lengths[b]
            # (equivalent to PyTorch since the final hidden is never exposed).
            h = jnp.where(valid, h_new, h)
        h_ref[...] = h

    # Deferred output projection: one (BB*TC, H) @ (H, TV) matmul per tile.
    bb, H = h_ref.shape
    tv = wout_ref.shape[1]
    hs = hs_ref[...].reshape(bb * tc, H)
    logits = jnp.dot(hs, wout_ref[...], preferred_element_type=jnp.float32)
    logits = logits + bout_ref[...]              # padded rows end up == bias
    out_ref[...] = logits.reshape(bb, tc, tv).astype(out_ref.dtype)


def _pick_tile(n, unit, cap):
    """Largest divisor of n that is a multiple of `unit` and <= cap (else n)."""
    for cand in range(min(cap, n), unit - 1, -1):
        if cand % unit == 0 and n % cand == 0:
            return cand
    return n


def rnn_language_model_forward(indices, lengths, params, *,
                               tc_cap=32, bb_cap=128, tv_cap=1024,
                               out_dtype=jnp.float32):
    """Batch-first forward: indices (B, T) int32, lengths (B,) int32 ->
    logits (B, T, V)."""
    w_emb = params["w_emb"]              # (V, E), pad row zeroed
    wih_t = params["wih_t"]              # (E, H)  == W_ih.T
    whh_t = params["whh_t"]              # (H, H)  == W_hh.T
    b_rnn = params["b_rnn"]              # (1, H)  == b_ih + b_hh
    wout_t = params["wout_t"]            # (H, V)  == W_out.T
    b_out = params["b_out"]              # (1, V)

    B, T = indices.shape
    H = whh_t.shape[0]
    V = wout_t.shape[1]

    bb = _pick_tile(B, 8, bb_cap)        # batch rows per grid step (MXU M)
    tc = _pick_tile(T, 8, tc_cap)        # timesteps per grid step
    tv = _pick_tile(V, 128, tv_cap)      # vocab columns per grid step

    # ---- glue (plain JAX): masking, embedding gather, hoisted input
    # projection for ALL timesteps as one big matmul, batch-major. ----
    mask = jnp.arange(T, dtype=jnp.int32)[None, :] < lengths[:, None]
    masked_idx = indices * mask.astype(indices.dtype)
    # NOTE: if padding_idx != 0 this maps padded slots onto token 0; outputs
    # at those positions are masked anyway (logits == bias), so this is safe.
    emb = jnp.take(w_emb, masked_idx, axis=0)                        # (B, T, E)
    xp = jnp.einsum("bte,eh->bth", emb, wih_t,
                    preferred_element_type=jnp.float32) + b_rnn      # (B, T, H)
    xp = xp.astype(jnp.bfloat16)         # halve HBM traffic; widened in-kernel

    lens_col = lengths.astype(jnp.int32).reshape(B, 1)

    grid = (B // bb, T // tc, V // tv)
    kernel = functools.partial(_rnn_lm_kernel, tc=tc)

    grid_spec = pl.GridSpec(
        grid=grid,
        in_specs=[
            pl.BlockSpec((bb, 1), lambda b, c, v: (b, 0)),       # lengths col
            pl.BlockSpec((bb, tc, H), lambda b, c, v: (b, c, 0)),  # xp chunk
            pl.BlockSpec((H, H), lambda b, c, v: (0, 0)),        # W_hh^T
            pl.BlockSpec((H, tv), lambda b, c, v: (0, v)),       # W_out^T tile
            pl.BlockSpec((1, tv), lambda b, c, v: (0, v)),       # b_out tile
        ],
        out_specs=pl.BlockSpec((bb, tc, tv), lambda b, c, v: (b, c, v)),
        scratch_shapes=[
            pltpu.VMEM((bb, H), jnp.float32),       # carried hidden state
            pltpu.VMEM((bb, tc, H), jnp.float32),   # masked hiddens (chunk)
        ],
    )

    logits = pl.pallas_call(
        kernel,
        out_shape=jax.ShapeDtypeStruct((B, T, V), out_dtype),
        grid_spec=grid_spec,
        compiler_params=pltpu.CompilerParams(
            # batch blocks independent -> megacore parallel on v7x;
            # time chunks carry the recurrence; vocab tiles reuse the chunk.
            dimension_semantics=("parallel", "arbitrary", "arbitrary"),
            vmem_limit_bytes=64 * 1024 * 1024),
    )(lens_col, xp, whh_t, wout_t, b_out)

    return logits                                   # (B, T, V), batch-major


def make_params(key, vocab_size, embed_size, hidden_size, pad_id=0):
    ks = jax.random.split(key, 7)
    scale = 1.0 / np.sqrt(hidden_size)
    w_emb = jax.random.normal(ks[0], (vocab_size, embed_size), jnp.float32) * 0.1
    w_emb = w_emb.at[pad_id].set(0.0)                         # padding_idx row
    w_ih = jax.random.uniform(ks[1], (hidden_size, embed_size), jnp.float32,
                              -scale, scale)
    w_hh = jax.random.uniform(ks[2], (hidden_size, hidden_size), jnp.float32,
                              -scale, scale)
    b_ih = jax.random.uniform(ks[3], (hidden_size,), jnp.float32, -scale, scale)
    b_hh = jax.random.uniform(ks[4], (hidden_size,), jnp.float32, -scale, scale)
    w_out = jax.random.uniform(ks[5], (vocab_size, hidden_size), jnp.float32,
                               -scale, scale)
    b_out = jax.random.uniform(ks[6], (vocab_size,), jnp.float32, -scale, scale)
    return {
        "w_emb": w_emb,
        "wih_t": w_ih.T,
        "whh_t": w_hh.T,
        "b_rnn": (b_ih + b_hh)[None, :],
        "wout_t": w_out.T,
        "b_out": b_out[None, :],
    }


def reference_forward(indices, lengths, params):
    """Pure-JAX f32 reference with PyTorch-equivalent semantics."""
    B, T = indices.shape
    H = params["whh_t"].shape[0]
    mask = (jnp.arange(T)[None, :] < lengths[:, None])
    idx = indices * mask.astype(indices.dtype)
    emb = jnp.take(params["w_emb"], idx, axis=0)               # (B, T, E)

    def step(h, x_t):
        h = jnp.tanh(x_t @ params["wih_t"] + h @ params["whh_t"]
                     + params["b_rnn"])
        return h, h

    _, hs = lax.scan(step, jnp.zeros((B, H), jnp.float32),
                     jnp.transpose(emb, (1, 0, 2)))
    hs = jnp.transpose(hs, (1, 0, 2)) * mask[:, :, None].astype(jnp.float32)
    return hs @ params["wout_t"] + params["b_out"]


if __name__ == "__main__":
    # Small, module-consistent shapes exercising the multi-chunk recurrence
    # (2 time chunks) and the vocab-tiling axis (2 vocab tiles via tv_cap).
    B, T = 16, 64
    VOCAB, EMBED, HIDDEN = 512, 128, 128
    PAD_ID = 0

    key = jax.random.PRNGKey(0)
    k_param, k_idx = jax.random.split(key)

    params = make_params(k_param, VOCAB, EMBED, HIDDEN, pad_id=PAD_ID)

    indices = jax.random.randint(k_idx, (B, T), 1, VOCAB, dtype=jnp.int32)
    lengths = jnp.array([64, 20, 64, 7, 45, 64, 3, 27,
                         50, 11, 64, 1, 24, 9, 38, 60], dtype=jnp.int32)

    logits = rnn_language_model_forward(indices, lengths, params, tv_cap=256)
    logits = jax.block_until_ready(logits)

    ref = jax.block_until_ready(reference_forward(indices, lengths, params))
    # xp is stored in bf16 (everything else f32) -> small bounded differences.
    np.testing.assert_allclose(np.asarray(logits), np.asarray(ref),
                               rtol=2e-2, atol=2e-2)

    assert logits.shape == (B, T, VOCAB)
    print("KERNEL_OK")
</pallas_src>

<mosaic_0001>
module attributes {stable_mosaic.version = 11 : i64} {
  func.func @_rnn_lm_kernel(%arg0: i32, %arg1: i32, %arg2: i32, %arg3: memref<16x1xi32, #tpu.memory_space<vmem>>, %arg4: memref<16x32x128xbf16, #tpu.memory_space<vmem>>, %arg5: memref<128x128xf32, #tpu.memory_space<vmem>>, %arg6: memref<128x256xf32, #tpu.memory_space<vmem>>, %arg7: memref<1x256xf32, #tpu.memory_space<vmem>>, %arg8: memref<16x32x256xf32, #tpu.memory_space<vmem>>, %arg9: memref<16x128xf32, #tpu.memory_space<vmem>>, %arg10: memref<16x32x128xf32, #tpu.memory_space<vmem>>) attributes {dimension_semantics = [#tpu.dimension_semantics<parallel>, #tpu.dimension_semantics<arbitrary>, #tpu.dimension_semantics<arbitrary>], iteration_bounds = array<i64: 1, 2, 2>, scalar_prefetch = 0 : i64, scratch_operands = 2 : i64, tpu.core_type = #tpu.core_type<tc>, window_params = [{transform_indices = @transform_0, window_bounds = array<i64: 16, 1>}, {transform_indices = @transform_1, window_bounds = array<i64: 16, 32, 128>}, {pipeline_mode = #tpu.pipeline_mode<synchronous>, transform_indices = @transform_2, window_bounds = array<i64: 128, 128>}, {transform_indices = @transform_3, window_bounds = array<i64: 128, 256>}, {transform_indices = @transform_4, window_bounds = array<i64: 1, 256>}, {transform_indices = @transform_5, window_bounds = array<i64: 16, 32, 256>}]} {
    %c0_i32 = arith.constant 0 : i32
    %0 = arith.cmpi eq, %arg1, %c0_i32 : i32
    %c0_i32_0 = arith.constant 0 : i32
    %1 = arith.cmpi eq, %arg2, %c0_i32_0 : i32
    %2 = arith.andi %0, %1 : i1
    %3 = arith.extui %2 : i1 to i32
    %c0_i32_1 = arith.constant 0 : i32
    %4 = arith.cmpi ne, %3, %c0_i32_1 : i32
    scf.if %4 {
      %cst_13 = arith.constant 0.000000e+00 : f32
      %17 = vector.broadcast %cst_13 : f32 to vector<16x128xf32>
      %c0_14 = arith.constant 0 : index
      %c0_15 = arith.constant 0 : index
      %18 = vector.load %arg9[%c0_14, %c0_15] : memref<16x128xf32, #tpu.memory_space<vmem>>, vector<16x128xf32>
      tpu.vector_store %arg9[%c0_14, %c0_15], %17 {strides = array<i32>} : memref<16x128xf32, #tpu.memory_space<vmem>>, vector<16x128xf32>,
    } else {
    }
    %c0_i32_2 = arith.constant 0 : i32
    %5 = arith.cmpi eq, %arg2, %c0_i32_2 : i32
    %6 = arith.extui %5 : i1 to i32
    %c0_i32_3 = arith.constant 0 : i32
    %7 = arith.cmpi ne, %6, %c0_i32_3 : i32
    scf.if %7 {
      %c0_13 = arith.constant 0 : index
      %c0_14 = arith.constant 0 : index
      %17 = vector.load %arg5[%c0_13, %c0_14] : memref<128x128xf32, #tpu.memory_space<vmem>>, vector<128x128xf32>
      %c0_15 = arith.constant 0 : index
      %c0_16 = arith.constant 0 : index
      %18 = vector.load %arg3[%c0_15, %c0_16] : memref<16x1xi32, #tpu.memory_space<vmem>>, vector<16x1xi32>
      %c32_i32 = arith.constant 32 : i32
      %19 = arith.muli %arg1, %c32_i32 : i32
      %20 = tpu.iota {dimensions = array<i32: 1>} : vector<1x32xi32>
      %21 = vector.broadcast %19 : i32 to vector<1x32xi32>
      %22 = arith.addi %21, %20 : vector<1x32xi32>
      %23 = vector.broadcast %22 : vector<1x32xi32> to vector<16x32xi32>
      %24 = vector.broadcast %18 : vector<16x1xi32> to vector<16x32xi32>
      %25 = arith.cmpi slt, %23, %24 : vector<16x32xi32>
      %c0_17 = arith.constant 0 : index
      %c0_18 = arith.constant 0 : index
      %26 = vector.load %arg9[%c0_17, %c0_18] : memref<16x128xf32, #tpu.memory_space<vmem>>, vector<16x128xf32>
      %c0_19 = arith.constant 0 : index
      %c0_20 = arith.constant 0 : index
      %c0_21 = arith.constant 0 : index
      %27 = vector.load %arg4[%c0_19, %c0_20, %c0_21] : memref<16x32x128xbf16, #tpu.memory_space<vmem>>, vector<16x1x128xbf16>
      %28 = vector.shape_cast %27 : vector<16x1x128xbf16> to vector<16x128xbf16>
      %29 = arith.extf %28 : vector<16x128xbf16> to vector<16x128xf32>
      %cst_22 = arith.constant dense<0.000000e+00> : vector<16x128xf32>
      %30 = tpu.matmul %26, %17, %cst_22 {dimension_numbers = #tpu.dot_dimension_numbers<[1], [0], [0], [1], [0, 0, 1, 1], [], []>} : vector<16x128xf32>, vector<128x128xf32>, vector<16x128xf32> -> vector<16x128xf32>
      %31 = arith.addf %29, %30 : vector<16x128xf32>
      %32 = math.tanh %31 : vector<16x128xf32>
      %33 = vector.extract_strided_slice %25 {offsets = [0, 0], sizes = [16, 1], strides = [1, 1]} : vector<16x32xi1> to vector<16x1xi1>
      %cst_23 = arith.constant 0.000000e+00 : f32
      %34 = vector.shape_cast %33 : vector<16x1xi1> to vector<16x1xi1>
      %35 = vector.broadcast %34 : vector<16x1xi1> to vector<16x128xi1>
      %36 = vector.broadcast %cst_23 : f32 to vector<16x128xf32>
      %37 = arith.select %35, %32, %36 : vector<16x128xi1>, vector<16x128xf32>
      %c0_24 = arith.constant 0 : index
      %c0_25 = arith.constant 0 : index
      %c0_26 = arith.constant 0 : index
      %38 = vector.load %arg10[%c0_24, %c0_25, %c0_26] : memref<16x32x128xf32, #tpu.memory_space<vmem>>, vector<16x1x128xf32>
      %39 = vector.shape_cast %38 : vector<16x1x128xf32> to vector<16x128xf32>
      %40 = vector.shape_cast %37 : vector<16x128xf32> to vector<16x1x128xf32>
      tpu.vector_store %arg10[%c0_24, %c0_25, %c0_26], %40 {strides = array<i32>} : memref<16x32x128xf32, #tpu.memory_space<vmem>>, vector<16x1x128xf32>,
      %41 = vector.shape_cast %33 : vector<16x1xi1> to vector<16x1xi1>
      %42 = vector.broadcast %41 : vector<16x1xi1> to vector<16x128xi1>
      %43 = arith.select %42, %32, %26 : vector<16x128xi1>, vector<16x128xf32>
      %c0_27 = arith.constant 0 : index
      %c1 = arith.constant 1 : index
      %c0_28 = arith.constant 0 : index
      %44 = vector.load %arg4[%c0_27, %c1, %c0_28] : memref<16x32x128xbf16, #tpu.memory_space<vmem>>, vector<16x1x128xbf16>
      %45 = vector.shape_cast %44 : vector<16x1x128xbf16> to vector<16x128xbf16>
      %46 = arith.extf %45 : vector<16x128xbf16> to vector<16x128xf32>
      %cst_29 = arith.constant dense<0.000000e+00> : vector<16x128xf32>
      %47 = tpu.matmul %43, %17, %cst_29 {dimension_numbers = #tpu.dot_dimension_numbers<[1], [0], [0], [1], [0, 0, 1, 1], [], []>} : vector<16x128xf32>, vector<128x128xf32>, vector<16x128xf32> -> vector<16x128xf32>
      %48 = arith.addf %46, %47 : vector<16x128xf32>
      %49 = math.tanh %48 : vector<16x128xf32>
      %50 = vector.extract_strided_slice %25 {offsets = [0, 1], sizes = [16, 1], strides = [1, 1]} : vector<16x32xi1> to vector<16x1xi1>
      %cst_30 = arith.constant 0.000000e+00 : f32
      %51 = vector.shape_cast %50 : vector<16x1xi1> to vector<16x1xi1>
      %52 = vector.broadcast %51 : vector<16x1xi1> to vector<16x128xi1>
      %53 = vector.broadcast %cst_30 : f32 to vector<16x128xf32>
      %54 = arith.select %52, %49, %53 : vector<16x128xi1>, vector<16x128xf32>
      %c0_31 = arith.constant 0 : index
      %c1_32 = arith.constant 1 : index
      %c0_33 = arith.constant 0 : index
      %55 = vector.load %arg10[%c0_31, %c1_32, %c0_33] : memref<16x32x128xf32, #tpu.memory_space<vmem>>, vector<16x1x128xf32>
      %56 = vector.shape_cast %55 : vector<16x1x128xf32> to vector<16x128xf32>
      %57 = vector.shape_cast %54 : vector<16x128xf32> to vector<16x1x128xf32>
      tpu.vector_store %arg10[%c0_31, %c1_32, %c0_33], %57 {strides = array<i32>} : memref<16x32x128xf32, #tpu.memory_space<vmem>>, vector<16x1x128xf32>,
      %58 = vector.shape_cast %50 : vector<16x1xi1> to vector<16x1xi1>
      %59 = vector.broadcast %58 : vector<16x1xi1> to vector<16x128xi1>
      %60 = arith.select %59, %49, %43 : vector<16x128xi1>, vector<16x128xf32>
      %c0_34 = arith.constant 0 : index
      %c2 = arith.constant 2 : index
      %c0_35 = arith.constant 0 : index
      %61 = vector.load %arg4[%c0_34, %c2, %c0_35] : memref<16x32x128xbf16, #tpu.memory_space<vmem>>, vector<16x1x128xbf16>
      %62 = vector.shape_cast %61 : vector<16x1x128xbf16> to vector<16x128xbf16>
      %63 = arith.extf %62 : vector<16x128xbf16> to vector<16x128xf32>
      %cst_36 = arith.constant dense<0.000000e+00> : vector<16x128xf32>
      %64 = tpu.matmul %60, %17, %cst_36 {dimension_numbers = #tpu.dot_dimension_numbers<[1], [0], [0], [1], [0, 0, 1, 1], [], []>} : vector<16x128xf32>, vector<128x128xf32>, vector<16x128xf32> -> vector<16x128xf32>
      %65 = arith.addf %63, %64 : vector<16x128xf32>
      %66 = math.tanh %65 : vector<16x128xf32>
      %67 = vector.extract_strided_slice %25 {offsets = [0, 2], sizes = [16, 1], strides = [1, 1]} : vector<16x32xi1> to vector<16x1xi1>
      %cst_37 = arith.constant 0.000000e+00 : f32
      %68 = vector.shape_cast %67 : vector<16x1xi1> to vector<16x1xi1>
      %69 = vector.broadcast %68 : vector<16x1xi1> to vector<16x128xi1>
      %70 = vector.broadcast %cst_37 : f32 to vector<16x128xf32>
      %71 = arith.select %69, %66, %70 : vector<16x128xi1>, vector<16x128xf32>
      %c0_38 = arith.constant 0 : index
      %c2_39 = arith.constant 2 : index
      %c0_40 = arith.constant 0 : index
      %72 = vector.load %arg10[%c0_38, %c2_39, %c0_40] : memref<16x32x128xf32, #tpu.memory_space<vmem>>, vector<16x1x128xf32>
      %73 = vector.shape_cast %72 : vector<16x1x128xf32> to vector<16x128xf32>
      %74 = vector.shape_cast %71 : vector<16x128xf32> to vector<16x1x128xf32>
      tpu.vector_store %arg10[%c0_38, %c2_39, %c0_40], %74 {strides = array<i32>} : memref<16x32x128xf32, #tpu.memory_space<vmem>>, vector<16x1x128xf32>,
      %75 = vector.shape_cast %67 : vector<16x1xi1> to vector<16x1xi1>
      %76 = vector.broadcast %75 : vector<16x1xi1> to vector<16x128xi1>
      %77 = arith.select %76, %66, %60 : vector<16x128xi1>, vector<16x128xf32>
      %c0_41 = arith.constant 0 : index
      %c3 = arith.constant 3 : index
      %c0_42 = arith.constant 0 : index
      %78 = vector.load %arg4[%c0_41, %c3, %c0_42] : memref<16x32x128xbf16, #tpu.memory_space<vmem>>, vector<16x1x128xbf16>
      %79 = vector.shape_cast %78 : vector<16x1x128xbf16> to vector<16x128xbf16>
      %80 = arith.extf %79 : vector<16x128xbf16> to vector<16x128xf32>
      %cst_43 = arith.constant dense<0.000000e+00> : vector<16x128xf32>
      %81 = tpu.matmul %77, %17, %cst_43 {dimension_numbers = #tpu.dot_dimension_numbers<[1], [0], [0], [1], [0, 0, 1, 1], [], []>} : vector<16x128xf32>, vector<128x128xf32>, vector<16x128xf32> -> vector<16x128xf32>
      %82 = arith.addf %80, %81 : vector<16x128xf32>
      %83 = math.tanh %82 : vector<16x128xf32>
      %84 = vector.extract_strided_slice %25 {offsets = [0, 3], sizes = [16, 1], strides = [1, 1]} : vector<16x32xi1> to vector<16x1xi1>
      %cst_44 = arith.constant 0.000000e+00 : f32
      %85 = vector.shape_cast %84 : vector<16x1xi1> to vector<16x1xi1>
      %86 = vector.broadcast %85 : vector<16x1xi1> to vector<16x128xi1>
      %87 = vector.broadcast %cst_44 : f32 to vector<16x128xf32>
      %88 = arith.select %86, %83, %87 : vector<16x128xi1>, vector<16x128xf32>
      %c0_45 = arith.constant 0 : index
      %c3_46 = arith.constant 3 : index
      %c0_47 = arith.constant 0 : index
      %89 = vector.load %arg10[%c0_45, %c3_46, %c0_47] : memref<16x32x128xf32, #tpu.memory_space<vmem>>, vector<16x1x128xf32>
      %90 = vector.shape_cast %89 : vector<16x1x128xf32> to vector<16x128xf32>
      %91 = vector.shape_cast %88 : vector<16x128xf32> to vector<16x1x128xf32>
      tpu.vector_store %arg10[%c0_45, %c3_46, %c0_47], %91 {strides = array<i32>} : memref<16x32x128xf32, #tpu.memory_space<vmem>>, vector<16x1x128xf32>,
      %92 = vector.shape_cast %84 : vector<16x1xi1> to vector<16x1xi1>
      %93 = vector.broadcast %92 : vector<16x1xi1> to vector<16x128xi1>
      %94 = arith.select %93, %83, %77 : vector<16x128xi1>, vector<16x128xf32>
      %c0_48 = arith.constant 0 : index
      %c4 = arith.constant 4 : index
      %c0_49 = arith.constant 0 : index
      %95 = vector.load %arg4[%c0_48, %c4, %c0_49] : memref<16x32x128xbf16, #tpu.memory_space<vmem>>, vector<16x1x128xbf16>
      %96 = vector.shape_cast %95 : vector<16x1x128xbf16> to vector<16x128xbf16>
      %97 = arith.extf %96 : vector<16x128xbf16> to vector<16x128xf32>
      %cst_50 = arith.constant dense<0.000000e+00> : vector<16x128xf32>
      %98 = tpu.matmul %94, %17, %cst_50 {dimension_numbers = #tpu.dot_dimension_numbers<[1], [0], [0], [1], [0, 0, 1, 1], [], []>} : vector<16x128xf32>, vector<128x128xf32>, vector<16x128xf32> -> vector<16x128xf32>
      %99 = arith.addf %97, %98 : vector<16x128xf32>
      %100 = math.tanh %99 : vector<16x128xf32>
      %101 = vector.extract_strided_slice %25 {offsets = [0, 4], sizes = [16, 1], strides = [1, 1]} : vector<16x32xi1> to vector<16x1xi1>
      %cst_51 = arith.constant 0.000000e+00 : f32
      %102 = vector.shape_cast %101 : vector<16x1xi1> to vector<16x1xi1>
      %103 = vector.broadcast %102 : vector<16x1xi1> to vector<16x128xi1>
      %104 = vector.broadcast %cst_51 : f32 to vector<16x128xf32>
      %105 = arith.select %103, %100, %104 : vector<16x128xi1>, vector<16x128xf32>
      %c0_52 = arith.constant 0 : index
      %c4_53 = arith.constant 4 : index
      %c0_54 = arith.constant 0 : index
      %106 = vector.load %arg10[%c0_52, %c4_53, %c0_54] : memref<16x32x128xf32, #tpu.memory_space<vmem>>, vector<16x1x128xf32>
      %107 = vector.shape_cast %106 : vector<16x1x128xf32> to vector<16x128xf32>
      %108 = vector.shape_cast %105 : vector<16x128xf32> to vector<16x1x128xf32>
      tpu.vector_store %arg10[%c0_52, %c4_53, %c0_54], %108 {strides = array<i32>} : memref<16x32x128xf32, #tpu.memory_space<vmem>>, vector<16x1x128xf32>,
      %109 = vector.shape_cast %101 : vector<16x1xi1> to vector<16x1xi1>
      %110 = vector.broadcast %109 : vector<16x1xi1> to vector<16x128xi1>
      %111 = arith.select %110, %100, %94 : vector<16x128xi1>, vector<16x128xf32>
      %c0_55 = arith.constant 0 : index
      %c5 = arith.constant 5 : index
      %c0_56 = arith.constant 0 : index
      %112 = vector.load %arg4[%c0_55, %c5, %c0_56] : memref<16x32x128xbf16, #tpu.memory_space<vmem>>, vector<16x1x128xbf16>
      %113 = vector.shape_cast %112 : vector<16x1x128xbf16> to vector<16x128xbf16>
      %114 = arith.extf %113 : vector<16x128xbf16> to vector<16x128xf32>
      %cst_57 = arith.constant dense<0.000000e+00> : vector<16x128xf32>
      %115 = tpu.matmul %111, %17, %cst_57 {dimension_numbers = #tpu.dot_dimension_numbers<[1], [0], [0], [1], [0, 0, 1, 1], [], []>} : vector<16x128xf32>, vector<128x128xf32>, vector<16x128xf32> -> vector<16x128xf32>
      %116 = arith.addf %114, %115 : vector<16x128xf32>
      %117 = math.tanh %116 : vector<16x128xf32>
      %118 = vector.extract_strided_slice %25 {offsets = [0, 5], sizes = [16, 1], strides = [1, 1]} : vector<16x32xi1> to vector<16x1xi1>
      %cst_58 = arith.constant 0.000000e+00 : f32
      %119 = vector.shape_cast %118 : vector<16x1xi1> to vector<16x1xi1>
      %120 = vector.broadcast %119 : vector<16x1xi1> to vector<16x128xi1>
      %121 = vector.broadcast %cst_58 : f32 to vector<16x128xf32>
      %122 = arith.select %120, %117, %121 : vector<16x128xi1>, vector<16x128xf32>
      %c0_59 = arith.constant 0 : index
      %c5_60 = arith.constant 5 : index
      %c0_61 = arith.constant 0 : index
      %123 = vector.load %arg10[%c0_59, %c5_60, %c0_61] : memref<16x32x128xf32, #tpu.memory_space<vmem>>, vector<16x1x128xf32>
      %124 = vector.shape_cast %123 : vector<16x1x128xf32> to vector<16x128xf32>
      %125 = vector.shape_cast %122 : vector<16x128xf32> to vector<16x1x128xf32>
      tpu.vector_store %arg10[%c0_59, %c5_60, %c0_61], %125 {strides = array<i32>} : memref<16x32x128xf32, #tpu.memory_space<vmem>>, vector<16x1x128xf32>,
      %126 = vector.shape_cast %118 : vector<16x1xi1> to vector<16x1xi1>
      %127 = vector.broadcast %126 : vector<16x1xi1> to vector<16x128xi1>
      %128 = arith.select %127, %117, %111 : vector<16x128xi1>, vector<16x128xf32>
      %c0_62 = arith.constant 0 : index
      %c6 = arith.constant 6 : index
      %c0_63 = arith.constant 0 : index
      %129 = vector.load %arg4[%c0_62, %c6, %c0_63] : memref<16x32x128xbf16, #tpu.memory_space<vmem>>, vector<16x1x128xbf16>
      %130 = vector.shape_cast %129 : vector<16x1x128xbf16> to vector<16x128xbf16>
      %131 = arith.extf %130 : vector<16x128xbf16> to vector<16x128xf32>
      %cst_64 = arith.constant dense<0.000000e+00> : vector<16x128xf32>
      %132 = tpu.matmul %128, %17, %cst_64 {dimension_numbers = #tpu.dot_dimension_numbers<[1], [0], [0], [1], [0, 0, 1, 1], [], []>} : vector<16x128xf32>, vector<128x128xf32>, vector<16x128xf32> -> vector<16x128xf32>
      %133 = arith.addf %131, %132 : vector<16x128xf32>
      %134 = math.tanh %133 : vector<16x128xf32>
      %135 = vector.extract_strided_slice %25 {offsets = [0, 6], sizes = [16, 1], strides = [1, 1]} : vector<16x32xi1> to vector<16x1xi1>
      %cst_65 = arith.constant 0.000000e+00 : f32
      %136 = vector.shape_cast %135 : vector<16x1xi1> to vector<16x1xi1>
      %137 = vector.broadcast %136 : vector<16x1xi1> to vector<16x128xi1>
      %138 = vector.broadcast %cst_65 : f32 to vector<16x128xf32>
      %139 = arith.select %137, %134, %138 : vector<16x128xi1>, vector<16x128xf32>
      %c0_66 = arith.constant 0 : index
      %c6_67 = arith.constant 6 : index
      %c0_68 = arith.constant 0 : index
      %140 = vector.load %arg10[%c0_66, %c6_67, %c0_68] : memref<16x32x128xf32, #tpu.memory_space<vmem>>, vector<16x1x128xf32>
      %141 = vector.shape_cast %140 : vector<16x1x128xf32> to vector<16x128xf32>
      %142 = vector.shape_cast %139 : vector<16x128xf32> to vector<16x1x128xf32>
      tpu.vector_store %arg10[%c0_66, %c6_67, %c0_68], %142 {strides = array<i32>} : memref<16x32x128xf32, #tpu.memory_space<vmem>>, vector<16x1x128xf32>,
      %143 = vector.shape_cast %135 : vector<16x1xi1> to vector<16x1xi1>
      %144 = vector.broadcast %143 : vector<16x1xi1> to vector<16x128xi1>
      %145 = arith.select %144, %134, %128 : vector<16x128xi1>, vector<16x128xf32>
      %c0_69 = arith.constant 0 : index
      %c7 = arith.constant 7 : index
      %c0_70 = arith.constant 0 : index
      %146 = vector.load %arg4[%c0_69, %c7, %c0_70] : memref<16x32x128xbf16, #tpu.memory_space<vmem>>, vector<16x1x128xbf16>
      %147 = vector.shape_cast %146 : vector<16x1x128xbf16> to vector<16x128xbf16>
      %148 = arith.extf %147 : vector<16x128xbf16> to vector<16x128xf32>
      %cst_71 = arith.constant dense<0.000000e+00> : vector<16x128xf32>
      %149 = tpu.matmul %145, %17, %cst_71 {dimension_numbers = #tpu.dot_dimension_numbers<[1], [0], [0], [1], [0, 0, 1, 1], [], []>} : vector<16x128xf32>, vector<128x128xf32>, vector<16x128xf32> -> vector<16x128xf32>
      %150 = arith.addf %148, %149 : vector<16x128xf32>
      %151 = math.tanh %150 : vector<16x128xf32>
      %152 = vector.extract_strided_slice %25 {offsets = [0, 7], sizes = [16, 1], strides = [1, 1]} : vector<16x32xi1> to vector<16x1xi1>
      %cst_72 = arith.constant 0.000000e+00 : f32
      %153 = vector.shape_cast %152 : vector<16x1xi1> to vector<16x1xi1>
      %154 = vector.broadcast %153 : vector<16x1xi1> to vector<16x128xi1>
      %155 = vector.broadcast %cst_72 : f32 to vector<16x128xf32>
      %156 = arith.select %154, %151, %155 : vector<16x128xi1>, vector<16x128xf32>
      %c0_73 = arith.constant 0 : index
      %c7_74 = arith.constant 7 : index
      %c0_75 = arith.constant 0 : index
      %157 = vector.load %arg10[%c0_73, %c7_74, %c0_75] : memref<16x32x128xf32, #tpu.memory_space<vmem>>, vector<16x1x128xf32>
      %158 = vector.shape_cast %157 : vector<16x1x128xf32> to vector<16x128xf32>
      %159 = vector.shape_cast %156 : vector<16x128xf32> to vector<16x1x128xf32>
      tpu.vector_store %arg10[%c0_73, %c7_74, %c0_75], %159 {strides = array<i32>} : memref<16x32x128xf32, #tpu.memory_space<vmem>>, vector<16x1x128xf32>,
      %160 = vector.shape_cast %152 : vector<16x1xi1> to vector<16x1xi1>
      %161 = vector.broadcast %160 : vector<16x1xi1> to vector<16x128xi1>
      %162 = arith.select %161, %151, %145 : vector<16x128xi1>, vector<16x128xf32>
      %c0_76 = arith.constant 0 : index
      %c8 = arith.constant 8 : index
      %c0_77 = arith.constant 0 : index
      %163 = vector.load %arg4[%c0_76, %c8, %c0_77] : memref<16x32x128xbf16, #tpu.memory_space<vmem>>, vector<16x1x128xbf16>
      %164 = vector.shape_cast %163 : vector<16x1x128xbf16> to vector<16x128xbf16>
      %165 = arith.extf %164 : vector<16x128xbf16> to vector<16x128xf32>
      %cst_78 = arith.constant dense<0.000000e+00> : vector<16x128xf32>
      %166 = tpu.matmul %162, %17, %cst_78 {dimension_numbers = #tpu.dot_dimension_numbers<[1], [0], [0], [1], [0, 0, 1, 1], [], []>} : vector<16x128xf32>, vector<128x128xf32>, vector<16x128xf32> -> vector<16x128xf32>
      %167 = arith.addf %165, %166 : vector<16x128xf32>
      %168 = math.tanh %167 : vector<16x128xf32>
      %169 = vector.extract_strided_slice %25 {offsets = [0, 8], sizes = [16, 1], strides = [1, 1]} : vector<16x32xi1> to vector<16x1xi1>
      %cst_79 = arith.constant 0.000000e+00 : f32
      %170 = vector.shape_cast %169 : vector<16x1xi1> to vector<16x1xi1>
      %171 = vector.broadcast %170 : vector<16x1xi1> to vector<16x128xi1>
      %172 = vector.broadcast %cst_79 : f32 to vector<16x128xf32>
      %173 = arith.select %171, %168, %172 : vector<16x128xi1>, vector<16x128xf32>
      %c0_80 = arith.constant 0 : index
      %c8_81 = arith.constant 8 : index
      %c0_82 = arith.constant 0 : index
      %174 = vector.load %arg10[%c0_80, %c8_81, %c0_82] : memref<16x32x128xf32, #tpu.memory_space<vmem>>, vector<16x1x128xf32>
      %175 = vector.shape_cast %174 : vector<16x1x128xf32> to vector<16x128xf32>
      %176 = vector.shape_cast %173 : vector<16x128xf32> to vector<16x1x128xf32>
      tpu.vector_store %arg10[%c0_80, %c8_81, %c0_82], %176 {strides = array<i32>} : memref<16x32x128xf32, #tpu.memory_space<vmem>>, vector<16x1x128xf32>,
      %177 = vector.shape_cast %169 : vector<16x1xi1> to vector<16x1xi1>
      %178 = vector.broadcast %177 : vector<16x1xi1> to vector<16x128xi1>
      %179 = arith.select %178, %168, %162 : vector<16x128xi1>, vector<16x128xf32>
      %c0_83 = arith.constant 0 : index
      %c9 = arith.constant 9 : index
      %c0_84 = arith.constant 0 : index
      %180 = vector.load %arg4[%c0_83, %c9, %c0_84] : memref<16x32x128xbf16, #tpu.memory_space<vmem>>, vector<16x1x128xbf16>
      %181 = vector.shape_cast %180 : vector<16x1x128xbf16> to vector<16x128xbf16>
      %182 = arith.extf %181 : vector<16x128xbf16> to vector<16x128xf32>
      %cst_85 = arith.constant dense<0.000000e+00> : vector<16x128xf32>
      %183 = tpu.matmul %179, %17, %cst_85 {dimension_numbers = #tpu.dot_dimension_numbers<[1], [0], [0], [1], [0, 0, 1, 1], [], []>} : vector<16x128xf32>, vector<128x128xf32>, vector<16x128xf32> -> vector<16x128xf32>
      %184 = arith.addf %182, %183 : vector<16x128xf32>
      %185 = math.tanh %184 : vector<16x128xf32>
      %186 = vector.extract_strided_slice %25 {offsets = [0, 9], sizes = [16, 1], strides = [1, 1]} : vector<16x32xi1> to vector<16x1xi1>
      %cst_86 = arith.constant 0.000000e+00 : f32
      %187 = vector.shape_cast %186 : vector<16x1xi1> to vector<16x1xi1>
      %188 = vector.broadcast %187 : vector<16x1xi1> to vector<16x128xi1>
      %189 = vector.broadcast %cst_86 : f32 to vector<16x128xf32>
      %190 = arith.select %188, %185, %189 : vector<16x128xi1>, vector<16x128xf32>
      %c0_87 = arith.constant 0 : index
      %c9_88 = arith.constant 9 : index
      %c0_89 = arith.constant 0 : index
      %191 = vector.load %arg10[%c0_87, %c9_88, %c0_89] : memref<16x32x128xf32, #tpu.memory_space<vmem>>, vector<16x1x128xf32>
      %192 = vector.shape_cast %191 : vector<16x1x128xf32> to vector<16x128xf32>
      %193 = vector.shape_cast %190 : vector<16x128xf32> to vector<16x1x128xf32>
      tpu.vector_store %arg10[%c0_87, %c9_88, %c0_89], %193 {strides = array<i32>} : memref<16x32x128xf32, #tpu.memory_space<vmem>>, vector<16x1x128xf32>,
      %194 = vector.shape_cast %186 : vector<16x1xi1> to vector<16x1xi1>
      %195 = vector.broadcast %194 : vector<16x1xi1> to vector<16x128xi1>
      %196 = arith.select %195, %185, %179 : vector<16x128xi1>, vector<16x128xf32>
      %c0_90 = arith.constant 0 : index
      %c10 = arith.constant 10 : index
      %c0_91 = arith.constant 0 : index
      %197 = vector.load %arg4[%c0_90, %c10, %c0_91] : memref<16x32x128xbf16, #tpu.memory_space<vmem>>, vector<16x1x128xbf16>
      %198 = vector.shape_cast %197 : vector<16x1x128xbf16> to vector<16x128xbf16>
      %199 = arith.extf %198 : vector<16x128xbf16> to vector<16x128xf32>
      %cst_92 = arith.constant dense<0.000000e+00> : vector<16x128xf32>
      %200 = tpu.matmul %196, %17, %cst_92 {dimension_numbers = #tpu.dot_dimension_numbers<[1], [0], [0], [1], [0, 0, 1, 1], [], []>} : vector<16x128xf32>, vector<128x128xf32>, vector<16x128xf32> -> vector<16x128xf32>
      %201 = arith.addf %199, %200 : vector<16x128xf32>
      %202 = math.tanh %201 : vector<16x128xf32>
      %203 = vector.extract_strided_slice %25 {offsets = [0, 10], sizes = [16, 1], strides = [1, 1]} : vector<16x32xi1> to vector<16x1xi1>
      %cst_93 = arith.constant 0.000000e+00 : f32
      %204 = vector.shape_cast %203 : vector<16x1xi1> to vector<16x1xi1>
      %205 = vector.broadcast %204 : vector<16x1xi1> to vector<16x128xi1>
      %206 = vector.broadcast %cst_93 : f32 to vector<16x128xf32>
      %207 = arith.select %205, %202, %206 : vector<16x128xi1>, vector<16x128xf32>
      %c0_94 = arith.constant 0 : index
      %c10_95 = arith.constant 10 : index
      %c0_96 = arith.constant 0 : index
      %208 = vector.load %arg10[%c0_94, %c10_95, %c0_96] : memref<16x32x128xf32, #tpu.memory_space<vmem>>, vector<16x1x128xf32>
      %209 = vector.shape_cast %208 : vector<16x1x128xf32> to vector<16x128xf32>
      %210 = vector.shape_cast %207 : vector<16x128xf32> to vector<16x1x128xf32>
      tpu.vector_store %arg10[%c0_94, %c10_95, %c0_96], %210 {strides = array<i32>} : memref<16x32x128xf32, #tpu.memory_space<vmem>>, vector<16x1x128xf32>,
      %211 = vector.shape_cast %203 : vector<16x1xi1> to vector<16x1xi1>
      %212 = vector.broadcast %211 : vector<16x1xi1> to vector<16x128xi1>
      %213 = arith.select %212, %202, %196 : vector<16x128xi1>, vector<16x128xf32>
      %c0_97 = arith.constant 0 : index
      %c11 = arith.constant 11 : index
      %c0_98 = arith.constant 0 : index
      %214 = vector.load %arg4[%c0_97, %c11, %c0_98] : memref<16x32x128xbf16, #tpu.memory_space<vmem>>, vector<16x1x128xbf16>
      %215 = vector.shape_cast %214 : vector<16x1x128xbf16> to vector<16x128xbf16>
      %216 = arith.extf %215 : vector<16x128xbf16> to vector<16x128xf32>
      %cst_99 = arith.constant dense<0.000000e+00> : vector<16x128xf32>
      %217 = tpu.matmul %213, %17, %cst_99 {dimension_numbers = #tpu.dot_dimension_numbers<[1], [0], [0], [1], [0, 0, 1, 1], [], []>} : vector<16x128xf32>, vector<128x128xf32>, vector<16x128xf32> -> vector<16x128xf32>
      %218 = arith.addf %216, %217 : vector<16x128xf32>
      %219 = math.tanh %218 : vector<16x128xf32>
      %220 = vector.extract_strided_slice %25 {offsets = [0, 11], sizes = [16, 1], strides = [1, 1]} : vector<16x32xi1> to vector<16x1xi1>
      %cst_100 = arith.constant 0.000000e+00 : f32
      %221 = vector.shape_cast %220 : vector<16x1xi1> to vector<16x1xi1>
      %222 = vector.broadcast %221 : vector<16x1xi1> to vector<16x128xi1>
      %223 = vector.broadcast %cst_100 : f32 to vector<16x128xf32>
      %224 = arith.select %222, %219, %223 : vector<16x128xi1>, vector<16x128xf32>
      %c0_101 = arith.constant 0 : index
      %c11_102 = arith.constant 11 : index
      %c0_103 = arith.constant 0 : index
      %225 = vector.load %arg10[%c0_101, %c11_102, %c0_103] : memref<16x32x128xf32, #tpu.memory_space<vmem>>, vector<16x1x128xf32>
      %226 = vector.shape_cast %225 : vector<16x1x128xf32> to vector<16x128xf32>
      %227 = vector.shape_cast %224 : vector<16x128xf32> to vector<16x1x128xf32>
      tpu.vector_store %arg10[%c0_101, %c11_102, %c0_103], %227 {strides = array<i32>} : memref<16x32x128xf32, #tpu.memory_space<vmem>>, vector<16x1x128xf32>,
      %228 = vector.shape_cast %220 : vector<16x1xi1> to vector<16x1xi1>
      %229 = vector.broadcast %228 : vector<16x1xi1> to vector<16x128xi1>
      %230 = arith.select %229, %219, %213 : vector<16x128xi1>, vector<16x128xf32>
      %c0_104 = arith.constant 0 : index
      %c12 = arith.constant 12 : index
      %c0_105 = arith.constant 0 : index
      %231 = vector.load %arg4[%c0_104, %c12, %c0_105] : memref<16x32x128xbf16, #tpu.memory_space<vmem>>, vector<16x1x128xbf16>
      %232 = vector.shape_cast %231 : vector<16x1x128xbf16> to vector<16x128xbf16>
      %233 = arith.extf %232 : vector<16x128xbf16> to vector<16x128xf32>
      %cst_106 = arith.constant dense<0.000000e+00> : vector<16x128xf32>
      %234 = tpu.matmul %230, %17, %cst_106 {dimension_numbers = #tpu.dot_dimension_numbers<[1], [0], [0], [1], [0, 0, 1, 1], [], []>} : vector<16x128xf32>, vector<128x128xf32>, vector<16x128xf32> -> vector<16x128xf32>
      %235 = arith.addf %233, %234 : vector<16x128xf32>
      %236 = math.tanh %235 : vector<16x128xf32>
      %237 = vector.extract_strided_slice %25 {offsets = [0, 12], sizes = [16, 1], strides = [1, 1]} : vector<16x32xi1> to vector<16x1xi1>
      %cst_107 = arith.constant 0.000000e+00 : f32
      %238 = vector.shape_cast %237 : vector<16x1xi1> to vector<16x1xi1>
      %239 = vector.broadcast %238 : vector<16x1xi1> to vector<16x128xi1>
      %240 = vector.broadcast %cst_107 : f32 to vector<16x128xf32>
      %241 = arith.select %239, %236, %240 : vector<16x128xi1>, vector<16x128xf32>
      %c0_108 = arith.constant 0 : index
      %c12_109 = arith.constant 12 : index
      %c0_110 = arith.constant 0 : index
      %242 = vector.load %arg10[%c0_108, %c12_109, %c0_110] : memref<16x32x128xf32, #tpu.memory_space<vmem>>, vector<16x1x128xf32>
      %243 = vector.shape_cast %242 : vector<16x1x128xf32> to vector<16x128xf32>
      %244 = vector.shape_cast %241 : vector<16x128xf32> to vector<16x1x128xf32>
      tpu.vector_store %arg10[%c0_108, %c12_109, %c0_110], %244 {strides = array<i32>} : memref<16x32x128xf32, #tpu.memory_space<vmem>>, vector<16x1x128xf32>,
      %245 = vector.shape_cast %237 : vector<16x1xi1> to vector<16x1xi1>
      %246 = vector.broadcast %245 : vector<16x1xi1> to vector<16x128xi1>
      %247 = arith.select %246, %236, %230 : vector<16x128xi1>, vector<16x128xf32>
      %c0_111 = arith.constant 0 : index
      %c13 = arith.constant 13 : index
      %c0_112 = arith.constant 0 : index
      %248 = vector.load %arg4[%c0_111, %c13, %c0_112] : memref<16x32x128xbf16, #tpu.memory_space<vmem>>, vector<16x1x128xbf16>
      %249 = vector.shape_cast %248 : vector<16x1x128xbf16> to vector<16x128xbf16>
      %250 = arith.extf %249 : vector<16x128xbf16> to vector<16x128xf32>
      %cst_113 = arith.constant dense<0.000000e+00> : vector<16x128xf32>
      %251 = tpu.matmul %247, %17, %cst_113 {dimension_numbers = #tpu.dot_dimension_numbers<[1], [0], [0], [1], [0, 0, 1, 1], [], []>} : vector<16x128xf32>, vector<128x128xf32>, vector<16x128xf32> -> vector<16x128xf32>
      %252 = arith.addf %250, %251 : vector<16x128xf32>
      %253 = math.tanh %252 : vector<16x128xf32>
      %254 = vector.extract_strided_slice %25 {offsets = [0, 13], sizes = [16, 1], strides = [1, 1]} : vector<16x32xi1> to vector<16x1xi1>
      %cst_114 = arith.constant 0.000000e+00 : f32
      %255 = vector.shape_cast %254 : vector<16x1xi1> to vector<16x1xi1>
      %256 = vector.broadcast %255 : vector<16x1xi1> to vector<16x128xi1>
      %257 = vector.broadcast %cst_114 : f32 to vector<16x128xf32>
      %258 = arith.select %256, %253, %257 : vector<16x128xi1>, vector<16x128xf32>
      %c0_115 = arith.constant 0 : index
      %c13_116 = arith.constant 13 : index
      %c0_117 = arith.constant 0 : index
      %259 = vector.load %arg10[%c0_115, %c13_116, %c0_117] : memref<16x32x128xf32, #tpu.memory_space<vmem>>, vector<16x1x128xf32>
      %260 = vector.shape_cast %259 : vector<16x1x128xf32> to vector<16x128xf32>
      %261 = vector.shape_cast %258 : vector<16x128xf32> to vector<16x1x128xf32>
      tpu.vector_store %arg10[%c0_115, %c13_116, %c0_117], %261 {strides = array<i32>} : memref<16x32x128xf32, #tpu.memory_space<vmem>>, vector<16x1x128xf32>,
      %262 = vector.shape_cast %254 : vector<16x1xi1> to vector<16x1xi1>
      %263 = vector.broadcast %262 : vector<16x1xi1> to vector<16x128xi1>
      %264 = arith.select %263, %253, %247 : vector<16x128xi1>, vector<16x128xf32>
      %c0_118 = arith.constant 0 : index
      %c14 = arith.constant 14 : index
      %c0_119 = arith.constant 0 : index
      %265 = vector.load %arg4[%c0_118, %c14, %c0_119] : memref<16x32x128xbf16, #tpu.memory_space<vmem>>, vector<16x1x128xbf16>
      %266 = vector.shape_cast %265 : vector<16x1x128xbf16> to vector<16x128xbf16>
      %267 = arith.extf %266 : vector<16x128xbf16> to vector<16x128xf32>
      %cst_120 = arith.constant dense<0.000000e+00> : vector<16x128xf32>
      %268 = tpu.matmul %264, %17, %cst_120 {dimension_numbers = #tpu.dot_dimension_numbers<[1], [0], [0], [1], [0, 0, 1, 1], [], []>} : vector<16x128xf32>, vector<128x128xf32>, vector<16x128xf32> -> vector<16x128xf32>
      %269 = arith.addf %267, %268 : vector<16x128xf32>
      %270 = math.tanh %269 : vector<16x128xf32>
      %271 = vector.extract_strided_slice %25 {offsets = [0, 14], sizes = [16, 1], strides = [1, 1]} : vector<16x32xi1> to vector<16x1xi1>
      %cst_121 = arith.constant 0.000000e+00 : f32
      %272 = vector.shape_cast %271 : vector<16x1xi1> to vector<16x1xi1>
      %273 = vector.broadcast %272 : vector<16x1xi1> to vector<16x128xi1>
      %274 = vector.broadcast %cst_121 : f32 to vector<16x128xf32>
      %275 = arith.select %273, %270, %274 : vector<16x128xi1>, vector<16x128xf32>
      %c0_122 = arith.constant 0 : index
      %c14_123 = arith.constant 14 : index
      %c0_124 = arith.constant 0 : index
      %276 = vector.load %arg10[%c0_122, %c14_123, %c0_124] : memref<16x32x128xf32, #tpu.memory_space<vmem>>, vector<16x1x128xf32>
      %277 = vector.shape_cast %276 : vector<16x1x128xf32> to vector<16x128xf32>
      %278 = vector.shape_cast %275 : vector<16x128xf32> to vector<16x1x128xf32>
      tpu.vector_store %arg10[%c0_122, %c14_123, %c0_124], %278 {strides = array<i32>} : memref<16x32x128xf32, #tpu.memory_space<vmem>>, vector<16x1x128xf32>,
      %279 = vector.shape_cast %271 : vector<16x1xi1> to vector<16x1xi1>
      %280 = vector.broadcast %279 : vector<16x1xi1> to vector<16x128xi1>
      %281 = arith.select %280, %270, %264 : vector<16x128xi1>, vector<16x128xf32>
      %c0_125 = arith.constant 0 : index
      %c15 = arith.constant 15 : index
      %c0_126 = arith.constant 0 : index
      %282 = vector.load %arg4[%c0_125, %c15, %c0_126] : memref<16x32x128xbf16, #tpu.memory_space<vmem>>, vector<16x1x128xbf16>
      %283 = vector.shape_cast %282 : vector<16x1x128xbf16> to vector<16x128xbf16>
      %284 = arith.extf %283 : vector<16x128xbf16> to vector<16x128xf32>
      %cst_127 = arith.constant dense<0.000000e+00> : vector<16x128xf32>
      %285 = tpu.matmul %281, %17, %cst_127 {dimension_numbers = #tpu.dot_dimension_numbers<[1], [0], [0], [1], [0, 0, 1, 1], [], []>} : vector<16x128xf32>, vector<128x128xf32>, vector<16x128xf32> -> vector<16x128xf32>
      %286 = arith.addf %284, %285 : vector<16x128xf32>
      %287 = math.tanh %286 : vector<16x128xf32>
      %288 = vector.extract_strided_slice %25 {offsets = [0, 15], sizes = [16, 1], strides = [1, 1]} : vector<16x32xi1> to vector<16x1xi1>
      %cst_128 = arith.constant 0.000000e+00 : f32
      %289 = vector.shape_cast %288 : vector<16x1xi1> to vector<16x1xi1>
      %290 = vector.broadcast %289 : vector<16x1xi1> to vector<16x128xi1>
      %291 = vector.broadcast %cst_128 : f32 to vector<16x128xf32>
      %292 = arith.select %290, %287, %291 : vector<16x128xi1>, vector<16x128xf32>
      %c0_129 = arith.constant 0 : index
      %c15_130 = arith.constant 15 : index
      %c0_131 = arith.constant 0 : index
      %293 = vector.load %arg10[%c0_129, %c15_130, %c0_131] : memref<16x32x128xf32, #tpu.memory_space<vmem>>, vector<16x1x128xf32>
      %294 = vector.shape_cast %293 : vector<16x1x128xf32> to vector<16x128xf32>
      %295 = vector.shape_cast %292 : vector<16x128xf32> to vector<16x1x128xf32>
      tpu.vector_store %arg10[%c0_129, %c15_130, %c0_131], %295 {strides = array<i32>} : memref<16x32x128xf32, #tpu.memory_space<vmem>>, vector<16x1x128xf32>,
      %296 = vector.shape_cast %288 : vector<16x1xi1> to vector<16x1xi1>
      %297 = vector.broadcast %296 : vector<16x1xi1> to vector<16x128xi1>
      %298 = arith.select %297, %287, %281 : vector<16x128xi1>, vector<16x128xf32>
      %c0_132 = arith.constant 0 : index
      %c16 = arith.constant 16 : index
      %c0_133 = arith.constant 0 : index
      %299 = vector.load %arg4[%c0_132, %c16, %c0_133] : memref<16x32x128xbf16, #tpu.memory_space<vmem>>, vector<16x1x128xbf16>
      %300 = vector.shape_cast %299 : vector<16x1x128xbf16> to vector<16x128xbf16>
      %301 = arith.extf %300 : vector<16x128xbf16> to vector<16x128xf32>
      %cst_134 = arith.constant dense<0.000000e+00> : vector<16x128xf32>
      %302 = tpu.matmul %298, %17, %cst_134 {dimension_numbers = #tpu.dot_dimension_numbers<[1], [0], [0], [1], [0, 0, 1, 1], [], []>} : vector<16x128xf32>, vector<128x128xf32>, vector<16x128xf32> -> vector<16x128xf32>
      %303 = arith.addf %301, %302 : vector<16x128xf32>
      %304 = math.tanh %303 : vector<16x128xf32>
      %305 = vector.extract_strided_slice %25 {offsets = [0, 16], sizes = [16, 1], strides = [1, 1]} : vector<16x32xi1> to vector<16x1xi1>
      %cst_135 = arith.constant 0.000000e+00 : f32
      %306 = vector.shape_cast %305 : vector<16x1xi1> to vector<16x1xi1>
      %307 = vector.broadcast %306 : vector<16x1xi1> to vector<16x128xi1>
      %308 = vector.broadcast %cst_135 : f32 to vector<16x128xf32>
      %309 = arith.select %307, %304, %308 : vector<16x128xi1>, vector<16x128xf32>
      %c0_136 = arith.constant 0 : index
      %c16_137 = arith.constant 16 : index
      %c0_138 = arith.constant 0 : index
      %310 = vector.load %arg10[%c0_136, %c16_137, %c0_138] : memref<16x32x128xf32, #tpu.memory_space<vmem>>, vector<16x1x128xf32>
      %311 = vector.shape_cast %310 : vector<16x1x128xf32> to vector<16x128xf32>
      %312 = vector.shape_cast %309 : vector<16x128xf32> to vector<16x1x128xf32>
      tpu.vector_store %arg10[%c0_136, %c16_137, %c0_138], %312 {strides = array<i32>} : memref<16x32x128xf32, #tpu.memory_space<vmem>>, vector<16x1x128xf32>,
      %313 = vector.shape_cast %305 : vector<16x1xi1> to vector<16x1xi1>
      %314 = vector.broadcast %313 : vector<16x1xi1> to vector<16x128xi1>
      %315 = arith.select %314, %304, %298 : vector<16x128xi1>, vector<16x128xf32>
      %c0_139 = arith.constant 0 : index
      %c17 = arith.constant 17 : index
      %c0_140 = arith.constant 0 : index
      %316 = vector.load %arg4[%c0_139, %c17, %c0_140] : memref<16x32x128xbf16, #tpu.memory_space<vmem>>, vector<16x1x128xbf16>
      %317 = vector.shape_cast %316 : vector<16x1x128xbf16> to vector<16x128xbf16>
      %318 = arith.extf %317 : vector<16x128xbf16> to vector<16x128xf32>
      %cst_141 = arith.constant dense<0.000000e+00> : vector<16x128xf32>
      %319 = tpu.matmul %315, %17, %cst_141 {dimension_numbers = #tpu.dot_dimension_numbers<[1], [0], [0], [1], [0, 0, 1, 1], [], []>} : vector<16x128xf32>, vector<128x128xf32>, vector<16x128xf32> -> vector<16x128xf32>
      %320 = arith.addf %318, %319 : vector<16x128xf32>
      %321 = math.tanh %320 : vector<16x128xf32>
      %322 = vector.extract_strided_slice %25 {offsets = [0, 17], sizes = [16, 1], strides = [1, 1]} : vector<16x32xi1> to vector<16x1xi1>
      %cst_142 = arith.constant 0.000000e+00 : f32
      %323 = vector.shape_cast %322 : vector<16x1xi1> to vector<16x1xi1>
      %324 = vector.broadcast %323 : vector<16x1xi1> to vector<16x128xi1>
      %325 = vector.broadcast %cst_142 : f32 to vector<16x128xf32>
      %326 = arith.select %324, %321, %325 : vector<16x128xi1>, vector<16x128xf32>
      %c0_143 = arith.constant 0 : index
      %c17_144 = arith.constant 17 : index
      %c0_145 = arith.constant 0 : index
      %327 = vector.load %arg10[%c0_143, %c17_144, %c0_145] : memref<16x32x128xf32, #tpu.memory_space<vmem>>, vector<16x1x128xf32>
      %328 = vector.shape_cast %327 : vector<16x1x128xf32> to vector<16x128xf32>
      %329 = vector.shape_cast %326 : vector<16x128xf32> to vector<16x1x128xf32>
      tpu.vector_store %arg10[%c0_143, %c17_144, %c0_145], %329 {strides = array<i32>} : memref<16x32x128xf32, #tpu.memory_space<vmem>>, vector<16x1x128xf32>,
      %330 = vector.shape_cast %322 : vector<16x1xi1> to vector<16x1xi1>
      %331 = vector.broadcast %330 : vector<16x1xi1> to vector<16x128xi1>
      %332 = arith.select %331, %321, %315 : vector<16x128xi1>, vector<16x128xf32>
      %c0_146 = arith.constant 0 : index
      %c18 = arith.constant 18 : index
      %c0_147 = arith.constant 0 : index
      %333 = vector.load %arg4[%c0_146, %c18, %c0_147] : memref<16x32x128xbf16, #tpu.memory_space<vmem>>, vector<16x1x128xbf16>
      %334 = vector.shape_cast %333 : vector<16x1x128xbf16> to vector<16x128xbf16>
      %335 = arith.extf %334 : vector<16x128xbf16> to vector<16x128xf32>
      %cst_148 = arith.constant dense<0.000000e+00> : vector<16x128xf32>
      %336 = tpu.matmul %332, %17, %cst_148 {dimension_numbers = #tpu.dot_dimension_numbers<[1], [0], [0], [1], [0, 0, 1, 1], [], []>} : vector<16x128xf32>, vector<128x128xf32>, vector<16x128xf32> -> vector<16x128xf32>
      %337 = arith.addf %335, %336 : vector<16x128xf32>
      %338 = math.tanh %337 : vector<16x128xf32>
      %339 = vector.extract_strided_slice %25 {offsets = [0, 18], sizes = [16, 1], strides = [1, 1]} : vector<16x32xi1> to vector<16x1xi1>
      %cst_149 = arith.constant 0.000000e+00 : f32
      %340 = vector.shape_cast %339 : vector<16x1xi1> to vector<16x1xi1>
      %341 = vector.broadcast %340 : vector<16x1xi1> to vector<16x128xi1>
      %342 = vector.broadcast %cst_149 : f32 to vector<16x128xf32>
      %343 = arith.select %341, %338, %342 : vector<16x128xi1>, vector<16x128xf32>
      %c0_150 = arith.constant 0 : index
      %c18_151 = arith.constant 18 : index
      %c0_152 = arith.constant 0 : index
      %344 = vector.load %arg10[%c0_150, %c18_151, %c0_152] : memref<16x32x128xf32, #tpu.memory_space<vmem>>, vector<16x1x128xf32>
      %345 = vector.shape_cast %344 : vector<16x1x128xf32> to vector<16x128xf32>
      %346 = vector.shape_cast %343 : vector<16x128xf32> to vector<16x1x128xf32>
      tpu.vector_store %arg10[%c0_150, %c18_151, %c0_152], %346 {strides = array<i32>} : memref<16x32x128xf32, #tpu.memory_space<vmem>>, vector<16x1x128xf32>,
      %347 = vector.shape_cast %339 : vector<16x1xi1> to vector<16x1xi1>
      %348 = vector.broadcast %347 : vector<16x1xi1> to vector<16x128xi1>
      %349 = arith.select %348, %338, %332 : vector<16x128xi1>, vector<16x128xf32>
      %c0_153 = arith.constant 0 : index
      %c19 = arith.constant 19 : index
      %c0_154 = arith.constant 0 : index
      %350 = vector.load %arg4[%c0_153, %c19, %c0_154] : memref<16x32x128xbf16, #tpu.memory_space<vmem>>, vector<16x1x128xbf16>
      %351 = vector.shape_cast %350 : vector<16x1x128xbf16> to vector<16x128xbf16>
      %352 = arith.extf %351 : vector<16x128xbf16> to vector<16x128xf32>
      %cst_155 = arith.constant dense<0.000000e+00> : vector<16x128xf32>
      %353 = tpu.matmul %349, %17, %cst_155 {dimension_numbers = #tpu.dot_dimension_numbers<[1], [0], [0], [1], [0, 0, 1, 1], [], []>} : vector<16x128xf32>, vector<128x128xf32>, vector<16x128xf32> -> vector<16x128xf32>
      %354 = arith.addf %352, %353 : vector<16x128xf32>
      %355 = math.tanh %354 : vector<16x128xf32>
      %356 = vector.extract_strided_slice %25 {offsets = [0, 19], sizes = [16, 1], strides = [1, 1]} : vector<16x32xi1> to vector<16x1xi1>
      %cst_156 = arith.constant 0.000000e+00 : f32
      %357 = vector.shape_cast %356 : vector<16x1xi1> to vector<16x1xi1>
      %358 = vector.broadcast %357 : vector<16x1xi1> to vector<16x128xi1>
      %359 = vector.broadcast %cst_156 : f32 to vector<16x128xf32>
      %360 = arith.select %358, %355, %359 : vector<16x128xi1>, vector<16x128xf32>
      %c0_157 = arith.constant 0 : index
      %c19_158 = arith.constant 19 : index
      %c0_159 = arith.constant 0 : index
      %361 = vector.load %arg10[%c0_157, %c19_158, %c0_159] : memref<16x32x128xf32, #tpu.memory_space<vmem>>, vector<16x1x128xf32>
      %362 = vector.shape_cast %361 : vector<16x1x128xf32> to vector<16x128xf32>
      %363 = vector.shape_cast %360 : vector<16x128xf32> to vector<16x1x128xf32>
      tpu.vector_store %arg10[%c0_157, %c19_158, %c0_159], %363 {strides = array<i32>} : memref<16x32x128xf32, #tpu.memory_space<vmem>>, vector<16x1x128xf32>,
      %364 = vector.shape_cast %356 : vector<16x1xi1> to vector<16x1xi1>
      %365 = vector.broadcast %364 : vector<16x1xi1> to vector<16x128xi1>
      %366 = arith.select %365, %355, %349 : vector<16x128xi1>, vector<16x128xf32>
      %c0_160 = arith.constant 0 : index
      %c20 = arith.constant 20 : index
      %c0_161 = arith.constant 0 : index
      %367 = vector.load %arg4[%c0_160, %c20, %c0_161] : memref<16x32x128xbf16, #tpu.memory_space<vmem>>, vector<16x1x128xbf16>
      %368 = vector.shape_cast %367 : vector<16x1x128xbf16> to vector<16x128xbf16>
      %369 = arith.extf %368 : vector<16x128xbf16> to vector<16x128xf32>
      %cst_162 = arith.constant dense<0.000000e+00> : vector<16x128xf32>
      %370 = tpu.matmul %366, %17, %cst_162 {dimension_numbers = #tpu.dot_dimension_numbers<[1], [0], [0], [1], [0, 0, 1, 1], [], []>} : vector<16x128xf32>, vector<128x128xf32>, vector<16x128xf32> -> vector<16x128xf32>
      %371 = arith.addf %369, %370 : vector<16x128xf32>
      %372 = math.tanh %371 : vector<16x128xf32>
      %373 = vector.extract_strided_slice %25 {offsets = [0, 20], sizes = [16, 1], strides = [1, 1]} : vector<16x32xi1> to vector<16x1xi1>
      %cst_163 = arith.constant 0.000000e+00 : f32
      %374 = vector.shape_cast %373 : vector<16x1xi1> to vector<16x1xi1>
      %375 = vector.broadcast %374 : vector<16x1xi1> to vector<16x128xi1>
      %376 = vector.broadcast %cst_163 : f32 to vector<16x128xf32>
      %377 = arith.select %375, %372, %376 : vector<16x128xi1>, vector<16x128xf32>
      %c0_164 = arith.constant 0 : index
      %c20_165 = arith.constant 20 : index
      %c0_166 = arith.constant 0 : index
      %378 = vector.load %arg10[%c0_164, %c20_165, %c0_166] : memref<16x32x128xf32, #tpu.memory_space<vmem>>, vector<16x1x128xf32>
      %379 = vector.shape_cast %378 : vector<16x1x128xf32> to vector<16x128xf32>
      %380 = vector.shape_cast %377 : vector<16x128xf32> to vector<16x1x128xf32>
      tpu.vector_store %arg10[%c0_164, %c20_165, %c0_166], %380 {strides = array<i32>} : memref<16x32x128xf32, #tpu.memory_space<vmem>>, vector<16x1x128xf32>,
      %381 = vector.shape_cast %373 : vector<16x1xi1> to vector<16x1xi1>
      %382 = vector.broadcast %381 : vector<16x1xi1> to vector<16x128xi1>
      %383 = arith.select %382, %372, %366 : vector<16x128xi1>, vector<16x128xf32>
      %c0_167 = arith.constant 0 : index
      %c21 = arith.constant 21 : index
      %c0_168 = arith.constant 0 : index
      %384 = vector.load %arg4[%c0_167, %c21, %c0_168] : memref<16x32x128xbf16, #tpu.memory_space<vmem>>, vector<16x1x128xbf16>
      %385 = vector.shape_cast %384 : vector<16x1x128xbf16> to vector<16x128xbf16>
      %386 = arith.extf %385 : vector<16x128xbf16> to vector<16x128xf32>
      %cst_169 = arith.constant dense<0.000000e+00> : vector<16x128xf32>
      %387 = tpu.matmul %383, %17, %cst_169 {dimension_numbers = #tpu.dot_dimension_numbers<[1], [0], [0], [1], [0, 0, 1, 1], [], []>} : vector<16x128xf32>, vector<128x128xf32>, vector<16x128xf32> -> vector<16x128xf32>
      %388 = arith.addf %386, %387 : vector<16x128xf32>
      %389 = math.tanh %388 : vector<16x128xf32>
      %390 = vector.extract_strided_slice %25 {offsets = [0, 21], sizes = [16, 1], strides = [1, 1]} : vector<16x32xi1> to vector<16x1xi1>
      %cst_170 = arith.constant 0.000000e+00 : f32
      %391 = vector.shape_cast %390 : vector<16x1xi1> to vector<16x1xi1>
      %392 = vector.broadcast %391 : vector<16x1xi1> to vector<16x128xi1>
      %393 = vector.broadcast %cst_170 : f32 to vector<16x128xf32>
      %394 = arith.select %392, %389, %393 : vector<16x128xi1>, vector<16x128xf32>
      %c0_171 = arith.constant 0 : index
      %c21_172 = arith.constant 21 : index
      %c0_173 = arith.constant 0 : index
      %395 = vector.load %arg10[%c0_171, %c21_172, %c0_173] : memref<16x32x128xf32, #tpu.memory_space<vmem>>, vector<16x1x128xf32>
      %396 = vector.shape_cast %395 : vector<16x1x128xf32> to vector<16x128xf32>
      %397 = vector.shape_cast %394 : vector<16x128xf32> to vector<16x1x128xf32>
      tpu.vector_store %arg10[%c0_171, %c21_172, %c0_173], %397 {strides = array<i32>} : memref<16x32x128xf32, #tpu.memory_space<vmem>>, vector<16x1x128xf32>,
      %398 = vector.shape_cast %390 : vector<16x1xi1> to vector<16x1xi1>
      %399 = vector.broadcast %398 : vector<16x1xi1> to vector<16x128xi1>
      %400 = arith.select %399, %389, %383 : vector<16x128xi1>, vector<16x128xf32>
      %c0_174 = arith.constant 0 : index
      %c22 = arith.constant 22 : index
      %c0_175 = arith.constant 0 : index
      %401 = vector.load %arg4[%c0_174, %c22, %c0_175] : memref<16x32x128xbf16, #tpu.memory_space<vmem>>, vector<16x1x128xbf16>
      %402 = vector.shape_cast %401 : vector<16x1x128xbf16> to vector<16x128xbf16>
      %403 = arith.extf %402 : vector<16x128xbf16> to vector<16x128xf32>
      %cst_176 = arith.constant dense<0.000000e+00> : vector<16x128xf32>
      %404 = tpu.matmul %400, %17, %cst_176 {dimension_numbers = #tpu.dot_dimension_numbers<[1], [0], [0], [1], [0, 0, 1, 1], [], []>} : vector<16x128xf32>, vector<128x128xf32>, vector<16x128xf32> -> vector<16x128xf32>
      %405 = arith.addf %403, %404 : vector<16x128xf32>
      %406 = math.tanh %405 : vector<16x128xf32>
      %407 = vector.extract_strided_slice %25 {offsets = [0, 22], sizes = [16, 1], strides = [1, 1]} : vector<16x32xi1> to vector<16x1xi1>
      %cst_177 = arith.constant 0.000000e+00 : f32
      %408 = vector.shape_cast %407 : vector<16x1xi1> to vector<16x1xi1>
      %409 = vector.broadcast %408 : vector<16x1xi1> to vector<16x128xi1>
      %410 = vector.broadcast %cst_177 : f32 to vector<16x128xf32>
      %411 = arith.select %409, %406, %410 : vector<16x128xi1>, vector<16x128xf32>
      %c0_178 = arith.constant 0 : index
      %c22_179 = arith.constant 22 : index
      %c0_180 = arith.constant 0 : index
      %412 = vector.load %arg10[%c0_178, %c22_179, %c0_180] : memref<16x32x128xf32, #tpu.memory_space<vmem>>, vector<16x1x128xf32>
      %413 = vector.shape_cast %412 : vector<16x1x128xf32> to vector<16x128xf32>
      %414 = vector.shape_cast %411 : vector<16x128xf32> to vector<16x1x128xf32>
      tpu.vector_store %arg10[%c0_178, %c22_179, %c0_180], %414 {strides = array<i32>} : memref<16x32x128xf32, #tpu.memory_space<vmem>>, vector<16x1x128xf32>,
      %415 = vector.shape_cast %407 : vector<16x1xi1> to vector<16x1xi1>
      %416 = vector.broadcast %415 : vector<16x1xi1> to vector<16x128xi1>
      %417 = arith.select %416, %406, %400 : vector<16x128xi1>, vector<16x128xf32>
      %c0_181 = arith.constant 0 : index
      %c23 = arith.constant 23 : index
      %c0_182 = arith.constant 0 : index
      %418 = vector.load %arg4[%c0_181, %c23, %c0_182] : memref<16x32x128xbf16, #tpu.memory_space<vmem>>, vector<16x1x128xbf16>
      %419 = vector.shape_cast %418 : vector<16x1x128xbf16> to vector<16x128xbf16>
      %420 = arith.extf %419 : vector<16x128xbf16> to vector<16x128xf32>
      %cst_183 = arith.constant dense<0.000000e+00> : vector<16x128xf32>
      %421 = tpu.matmul %417, %17, %cst_183 {dimension_numbers = #tpu.dot_dimension_numbers<[1], [0], [0], [1], [0, 0, 1, 1], [], []>} : vector<16x128xf32>, vector<128x128xf32>, vector<16x128xf32> -> vector<16x128xf32>
      %422 = arith.addf %420, %421 : vector<16x128xf32>
      %423 = math.tanh %422 : vector<16x128xf32>
      %424 = vector.extract_strided_slice %25 {offsets = [0, 23], sizes = [16, 1], strides = [1, 1]} : vector<16x32xi1> to vector<16x1xi1>
      %cst_184 = arith.constant 0.000000e+00 : f32
      %425 = vector.shape_cast %424 : vector<16x1xi1> to vector<16x1xi1>
      %426 = vector.broadcast %425 : vector<16x1xi1> to vector<16x128xi1>
      %427 = vector.broadcast %cst_184 : f32 to vector<16x128xf32>
      %428 = arith.select %426, %423, %427 : vector<16x128xi1>, vector<16x128xf32>
      %c0_185 = arith.constant 0 : index
      %c23_186 = arith.constant 23 : index
      %c0_187 = arith.constant 0 : index
      %429 = vector.load %arg10[%c0_185, %c23_186, %c0_187] : memref<16x32x128xf32, #tpu.memory_space<vmem>>, vector<16x1x128xf32>
      %430 = vector.shape_cast %429 : vector<16x1x128xf32> to vector<16x128xf32>
      %431 = vector.shape_cast %428 : vector<16x128xf32> to vector<16x1x128xf32>
      tpu.vector_store %arg10[%c0_185, %c23_186, %c0_187], %431 {strides = array<i32>} : memref<16x32x128xf32, #tpu.memory_space<vmem>>, vector<16x1x128xf32>,
      %432 = vector.shape_cast %424 : vector<16x1xi1> to vector<16x1xi1>
      %433 = vector.broadcast %432 : vector<16x1xi1> to vector<16x128xi1>
      %434 = arith.select %433, %423, %417 : vector<16x128xi1>, vector<16x128xf32>
      %c0_188 = arith.constant 0 : index
      %c24 = arith.constant 24 : index
      %c0_189 = arith.constant 0 : index
      %435 = vector.load %arg4[%c0_188, %c24, %c0_189] : memref<16x32x128xbf16, #tpu.memory_space<vmem>>, vector<16x1x128xbf16>
      %436 = vector.shape_cast %435 : vector<16x1x128xbf16> to vector<16x128xbf16>
      %437 = arith.extf %436 : vector<16x128xbf16> to vector<16x128xf32>
      %cst_190 = arith.constant dense<0.000000e+00> : vector<16x128xf32>
      %438 = tpu.matmul %434, %17, %cst_190 {dimension_numbers = #tpu.dot_dimension_numbers<[1], [0], [0], [1], [0, 0, 1, 1], [], []>} : vector<16x128xf32>, vector<128x128xf32>, vector<16x128xf32> -> vector<16x128xf32>
      %439 = arith.addf %437, %438 : vector<16x128xf32>
      %440 = math.tanh %439 : vector<16x128xf32>
      %441 = vector.extract_strided_slice %25 {offsets = [0, 24], sizes = [16, 1], strides = [1, 1]} : vector<16x32xi1> to vector<16x1xi1>
      %cst_191 = arith.constant 0.000000e+00 : f32
      %442 = vector.shape_cast %441 : vector<16x1xi1> to vector<16x1xi1>
      %443 = vector.broadcast %442 : vector<16x1xi1> to vector<16x128xi1>
      %444 = vector.broadcast %cst_191 : f32 to vector<16x128xf32>
      %445 = arith.select %443, %440, %444 : vector<16x128xi1>, vector<16x128xf32>
      %c0_192 = arith.constant 0 : index
      %c24_193 = arith.constant 24 : index
      %c0_194 = arith.constant 0 : index
      %446 = vector.load %arg10[%c0_192, %c24_193, %c0_194] : memref<16x32x128xf32, #tpu.memory_space<vmem>>, vector<16x1x128xf32>
      %447 = vector.shape_cast %446 : vector<16x1x128xf32> to vector<16x128xf32>
      %448 = vector.shape_cast %445 : vector<16x128xf32> to vector<16x1x128xf32>
      tpu.vector_store %arg10[%c0_192, %c24_193, %c0_194], %448 {strides = array<i32>} : memref<16x32x128xf32, #tpu.memory_space<vmem>>, vector<16x1x128xf32>,
      %449 = vector.shape_cast %441 : vector<16x1xi1> to vector<16x1xi1>
      %450 = vector.broadcast %449 : vector<16x1xi1> to vector<16x128xi1>
      %451 = arith.select %450, %440, %434 : vector<16x128xi1>, vector<16x128xf32>
      %c0_195 = arith.constant 0 : index
      %c25 = arith.constant 25 : index
      %c0_196 = arith.constant 0 : index
      %452 = vector.load %arg4[%c0_195, %c25, %c0_196] : memref<16x32x128xbf16, #tpu.memory_space<vmem>>, vector<16x1x128xbf16>
      %453 = vector.shape_cast %452 : vector<16x1x128xbf16> to vector<16x128xbf16>
      %454 = arith.extf %453 : vector<16x128xbf16> to vector<16x128xf32>
      %cst_197 = arith.constant dense<0.000000e+00> : vector<16x128xf32>
      %455 = tpu.matmul %451, %17, %cst_197 {dimension_numbers = #tpu.dot_dimension_numbers<[1], [0], [0], [1], [0, 0, 1, 1], [], []>} : vector<16x128xf32>, vector<128x128xf32>, vector<16x128xf32> -> vector<16x128xf32>
      %456 = arith.addf %454, %455 : vector<16x128xf32>
      %457 = math.tanh %456 : vector<16x128xf32>
      %458 = vector.extract_strided_slice %25 {offsets = [0, 25], sizes = [16, 1], strides = [1, 1]} : vector<16x32xi1> to vector<16x1xi1>
      %cst_198 = arith.constant 0.000000e+00 : f32
      %459 = vector.shape_cast %458 : vector<16x1xi1> to vector<16x1xi1>
      %460 = vector.broadcast %459 : vector<16x1xi1> to vector<16x128xi1>
      %461 = vector.broadcast %cst_198 : f32 to vector<16x128xf32>
      %462 = arith.select %460, %457, %461 : vector<16x128xi1>, vector<16x128xf32>
      %c0_199 = arith.constant 0 : index
      %c25_200 = arith.constant 25 : index
      %c0_201 = arith.constant 0 : index
      %463 = vector.load %arg10[%c0_199, %c25_200, %c0_201] : memref<16x32x128xf32, #tpu.memory_space<vmem>>, vector<16x1x128xf32>
      %464 = vector.shape_cast %463 : vector<16x1x128xf32> to vector<16x128xf32>
      %465 = vector.shape_cast %462 : vector<16x128xf32> to vector<16x1x128xf32>
      tpu.vector_store %arg10[%c0_199, %c25_200, %c0_201], %465 {strides = array<i32>} : memref<16x32x128xf32, #tpu.memory_space<vmem>>, vector<16x1x128xf32>,
      %466 = vector.shape_cast %458 : vector<16x1xi1> to vector<16x1xi1>
      %467 = vector.broadcast %466 : vector<16x1xi1> to vector<16x128xi1>
      %468 = arith.select %467, %457, %451 : vector<16x128xi1>, vector<16x128xf32>
      %c0_202 = arith.constant 0 : index
      %c26 = arith.constant 26 : index
      %c0_203 = arith.constant 0 : index
      %469 = vector.load %arg4[%c0_202, %c26, %c0_203] : memref<16x32x128xbf16, #tpu.memory_space<vmem>>, vector<16x1x128xbf16>
      %470 = vector.shape_cast %469 : vector<16x1x128xbf16> to vector<16x128xbf16>
      %471 = arith.extf %470 : vector<16x128xbf16> to vector<16x128xf32>
      %cst_204 = arith.constant dense<0.000000e+00> : vector<16x128xf32>
      %472 = tpu.matmul %468, %17, %cst_204 {dimension_numbers = #tpu.dot_dimension_numbers<[1], [0], [0], [1], [0, 0, 1, 1], [], []>} : vector<16x128xf32>, vector<128x128xf32>, vector<16x128xf32> -> vector<16x128xf32>
      %473 = arith.addf %471, %472 : vector<16x128xf32>
      %474 = math.tanh %473 : vector<16x128xf32>
      %475 = vector.extract_strided_slice %25 {offsets = [0, 26], sizes = [16, 1], strides = [1, 1]} : vector<16x32xi1> to vector<16x1xi1>
      %cst_205 = arith.constant 0.000000e+00 : f32
      %476 = vector.shape_cast %475 : vector<16x1xi1> to vector<16x1xi1>
      %477 = vector.broadcast %476 : vector<16x1xi1> to vector<16x128xi1>
      %478 = vector.broadcast %cst_205 : f32 to vector<16x128xf32>
      %479 = arith.select %477, %474, %478 : vector<16x128xi1>, vector<16x128xf32>
      %c0_206 = arith.constant 0 : index
      %c26_207 = arith.constant 26 : index
      %c0_208 = arith.constant 0 : index
      %480 = vector.load %arg10[%c0_206, %c26_207, %c0_208] : memref<16x32x128xf32, #tpu.memory_space<vmem>>, vector<16x1x128xf32>
      %481 = vector.shape_cast %480 : vector<16x1x128xf32> to vector<16x128xf32>
      %482 = vector.shape_cast %479 : vector<16x128xf32> to vector<16x1x128xf32>
      tpu.vector_store %arg10[%c0_206, %c26_207, %c0_208], %482 {strides = array<i32>} : memref<16x32x128xf32, #tpu.memory_space<vmem>>, vector<16x1x128xf32>,
      %483 = vector.shape_cast %475 : vector<16x1xi1> to vector<16x1xi1>
      %484 = vector.broadcast %483 : vector<16x1xi1> to vector<16x128xi1>
      %485 = arith.select %484, %474, %468 : vector<16x128xi1>, vector<16x128xf32>
      %c0_209 = arith.constant 0 : index
      %c27 = arith.constant 27 : index
      %c0_210 = arith.constant 0 : index
      %486 = vector.load %arg4[%c0_209, %c27, %c0_210] : memref<16x32x128xbf16, #tpu.memory_space<vmem>>, vector<16x1x128xbf16>
      %487 = vector.shape_cast %486 : vector<16x1x128xbf16> to vector<16x128xbf16>
      %488 = arith.extf %487 : vector<16x128xbf16> to vector<16x128xf32>
      %cst_211 = arith.constant dense<0.000000e+00> : vector<16x128xf32>
      %489 = tpu.matmul %485, %17, %cst_211 {dimension_numbers = #tpu.dot_dimension_numbers<[1], [0], [0], [1], [0, 0, 1, 1], [], []>} : vector<16x128xf32>, vector<128x128xf32>, vector<16x128xf32> -> vector<16x128xf32>
      %490 = arith.addf %488, %489 : vector<16x128xf32>
      %491 = math.tanh %490 : vector<16x128xf32>
      %492 = vector.extract_strided_slice %25 {offsets = [0, 27], sizes = [16, 1], strides = [1, 1]} : vector<16x32xi1> to vector<16x1xi1>
      %cst_212 = arith.constant 0.000000e+00 : f32
      %493 = vector.shape_cast %492 : vector<16x1xi1> to vector<16x1xi1>
      %494 = vector.broadcast %493 : vector<16x1xi1> to vector<16x128xi1>
      %495 = vector.broadcast %cst_212 : f32 to vector<16x128xf32>
      %496 = arith.select %494, %491, %495 : vector<16x128xi1>, vector<16x128xf32>
      %c0_213 = arith.constant 0 : index
      %c27_214 = arith.constant 27 : index
      %c0_215 = arith.constant 0 : index
      %497 = vector.load %arg10[%c0_213, %c27_214, %c0_215] : memref<16x32x128xf32, #tpu.memory_space<vmem>>, vector<16x1x128xf32>
      %498 = vector.shape_cast %497 : vector<16x1x128xf32> to vector<16x128xf32>
      %499 = vector.shape_cast %496 : vector<16x128xf32> to vector<16x1x128xf32>
      tpu.vector_store %arg10[%c0_213, %c27_214, %c0_215], %499 {strides = array<i32>} : memref<16x32x128xf32, #tpu.memory_space<vmem>>, vector<16x1x128xf32>,
      %500 = vector.shape_cast %492 : vector<16x1xi1> to vector<16x1xi1>
      %501 = vector.broadcast %500 : vector<16x1xi1> to vector<16x128xi1>
      %502 = arith.select %501, %491, %485 : vector<16x128xi1>, vector<16x128xf32>
      %c0_216 = arith.constant 0 : index
      %c28 = arith.constant 28 : index
      %c0_217 = arith.constant 0 : index
      %503 = vector.load %arg4[%c0_216, %c28, %c0_217] : memref<16x32x128xbf16, #tpu.memory_space<vmem>>, vector<16x1x128xbf16>
      %504 = vector.shape_cast %503 : vector<16x1x128xbf16> to vector<16x128xbf16>
      %505 = arith.extf %504 : vector<16x128xbf16> to vector<16x128xf32>
      %cst_218 = arith.constant dense<0.000000e+00> : vector<16x128xf32>
      %506 = tpu.matmul %502, %17, %cst_218 {dimension_numbers = #tpu.dot_dimension_numbers<[1], [0], [0], [1], [0, 0, 1, 1], [], []>} : vector<16x128xf32>, vector<128x128xf32>, vector<16x128xf32> -> vector<16x128xf32>
      %507 = arith.addf %505, %506 : vector<16x128xf32>
      %508 = math.tanh %507 : vector<16x128xf32>
      %509 = vector.extract_strided_slice %25 {offsets = [0, 28], sizes = [16, 1], strides = [1, 1]} : vector<16x32xi1> to vector<16x1xi1>
      %cst_219 = arith.constant 0.000000e+00 : f32
      %510 = vector.shape_cast %509 : vector<16x1xi1> to vector<16x1xi1>
      %511 = vector.broadcast %510 : vector<16x1xi1> to vector<16x128xi1>
      %512 = vector.broadcast %cst_219 : f32 to vector<16x128xf32>
      %513 = arith.select %511, %508, %512 : vector<16x128xi1>, vector<16x128xf32>
      %c0_220 = arith.constant 0 : index
      %c28_221 = arith.constant 28 : index
      %c0_222 = arith.constant 0 : index
      %514 = vector.load %arg10[%c0_220, %c28_221, %c0_222] : memref<16x32x128xf32, #tpu.memory_space<vmem>>, vector<16x1x128xf32>
      %515 = vector.shape_cast %514 : vector<16x1x128xf32> to vector<16x128xf32>
      %516 = vector.shape_cast %513 : vector<16x128xf32> to vector<16x1x128xf32>
      tpu.vector_store %arg10[%c0_220, %c28_221, %c0_222], %516 {strides = array<i32>} : memref<16x32x128xf32, #tpu.memory_space<vmem>>, vector<16x1x128xf32>,
      %517 = vector.shape_cast %509 : vector<16x1xi1> to vector<16x1xi1>
      %518 = vector.broadcast %517 : vector<16x1xi1> to vector<16x128xi1>
      %519 = arith.select %518, %508, %502 : vector<16x128xi1>, vector<16x128xf32>
      %c0_223 = arith.constant 0 : index
      %c29 = arith.constant 29 : index
      %c0_224 = arith.constant 0 : index
      %520 = vector.load %arg4[%c0_223, %c29, %c0_224] : memref<16x32x128xbf16, #tpu.memory_space<vmem>>, vector<16x1x128xbf16>
      %521 = vector.shape_cast %520 : vector<16x1x128xbf16> to vector<16x128xbf16>
      %522 = arith.extf %521 : vector<16x128xbf16> to vector<16x128xf32>
      %cst_225 = arith.constant dense<0.000000e+00> : vector<16x128xf32>
      %523 = tpu.matmul %519, %17, %cst_225 {dimension_numbers = #tpu.dot_dimension_numbers<[1], [0], [0], [1], [0, 0, 1, 1], [], []>} : vector<16x128xf32>, vector<128x128xf32>, vector<16x128xf32> -> vector<16x128xf32>
      %524 = arith.addf %522, %523 : vector<16x128xf32>
      %525 = math.tanh %524 : vector<16x128xf32>
      %526 = vector.extract_strided_slice %25 {offsets = [0, 29], sizes = [16, 1], strides = [1, 1]} : vector<16x32xi1> to vector<16x1xi1>
      %cst_226 = arith.constant 0.000000e+00 : f32
      %527 = vector.shape_cast %526 : vector<16x1xi1> to vector<16x1xi1>
      %528 = vector.broadcast %527 : vector<16x1xi1> to vector<16x128xi1>
      %529 = vector.broadcast %cst_226 : f32 to vector<16x128xf32>
      %530 = arith.select %528, %525, %529 : vector<16x128xi1>, vector<16x128xf32>
      %c0_227 = arith.constant 0 : index
      %c29_228 = arith.constant 29 : index
      %c0_229 = arith.constant 0 : index
      %531 = vector.load %arg10[%c0_227, %c29_228, %c0_229] : memref<16x32x128xf32, #tpu.memory_space<vmem>>, vector<16x1x128xf32>
      %532 = vector.shape_cast %531 : vector<16x1x128xf32> to vector<16x128xf32>
      %533 = vector.shape_cast %530 : vector<16x128xf32> to vector<16x1x128xf32>
      tpu.vector_store %arg10[%c0_227, %c29_228, %c0_229], %533 {strides = array<i32>} : memref<16x32x128xf32, #tpu.memory_space<vmem>>, vector<16x1x128xf32>,
      %534 = vector.shape_cast %526 : vector<16x1xi1> to vector<16x1xi1>
      %535 = vector.broadcast %534 : vector<16x1xi1> to vector<16x128xi1>
      %536 = arith.select %535, %525, %519 : vector<16x128xi1>, vector<16x128xf32>
      %c0_230 = arith.constant 0 : index
      %c30 = arith.constant 30 : index
      %c0_231 = arith.constant 0 : index
      %537 = vector.load %arg4[%c0_230, %c30, %c0_231] : memref<16x32x128xbf16, #tpu.memory_space<vmem>>, vector<16x1x128xbf16>
      %538 = vector.shape_cast %537 : vector<16x1x128xbf16> to vector<16x128xbf16>
      %539 = arith.extf %538 : vector<16x128xbf16> to vector<16x128xf32>
      %cst_232 = arith.constant dense<0.000000e+00> : vector<16x128xf32>
      %540 = tpu.matmul %536, %17, %cst_232 {dimension_numbers = #tpu.dot_dimension_numbers<[1], [0], [0], [1], [0, 0, 1, 1], [], []>} : vector<16x128xf32>, vector<128x128xf32>, vector<16x128xf32> -> vector<16x128xf32>
      %541 = arith.addf %539, %540 : vector<16x128xf32>
      %542 = math.tanh %541 : vector<16x128xf32>
      %543 = vector.extract_strided_slice %25 {offsets = [0, 30], sizes = [16, 1], strides = [1, 1]} : vector<16x32xi1> to vector<16x1xi1>
      %cst_233 = arith.constant 0.000000e+00 : f32
      %544 = vector.shape_cast %543 : vector<16x1xi1> to vector<16x1xi1>
      %545 = vector.broadcast %544 : vector<16x1xi1> to vector<16x128xi1>
      %546 = vector.broadcast %cst_233 : f32 to vector<16x128xf32>
      %547 = arith.select %545, %542, %546 : vector<16x128xi1>, vector<16x128xf32>
      %c0_234 = arith.constant 0 : index
      %c30_235 = arith.constant 30 : index
      %c0_236 = arith.constant 0 : index
      %548 = vector.load %arg10[%c0_234, %c30_235, %c0_236] : memref<16x32x128xf32, #tpu.memory_space<vmem>>, vector<16x1x128xf32>
      %549 = vector.shape_cast %548 : vector<16x1x128xf32> to vector<16x128xf32>
      %550 = vector.shape_cast %547 : vector<16x128xf32> to vector<16x1x128xf32>
      tpu.vector_store %arg10[%c0_234, %c30_235, %c0_236], %550 {strides = array<i32>} : memref<16x32x128xf32, #tpu.memory_space<vmem>>, vector<16x1x128xf32>,
      %551 = vector.shape_cast %543 : vector<16x1xi1> to vector<16x1xi1>
      %552 = vector.broadcast %551 : vector<16x1xi1> to vector<16x128xi1>
      %553 = arith.select %552, %542, %536 : vector<16x128xi1>, vector<16x128xf32>
      %c0_237 = arith.constant 0 : index
      %c31 = arith.constant 31 : index
      %c0_238 = arith.constant 0 : index
      %554 = vector.load %arg4[%c0_237, %c31, %c0_238] : memref<16x32x128xbf16, #tpu.memory_space<vmem>>, vector<16x1x128xbf16>
      %555 = vector.shape_cast %554 : vector<16x1x128xbf16> to vector<16x128xbf16>
      %556 = arith.extf %555 : vector<16x128xbf16> to vector<16x128xf32>
      %cst_239 = arith.constant dense<0.000000e+00> : vector<16x128xf32>
      %557 = tpu.matmul %553, %17, %cst_239 {dimension_numbers = #tpu.dot_dimension_numbers<[1], [0], [0], [1], [0, 0, 1, 1], [], []>} : vector<16x128xf32>, vector<128x128xf32>, vector<16x128xf32> -> vector<16x128xf32>
      %558 = arith.addf %556, %557 : vector<16x128xf32>
      %559 = math.tanh %558 : vector<16x128xf32>
      %560 = vector.extract_strided_slice %25 {offsets = [0, 31], sizes = [16, 1], strides = [1, 1]} : vector<16x32xi1> to vector<16x1xi1>
      %cst_240 = arith.constant 0.000000e+00 : f32
      %561 = vector.shape_cast %560 : vector<16x1xi1> to vector<16x1xi1>
      %562 = vector.broadcast %561 : vector<16x1xi1> to vector<16x128xi1>
      %563 = vector.broadcast %cst_240 : f32 to vector<16x128xf32>
      %564 = arith.select %562, %559, %563 : vector<16x128xi1>, vector<16x128xf32>
      %c0_241 = arith.constant 0 : index
      %c31_242 = arith.constant 31 : index
      %c0_243 = arith.constant 0 : index
      %565 = vector.load %arg10[%c0_241, %c31_242, %c0_243] : memref<16x32x128xf32, #tpu.memory_space<vmem>>, vector<16x1x128xf32>
      %566 = vector.shape_cast %565 : vector<16x1x128xf32> to vector<16x128xf32>
      %567 = vector.shape_cast %564 : vector<16x128xf32> to vector<16x1x128xf32>
      tpu.vector_store %arg10[%c0_241, %c31_242, %c0_243], %567 {strides = array<i32>} : memref<16x32x128xf32, #tpu.memory_space<vmem>>, vector<16x1x128xf32>,
      %568 = vector.shape_cast %560 : vector<16x1xi1> to vector<16x1xi1>
      %569 = vector.broadcast %568 : vector<16x1xi1> to vector<16x128xi1>
      %570 = arith.select %569, %559, %553 : vector<16x128xi1>, vector<16x128xf32>
      %c0_244 = arith.constant 0 : index
      %c0_245 = arith.constant 0 : index
      %571 = vector.load %arg9[%c0_244, %c0_245] : memref<16x128xf32, #tpu.memory_space<vmem>>, vector<16x128xf32>
      tpu.vector_store %arg9[%c0_244, %c0_245], %570 {strides = array<i32>} : memref<16x128xf32, #tpu.memory_space<vmem>>, vector<16x128xf32>,
    } else {
    }
    %c0 = arith.constant 0 : index
    %c0_4 = arith.constant 0 : index
    %c0_5 = arith.constant 0 : index
    %8 = vector.load %arg10[%c0, %c0_4, %c0_5] : memref<16x32x128xf32, #tpu.memory_space<vmem>>, vector<16x32x128xf32>
    %9 = vector.shape_cast %8 : vector<16x32x128xf32> to vector<512x128xf32>
    %c0_6 = arith.constant 0 : index
    %c0_7 = arith.constant 0 : index
    %10 = vector.load %arg6[%c0_6, %c0_7] : memref<128x256xf32, #tpu.memory_space<vmem>>, vector<128x256xf32>
    %cst = arith.constant dense<0.000000e+00> : vector<512x256xf32>
    %11 = tpu.matmul %9, %10, %cst {dimension_numbers = #tpu.dot_dimension_numbers<[1], [0], [0], [1], [0, 0, 1, 1], [], []>} : vector<512x128xf32>, vector<128x256xf32>, vector<512x256xf32> -> vector<512x256xf32>
    %c0_8 = arith.constant 0 : index
    %c0_9 = arith.constant 0 : index
    %12 = vector.load %arg7[%c0_8, %c0_9] : memref<1x256xf32, #tpu.memory_space<vmem>>, vector<1x256xf32>
    %13 = vector.broadcast %12 : vector<1x256xf32> to vector<512x256xf32>
    %14 = arith.addf %11, %13 : vector<512x256xf32>
    %15 = vector.shape_cast %14 : vector<512x256xf32> to vector<16x32x256xf32>
    %c0_10 = arith.constant 0 : index
    %c0_11 = arith.constant 0 : index
    %c0_12 = arith.constant 0 : index
    %16 = vector.load %arg8[%c0_10, %c0_11, %c0_12] : memref<16x32x256xf32, #tpu.memory_space<vmem>>, vector<16x32x256xf32>
    tpu.vector_store %arg8[%c0_10, %c0_11, %c0_12], %15 {strides = array<i32>} : memref<16x32x256xf32, #tpu.memory_space<vmem>>, vector<16x32x256xf32>,
    return
  }
  func.func @transform_0(%arg0: i32, %arg1: i32, %arg2: i32) -> (i32, i32) {
    %c0_i32 = arith.constant 0 : i32
    %c0_i32_0 = arith.constant 0 : i32
    return %arg0, %c0_i32 : i32, i32
  }
  func.func @transform_1(%arg0: i32, %arg1: i32, %arg2: i32) -> (i32, i32, i32) {
    %c0_i32 = arith.constant 0 : i32
    %c0_i32_0 = arith.constant 0 : i32
    return %arg0, %arg1, %c0_i32 : i32, i32, i32
  }
  func.func @transform_2(%arg0: i32, %arg1: i32, %arg2: i32) -> (i32, i32) {
    %c0_i32 = arith.constant 0 : i32
    %c0_i32_0 = arith.constant 0 : i32
    %c0_i32_1 = arith.constant 0 : i32
    return %c0_i32, %c0_i32_0 : i32, i32
  }
  func.func @transform_3(%arg0: i32, %arg1: i32, %arg2: i32) -> (i32, i32) {
    %c0_i32 = arith.constant 0 : i32
    %c0_i32_0 = arith.constant 0 : i32
    return %c0_i32, %arg2 : i32, i32
  }
  func.func @transform_4(%arg0: i32, %arg1: i32, %arg2: i32) -> (i32, i32) {
    %c0_i32 = arith.constant 0 : i32
    %c0_i32_0 = arith.constant 0 : i32
    return %c0_i32, %arg2 : i32, i32
  }
  func.func @transform_5(%arg0: i32, %arg1: i32, %arg2: i32) -> (i32, i32, i32) {
    %c0_i32 = arith.constant 0 : i32
    return %arg0, %arg1, %arg2 : i32, i32, i32
  }
}

</mosaic_0001>

<bundles_post_ra>
// kernel: tpu_custom_call.1
= control target key start
LH: loop header
LB: loop body
LE: loop exit
PB: predicated region body
PF: predicated region fallthrough
CT: control target
= control target key end

     0   :  { %s12954_s0 = inlined_call_operand.vmem [shape: s32[16,1], index: 0, kind: input, shape index: {}]   ;;  %s12955_s1 = inlined_call_operand.hbm [shape: bf16[16,64,128], index: 1, kind: input, shape index: {}]   ;;  %s12956_s2 = inlined_call_operand.hbm [shape: f32[128,128], index: 2, kind: input, shape index: {}]   ;;  %s12957_s3 = inlined_call_operand.hbm [shape: f32[128,512], index: 3, kind: input, shape index: {}]   ;;  %s12958_s4 = inlined_call_operand.hbm [shape: f32[1,512], index: 4, kind: input, shape index: {}]   ;;  %s12959_s5 = inlined_call_operand.hbm [shape: f32[16,64,512], index: 5, kind: output, shape index: {}]  }
   0x1   :  { %12974 = sst [smem:[#allocation35_spill]] %s12954_s0 }
   0x2   :  { %12975 = sst [smem:[#allocation36_spill]] %s12955_s1 }
   0x3   :  { %12976 = sst [smem:[#allocation37_spill]] %s12956_s2 }
   0x4   :  { %12977 = sst [smem:[#allocation38_spill]] %s12959_s5 }
   0x5   :  { %10 = vsyncpa [#allocation5], 0 }
   0x6   :  { %12 = vsyncpa [#allocation5 + $0x1], 0 }
   0x7   :  { %13 = vsyncpa [#allocation8], 0 }
   0x8   :  { %14 = vsyncpa [#allocation6], 0 }
   0x9   :  { %16 = vsyncpa [#allocation6 + $0x1], 0  ;;  %s10241_s18 = smov 0   ;;  %s10243_s19 = smov 0  }
   0xa   :  { %s10245_s20 = smov 0   ;;  %s10247_s21 = smov 0  }
   0xb   :  { %s10249_s22 = smov 0   ;;  %s10251_s23 = smov 0  }
   0xc   :  { %s10253_s24 = smov 0   ;;  %s10255_s25 = smov 0  }
   0xd   :  { %s10257_s26 = smov 0   ;;  %s10259_s27 = smov 0  }
   0xe   :  { %s10261_s28 = smov 0   ;;  %s10263_s29 = smov 0  }
   0xf   :  { %s10265_s30 = smov 0   ;;  %s10267_s6 = smov 0  }
  0x10 LB: > { %12978 = sst [smem:[#allocation21_spill]] %s10105_s18  ;;  %s10310_s7 = sadd.s32 4294967295, %s10157_s6   ;;  %s10157_s6 = sphi %s10267_s6, %s22_s6   ;;  %s10153_s30 = sphi %s10265_s30, %s13024_s30   ;;  %s10149_s29 = sphi %s10263_s29, %s13032_s29   ;;  %s10145_s28 = sphi %s10261_s28, %s13022_s28   ;;  %s10141_s27 = sphi %s10259_s27, %s13031_s27   ;;  %s10137_s26 = sphi %s10257_s26, %s13021_s26   ;;  %s10133_s25 = sphi %s10255_s25, %s13030_s25   ;;  %s10129_s24 = sphi %s10253_s24, %s13029_s24   ;;  %s10125_s23 = sphi %s10251_s23, %s13019_s23   ;;  %s10121_s22 = sphi %s10249_s22, %s13028_s22   ;;  %s10117_s21 = sphi %s10247_s21, %s13027_s21   ;;  %s10113_s20 = sphi %s10245_s20, %s13017_s20   ;;  %s10109_s19 = sphi %s10243_s19, %s13026_s19   ;;  %s10105_s18 = sphi %s10241_s18, %s13025_s18  }
  0x11   : > { %12979 = sst [smem:[#allocation22_spill]] %s10113_s20  ;;  %s34_s9 = sadd.s32 1, %s10149_s29 }
  0x12   : > { %12980 = sst [smem:[#allocation23_spill]] %s10125_s23  ;;  %s37_s10 = sadd.s32 1, %s10153_s30 }
  0x13   : > { %12981 = sst [smem:[#allocation24_spill]] %s10137_s26  ;;  %p35_p0 = scmp.ge.s32.totalorder %s34_s9, 2 }
  0x14   : > { %12982 = sst [smem:[#allocation25_spill]] %s10141_s27  ;;  %s76_s11 = sadd.s32 1, %s10137_s26 }
  0x15   : > { %12983 = sst [smem:[#allocation26_spill]] %s10153_s30  ;;  %p83_p1 = scmp.ne.s32.totalorder %s10137_s26, %s10133_s25 }
  0x16   : > { %12984 = sst [smem:[#allocation27_spill]] %s10157_s6  ;;  %p84_p2 = scmp.eq.s32.totalorder %s10157_s6, 0 }
  0x17   : > { %s13034_s9 = smov (%p35_p0, %s34_s9), 0  ;;  %s13036_s10 = smov (!%p35_p0, %s37_s10), %s10153_s30 }
  0x18   : > { %12985 = sst [smem:[#allocation28_spill]] %s13034_s9  ;;  %p10324_p3 = por %p84_p2, %p83_p1 }
  0x19   : > { %p89_p4 = scmp.ne.s32.totalorder %s10133_s25, %s10129_s24  ;;  %p39_p5 = scmp.ge.s32.totalorder %s13036_s10, 2 }
  0x1a   : > { %p12962_p6 = scmp.eq.s32.totalorder %s10310_s7, 0  ;;  %s120_s13 = ssub.s32 %s10149_s29, %s13034_s9 }
  0x1b   : > { %s123_s14 = sadd.s32 1, %s10125_s23  ;;  %s13038_s10 = smov (%p39_p5, %s13036_s10), 0 }
  0x1c   : > { %12987 = sst [smem:[#allocation29_spill]] %s13038_s10  ;;  %p10337_p7 = por %p12962_p6, %p89_p4 }
  0x1d   : > { %p121_p8 = scmp.eq.s32.totalorder %s120_s13, 0  ;;  %s72_s16 = ssub.s32 %s10153_s30, %s13038_s10 }
  0x1e   : > { %p130_p9 = scmp.ne.s32.totalorder %s10125_s23, %s10121_s22  ;;  %p74_p10 = scmp.eq.s32.totalorder %s72_s16, 0 }
  0x1f   : > { %p136_p11 = scmp.ne.s32.totalorder %s10121_s22, %s10117_s21  ;;  %s176_s10 = sor.u32 %s120_s13, %s72_s16 }
  0x20   : > { %s10348_s17 = scalar_select %p121_p8, %s10125_s23, %s123_s14  }
  0x21   : > { %s10351_s24 = scalar_select %p74_p10, %s10137_s26, %s76_s11  }
  0x22   : > { %12989 = sst [smem:[#allocation30_spill]] %s10348_s17  ;;  %p10355_p12 = por %p130_p9, %p84_p2 }
  0x23   : > { %12990 = sst [smem:[#allocation31_spill]] %s10351_s24  ;;  %p10361_p13 = por %p136_p11, %p12962_p6 }
  0x24   : > { %s179_s5 = sadd.s32 1, %s10113_s20  ;;  %p177_p0 = scmp.eq.s32.totalorder %s176_s10, 0 }
  0x25   : > { %p189_p1 = scmp.ne.s32.totalorder %s10113_s20, %s10109_s19  ;;  %p190_p4 = scmp.eq.s32.totalorder %s10310_s7, 3 }
  0x26   : > { %p195_p5 = scmp.ne.s32.totalorder %s10109_s19, %s10105_s18  ;;  %s12996_s14 = sadd.s32 4294967294, %s10157_s6  }
  0x27   : > { %s10372_s21 = scalar_select %p177_p0, %s10113_s20, %s179_s5  }
  0x28   : > { %p10374_p8 = por %p190_p4, %p189_p1  ;;  %p196_p2 = scmp.eq.s32.totalorder %s12996_s14, 3 }
  0x29   : > { %12993 = sst [smem:[#allocation32_spill]] %s10372_s21  ;;  %p8465_p9 = scmp.ge.s32.totalorder %s10157_s6, 1 }
  0x2a   : > { %s12994_s11 = scalar_select %p10374_p8, 1, 0 }
  0x2b   : > { %p203_p10 = scmp.lt.s32.totalorder %s10157_s6, 5  ;;  %p10382_p11 = por %p196_p2, %p195_p5 }
  0x2c   : > { %12995 = sst [smem:[#allocation33_spill]] %s12994_s11  ;;  %s10159_s17 = smov [#allocation7]  }
  0x2d   : > { %s12997_s24 = scalar_select %p10382_p11, 1, 0 }
  0x2e   : > { %p10386_p6 = pnand %p8465_p9, %p203_p10  ;;  %s13000_s2 = sld [smem:[#allocation37_spill]] }
  0x2f   : > { %12998 = sst [smem:[#allocation34_spill]] %s12997_s24  ;;  %s225_s14 = sshll.u32 %s10159_s17, 4  ;;  %s226_s14 = int_to_ptr.vmem [resolvable:$true] %s225_s14 }
  0x30   : > { %p8554_p0 = pneg %p10386_p6  ;;  %p13001_p1 = scmp.eq.s32.totalorder %s10310_s7, 0 }
  0x31   : > { %s10160_s21 = smov 128   ;;  %s10161_s20 = smov 8  }
  0x32   : > { %p8555_p4 = pnand %p8554_p0, %p13001_p1  ;;  %p8468_p5 = scmp.ge.s32.totalorder %s10157_s6, 4 }
  0x34   : > { %s223_s5 = sshll.u32 %s13000_s2, 4  ;;  %235 = sbr.rel (%p8468_p5) target bundleno = 81 (0x51), region = 24  ;;  %s224_s5 = int_to_ptr.hbm [resolvable:$true] %s223_s5 }
  0x35   : > { %8557 = dma.hbm_to_vmem [thread:$0]  (!%p8555_p4), %s224_s5, 2048, %s226_s14, [#allocation8], %s10160_s21, %s10160_s21, %s10161_s20  }
  0x39   : > { %s241_s13 = sand.u32 1, %s10137_s26   ;;  %s239_s16 = sand.u32 1, %s10157_s6  }
  0x3a   : > { %s8469_s2 = sshll.u32 %s241_s13, 8  ;;  %s8494_s17 = sshll.u32 %s10153_s30, 4 }
  0x3b   : > { %s13002_s1 = sld [smem:[#allocation36_spill]]  ;;  %s243_s20 = scalar_lea.vmem [#allocation4], %s8469_s2 }
  0x3c   : > { %s266_s21 = sshll.u32 %s243_s20, 4  ;;  %s10162_s26 = smov 512   ;;  %s267_s21 = int_to_ptr.vmem [resolvable:$true] %s266_s21 }
  0x3d   : > { %s8531_s5 = scalar_select %p10324_p3, [#allocation0], [#allocation16] }
  0x3e   : > { %8532 = sst [smem:[#allocation13]] (%p10324_p3), %s10162_s26  ;;  %s10163_s13 = smov 256  }
  0x3f   : > { %s256_s0 = sld [smem:[%s8531_s5]]   ;;  %s10164_s18 = smov 4  }
  0x40   : > { %8533 = sst [smem:[#allocation13 + $0x1]] (%p10324_p3), %s10163_s13  ;;  %s10165_s2 = smov 64  }
  0x41   : > { %s251_s11 = scalar_lea.hbm %s13002_s1, %s8494_s17  ;;  %8534 = sst [smem:[#allocation13 + $0x2]] (%p10324_p3), %s10164_s18 }
  0x42   : > { %s264_s14 = sshll.u32 %s251_s11, 4  ;;  %8535 = sst [smem:[#allocation13 + $0x3]] (%p10324_p3), %s10165_s2  ;;  %s265_s14 = int_to_ptr.hbm [resolvable:$true] %s264_s14 }
  0x43   : > { %8536 = sst [smem:[#allocation13 + $0x4]] (%p10324_p3), %s10165_s2  ;;  %s240_s17 = scalar_lea.sflag [#allocation5], %s239_s16 }
  0x44   : > { %8537 = sst [smem:[#allocation13 + $0x5]] (%p10324_p3), %s10164_s18  ;;  %s10166_s20 = smov [#allocation12]  }
  0x45   : > { %s8472_s24 = sshll.u32 %s256_s0, 26  ;;  %s291_s26 = sand.u32 1, %s10125_s23  }
  0x46   : > { %s8473_s11 = sadd.s32 134217728, %s8472_s24  ;;  %s8495_s5 = sshll.u32 %s10149_s29, 4 }
  0x47   : > { %8538 = dma.general (%p10324_p3), %s265_s14, 4096, %s267_s21, %s240_s17, %s10166_s20, [#allocation13], %s8473_s11, 0  }
  0x48   : > { %s8474_s13 = sshll.u32 %s291_s26, 8  ;;  %s298_s0 = scalar_lea.hbm %s12957_s3, %s8495_s5 }
  0x49   : > { %s299_s6 = sshll.u32 %s298_s0, 4  ;;  %s293_s2 = scalar_lea.vmem [#allocation9], %s8474_s13  ;;  %s300_s6 = int_to_ptr.hbm [resolvable:$true] %s299_s6 }
  0x4a   : > { %s301_s18 = sshll.u32 %s293_s2, 4  ;;  %s10167_s16 = smov 512   ;;  %s302_s18 = int_to_ptr.vmem [resolvable:$true] %s301_s18 }
  0x4b   : > { %s10168_s12 = smov 256   ;;  %s10169_s21 = smov 16  }
  0x4c   : > { %8539 = dma.hbm_to_vmem [thread:$0]  (%p10355_p12), %s300_s6, 4096, %s302_s18, %s240_s17, %s10167_s16, %s10168_s12, %s10169_s21  }
  0x4d   : > { %s8477_s14 = sshll.u32 %s291_s26, 1  ;;  %s8478_s24 = sshll.u32 %s10149_s29, 1 }
  0x4e   : > { %s319_s23 = scalar_lea.hbm %s12958_s4, %s8478_s24  ;;  %s315_s1 = scalar_lea.vmem [#allocation10], %s8477_s14 }
  0x4f   : > { %s321_s27 = sshll.u32 %s319_s23, 4  ;;  %s323_s30 = sshll.u32 %s315_s1, 4  ;;  %s322_s27 = int_to_ptr.hbm [resolvable:$true] %s321_s27  ;;  %s324_s30 = int_to_ptr.vmem [resolvable:$true] %s323_s30 }
  0x50   : > { %8540 = dma.hbm_to_vmem [thread:$0]  (%p10355_p12), %s322_s27, 32, %s324_s30, %s240_s17  }
  0x51 PF: > { %332 = sbr.rel (%p10386_p6) target bundleno = 5521 (0x1591), region = 40  ;;  %s334_s6 = sand.u32 (!%p10386_p6), 1, %s10310_s7  }
  0x52   : > { %s336_s26 = sand.u32 (!%p10386_p6), 1, %s10133_s25   ;;  %s335_s13 = scalar_lea.sflag (!%p10386_p6), [#allocation5], %s334_s6 }
  0x53   : > { %s8480_s5 = sshll.u32 (!%p10386_p6), %s336_s26, 8 }
  0x54   : > { %s10437_s0 = scalar_lea.vmem (!%p10386_p6), [#allocation4], %s8480_s5 }
  0x56   : > { %10088 = dma.done.wait (%p10337_p7), %s335_s13, 4096  }
  0x57   : > { %10090 = vsyncadd (%p10337_p7), %s335_s13, 4294963200  ;;  %p13003_p3 = scmp.eq.s32.totalorder %s10310_s7, 0 }
  0x59   : > { %10092 = dma.done.wait (%p13003_p3), [#allocation8], 2048   ;;  %p13004_p12 = pmov %p13003_p3 }
  0x5a   : > { %s351_s23 = sand.u32 1, %s10121_s22  }
  0x5b   : > { %10094 = vsyncadd (%p13004_p12), [#allocation8], 4294965248  ;;  %s8482_s27 = sshll.u32 %s351_s23, 8 }
  0x5c   : > { %s10448_s8 = scalar_lea.vmem [#allocation9], %s8482_s27 }
  0x5d   : > { %10096 = dma.done.wait (%p10361_p13), %s335_s13, 4128  }
  0x5e   : > { %10098 = vsyncadd (%p10361_p13), %s335_s13, 4294963168  ;;  %s13005_s15 = sld [smem:[#allocation25_spill]]  ;;  %s10454_s10 = sshll.u32 %s351_s23, 1 }
  0x5f   : > { %s403_s7 = sand.u32 1, %s10109_s19   ;;  %p419_p6 = scmp.eq.s32.totalorder %s10145_s28, 0 }
  0x60   : > { %s8484_s17 = sshll.u32 %s403_s7, 10  ;;  %s363_s2 = scalar_lea.vmem [#allocation10], %s10454_s10 }
  0x61   : > { %s10462_s18 = scalar_lea.vmem [#allocation11], %s8484_s17 }
  0x64   : > { %p420_p7 = scmp.eq.s32.totalorder %s13005_s15, 0 }
  0x66   : > { %p421_p2 = pnand %p420_p7, %p419_p6 }
  0x68   : > { %424 = sbr.rel (%p421_p2) target bundleno = 112 (0x70), region = 60 }
  0x6d   : > { %v10170_v0 = vmov 0.0  }
  0x6e   : > { %425 = vst [vmem:[#allocation2] sm:$0xff] %v10170_v0 }
  0x6f   : > { %426 = vst [vmem:[#allocation2 + $0x8] sm:$0xff] %v10170_v0 }
  0x70 PF: > { %s13006_s9 = sld [smem:[#allocation25_spill]] }
  0x76   : > { %p8485_p13 = scmp.ne.s32.totalorder %s13006_s9, 0 }
  0x77   : > { %s13007_s21 = sld [smem:[#allocation35_spill]] (!%p8485_p13)  ;;  %s8486_s20 = sshll.u32 (!%p8485_p13), %s10145_s28, 5 }
  0x78   : > { %429 = sbr.rel (%p8485_p13) target bundleno = 5092 (0x13e4), region = 64 }
  0x7d   : > { %s13008_s14 = smov %s13007_s21  ;;  %v446_v1 = vld [vmem:[%s13007_s21] sm:$0xff]  ;;  %v10468_v2 = vld [vmem:[#allocation7 + $0x78] sm:$0xff]  ;;  %v10171_v3 = vmov 0   ;;  %v10474_v5 = vld [vmem:[#allocation7 + $0x68] sm:$0xff]  ;;  %v10172_v22 = vmov 1   ;;  %v10173_v23 = vmov 2   ;;  %v449_v24 = vlaneseq }
  0x7e   : > { %8729 = vset.pattern.permute.xlu0 %v10171_v3  ;;  %495 = vmatpush.msra.mxu0 %v10468_v2  ;;  %v10472_v4 = vld [vmem:[#allocation7 + $0x70] sm:$0xff]  ;;  %v10479_v6 = vld [vmem:[#allocation7 + $0x60] sm:$0xff]  ;;  %v10485_v7 = vld [vmem:[#allocation7 + $0x58] sm:$0xff]  ;;  %v451_v26 = vstv %s8486_s20  ;;  %v10174_v32 = vmov 4   ;;  %v10175_v33 = vmov 3   ;;  %v10176_v34 = vmov 7  }
  0x7f   : > { %454 = vperm.xlu0 %8729, %v446_v1   ;;  %8730 = vset.pattern.permute.xlu1 %v10171_v3  ;;  %v447_v8 = vld [vmem:[%s13008_s14 + $0x8] sm:$0xff]  ;;  %v10494_v9 = vld [vmem:[#allocation7 + $0x50] sm:$0xff]  ;;  %v10500_v10 = vld [vmem:[#allocation7 + $0x48] sm:$0xff]  ;;  %v450_v25 = vand.u32 127, %v449_v24  ;;  %v10177_v35 = vmov 9   ;;  %v10178_v36 = vmov 5  }
  0x80   : > { %496 = vmatpush.msra.mxu0 %v10472_v4  ;;  %727 = vmatpush.msra.mxu1 %v10468_v2  ;;  %v10505_v11 = vld [vmem:[#allocation7 + $0x40] sm:$0xff]  ;;  %v10511_v12 = vld [vmem:[#allocation7 + $0x38] sm:$0xff]  ;;  %v10517_v13 = vld [vmem:[#allocation7 + $0x30] sm:$0xff]  ;;  %v10179_v37 = vmov 12   ;;  %v10180_v38 = vmov 6   ;;  %v10181_v39 = vmov 14  }
  0x81   : > { %950 = vmatpush.msra.mxu2 %v10468_v2  ;;  %1173 = vmatpush.msra.mxu3 %v10468_v2  ;;  %v10523_v14 = vld [vmem:[#allocation7 + $0x28] sm:$0xff]  ;;  %v10529_v15 = vld [vmem:[#allocation7 + $0x20] sm:$0xff]  ;;  %v10535_v16 = vld [vmem:[#allocation7 + $0x18] sm:$0xff]  ;;  %v452_v27 = vadd.s32 %v451_v26, %v450_v25  ;;  %v10182_v40 = vmov 8   ;;  %v10183_v41 = vmov 17   ;;  %v10184_v42 = vmov 19  }
  0x82   : > { %497 = vmatpush.msra.mxu0 %v10474_v5  ;;  %728 = vmatpush.msra.mxu1 %v10472_v4  ;;  %v10541_v17 = vld [vmem:[#allocation7 + $0x10] sm:$0xff]  ;;  %v10547_v18 = vld [vmem:[#allocation7 + $0x8] sm:$0xff]  ;;  %v10553_v19 = vld [vmem:[#allocation7] sm:$0xff]  ;;  %v10185_v44 = vmov 10   ;;  %v10186_v45 = vmov 22   ;;  %v10187_v58 = vmov 11  }
  0x83   : > { %951 = vmatpush.msra.mxu2 %v10472_v4  ;;  %1174 = vmatpush.msra.mxu3 %v10472_v4  ;;  %v10558_v20 = vld [vmem:[#allocation2] sm:$0xff]  ;;  %v10575_v21 = vld [vmem:[#allocation2 + $0x8] sm:$0xff]  ;;  %v465_v49 = vld [vmem:[%s10437_s0 + $0x20] sm:$0x1]  ;;  %v10188_v62 = vmov 24   ;;  %vm609_vm2 = vcmask 1041409  }
  0x84   : > { %498 = vmatpush.msra.mxu0 %v10479_v6  ;;  %729 = vmatpush.msra.mxu1 %v10474_v5  ;;  %v464_v46 = vld [vmem:[%s10437_s0 + $0x10] sm:$0x1]  ;;  %v463_v50 = vld [vmem:[%s10437_s0] sm:$0x1]  ;;  %v481_v53 = vunpack.c.l.bf16 %v465_v49  ;;  %vm612_vm3 = vcmask 1042434   ;;  %vm615_vm4 = vcmask 1043459  }
  0x85   : > { %952 = vmatpush.msra.mxu2 %v10474_v5  ;;  %1175 = vmatpush.msra.mxu3 %v10474_v5  ;;  %v480_v47 = vunpack.c.l.bf16 %v464_v46  ;;  %v466_v52 = vld [vmem:[%s10437_s0 + $0x30] sm:$0x1]  ;;  %v479_v54 = vunpack.c.l.bf16 %v463_v50  ;;  %v467_v60 = vld [vmem:[%s10437_s0 + $0x40] sm:$0x1]  ;;  %v10189_v50 = vmov 13   ;;  %vm618_vm5 = vcmask 1044484  }
  0x86   : > { %499 = vmatpush.msra.mxu0 %v10485_v7  ;;  %730 = vmatpush.msra.mxu1 %v10479_v6  ;;  %v472_v56 = vld [vmem:[%s10437_s0 + $0x90] sm:$0x1]  ;;  %v482_v61 = vunpack.c.l.bf16 %v466_v52  ;;  %v471_v63 = vld [vmem:[%s10437_s0 + $0x80] sm:$0x1]  ;;  %v483_v24 = vunpack.c.l.bf16 %v467_v60  ;;  %vm621_vm6 = vcmask 1045509   ;;  %vm624_vm7 = vcmask 1046534  }
  0x87   : > { %457 = vperm.xlu0 %8729, %v447_v8   ;;  %953 = vmatpush.msra.mxu2 %v10479_v6  ;;  %v487_v26 = vunpack.c.l.bf16 %v471_v63  ;;  %v476_v60 = vld [vmem:[%s10437_s0 + $0xd0] sm:$0x1]  ;;  %vm627_vm8 = vcmask 1047559  }
  0x88   : > { %500 = vmatpush.msra.mxu0 %v10494_v9  ;;  %731 = vmatpush.msra.mxu1 %v10485_v7 }
  0x89   : > { %954 = vmatpush.msra.mxu2 %v10485_v7  ;;  %1176 = vmatpush.msra.mxu3 %v10479_v6 }
  0x8a   : > { %501 = vmatpush.msra.mxu0 %v10500_v10  ;;  %732 = vmatpush.msra.mxu1 %v10494_v9 }
  0x8b   : > { %955 = vmatpush.msra.mxu2 %v10494_v9  ;;  %1177 = vmatpush.msra.mxu3 %v10485_v7 }
  0x8c   : > { %502 = vmatpush.msra.mxu0 %v10505_v11  ;;  %733 = vmatpush.msra.mxu1 %v10500_v10 }
  0x8d   : > { %956 = vmatpush.msra.mxu2 %v10500_v10  ;;  %1178 = vmatpush.msra.mxu3 %v10494_v9 }
  0x8e   : > { %503 = vmatpush.msra.mxu0 %v10511_v12  ;;  %734 = vmatpush.msra.mxu1 %v10505_v11 }
  0x8f   : > { %957 = vmatpush.msra.mxu2 %v10505_v11  ;;  %1179 = vmatpush.msra.mxu3 %v10500_v10 }
  0x90   : > { %504 = vmatpush.msra.mxu0 %v10517_v13  ;;  %735 = vmatpush.msra.mxu1 %v10511_v12 }
  0x91   : > { %958 = vmatpush.msra.mxu2 %v10511_v12  ;;  %1180 = vmatpush.msra.mxu3 %v10505_v11 }
  0x92   : > { %505 = vmatpush.msra.mxu0 %v10523_v14  ;;  %736 = vmatpush.msra.mxu1 %v10517_v13 }
  0x93   : > { %959 = vmatpush.msra.mxu2 %v10517_v13  ;;  %1181 = vmatpush.msra.mxu3 %v10511_v12 }
  0x94   : > { %506 = vmatpush.msra.mxu0 %v10529_v15  ;;  %737 = vmatpush.msra.mxu1 %v10523_v14 }
  0x95   : > { %960 = vmatpush.msra.mxu2 %v10523_v14  ;;  %1182 = vmatpush.msra.mxu3 %v10517_v13 }
  0x96   : > { %507 = vmatpush.msra.mxu0 %v10535_v16  ;;  %738 = vmatpush.msra.mxu1 %v10529_v15 }
  0x97   : > { %961 = vmatpush.msra.mxu2 %v10529_v15  ;;  %1183 = vmatpush.msra.mxu3 %v10523_v14 }
  0x98   : > { %508 = vmatpush.msra.mxu0 %v10541_v17  ;;  %739 = vmatpush.msra.mxu1 %v10535_v16 }
  0x99   : > { %962 = vmatpush.msra.mxu2 %v10535_v16  ;;  %1184 = vmatpush.msra.mxu3 %v10529_v15 }
  0x9a   : > { %509 = vmatpush.msra.mxu0 %v10547_v18  ;;  %740 = vmatpush.msra.mxu1 %v10541_v17 }
  0x9b   : > { %963 = vmatpush.msra.mxu2 %v10541_v17  ;;  %1185 = vmatpush.msra.mxu3 %v10535_v16 }
  0x9c   : > { %510 = vmatpush.msra.mxu0 %v10553_v19  ;;  %741 = vmatpush.msra.mxu1 %v10547_v18 }
  0x9d   : > { %511 = vmatmul.f32.vlgmr.msra.gmra.mxu0 %v10558_v20  ;;  %964 = vmatpush.msra.mxu2 %v10547_v18 }
  0x9e   : > { %742 = vmatpush.msra.mxu1 %v10553_v19  ;;  %1186 = vmatpush.msra.mxu3 %v10541_v17 }
  0x9f   : > { %965 = vmatpush.msra.mxu2 %v10553_v19  ;;  %1396 = vmatpush.msrb.mxu0 %v10468_v2 }
  0xa0   : > { %1187 = vmatpush.msra.mxu3 %v10547_v18  ;;  %1619 = vmatpush.msrb.mxu1 %v10468_v2 }
  0xa1   : > { %1397 = vmatpush.msrb.mxu0 %v10472_v4  ;;  %1842 = vmatpush.msrb.mxu2 %v10468_v2 }
  0xa2   : > { %1188 = vmatpush.msra.mxu3 %v10553_v19  ;;  %1620 = vmatpush.msrb.mxu1 %v10472_v4 }
  0xa3   : > { %1398 = vmatpush.msrb.mxu0 %v10474_v5  ;;  %1843 = vmatpush.msrb.mxu2 %v10472_v4 }
  0xa4   : > { %1621 = vmatpush.msrb.mxu1 %v10474_v5  ;;  %2065 = vmatpush.msrb.mxu3 %v10468_v2 }
  0xa5   : > { %514 = vmatmul.f32.gmra.mxu0 %v10575_v21  ;;  %1844 = vmatpush.msrb.mxu2 %v10474_v5 }
  0xa6   : > { %1399 = vmatpush.msrb.mxu0 %v10479_v6  ;;  %1622 = vmatpush.msrb.mxu1 %v10479_v6 }
  0xa7   : > { %1845 = vmatpush.msrb.mxu2 %v10479_v6  ;;  %2066 = vmatpush.msrb.mxu3 %v10472_v4 }
  0xa8   : > { %1400 = vmatpush.msrb.mxu0 %v10485_v7  ;;  %1623 = vmatpush.msrb.mxu1 %v10485_v7 }
  0xa9   : > { %1846 = vmatpush.msrb.mxu2 %v10485_v7  ;;  %2067 = vmatpush.msrb.mxu3 %v10474_v5 }
  0xaa   : > { %1401 = vmatpush.msrb.mxu0 %v10494_v9  ;;  %1624 = vmatpush.msrb.mxu1 %v10494_v9 }
  0xab   : > { %1847 = vmatpush.msrb.mxu2 %v10494_v9  ;;  %2068 = vmatpush.msrb.mxu3 %v10479_v6 }
  0xac   : > { %1402 = vmatpush.msrb.mxu0 %v10500_v10  ;;  %1625 = vmatpush.msrb.mxu1 %v10500_v10 }
  0xad   : > { %1848 = vmatpush.msrb.mxu2 %v10500_v10  ;;  %2069 = vmatpush.msrb.mxu3 %v10485_v7 }
  0xae   : > { %1403 = vmatpush.msrb.mxu0 %v10505_v11  ;;  %1626 = vmatpush.msrb.mxu1 %v10505_v11 }
  0xaf   : > { %1849 = vmatpush.msrb.mxu2 %v10505_v11  ;;  %2070 = vmatpush.msrb.mxu3 %v10494_v9 }
  0xb0   : > { %1404 = vmatpush.msrb.mxu0 %v10511_v12  ;;  %1627 = vmatpush.msrb.mxu1 %v10511_v12 }
  0xb1   : > { %1850 = vmatpush.msrb.mxu2 %v10511_v12  ;;  %2071 = vmatpush.msrb.mxu3 %v10500_v10 }
  0xb2   : > { %1405 = vmatpush.msrb.mxu0 %v10517_v13  ;;  %1628 = vmatpush.msrb.mxu1 %v10517_v13 }
  0xb3   : > { %1851 = vmatpush.msrb.mxu2 %v10517_v13  ;;  %2072 = vmatpush.msrb.mxu3 %v10505_v11 }
  0xb4   : > { %1406 = vmatpush.msrb.mxu0 %v10523_v14  ;;  %1629 = vmatpush.msrb.mxu1 %v10523_v14 }
  0xb5   : > { %1852 = vmatpush.msrb.mxu2 %v10523_v14  ;;  %2073 = vmatpush.msrb.mxu3 %v10511_v12 }
  0xb6   : > { %1407 = vmatpush.msrb.mxu0 %v10529_v15  ;;  %1630 = vmatpush.msrb.mxu1 %v10529_v15 }
  0xb7   : > { %1853 = vmatpush.msrb.mxu2 %v10529_v15  ;;  %2074 = vmatpush.msrb.mxu3 %v10517_v13 }
  0xb8   : > { %1408 = vmatpush.msrb.mxu0 %v10535_v16  ;;  %1631 = vmatpush.msrb.mxu1 %v10535_v16 }
  0xb9   : > { %1854 = vmatpush.msrb.mxu2 %v10535_v16  ;;  %2075 = vmatpush.msrb.mxu3 %v10523_v14 }
  0xba   : > { %1409 = vmatpush.msrb.mxu0 %v10541_v17  ;;  %1632 = vmatpush.msrb.mxu1 %v10541_v17 }
  0xbb   : > { %1855 = vmatpush.msrb.mxu2 %v10541_v17  ;;  %2076 = vmatpush.msrb.mxu3 %v10529_v15 }
  0xbc   : > { %1410 = vmatpush.msrb.mxu0 %v10547_v18  ;;  %1633 = vmatpush.msrb.mxu1 %v10547_v18 }
  0xbd   : > { %1856 = vmatpush.msrb.mxu2 %v10547_v18  ;;  %2077 = vmatpush.msrb.mxu3 %v10535_v16 }
  0xbe   : > { %1411 = vmatpush.msrb.mxu0 %v10553_v19  ;;  %1634 = vmatpush.msrb.mxu1 %v10553_v19 }
  0xbf   : > { %1857 = vmatpush.msrb.mxu2 %v10553_v19  ;;  %2078 = vmatpush.msrb.mxu3 %v10541_v17 }
  0xc0   : > { %2288 = vmatpush.msra.mxu0 %v10468_v2  ;;  %8731 = vset.pattern.permute.xlu2 %v10172_v22  ;;  %v473_v22 = vld [vmem:[%s10437_s0 + $0xa0] sm:$0x1] }
  0xc1   : > { %2079 = vmatpush.msrb.mxu3 %v10547_v18  ;;  %8732 = vset.pattern.permute.xlu0 %v10173_v23 }
  0xc2   : > { %2289 = vmatpush.msra.mxu0 %v10472_v4 }
  0xc3   : > { %2080 = vmatpush.msrb.mxu3 %v10553_v19 }
  0xc4   : > { %2290 = vmatpush.msra.mxu0 %v10474_v5 }
  0xc6   : > { %2291 = vmatpush.msra.mxu0 %v10479_v6 }
  0xc8   : > { %2292 = vmatpush.msra.mxu0 %v10485_v7 }
  0xca   : > { %2293 = vmatpush.msra.mxu0 %v10494_v9 }
  0xcc   : > { %2294 = vmatpush.msra.mxu0 %v10500_v10 }
  0xce   : > { %2295 = vmatpush.msra.mxu0 %v10505_v11 }
  0xd0   : > { %2296 = vmatpush.msra.mxu0 %v10511_v12 }
  0xd2   : > { %2297 = vmatpush.msra.mxu0 %v10517_v13 }
  0xd4   : > { %2298 = vmatpush.msra.mxu0 %v10523_v14 }
  0xd6   : > { %2299 = vmatpush.msra.mxu0 %v10529_v15 }
  0xd8   : > { %2300 = vmatpush.msra.mxu0 %v10535_v16 }
  0xda   : > { %2301 = vmatpush.msra.mxu0 %v10541_v17 }
  0xdc   : > { %2302 = vmatpush.msra.mxu0 %v10547_v18 }
  0xde   : > { %2303 = vmatpush.msra.mxu0 %v10553_v19 }
  0xf1   : > { %v455_v28 = vpop.permute.xlu0 %454 }
  0xf2   : > { %vm459_vm0 = vcmp.lt.s32.totalorder %v452_v27, %v455_v28 }
  0xf3   : > { %v10657_v29 = vsel %vm459_vm0, 1, %v10171_v3 }
  0xf4   : > { %1038 = vperm.xlu0 %8732, %v10657_v29   ;;  %815 = vperm.xlu2 %8731, %v10657_v29  }
  0xf5   : > { %585 = vperm.xlu1 %8730, %v10657_v29  }
  0xf9   : > { %v458_v30 = vpop.permute.xlu0 %457 }
  0xfa   : > { %vm460_vm1 = vcmp.lt.s32.totalorder %v452_v27, %v458_v30  ;;  %v474_v30 = vld [vmem:[%s10437_s0 + $0xb0] sm:$0x1] }
  0xfb   : > { %v10663_v31 = vsel %vm460_vm1, 1, %v10171_v3  ;;  %v488_v3 = vunpack.c.l.bf16 %v472_v56  ;;  %v490_v49 = vunpack.c.l.bf16 %v474_v30 }
  0xfc   : > { %8737 = vset.pattern.permute.xlu0 %v10174_v32  ;;  %818 = vperm.xlu2 %8731, %v10663_v31  }
  0xfd   : > { %588 = vperm.xlu1 %8730, %v10663_v31   ;;  %1487 = vperm.xlu0 %8737, %v10663_v31  }
 0x104   : > { %8734 = vset.pattern.permute.xlu2 %v10175_v33 }
 0x105   : > { %8733 = vset.pattern.permute.xlu1 %v10173_v23  ;;  %8742 = vset.pattern.permute.xlu0 %v10176_v34  ;;  %v468_v23 = vld [vmem:[%s10437_s0 + $0x50] sm:$0x1] }
 0x106   : > { %1261 = vperm.xlu2 %8734, %v10657_v29   ;;  %1041 = vperm.xlu1 %8733, %v10663_v31  }
 0x107   : > { %2153 = vperm.xlu0 %8742, %v10657_v29  }
 0x10e   : > { %8736 = vset.pattern.permute.xlu2 %v10174_v32  ;;  %8735 = vset.pattern.permute.xlu1 %v10175_v33  ;;  %v489_v32 = vunpack.c.l.bf16 %v473_v22 }
 0x10f   : > { %8747 = vset.pattern.permute.xlu0 %v10177_v35  ;;  %1484 = vperm.xlu2 %8736, %v10657_v29  }
 0x110   : > { %1264 = vperm.xlu1 %8735, %v10663_v31   ;;  %2602 = vperm.xlu0 %8747, %v10663_v31  }
 0x117   : > { %8739 = vset.pattern.permute.xlu2 %v10178_v36 }
 0x118   : > { %8738 = vset.pattern.permute.xlu1 %v10178_v36  ;;  %8752 = vset.pattern.permute.xlu0 %v10179_v37 }
 0x119   : > { %1710 = vperm.xlu2 %8739, %v10663_v31   ;;  %1707 = vperm.xlu1 %8738, %v10657_v29  }
 0x11a   : > { %3268 = vperm.xlu0 %8752, %v10657_v29   ;;  %v10690_v43 = vpop.f32.mrf.mxu0 }
 0x11b   : > { %v520_v48 = vrot.slane %v10690_v43, 1  ;;  %v521_v51 = vrot.slane %v10690_v43, 2  ;;  %v522_v59 = vrot.slane %v10690_v43, 3  ;;  %v550_v1 = vadd.f32 %v10690_v43, %v479_v54 }
 0x11c   : > { %v523_v25 = vrot.slane %v10690_v43, 4  ;;  %v524_v36 = vrot.slane %v10690_v43, 5  ;;  %v525_v52 = vrot.slane %v10690_v43, 6  ;;  %v10190_v54 = vmov 27  }
 0x11d   : > { %v551_v55 = vadd.f32 %v520_v48, %v480_v47  ;;  %v552_v0 = vadd.f32 %v521_v51, %v481_v53  ;;  %v553_v27 = vadd.f32 %v522_v59, %v482_v61  ;;  %v475_v48 = vld [vmem:[%s10437_s0 + $0xc0] sm:$0x1] }
 0x11e   : > { %v491_v61 = vunpack.c.l.bf16 %v475_v48  ;;  %v10191_v48 = vmov 29  }
 0x11f   : > { %8793 = vtanh.f32 %v551_v55 }
 0x120   : > { %8795 = vtanh.f32 %v552_v0 }
 0x121   : > { %8741 = vset.pattern.permute.xlu2 %v10180_v38  ;;  %8740 = vset.pattern.permute.xlu1 %v10180_v38  ;;  %8797 = vtanh.f32 %v550_v1  ;;  %v470_v38 = vld [vmem:[%s10437_s0 + $0x70] sm:$0x1] }
 0x122   : > { %8757 = vset.pattern.permute.xlu0 %v10181_v39  ;;  %1933 = vperm.xlu2 %8741, %v10663_v31   ;;  %v10703_v57 = vpop.f32.mrf.mxu0  ;;  %8799 = vtanh.f32 %v553_v27  ;;  %v486_v55 = vunpack.c.l.bf16 %v470_v38 }
 0x123   : > { %1930 = vperm.xlu1 %8740, %v10657_v29   ;;  %3717 = vperm.xlu0 %8757, %v10663_v31   ;;  %v527_v8 = vrot.slane %v10703_v57, 1  ;;  %v528_v28 = vrot.slane %v10703_v57, 2  ;;  %v529_v46 = vrot.slane %v10703_v57, 3  ;;  %v558_v47 = vadd.f32 %v10703_v57, %v487_v26 }
 0x124   : > { %v530_v63 = vrot.slane %v10703_v57, 4 }
 0x125   : > { %v559_v33 = vadd.f32 %v527_v8, %v488_v3  ;;  %v560_v53 = vadd.f32 %v528_v28, %v489_v32  ;;  %v561_v1 = vadd.f32 %v529_v46, %v490_v49 }
 0x126   : > { %v562_v27 = vadd.f32 %v530_v63, %v491_v61 }
 0x127   : > { %8801 = vtanh.f32 %v559_v33  ;;  %v478_v33 = vld [vmem:[%s10437_s0 + $0xf0] sm:$0x1] }
 0x12a   : > { %8744 = vset.pattern.permute.xlu2 %v10182_v40 }
 0x12b   : > { %8743 = vset.pattern.permute.xlu1 %v10176_v34  ;;  %8762 = vset.pattern.permute.xlu0 %v10183_v41  ;;  %v469_v34 = vld [vmem:[%s10437_s0 + $0x60] sm:$0x1] }
 0x12c   : > { %2376 = vperm.xlu2 %8744, %v10657_v29   ;;  %2156 = vperm.xlu1 %8743, %v10663_v31   ;;  %v485_v51 = vunpack.c.l.bf16 %v469_v34 }
 0x12d   : > { %4383 = vperm.xlu0 %8762, %v10657_v29  }
 0x12e   : > { %v556_v3 = vadd.f32 %v525_v52, %v485_v51  ;;  %v494_v51 = vunpack.c.l.bf16 %v478_v33  ;;  %v533_v52 = vrot.slane %v10703_v57, 7 }
 0x130   : > { %v565_v61 = vadd.f32 %v533_v52, %v494_v51  ;;  %v10193_v51 = vmov 16  }
 0x134   : > { %8746 = vset.pattern.permute.xlu2 %v10177_v35  ;;  %8745 = vset.pattern.permute.xlu1 %v10182_v40  ;;  %v484_v35 = vunpack.c.l.bf16 %v468_v23  ;;  %v554_v40 = vadd.f32 %v523_v25, %v483_v24  ;;  %v477_v23 = vld [vmem:[%s10437_s0 + $0xe0] sm:$0x1]  ;;  %v492_v24 = vunpack.c.l.bf16 %v476_v60  ;;  %v531_v25 = vrot.slane %v10703_v57, 5 }
 0x135   : > { %8767 = vset.pattern.permute.xlu0 %v10184_v42  ;;  %2599 = vperm.xlu2 %8746, %v10657_v29   ;;  %v493_v34 = vunpack.c.l.bf16 %v477_v23 }
 0x136   : > { %2379 = vperm.xlu1 %8745, %v10663_v31   ;;  %4832 = vperm.xlu0 %8767, %v10663_v31   ;;  %v555_v56 = vadd.f32 %v524_v36, %v484_v35  ;;  %8803 = vtanh.f32 %v554_v40  ;;  %v532_v35 = vrot.slane %v10703_v57, 6  ;;  %v563_v40 = vadd.f32 %v531_v25, %v492_v24 }
 0x137   : > { %8805 = vtanh.f32 %v558_v47 }
 0x138   : > { %8807 = vtanh.f32 %v560_v53 }
 0x139   : > { %8809 = vtanh.f32 %v555_v56 }
 0x13a   : > { %8811 = vtanh.f32 %v561_v1 }
 0x13b   : > { %8813 = vtanh.f32 %v556_v3 }
 0x13c   : > { %8815 = vtanh.f32 %v562_v27 }
 0x13d   : > { %8749 = vset.pattern.permute.xlu2 %v10185_v44 }
 0x13e   : > { %8748 = vset.pattern.permute.xlu1 %v10185_v44  ;;  %8772 = vset.pattern.permute.xlu0 %v10186_v45  ;;  %v8794_v44 = vpop.eup %8793 }
 0x13f   : > { %2825 = vperm.xlu2 %8749, %v10663_v31   ;;  %2822 = vperm.xlu1 %8748, %v10657_v29   ;;  %v608_v59 = vrot.slane %v8794_v44, 7 }
 0x140   : > { %5498 = vperm.xlu0 %8772, %v10657_v29  }
 0x147   : > { %8751 = vset.pattern.permute.xlu2 %v10187_v58  ;;  %8750 = vset.pattern.permute.xlu1 %v10187_v58  ;;  %v8796_v58 = vpop.eup %8795 }
 0x148   : > { %8777 = vset.pattern.permute.xlu0 %v10188_v62  ;;  %3048 = vperm.xlu2 %8751, %v10663_v31   ;;  %v8798_v0 = vpop.eup %8797  ;;  %v611_v22 = vrot.slane %v8796_v58, 6 }
 0x149   : > { %3045 = vperm.xlu1 %8750, %v10657_v29   ;;  %5947 = vperm.xlu0 %8777, %v10663_v31   ;;  %v8800_v8 = vpop.eup %8799  ;;  %v610_v26 = vsel %vm609_vm2, %v608_v59, %v8798_v0 }
 0x14a   : > { %v8802_v28 = vpop.eup %8801  ;;  %v613_v38 = vsel %vm612_vm3, %v611_v22, %v610_v26  ;;  %v10192_v22 = vmov 15  }
 0x14b   : > { %v8804_v32 = vpop.eup %8803  ;;  %v629_v46 = vrot.slane %v8802_v28, 7 }
 0x14c   : > { %v8806_v36 = vpop.eup %8805  ;;  %v617_v49 = vrot.slane %v8804_v32, 4 }
 0x14d   : > { %v8808_v44 = vpop.eup %8807  ;;  %v630_v59 = vsel %vm609_vm2, %v629_v46, %v8806_v36 }
 0x14e   : > { %v8810_v47 = vpop.eup %8809 }
 0x14f   : > { %v8812_v53 = vpop.eup %8811  ;;  %v620_v58 = vrot.slane %v8810_v47, 3 }
 0x150   : > { %8754 = vset.pattern.permute.xlu2 %v10189_v50  ;;  %v8814_v56 = vpop.eup %8813  ;;  %v633_v63 = vrot.slane %v8812_v53, 5 }
 0x151   : > { %8753 = vset.pattern.permute.xlu1 %v10179_v37  ;;  %8782 = vset.pattern.permute.xlu0 %v10190_v54  ;;  %v526_v37 = vrot.slane %v10690_v43, 7  ;;  %v614_v43 = vrot.slane %v8800_v8, 5  ;;  %v8816_v57 = vpop.eup %8815 }
 0x152   : > { %3491 = vperm.xlu2 %8754, %v10657_v29   ;;  %3271 = vperm.xlu1 %8753, %v10663_v31   ;;  %v635_v23 = vrot.slane %v8816_v57, 4 }
 0x153   : > { %6613 = vperm.xlu0 %8782, %v10657_v29   ;;  %v557_v30 = vadd.f32 %v526_v37, %v486_v55  ;;  %v631_v55 = vrot.slane %v8808_v44, 6  ;;  %v623_v37 = vrot.slane %v8814_v56, 2 }
 0x155   : > { %8817 = vtanh.f32 %v557_v30  ;;  %v632_v1 = vsel %vm612_vm3, %v631_v55, %v630_v59 }
 0x156   : > { %8819 = vtanh.f32 %v563_v40  ;;  %v634_v25 = vsel %vm615_vm4, %v633_v63, %v632_v1 }
 0x157   : > { %v636_v32 = vsel %vm618_vm5, %v635_v23, %v634_v25  ;;  %v702_v25 = vld [vmem:[%s10437_s0 + $0x70] sm:$0x1] }
 0x15a   : > { %8756 = vset.pattern.permute.xlu2 %v10181_v39  ;;  %8755 = vset.pattern.permute.xlu1 %v10189_v50  ;;  %v616_v39 = vsel %vm615_vm4, %v614_v43, %v613_v38  ;;  %v564_v50 = vadd.f32 %v532_v35, %v493_v34 }
 0x15b   : > { %8787 = vset.pattern.permute.xlu0 %v10191_v48  ;;  %3714 = vperm.xlu2 %8756, %v10657_v29   ;;  %v619_v60 = vsel %vm618_vm5, %v617_v49, %v616_v39  ;;  %v8818_v0 = vpop.eup %8817 }
 0x15c   : > { %3494 = vperm.xlu1 %8755, %v10663_v31   ;;  %7062 = vperm.xlu0 %8787, %v10663_v31   ;;  %8821 = vtanh.f32 %v564_v50  ;;  %v622_v3 = vsel %vm621_vm6, %v620_v58, %v619_v60  ;;  %v8820_v8 = vpop.eup %8819  ;;  %v626_v24 = vrot.slane %v8818_v0, 1 }
 0x15d   : > { %8823 = vtanh.f32 %v565_v61  ;;  %v625_v26 = vsel %vm624_vm7, %v623_v37, %v622_v3  ;;  %v637_v28 = vrot.slane %v8820_v8, 3 }
 0x15e   : > { %v628_v43 = vsel %vm627_vm8, %v626_v24, %v625_v26  ;;  %v703_v24 = vld [vmem:[%s10437_s0 + $0x80] sm:$0x1] }
 0x15f   : > { %v638_v46 = vsel %vm621_vm6, %v637_v28, %v636_v32  ;;  %v704_v28 = vld [vmem:[%s10437_s0 + $0x90] sm:$0x1] }
 0x162   : > { %v8822_v27 = vpop.eup %8821 }
 0x163   : > { %8759 = vset.pattern.permute.xlu2 %v10192_v22  ;;  %v8824_v33 = vpop.eup %8823  ;;  %v639_v36 = vrot.slane %v8822_v27, 2 }
 0x164   : > { %8758 = vset.pattern.permute.xlu1 %v10192_v22  ;;  %3940 = vperm.xlu2 %8759, %v10663_v31   ;;  %v641_v52 = vrot.slane %v8824_v33, 1  ;;  %v705_v33 = vld [vmem:[%s10437_s0 + $0xa0] sm:$0x1] }
 0x165   : > { %3937 = vperm.xlu1 %8758, %v10657_v29  }
 0x167   : > { %v586_v30 = vpop.permute.xlu1 %585 }
 0x168   : > { %vm590_vm9 = vcmp.eq.s32.totalorder %v586_v30, 1 }
 0x169   : > { %v645_v34 = vsel %vm590_vm9, %v628_v43, 0.0  ;;  %v10758_v35 = vsel %vm590_vm9, %v628_v43, %v10558_v20  ;;  %v640_v20 = vsel %vm624_vm7, %v639_v36, %v638_v46  ;;  %v707_v36 = vld [vmem:[%s10437_s0 + $0xc0] sm:$0x1]  ;;  %v708_v46 = vld [vmem:[%s10437_s0 + $0xd0] sm:$0x1] }
 0x16a   : > { %v649_v38 = vrot.slane %v645_v34, 1  ;;  %v650_v40 = vrot.slane %v645_v34, 2  ;;  %v651_v44 = vrot.slane %v645_v34, 3  ;;  %677 = vst [vmem:[#allocation3] sm:$0x1] %v645_v34  ;;  %743 = vmatmul.f32.vlgmr.msra.gmra.mxu1 %v10758_v35  ;;  %v652_v47 = vrot.slane %v645_v34, 4 }
 0x16b   : > { %2511 = vmatpush.msra.mxu1 %v10468_v2  ;;  %v653_v49 = vrot.slane %v645_v34, 5  ;;  %v654_v39 = vrot.slane %v645_v34, 6  ;;  %v655_v50 = vrot.slane %v645_v34, 7  ;;  %v642_v53 = vsel %vm627_vm8, %v641_v52, %v640_v20  ;;  %v706_v34 = vld [vmem:[%s10437_s0 + $0xb0] sm:$0x1] }
 0x16c   : > { %678 = vst [vmem:[#allocation3 + $0x20] sm:$0x1] %v649_v38  ;;  %8761 = vset.pattern.permute.xlu2 %v10193_v51  ;;  %v718_v38 = vunpack.c.l.bf16 %v702_v25  ;;  %v721_v52 = vunpack.c.l.bf16 %v705_v33 }
 0x16d   : > { %679 = vst [vmem:[#allocation3 + $0x40] sm:$0x1] %v650_v40  ;;  %8760 = vset.pattern.permute.xlu1 %v10193_v51  ;;  %4163 = vperm.xlu2 %8761, %v10663_v31   ;;  %v709_v51 = vld [vmem:[%s10437_s0 + $0xe0] sm:$0x1] }
 0x16e   : > { %680 = vst [vmem:[#allocation3 + $0x60] sm:$0x1] %v651_v44  ;;  %4160 = vperm.xlu1 %8760, %v10657_v29   ;;  %2512 = vmatpush.msra.mxu1 %v10472_v4 }
 0x16f   : > { %681 = vst [vmem:[#allocation3 + $0x80] sm:$0x1] %v652_v47  ;;  %v589_v2 = vpop.permute.xlu1 %588  ;;  %v719_v47 = vunpack.c.l.bf16 %v703_v24 }
 0x170   : > { %682 = vst [vmem:[#allocation3 + $0xa0] sm:$0x1] %v653_v49  ;;  %vm591_vm10 = vcmp.eq.s32.totalorder %v589_v2, 1  ;;  %2513 = vmatpush.msra.mxu1 %v10474_v5  ;;  %v10194_v5 = vmov 18   ;;  %v720_v49 = vunpack.c.l.bf16 %v704_v28  ;;  %v722_v2 = vunpack.c.l.bf16 %v706_v34 }
 0x171   : > { %683 = vst [vmem:[#allocation3 + $0xc0] sm:$0x1] %v654_v39  ;;  %v646_v55 = vsel %vm591_vm10, %v642_v53, 0.0  ;;  %v10770_v56 = vsel %vm591_vm10, %v642_v53, %v10575_v21  ;;  %v723_v53 = vunpack.c.l.bf16 %v707_v36 }
 0x172   : > { %684 = vst [vmem:[#allocation3 + $0xe0] sm:$0x1] %v655_v50  ;;  %v656_v58 = vrot.slane %v646_v55, 1  ;;  %v657_v59 = vrot.slane %v646_v55, 2  ;;  %v658_v60 = vrot.slane %v646_v55, 3  ;;  %746 = vmatmul.f32.gmra.mxu1 %v10770_v56  ;;  %v659_v4 = vrot.slane %v646_v55, 4 }
 0x173   : > { %685 = vst [vmem:[#allocation3 + $0x100] sm:$0x1] %v646_v55  ;;  %2514 = vmatpush.msra.mxu1 %v10479_v6  ;;  %v660_v61 = vrot.slane %v646_v55, 5  ;;  %v661_v57 = vrot.slane %v646_v55, 6  ;;  %v662_v21 = vrot.slane %v646_v55, 7  ;;  %v10195_v6 = vmov 20  }
 0x174   : > { %686 = vst [vmem:[#allocation3 + $0x120] sm:$0x1] %v656_v58  ;;  %v710_v50 = vld [vmem:[%s10437_s0 + $0xf0] sm:$0x1] }
 0x175   : > { %687 = vst [vmem:[#allocation3 + $0x140] sm:$0x1] %v657_v59  ;;  %8764 = vset.pattern.permute.xlu2 %v10194_v5  ;;  %2515 = vmatpush.msra.mxu1 %v10485_v7  ;;  %v10196_v7 = vmov 21  }
 0x176   : > { %688 = vst [vmem:[#allocation3 + $0x160] sm:$0x1] %v658_v60  ;;  %8763 = vset.pattern.permute.xlu1 %v10183_v41  ;;  %4606 = vperm.xlu2 %8764, %v10657_v29   ;;  %v699_v41 = vld [vmem:[%s10437_s0 + $0x40] sm:$0x1]  ;;  %v724_v60 = vunpack.c.l.bf16 %v708_v46 }
 0x177   : > { %689 = vst [vmem:[#allocation3 + $0x180] sm:$0x1] %v659_v4  ;;  %4386 = vperm.xlu1 %8763, %v10663_v31   ;;  %2516 = vmatpush.msra.mxu1 %v10494_v9  ;;  %v10197_v9 = vmov 23   ;;  %v715_v0 = vunpack.c.l.bf16 %v699_v41 }
 0x178   : > { %690 = vst [vmem:[#allocation3 + $0x1a0] sm:$0x1] %v660_v61 }
 0x179   : > { %691 = vst [vmem:[#allocation3 + $0x1c0] sm:$0x1] %v661_v57  ;;  %2517 = vmatpush.msra.mxu1 %v10500_v10  ;;  %v10198_v10 = vmov 25   ;;  %v725_v57 = vunpack.c.l.bf16 %v709_v51 }
 0x17a   : > { %692 = vst [vmem:[#allocation3 + $0x1e0] sm:$0x1] %v662_v21 }
 0x17b   : > { %2518 = vmatpush.msra.mxu1 %v10505_v11  ;;  %v10199_v11 = vmov 26  }
 0x17d   : > { %2519 = vmatpush.msra.mxu1 %v10511_v12  ;;  %v10200_v12 = vmov 31  }
 0x17e   : > { %8766 = vset.pattern.permute.xlu2 %v10184_v42  ;;  %8792 = vset.pattern.permute.xlu0 %v10200_v12 }
 0x17f   : > { %8765 = vset.pattern.permute.xlu1 %v10194_v5  ;;  %4829 = vperm.xlu2 %8766, %v10657_v29  }
 0x180   : > { %4609 = vperm.xlu1 %8765, %v10663_v31   ;;  %2520 = vmatpush.msra.mxu1 %v10517_v13  ;;  %v10201_v13 = vmov 28  }
 0x182   : > { %2521 = vmatpush.msra.mxu1 %v10523_v14  ;;  %v10202_v14 = vmov 30  }
 0x184   : > { %2522 = vmatpush.msra.mxu1 %v10529_v15  ;;  %v696_v15 = vld [vmem:[%s10437_s0 + $0x10] sm:$0x1] }
 0x186   : > { %2523 = vmatpush.msra.mxu1 %v10535_v16  ;;  %v695_v16 = vld [vmem:[%s10437_s0] sm:$0x1] }
 0x187   : > { %8769 = vset.pattern.permute.xlu2 %v10195_v6  ;;  %v711_v42 = vunpack.c.l.bf16 %v695_v16 }
 0x188   : > { %8768 = vset.pattern.permute.xlu1 %v10195_v6  ;;  %5055 = vperm.xlu2 %8769, %v10663_v31  }
 0x189   : > { %5052 = vperm.xlu1 %8768, %v10657_v29   ;;  %2524 = vmatpush.msra.mxu1 %v10541_v17  ;;  %v697_v17 = vld [vmem:[%s10437_s0 + $0x20] sm:$0x1] }
 0x18b   : > { %2525 = vmatpush.msra.mxu1 %v10547_v18  ;;  %v712_v18 = vunpack.c.l.bf16 %v696_v15 }
 0x18d   : > { %2526 = vmatpush.msra.mxu1 %v10553_v19  ;;  %v698_v19 = vld [vmem:[%s10437_s0 + $0x30] sm:$0x1] }
 0x18e   : > { %v714_v63 = vunpack.c.l.bf16 %v698_v19 }
 0x190   : > { %8771 = vset.pattern.permute.xlu2 %v10196_v7 }
 0x191   : > { %8770 = vset.pattern.permute.xlu1 %v10196_v7  ;;  %5278 = vperm.xlu2 %8771, %v10663_v31  }
 0x192   : > { %5275 = vperm.xlu1 %8770, %v10657_v29  }
 0x199   : > { %8774 = vset.pattern.permute.xlu2 %v10197_v9 }
 0x19a   : > { %8773 = vset.pattern.permute.xlu1 %v10186_v45  ;;  %5721 = vperm.xlu2 %8774, %v10657_v29   ;;  %v700_v45 = vld [vmem:[%s10437_s0 + $0x50] sm:$0x1] }
 0x19b   : > { %5501 = vperm.xlu1 %8773, %v10663_v31   ;;  %v716_v3 = vunpack.c.l.bf16 %v700_v45 }
 0x1a2   : > { %8776 = vset.pattern.permute.xlu2 %v10188_v62  ;;  %v713_v62 = vunpack.c.l.bf16 %v697_v17 }
 0x1a3   : > { %8775 = vset.pattern.permute.xlu1 %v10197_v9  ;;  %5944 = vperm.xlu2 %8776, %v10657_v29   ;;  %v726_v9 = vunpack.c.l.bf16 %v710_v50 }
 0x1a4   : > { %5724 = vperm.xlu1 %8775, %v10663_v31  }
 0x1ab   : > { %8779 = vset.pattern.permute.xlu2 %v10198_v10 }
 0x1ac   : > { %8778 = vset.pattern.permute.xlu1 %v10198_v10  ;;  %6170 = vperm.xlu2 %8779, %v10663_v31  }
 0x1ad   : > { %6167 = vperm.xlu1 %8778, %v10657_v29  }
 0x1b4   : > { %8781 = vset.pattern.permute.xlu2 %v10199_v11 }
 0x1b5   : > { %8780 = vset.pattern.permute.xlu1 %v10199_v11  ;;  %6393 = vperm.xlu2 %8781, %v10663_v31  }
 0x1b6   : > { %6390 = vperm.xlu1 %8780, %v10657_v29  }
 0x1bd   : > { %8784 = vset.pattern.permute.xlu2 %v10201_v13 }
 0x1be   : > { %8783 = vset.pattern.permute.xlu1 %v10190_v54  ;;  %6836 = vperm.xlu2 %8784, %v10657_v29  }
 0x1bf   : > { %6616 = vperm.xlu1 %8783, %v10663_v31  }
 0x1c6   : > { %8786 = vset.pattern.permute.xlu2 %v10191_v48  ;;  %v701_v48 = vld [vmem:[%s10437_s0 + $0x60] sm:$0x1] }
 0x1c7   : > { %8785 = vset.pattern.permute.xlu1 %v10201_v13  ;;  %7059 = vperm.xlu2 %8786, %v10657_v29   ;;  %v717_v26 = vunpack.c.l.bf16 %v701_v48 }
 0x1c8   : > { %6839 = vperm.xlu1 %8785, %v10663_v31  }
 0x1cf   : > { %8789 = vset.pattern.permute.xlu2 %v10202_v14 }
 0x1d0   : > { %8788 = vset.pattern.permute.xlu1 %v10202_v14  ;;  %7285 = vperm.xlu2 %8789, %v10663_v31  }
 0x1d1   : > { %7282 = vperm.xlu1 %8788, %v10657_v29  }
 0x1d8   : > { %8791 = vset.pattern.permute.xlu2 %v10200_v12 }
 0x1d9   : > { %8790 = vset.pattern.permute.xlu1 %v10200_v12  ;;  %7508 = vperm.xlu2 %8791, %v10663_v31  }
 0x1da   : > { %7505 = vperm.xlu1 %8790, %v10657_v29  }
 0x1e7   : > { %v744_v54 = vpop.f32.mrf.mxu1 }
 0x1e8   : > { %v752_v37 = vrot.slane %v744_v54, 7  ;;  %v753_v31 = vrot.slane %v744_v54, 1  ;;  %v754_v29 = vrot.slane %v744_v54, 2  ;;  %v783_v1 = vadd.f32 %v744_v54, %v712_v18 }
 0x1e9   : > { %v755_v8 = vrot.slane %v744_v54, 3  ;;  %v756_v22 = vrot.slane %v744_v54, 4  ;;  %v757_v30 = vrot.slane %v744_v54, 5  ;;  %v758_v40 = vrot.slane %v744_v54, 6 }
 0x1ea   : > { %v782_v23 = vadd.f32 %v752_v37, %v711_v42  ;;  %v784_v27 = vadd.f32 %v753_v31, %v713_v62  ;;  %8825 = vtanh.f32 %v783_v1  ;;  %v785_v32 = vadd.f32 %v754_v29, %v714_v63 }
 0x1eb   : > { %v786_v43 = vadd.f32 %v755_v8, %v715_v0  ;;  %v787_v44 = vadd.f32 %v756_v22, %v716_v3  ;;  %v788_v20 = vadd.f32 %v757_v30, %v717_v26  ;;  %v789_v61 = vadd.f32 %v758_v40, %v718_v38  ;;  %v816_v22 = vpop.permute.xlu2 %815 }
 0x1ec   : > { %8827 = vtanh.f32 %v782_v23  ;;  %vm820_vm11 = vcmp.eq.s32.totalorder %v816_v22, 1  ;;  %v918_v22 = vld [vmem:[%s10437_s0] sm:$0x2] }
 0x1ed   : > { %8829 = vtanh.f32 %v784_v27 }
 0x1ee   : > { %8831 = vtanh.f32 %v785_v32 }
 0x1ef   : > { %v747_v39 = vpop.f32.mrf.mxu1  ;;  %8833 = vtanh.f32 %v786_v43 }
 0x1f0   : > { %v759_v55 = vrot.slane %v747_v39, 7  ;;  %v760_v58 = vrot.slane %v747_v39, 1  ;;  %v761_v59 = vrot.slane %v747_v39, 2  ;;  %v8826_v4 = vpop.eup %8825  ;;  %8835 = vtanh.f32 %v787_v44 }
 0x1f1   : > { %v762_v5 = vrot.slane %v747_v39, 3  ;;  %v791_v7 = vadd.f32 %v747_v39, %v720_v49  ;;  %v763_v10 = vrot.slane %v747_v39, 4  ;;  %8837 = vtanh.f32 %v788_v20 }
 0x1f2   : > { %v8828_v21 = vpop.eup %8827  ;;  %v790_v6 = vadd.f32 %v759_v55, %v719_v47  ;;  %v764_v13 = vrot.slane %v747_v39, 5  ;;  %v792_v14 = vadd.f32 %v760_v58, %v721_v52  ;;  %v765_v17 = vrot.slane %v747_v39, 6 }
 0x1f3   : > { %v8830_v11 = vpop.eup %8829  ;;  %v838_v12 = vrot.slane %v8828_v21, 1  ;;  %v793_v18 = vadd.f32 %v761_v59, %v722_v2  ;;  %v794_v45 = vadd.f32 %v762_v5, %v723_v53  ;;  %v795_v48 = vadd.f32 %v763_v10, %v724_v60  ;;  %v10845_v2 = vld [vmem:[#allocation7 + $0x78] sm:$0xff] }
 0x1f4   : > { %v8832_v15 = vpop.eup %8831  ;;  %8839 = vtanh.f32 %v790_v6  ;;  %v840_v16 = vrot.slane %v8830_v11, 7  ;;  %v796_v37 = vadd.f32 %v764_v13, %v725_v57  ;;  %v797_v1 = vadd.f32 %v765_v17, %v726_v9  ;;  %v10854_v9 = vld [vmem:[#allocation7 + $0x68] sm:$0xff] }
 0x1f5   : > { %v8834_v19 = vpop.eup %8833  ;;  %8841 = vtanh.f32 %v789_v61  ;;  %v839_v41 = vsel %vm609_vm2, %v8826_v4, %v838_v12  ;;  %v842_v42 = vrot.slane %v8832_v15, 6  ;;  %v10849_v4 = vld [vmem:[#allocation7 + $0x70] sm:$0xff]  ;;  %v819_v61 = vpop.permute.xlu2 %818  ;;  %v10859_v12 = vld [vmem:[#allocation7 + $0x60] sm:$0xff] }
 0x1f6   : > { %8843 = vtanh.f32 %v791_v7  ;;  %v841_v62 = vsel %vm612_vm3, %v840_v16, %v839_v41  ;;  %v844_v54 = vrot.slane %v8834_v19, 5  ;;  %v8836_v63 = vpop.eup %8835  ;;  %vm821_vm12 = vcmp.eq.s32.totalorder %v819_v61, 1  ;;  %v10866_v19 = vld [vmem:[#allocation7 + $0x58] sm:$0xff]  ;;  %v929_v61 = vld [vmem:[%s10437_s0 + $0xb0] sm:$0x2] }
 0x1f7   : > { %v843_v0 = vsel %vm615_vm4, %v842_v42, %v841_v62  ;;  %8845 = vtanh.f32 %v792_v14  ;;  %v846_v29 = vrot.slane %v8836_v63, 4  ;;  %v8838_v3 = vpop.eup %8837  ;;  %v10872_v62 = vld [vmem:[#allocation7 + $0x48] sm:$0xff]  ;;  %v10881_v63 = vld [vmem:[#allocation7 + $0x30] sm:$0xff] }
 0x1f8   : > { %v845_v31 = vsel %vm618_vm5, %v844_v54, %v843_v0  ;;  %8847 = vtanh.f32 %v793_v18  ;;  %v848_v24 = vrot.slane %v8838_v3, 3  ;;  %v10875_v54 = vld [vmem:[#allocation7 + $0x40] sm:$0xff]  ;;  %v10884_v0 = vld [vmem:[#allocation7 + $0x28] sm:$0xff] }
 0x1f9   : > { %8849 = vtanh.f32 %v794_v45  ;;  %v847_v23 = vsel %vm621_vm6, %v846_v29, %v845_v31  ;;  %v10869_v45 = vld [vmem:[#allocation7 + $0x50] sm:$0xff]  ;;  %v10890_v31 = vld [vmem:[#allocation7 + $0x18] sm:$0xff]  ;;  %v10899_v3 = vld [vmem:[#allocation7] sm:$0xff] }
 0x1fa   : > { %v8840_v8 = vpop.eup %8839  ;;  %8851 = vtanh.f32 %v795_v48  ;;  %v849_v28 = vsel %vm624_vm7, %v848_v24, %v847_v23  ;;  %v10878_v48 = vld [vmem:[#allocation7 + $0x38] sm:$0xff]  ;;  %v10893_v29 = vld [vmem:[#allocation7 + $0x10] sm:$0xff] }
 0x1fb   : > { %v8842_v25 = vpop.eup %8841  ;;  %8853 = vtanh.f32 %v796_v37  ;;  %v852_v26 = vrot.slane %v8840_v8, 1  ;;  %v10887_v37 = vld [vmem:[#allocation7 + $0x20] sm:$0xff]  ;;  %v919_v23 = vld [vmem:[%s10437_s0 + $0x10] sm:$0x2] }
 0x1fc   : > { %v8844_v27 = vpop.eup %8843  ;;  %v850_v30 = vrot.slane %v8842_v25, 2  ;;  %8855 = vtanh.f32 %v797_v1  ;;  %v10896_v1 = vld [vmem:[#allocation7 + $0x8] sm:$0xff]  ;;  %v920_v8 = vld [vmem:[%s10437_s0 + $0x20] sm:$0x2]  ;;  %v921_v24 = vld [vmem:[%s10437_s0 + $0x30] sm:$0x2] }
 0x1fd   : > { %v8846_v32 = vpop.eup %8845  ;;  %v853_v34 = vsel %vm609_vm2, %v8844_v27, %v852_v26  ;;  %v936_v25 = vunpack.c.l.bf16 %v920_v8  ;;  %v922_v26 = vld [vmem:[%s10437_s0 + $0x40] sm:$0x2]  ;;  %v923_v27 = vld [vmem:[%s10437_s0 + $0x50] sm:$0x2] }
 0x1fe   : > { %v8848_v43 = vpop.eup %8847  ;;  %v851_v33 = vsel %vm627_vm8, %v850_v30, %v849_v28  ;;  %v854_v36 = vrot.slane %v8846_v32, 7  ;;  %v934_v28 = vunpack.c.l.bf16 %v918_v22  ;;  %v935_v30 = vunpack.c.l.bf16 %v919_v23  ;;  %v924_v32 = vld [vmem:[%s10437_s0 + $0x60] sm:$0x2] }
 0x1ff   : > { %v8850_v38 = vpop.eup %8849  ;;  %v868_v40 = vsel %vm820_vm11, %v851_v33, 0.0  ;;  %v10841_v44 = vsel %vm820_vm11, %v851_v33, %v10758_v35  ;;  %v856_v52 = vrot.slane %v8848_v43, 6  ;;  %v937_v43 = vunpack.c.l.bf16 %v921_v24 }
 0x200   : > { %v8852_v46 = vpop.eup %8851  ;;  %v872_v47 = vrot.slane %v868_v40, 1  ;;  %v873_v49 = vrot.slane %v868_v40, 2  ;;  %v874_v51 = vrot.slane %v868_v40, 3  ;;  %900 = vst [vmem:[#allocation3 + $0x1] sm:$0x1] %v868_v40  ;;  %966 = vmatmul.f32.vlgmr.msra.gmra.mxu2 %v10841_v44  ;;  %v875_v20 = vrot.slane %v868_v40, 4 }
 0x201   : > { %v8854_v39 = vpop.eup %8853  ;;  %v855_v50 = vsel %vm612_vm3, %v854_v36, %v853_v34  ;;  %2734 = vmatpush.msra.mxu2 %v10845_v2  ;;  %v876_v55 = vrot.slane %v868_v40, 5  ;;  %v858_v58 = vrot.slane %v8850_v38, 5  ;;  %v877_v59 = vrot.slane %v868_v40, 6 }
 0x202   : > { %v8856_v53 = vpop.eup %8855  ;;  %901 = vst [vmem:[#allocation3 + $0x21] sm:$0x1] %v872_v47  ;;  %v857_v35 = vsel %vm615_vm4, %v856_v52, %v855_v50  ;;  %v860_v60 = vrot.slane %v8852_v46, 4  ;;  %v878_v57 = vrot.slane %v868_v40, 7  ;;  %v862_v21 = vrot.slane %v8854_v39, 3 }
 0x203   : > { %902 = vst [vmem:[#allocation3 + $0x41] sm:$0x1] %v873_v49  ;;  %2735 = vmatpush.msra.mxu2 %v10849_v4  ;;  %v859_v5 = vsel %vm618_vm5, %v858_v58, %v857_v35  ;;  %v864_v7 = vrot.slane %v8856_v53, 2  ;;  %v938_v34 = vunpack.c.l.bf16 %v922_v26  ;;  %v939_v36 = vunpack.c.l.bf16 %v923_v27  ;;  %v925_v49 = vld [vmem:[%s10437_s0 + $0x70] sm:$0x2] }
 0x204   : > { %903 = vst [vmem:[#allocation3 + $0x61] sm:$0x1] %v874_v51  ;;  %v861_v6 = vsel %vm621_vm6, %v860_v60, %v859_v5  ;;  %v940_v51 = vunpack.c.l.bf16 %v924_v32  ;;  %v928_v53 = vld [vmem:[%s10437_s0 + $0xa0] sm:$0x2] }
 0x205   : > { %904 = vst [vmem:[#allocation3 + $0x81] sm:$0x1] %v875_v20  ;;  %2736 = vmatpush.msra.mxu2 %v10854_v9  ;;  %v863_v10 = vsel %vm624_vm7, %v862_v21, %v861_v6  ;;  %v926_v58 = vld [vmem:[%s10437_s0 + $0x80] sm:$0x2] }
 0x206   : > { %905 = vst [vmem:[#allocation3 + $0xa1] sm:$0x1] %v876_v55  ;;  %v865_v11 = vsel %vm627_vm8, %v864_v7, %v863_v10  ;;  %v930_v6 = vld [vmem:[%s10437_s0 + $0xc0] sm:$0x2]  ;;  %v931_v7 = vld [vmem:[%s10437_s0 + $0xd0] sm:$0x2]  ;;  %v944_v10 = vunpack.c.l.bf16 %v928_v53 }
 0x207   : > { %906 = vst [vmem:[#allocation3 + $0xc1] sm:$0x1] %v877_v59  ;;  %2737 = vmatpush.msra.mxu2 %v10859_v12  ;;  %v869_v13 = vsel %vm821_vm12, %v865_v11, 0.0  ;;  %v10863_v14 = vsel %vm821_vm12, %v865_v11, %v10770_v56  ;;  %v927_v59 = vld [vmem:[%s10437_s0 + $0x90] sm:$0x2] }
 0x208   : > { %907 = vst [vmem:[#allocation3 + $0xe1] sm:$0x1] %v878_v57  ;;  %v879_v15 = vrot.slane %v869_v13, 1  ;;  %v880_v16 = vrot.slane %v869_v13, 2  ;;  %v881_v17 = vrot.slane %v869_v13, 3  ;;  %969 = vmatmul.f32.gmra.mxu2 %v10863_v14  ;;  %v882_v18 = vrot.slane %v869_v13, 4 }
 0x209   : > { %908 = vst [vmem:[#allocation3 + $0x101] sm:$0x1] %v869_v13  ;;  %2738 = vmatpush.msra.mxu2 %v10866_v19  ;;  %v883_v41 = vrot.slane %v869_v13, 5  ;;  %v884_v42 = vrot.slane %v869_v13, 6  ;;  %v885_v56 = vrot.slane %v869_v13, 7  ;;  %v941_v57 = vunpack.c.l.bf16 %v925_v49 }
 0x20a   : > { %909 = vst [vmem:[#allocation3 + $0x121] sm:$0x1] %v879_v15  ;;  %v932_v11 = vld [vmem:[%s10437_s0 + $0xe0] sm:$0x2]  ;;  %v933_v13 = vld [vmem:[%s10437_s0 + $0xf0] sm:$0x2]  ;;  %v942_v15 = vunpack.c.l.bf16 %v926_v58 }
 0x20b   : > { %910 = vst [vmem:[#allocation3 + $0x141] sm:$0x1] %v880_v16  ;;  %2739 = vmatpush.msra.mxu2 %v10869_v45  ;;  %v943_v16 = vunpack.c.l.bf16 %v927_v59  ;;  %v948_v22 = vunpack.c.l.bf16 %v932_v11  ;;  %v949_v23 = vunpack.c.l.bf16 %v933_v13  ;;  %v1039_v11 = vpop.permute.xlu0 %1038 }
 0x20c   : > { %911 = vst [vmem:[#allocation3 + $0x161] sm:$0x1] %v881_v17  ;;  %vm1043_vm13 = vcmp.eq.s32.totalorder %v1039_v11, 1  ;;  %v1143_v11 = vld [vmem:[%s10437_s0 + $0x20] sm:$0x2] }
 0x20d   : > { %912 = vst [vmem:[#allocation3 + $0x181] sm:$0x1] %v882_v18  ;;  %2740 = vmatpush.msra.mxu2 %v10872_v62  ;;  %v945_v18 = vunpack.c.l.bf16 %v929_v61 }
 0x20e   : > { %913 = vst [vmem:[#allocation3 + $0x1a1] sm:$0x1] %v883_v41  ;;  %v946_v41 = vunpack.c.l.bf16 %v930_v6 }
 0x20f   : > { %914 = vst [vmem:[#allocation3 + $0x1c1] sm:$0x1] %v884_v42  ;;  %2741 = vmatpush.msra.mxu2 %v10875_v54  ;;  %v947_v42 = vunpack.c.l.bf16 %v931_v7 }
 0x210   : > { %915 = vst [vmem:[#allocation3 + $0x1e1] sm:$0x1] %v885_v56 }
 0x211   : > { %2742 = vmatpush.msra.mxu2 %v10878_v48 }
 0x213   : > { %2743 = vmatpush.msra.mxu2 %v10881_v63 }
 0x215   : > { %2744 = vmatpush.msra.mxu2 %v10884_v0 }
 0x217   : > { %2745 = vmatpush.msra.mxu2 %v10887_v37 }
 0x219   : > { %2746 = vmatpush.msra.mxu2 %v10890_v31 }
 0x21b   : > { %2747 = vmatpush.msra.mxu2 %v10893_v29 }
 0x21d   : > { %2748 = vmatpush.msra.mxu2 %v10896_v1 }
 0x21f   : > { %2749 = vmatpush.msra.mxu2 %v10899_v3 }
 0x283   : > { %v967_v33 = vpop.f32.mrf.mxu2 }
 0x284   : > { %v975_v38 = vrot.slane %v967_v33, 6  ;;  %v976_v40 = vrot.slane %v967_v33, 7  ;;  %v977_v46 = vrot.slane %v967_v33, 1  ;;  %v1007_v47 = vadd.f32 %v967_v33, %v936_v25 }
 0x285   : > { %v978_v52 = vrot.slane %v967_v33, 2  ;;  %v979_v39 = vrot.slane %v967_v33, 3  ;;  %v980_v55 = vrot.slane %v967_v33, 4  ;;  %v981_v5 = vrot.slane %v967_v33, 5 }
 0x286   : > { %v1005_v20 = vadd.f32 %v975_v38, %v934_v28  ;;  %v1006_v50 = vadd.f32 %v976_v40, %v935_v30  ;;  %v1008_v35 = vadd.f32 %v977_v46, %v937_v43  ;;  %8857 = vtanh.f32 %v1007_v47 }
 0x287   : > { %v1009_v60 = vadd.f32 %v978_v52, %v938_v34  ;;  %v1010_v21 = vadd.f32 %v979_v39, %v939_v36  ;;  %v1011_v17 = vadd.f32 %v980_v55, %v940_v51  ;;  %v1012_v8 = vadd.f32 %v981_v5, %v941_v57 }
 0x288   : > { %8859 = vtanh.f32 %v1005_v20 }
 0x289   : > { %8861 = vtanh.f32 %v1006_v50 }
 0x28a   : > { %8863 = vtanh.f32 %v1008_v35 }
 0x28b   : > { %8865 = vtanh.f32 %v1009_v60  ;;  %v970_v56 = vpop.f32.mrf.mxu2 }
 0x28c   : > { %8867 = vtanh.f32 %v1010_v21  ;;  %v8858_v24 = vpop.eup %8857  ;;  %v982_v25 = vrot.slane %v970_v56, 6  ;;  %v983_v26 = vrot.slane %v970_v56, 7  ;;  %v984_v27 = vrot.slane %v970_v56, 1 }
 0x28d   : > { %v1015_v28 = vadd.f32 %v970_v56, %v944_v10  ;;  %8869 = vtanh.f32 %v1011_v17  ;;  %v985_v32 = vrot.slane %v970_v56, 2  ;;  %v986_v43 = vrot.slane %v970_v56, 3 }
 0x28e   : > { %v8860_v30 = vpop.eup %8859  ;;  %v987_v33 = vrot.slane %v970_v56, 4  ;;  %v1013_v36 = vadd.f32 %v982_v25, %v942_v15  ;;  %v1014_v38 = vadd.f32 %v983_v26, %v943_v16  ;;  %v988_v49 = vrot.slane %v970_v56, 5 }
 0x28f   : > { %v8862_v34 = vpop.eup %8861  ;;  %8871 = vtanh.f32 %v1015_v28  ;;  %v1061_v40 = vrot.slane %v8860_v30, 2  ;;  %v1016_v51 = vadd.f32 %v984_v27, %v945_v18  ;;  %v1017_v39 = vadd.f32 %v985_v32, %v946_v41 }
 0x290   : > { %v8864_v46 = vpop.eup %8863  ;;  %8873 = vtanh.f32 %v1012_v8  ;;  %v1062_v47 = vrot.slane %v8862_v34, 1  ;;  %v1018_v20 = vadd.f32 %v986_v43, %v947_v42  ;;  %v1019_v35 = vadd.f32 %v987_v33, %v948_v22 }
 0x291   : > { %v8866_v52 = vpop.eup %8865  ;;  %8875 = vtanh.f32 %v1013_v36  ;;  %v1065_v55 = vrot.slane %v8864_v46, 7  ;;  %v1020_v60 = vadd.f32 %v988_v49, %v949_v23  ;;  %v1042_v49 = vpop.permute.xlu1 %1041 }
 0x292   : > { %v8868_v50 = vpop.eup %8867  ;;  %8877 = vtanh.f32 %v1014_v38  ;;  %v1063_v53 = vsel %vm609_vm2, %v1062_v47, %v1061_v40  ;;  %v1067_v59 = vrot.slane %v8866_v52, 6  ;;  %vm1044_vm14 = vcmp.eq.s32.totalorder %v1042_v49, 1  ;;  %v1151_v49 = vld [vmem:[%s10437_s0 + $0xa0] sm:$0x2] }
 0x293   : > { %v1064_v58 = vsel %vm612_vm3, %v8858_v24, %v1063_v53  ;;  %8879 = vtanh.f32 %v1016_v51  ;;  %v8870_v61 = vpop.eup %8869  ;;  %v1069_v5 = vrot.slane %v8868_v50, 5 }
 0x294   : > { %v1066_v57 = vsel %vm615_vm4, %v1065_v55, %v1064_v58  ;;  %8881 = vtanh.f32 %v1017_v39  ;;  %v1071_v7 = vrot.slane %v8870_v61, 4 }
 0x295   : > { %v8872_v21 = vpop.eup %8871  ;;  %v1068_v6 = vsel %vm618_vm5, %v1067_v59, %v1066_v57  ;;  %8883 = vtanh.f32 %v1018_v20 }
 0x296   : > { %v8874_v10 = vpop.eup %8873  ;;  %v1070_v13 = vsel %vm621_vm6, %v1069_v5, %v1068_v6  ;;  %8885 = vtanh.f32 %v1019_v35 }
 0x297   : > { %v8876_v15 = vpop.eup %8875  ;;  %v1072_v16 = vsel %vm624_vm7, %v1071_v7, %v1070_v13  ;;  %v1073_v17 = vrot.slane %v8874_v10, 3  ;;  %8887 = vtanh.f32 %v1020_v60  ;;  %v1141_v7 = vld [vmem:[%s10437_s0] sm:$0x2]  ;;  %v1142_v10 = vld [vmem:[%s10437_s0 + $0x10] sm:$0x2] }
 0x298   : > { %v8878_v18 = vpop.eup %8877  ;;  %v1075_v41 = vrot.slane %v8876_v15, 2  ;;  %v1145_v15 = vld [vmem:[%s10437_s0 + $0x40] sm:$0x2] }
 0x299   : > { %v8880_v42 = vpop.eup %8879  ;;  %v1074_v56 = vsel %vm627_vm8, %v1073_v17, %v1072_v16  ;;  %v1076_v8 = vrot.slane %v8878_v18, 1  ;;  %v1146_v16 = vld [vmem:[%s10437_s0 + $0x50] sm:$0x2]  ;;  %v1157_v17 = vunpack.c.l.bf16 %v1141_v7  ;;  %v1158_v18 = vunpack.c.l.bf16 %v1142_v10 }
 0x29a   : > { %v8882_v22 = vpop.eup %8881  ;;  %v1091_v23 = vsel %vm1043_vm13, %v1074_v56, 0.0  ;;  %v10926_v24 = vsel %vm1043_vm13, %v1074_v56, %v10841_v44  ;;  %v1079_v33 = vrot.slane %v8880_v42, 7  ;;  %v1147_v42 = vld [vmem:[%s10437_s0 + $0x60] sm:$0x2] }
 0x29b   : > { %v8884_v25 = vpop.eup %8883  ;;  %v1095_v26 = vrot.slane %v1091_v23, 1  ;;  %v1096_v27 = vrot.slane %v1091_v23, 2  ;;  %v1097_v28 = vrot.slane %v1091_v23, 3  ;;  %1123 = vst [vmem:[#allocation3 + $0x2] sm:$0x1] %v1091_v23  ;;  %1189 = vmatmul.f32.vlgmr.msra.gmra.mxu3 %v10926_v24  ;;  %v1098_v32 = vrot.slane %v1091_v23, 4 }
 0x29c   : > { %v8886_v30 = vpop.eup %8885  ;;  %v1077_v43 = vsel %vm609_vm2, %v1076_v8, %v1075_v41  ;;  %2957 = vmatpush.msra.mxu3 %v10845_v2  ;;  %v1099_v36 = vrot.slane %v1091_v23, 5  ;;  %v1081_v38 = vrot.slane %v8882_v22, 6  ;;  %v1100_v40 = vrot.slane %v1091_v23, 6 }
 0x29d   : > { %v8888_v34 = vpop.eup %8887  ;;  %1124 = vst [vmem:[#allocation3 + $0x22] sm:$0x1] %v1095_v26  ;;  %v1078_v44 = vsel %vm612_vm3, %v8872_v21, %v1077_v43  ;;  %v1083_v47 = vrot.slane %v8884_v25, 5  ;;  %v1101_v51 = vrot.slane %v1091_v23, 7  ;;  %v1085_v39 = vrot.slane %v8886_v30, 4 }
 0x29e   : > { %1125 = vst [vmem:[#allocation3 + $0x42] sm:$0x1] %v1096_v27  ;;  %v1080_v46 = vsel %vm615_vm4, %v1079_v33, %v1078_v44  ;;  %2958 = vmatpush.msra.mxu3 %v10849_v4  ;;  %v1087_v50 = vrot.slane %v8888_v34, 3  ;;  %v1159_v41 = vunpack.c.l.bf16 %v1143_v11  ;;  %v1161_v8 = vunpack.c.l.bf16 %v1145_v15  ;;  %v1152_v44 = vld [vmem:[%s10437_s0 + $0xb0] sm:$0x2] }
 0x29f   : > { %1126 = vst [vmem:[#allocation3 + $0x62] sm:$0x1] %v1097_v28  ;;  %v1082_v52 = vsel %vm618_vm5, %v1081_v38, %v1080_v46  ;;  %v1162_v22 = vunpack.c.l.bf16 %v1146_v16  ;;  %v1148_v28 = vld [vmem:[%s10437_s0 + $0x70] sm:$0x2]  ;;  %v1163_v30 = vunpack.c.l.bf16 %v1147_v42 }
 0x2a0   : > { %1127 = vst [vmem:[#allocation3 + $0x82] sm:$0x1] %v1098_v32  ;;  %v1084_v20 = vsel %vm621_vm6, %v1083_v47, %v1082_v52  ;;  %2959 = vmatpush.msra.mxu3 %v10854_v9  ;;  %v1150_v46 = vld [vmem:[%s10437_s0 + $0x90] sm:$0x2] }
 0x2a1   : > { %1128 = vst [vmem:[#allocation3 + $0xa2] sm:$0x1] %v1099_v36  ;;  %v1086_v53 = vsel %vm624_vm7, %v1085_v39, %v1084_v20  ;;  %v1153_v20 = vld [vmem:[%s10437_s0 + $0xc0] sm:$0x2] }
 0x2a2   : > { %1129 = vst [vmem:[#allocation3 + $0xc2] sm:$0x1] %v1100_v40  ;;  %v1088_v55 = vsel %vm627_vm8, %v1087_v50, %v1086_v53  ;;  %2960 = vmatpush.msra.mxu3 %v10859_v12  ;;  %v1149_v40 = vld [vmem:[%s10437_s0 + $0x80] sm:$0x2]  ;;  %v1154_v50 = vld [vmem:[%s10437_s0 + $0xd0] sm:$0x2]  ;;  %v1168_v53 = vunpack.c.l.bf16 %v1152_v44 }
 0x2a3   : > { %1130 = vst [vmem:[#allocation3 + $0xe2] sm:$0x1] %v1101_v51  ;;  %v1092_v35 = vsel %vm1044_vm14, %v1088_v55, 0.0  ;;  %v10941_v58 = vsel %vm1044_vm14, %v1088_v55, %v10863_v14  ;;  %v1144_v14 = vld [vmem:[%s10437_s0 + $0x30] sm:$0x2]  ;;  %v1164_v51 = vunpack.c.l.bf16 %v1148_v28 }
 0x2a4   : > { %v1102_v59 = vrot.slane %v1092_v35, 1  ;;  %v1103_v60 = vrot.slane %v1092_v35, 2  ;;  %v1104_v61 = vrot.slane %v1092_v35, 3  ;;  %1131 = vst [vmem:[#allocation3 + $0x102] sm:$0x1] %v1092_v35  ;;  %1192 = vmatmul.f32.gmra.mxu3 %v10941_v58  ;;  %v1105_v57 = vrot.slane %v1092_v35, 4 }
 0x2a5   : > { %2961 = vmatpush.msra.mxu3 %v10866_v19  ;;  %v1106_v5 = vrot.slane %v1092_v35, 5  ;;  %v1107_v21 = vrot.slane %v1092_v35, 6  ;;  %v1108_v6 = vrot.slane %v1092_v35, 7  ;;  %v1160_v13 = vunpack.c.l.bf16 %v1144_v14  ;;  %v1155_v55 = vld [vmem:[%s10437_s0 + $0xe0] sm:$0x2] }
 0x2a6   : > { %1132 = vst [vmem:[#allocation3 + $0x122] sm:$0x1] %v1102_v59  ;;  %v1156_v35 = vld [vmem:[%s10437_s0 + $0xf0] sm:$0x2]  ;;  %v1165_v59 = vunpack.c.l.bf16 %v1149_v40  ;;  %v1171_v7 = vunpack.c.l.bf16 %v1155_v55  ;;  %v1262_v55 = vpop.permute.xlu2 %1261 }
 0x2a7   : > { %1133 = vst [vmem:[#allocation3 + $0x142] sm:$0x1] %v1103_v60  ;;  %2962 = vmatpush.msra.mxu3 %v10869_v45  ;;  %v1166_v60 = vunpack.c.l.bf16 %v1150_v46  ;;  %v1172_v10 = vunpack.c.l.bf16 %v1156_v35  ;;  %vm1266_vm15 = vcmp.eq.s32.totalorder %v1262_v55, 1 }
 0x2a8   : > { %1134 = vst [vmem:[#allocation3 + $0x162] sm:$0x1] %v1104_v61 }
 0x2a9   : > { %1135 = vst [vmem:[#allocation3 + $0x182] sm:$0x1] %v1105_v57  ;;  %2963 = vmatpush.msra.mxu3 %v10872_v62  ;;  %v1167_v57 = vunpack.c.l.bf16 %v1151_v49 }
 0x2aa   : > { %1136 = vst [vmem:[#allocation3 + $0x1a2] sm:$0x1] %v1106_v5  ;;  %v1169_v5 = vunpack.c.l.bf16 %v1153_v20 }
 0x2ab   : > { %1137 = vst [vmem:[#allocation3 + $0x1c2] sm:$0x1] %v1107_v21  ;;  %2964 = vmatpush.msra.mxu3 %v10875_v54  ;;  %v1170_v21 = vunpack.c.l.bf16 %v1154_v50 }
 0x2ac   : > { %1138 = vst [vmem:[#allocation3 + $0x1e2] sm:$0x1] %v1108_v6 }
 0x2ad   : > { %2965 = vmatpush.msra.mxu3 %v10878_v48 }
 0x2af   : > { %2966 = vmatpush.msra.mxu3 %v10881_v63 }
 0x2b1   : > { %2967 = vmatpush.msra.mxu3 %v10884_v0 }
 0x2b3   : > { %2968 = vmatpush.msra.mxu3 %v10887_v37 }
 0x2b5   : > { %2969 = vmatpush.msra.mxu3 %v10890_v31 }
 0x2b7   : > { %2970 = vmatpush.msra.mxu3 %v10893_v29 }
 0x2b9   : > { %2971 = vmatpush.msra.mxu3 %v10896_v1 }
 0x2bb   : > { %2972 = vmatpush.msra.mxu3 %v10899_v3 }
 0x31e   : > { %v1190_v56 = vpop.f32.mrf.mxu3 }
 0x31f   : > { %v1198_v23 = vrot.slane %v1190_v56, 5  ;;  %v1199_v25 = vrot.slane %v1190_v56, 6  ;;  %v1200_v26 = vrot.slane %v1190_v56, 7  ;;  %v1231_v27 = vadd.f32 %v1190_v56, %v1160_v13 }
 0x320   : > { %v1201_v32 = vrot.slane %v1190_v56, 1  ;;  %v1202_v43 = vrot.slane %v1190_v56, 2  ;;  %v1203_v38 = vrot.slane %v1190_v56, 3  ;;  %v1204_v52 = vrot.slane %v1190_v56, 4 }
 0x321   : > { %v1228_v33 = vadd.f32 %v1198_v23, %v1157_v17  ;;  %v1229_v34 = vadd.f32 %v1199_v25, %v1158_v18  ;;  %v1230_v36 = vadd.f32 %v1200_v26, %v1159_v41  ;;  %8889 = vtanh.f32 %v1231_v27 }
 0x322   : > { %v1232_v47 = vadd.f32 %v1201_v32, %v1161_v8  ;;  %v1233_v39 = vadd.f32 %v1202_v43, %v1162_v22  ;;  %v1234_v61 = vadd.f32 %v1203_v38, %v1163_v30  ;;  %v1235_v14 = vadd.f32 %v1204_v52, %v1164_v51 }
 0x323   : > { %8891 = vtanh.f32 %v1228_v33 }
 0x324   : > { %8893 = vtanh.f32 %v1229_v34 }
 0x325   : > { %8895 = vtanh.f32 %v1230_v36 }
 0x326   : > { %8897 = vtanh.f32 %v1232_v47 }
 0x327   : > { %v1193_v6 = vpop.f32.mrf.mxu3  ;;  %8899 = vtanh.f32 %v1233_v39  ;;  %v8890_v11 = vpop.eup %8889 }
 0x328   : > { %v1205_v13 = vrot.slane %v1193_v6, 5  ;;  %v1206_v15 = vrot.slane %v1193_v6, 6  ;;  %v1207_v16 = vrot.slane %v1193_v6, 7  ;;  %v1239_v17 = vadd.f32 %v1193_v6, %v1168_v53 }
 0x329   : > { %v8892_v18 = vpop.eup %8891  ;;  %8901 = vtanh.f32 %v1234_v61  ;;  %v1208_v41 = vrot.slane %v1193_v6, 1  ;;  %v1209_v42 = vrot.slane %v1193_v6, 2  ;;  %v1210_v56 = vrot.slane %v1193_v6, 3 }
 0x32a   : > { %v8894_v8 = vpop.eup %8893  ;;  %v1236_v22 = vadd.f32 %v1205_v13, %v1165_v59  ;;  %v1237_v23 = vadd.f32 %v1206_v15, %v1166_v60  ;;  %8903 = vtanh.f32 %v1239_v17  ;;  %v1284_v25 = vrot.slane %v8892_v18, 3 }
 0x32b   : > { %v8896_v26 = vpop.eup %8895  ;;  %8905 = vtanh.f32 %v1235_v14  ;;  %v1285_v27 = vrot.slane %v8894_v8, 2  ;;  %v1211_v28 = vrot.slane %v1193_v6, 4  ;;  %v1238_v30 = vadd.f32 %v1207_v16, %v1167_v57 }
 0x32c   : > { %v8898_v32 = vpop.eup %8897  ;;  %8907 = vtanh.f32 %v1236_v22  ;;  %v1287_v43 = vrot.slane %v8896_v26, 1  ;;  %v1240_v33 = vadd.f32 %v1208_v41, %v1169_v5  ;;  %v1241_v34 = vadd.f32 %v1209_v42, %v1170_v21 }
 0x32d   : > { %v8900_v36 = vpop.eup %8899  ;;  %8909 = vtanh.f32 %v1237_v23  ;;  %v1286_v44 = vsel %vm609_vm2, %v1285_v27, %v1284_v25  ;;  %v1242_v38 = vadd.f32 %v1210_v56, %v1171_v7  ;;  %v1290_v46 = vrot.slane %v8898_v32, 7 }
 0x32e   : > { %v1288_v40 = vsel %vm612_vm3, %v1287_v43, %v1286_v44  ;;  %v1243_v47 = vadd.f32 %v1211_v28, %v1172_v10  ;;  %8911 = vtanh.f32 %v1238_v30  ;;  %v1292_v52 = vrot.slane %v8900_v36, 6  ;;  %v1265_v28 = vpop.permute.xlu1 %1264 }
 0x32f   : > { %v8902_v49 = vpop.eup %8901  ;;  %v1289_v51 = vsel %vm615_vm4, %v8890_v11, %v1288_v40  ;;  %8913 = vtanh.f32 %v1240_v33  ;;  %vm1267_vm0 = vcmp.eq.s32.totalorder %v1265_v28, 1 }
 0x330   : > { %v8904_v39 = vpop.eup %8903  ;;  %v1291_v20 = vsel %vm618_vm5, %v1290_v46, %v1289_v51  ;;  %v1294_v50 = vrot.slane %v8902_v49, 5  ;;  %8915 = vtanh.f32 %v1241_v34 }
 0x331   : > { %v8906_v53 = vpop.eup %8905  ;;  %v1293_v35 = vsel %vm621_vm6, %v1292_v52, %v1291_v20  ;;  %8917 = vtanh.f32 %v1242_v38 }
 0x332   : > { %v8908_v59 = vpop.eup %8907  ;;  %v1295_v60 = vsel %vm624_vm7, %v1294_v50, %v1293_v35  ;;  %v1296_v61 = vrot.slane %v8906_v53, 4  ;;  %8919 = vtanh.f32 %v1243_v47  ;;  %v1371_v53 = vld [vmem:[%s10437_s0 + $0x70] sm:$0x4] }
 0x333   : > { %v8910_v57 = vpop.eup %8909  ;;  %v1298_v5 = vrot.slane %v8908_v59, 3 }
 0x334   : > { %v8912_v21 = vpop.eup %8911  ;;  %v1297_v6 = vsel %vm627_vm8, %v1296_v61, %v1295_v60  ;;  %v1299_v14 = vrot.slane %v8910_v57, 2 }
 0x335   : > { %v8914_v7 = vpop.eup %8913  ;;  %v1314_v10 = vsel %vm1266_vm15, %v1297_v6, 0.0  ;;  %v10980_v11 = vsel %vm1266_vm15, %v1297_v6, %v10926_v24  ;;  %v1301_v13 = vrot.slane %v8912_v21, 1  ;;  %v1387_v21 = vunpack.c.l.bf16 %v1371_v53 }
 0x336   : > { %v8916_v15 = vpop.eup %8915  ;;  %v1318_v16 = vrot.slane %v1314_v10, 1  ;;  %v1319_v17 = vrot.slane %v1314_v10, 2  ;;  %v1320_v18 = vrot.slane %v1314_v10, 3  ;;  %1346 = vst [vmem:[#allocation3 + $0x3] sm:$0x1] %v1314_v10  ;;  %1412 = vmatmul.f32.vlgmr.msrb.gmra.mxu0 %v10980_v11  ;;  %v1321_v42 = vrot.slane %v1314_v10, 4 }
 0x337   : > { %v8918_v41 = vpop.eup %8917  ;;  %v1300_v56 = vsel %vm609_vm2, %v1299_v14, %v1298_v5  ;;  %3180 = vmatpush.msrb.mxu0 %v10845_v2  ;;  %v1322_v22 = vrot.slane %v1314_v10, 5  ;;  %v1304_v23 = vrot.slane %v8914_v7, 7  ;;  %v1323_v25 = vrot.slane %v1314_v10, 6  ;;  %v1372_v7 = vld [vmem:[%s10437_s0 + $0x80] sm:$0x4] }
 0x338   : > { %v8920_v8 = vpop.eup %8919  ;;  %1347 = vst [vmem:[#allocation3 + $0x23] sm:$0x1] %v1318_v16  ;;  %v1302_v24 = vsel %vm612_vm3, %v1301_v13, %v1300_v56  ;;  %v1306_v27 = vrot.slane %v8916_v15, 6  ;;  %v1324_v30 = vrot.slane %v1314_v10, 7  ;;  %v1308_v43 = vrot.slane %v8918_v41, 5 }
 0x339   : > { %1348 = vst [vmem:[#allocation3 + $0x43] sm:$0x1] %v1319_v17  ;;  %v1303_v26 = vsel %vm615_vm4, %v8904_v39, %v1302_v24  ;;  %3181 = vmatpush.msrb.mxu0 %v10849_v4  ;;  %v1310_v33 = vrot.slane %v8920_v8, 4  ;;  %v1373_v10 = vld [vmem:[%s10437_s0 + $0x90] sm:$0x4]  ;;  %v1388_v41 = vunpack.c.l.bf16 %v1372_v7 }
 0x33a   : > { %1349 = vst [vmem:[#allocation3 + $0x63] sm:$0x1] %v1320_v18  ;;  %v1305_v32 = vsel %vm618_vm5, %v1304_v23, %v1303_v26  ;;  %v1374_v15 = vld [vmem:[%s10437_s0 + $0xa0] sm:$0x4]  ;;  %v1375_v16 = vld [vmem:[%s10437_s0 + $0xb0] sm:$0x4] }
 0x33b   : > { %1350 = vst [vmem:[#allocation3 + $0x83] sm:$0x1] %v1321_v42  ;;  %v1307_v2 = vsel %vm621_vm6, %v1306_v27, %v1305_v32  ;;  %3182 = vmatpush.msrb.mxu0 %v10854_v9  ;;  %v1377_v17 = vld [vmem:[%s10437_s0 + $0xd0] sm:$0x4]  ;;  %v1389_v42 = vunpack.c.l.bf16 %v1373_v10  ;;  %v1378_v8 = vld [vmem:[%s10437_s0 + $0xe0] sm:$0x4]  ;;  %v1390_v24 = vunpack.c.l.bf16 %v1374_v15  ;;  %v1391_v23 = vunpack.c.l.bf16 %v1375_v16 }
 0x33c   : > { %1351 = vst [vmem:[#allocation3 + $0xa3] sm:$0x1] %v1322_v22  ;;  %v1309_v34 = vsel %vm624_vm7, %v1308_v43, %v1307_v2  ;;  %v1379_v43 = vld [vmem:[%s10437_s0 + $0xf0] sm:$0x4] }
 0x33d   : > { %1352 = vst [vmem:[#allocation3 + $0xc3] sm:$0x1] %v1323_v25  ;;  %v1311_v36 = vsel %vm627_vm8, %v1310_v33, %v1309_v34  ;;  %3183 = vmatpush.msrb.mxu0 %v10859_v12  ;;  %v1393_v25 = vunpack.c.l.bf16 %v1377_v17  ;;  %v1376_v33 = vld [vmem:[%s10437_s0 + $0xc0] sm:$0x4]  ;;  %v1394_v34 = vunpack.c.l.bf16 %v1378_v8 }
 0x33e   : > { %1353 = vst [vmem:[#allocation3 + $0xe3] sm:$0x1] %v1324_v30  ;;  %v1315_v4 = vsel %vm1267_vm0, %v1311_v36, 0.0  ;;  %v10995_v44 = vsel %vm1267_vm0, %v1311_v36, %v10941_v58 }
 0x33f   : > { %v1325_v38 = vrot.slane %v1315_v4, 1  ;;  %v1326_v40 = vrot.slane %v1315_v4, 2  ;;  %v1327_v46 = vrot.slane %v1315_v4, 3  ;;  %1354 = vst [vmem:[#allocation3 + $0x103] sm:$0x1] %v1315_v4  ;;  %1415 = vmatmul.f32.gmra.mxu0 %v10995_v44  ;;  %v1328_v9 = vrot.slane %v1315_v4, 4 }
 0x340   : > { %3184 = vmatpush.msrb.mxu0 %v10866_v19  ;;  %v1329_v47 = vrot.slane %v1315_v4, 5  ;;  %v1330_v49 = vrot.slane %v1315_v4, 6  ;;  %v1331_v12 = vrot.slane %v1315_v4, 7  ;;  %v1368_v19 = vld [vmem:[%s10437_s0 + $0x40] sm:$0x4] }
 0x341   : > { %1355 = vst [vmem:[#allocation3 + $0x123] sm:$0x1] %v1325_v38  ;;  %v1384_v58 = vunpack.c.l.bf16 %v1368_v19 }
 0x342   : > { %1356 = vst [vmem:[#allocation3 + $0x143] sm:$0x1] %v1326_v40  ;;  %3185 = vmatpush.msrb.mxu0 %v10869_v45  ;;  %v1364_v45 = vld [vmem:[%s10437_s0] sm:$0x4] }
 0x343   : > { %1357 = vst [vmem:[#allocation3 + $0x163] sm:$0x1] %v1327_v46 }
 0x344   : > { %1358 = vst [vmem:[#allocation3 + $0x183] sm:$0x1] %v1328_v9  ;;  %3186 = vmatpush.msrb.mxu0 %v10872_v62  ;;  %v1365_v62 = vld [vmem:[%s10437_s0 + $0x10] sm:$0x4] }
 0x345   : > { %1359 = vst [vmem:[#allocation3 + $0x1a3] sm:$0x1] %v1329_v47  ;;  %v1381_v51 = vunpack.c.l.bf16 %v1365_v62 }
 0x346   : > { %1360 = vst [vmem:[#allocation3 + $0x1c3] sm:$0x1] %v1330_v49  ;;  %3187 = vmatpush.msrb.mxu0 %v10875_v54  ;;  %v1366_v54 = vld [vmem:[%s10437_s0 + $0x20] sm:$0x4] }
 0x347   : > { %1361 = vst [vmem:[#allocation3 + $0x1e3] sm:$0x1] %v1331_v12  ;;  %v1382_v52 = vunpack.c.l.bf16 %v1366_v54  ;;  %v1395_v12 = vunpack.c.l.bf16 %v1379_v43  ;;  %v1392_v54 = vunpack.c.l.bf16 %v1376_v33  ;;  %v11046_v33 = vld [vmem:[#allocation7 + $0x68] sm:$0xff] }
 0x348   : > { %3188 = vmatpush.msrb.mxu0 %v10878_v48  ;;  %v1367_v48 = vld [vmem:[%s10437_s0 + $0x30] sm:$0x4] }
 0x34a   : > { %3189 = vmatpush.msrb.mxu0 %v10881_v63  ;;  %v1369_v63 = vld [vmem:[%s10437_s0 + $0x50] sm:$0x4] }
 0x34b   : > { %v1385_v20 = vunpack.c.l.bf16 %v1369_v63 }
 0x34c   : > { %3190 = vmatpush.msrb.mxu0 %v10884_v0  ;;  %v1380_v0 = vunpack.c.l.bf16 %v1364_v45 }
 0x34e   : > { %3191 = vmatpush.msrb.mxu0 %v10887_v37  ;;  %v1370_v37 = vld [vmem:[%s10437_s0 + $0x60] sm:$0x4] }
 0x34f   : > { %v1386_v35 = vunpack.c.l.bf16 %v1370_v37 }
 0x350   : > { %3192 = vmatpush.msrb.mxu0 %v10890_v31  ;;  %v1383_v31 = vunpack.c.l.bf16 %v1367_v48 }
 0x352   : > { %3193 = vmatpush.msrb.mxu0 %v10893_v29 }
 0x354   : > { %3194 = vmatpush.msrb.mxu0 %v10896_v1 }
 0x356   : > { %3195 = vmatpush.msrb.mxu0 %v10899_v3 }
 0x3b3   : > { %v1413_v39 = vpop.f32.mrf.mxu0 }
 0x3b4   : > { %v1421_v29 = vrot.slane %v1413_v39, 4  ;;  %v1422_v50 = vrot.slane %v1413_v39, 5  ;;  %v1423_v1 = vrot.slane %v1413_v39, 6  ;;  %v1424_v3 = vrot.slane %v1413_v39, 7 }
 0x3b5   : > { %v1455_v55 = vadd.f32 %v1413_v39, %v1384_v58  ;;  %v1425_v59 = vrot.slane %v1413_v39, 1  ;;  %v1426_v5 = vrot.slane %v1413_v39, 2  ;;  %v1427_v6 = vrot.slane %v1413_v39, 3 }
 0x3b6   : > { %v1451_v60 = vadd.f32 %v1421_v29, %v1380_v0  ;;  %v1452_v61 = vadd.f32 %v1422_v50, %v1381_v51  ;;  %v1453_v57 = vadd.f32 %v1423_v1, %v1382_v52  ;;  %v1454_v14 = vadd.f32 %v1424_v3, %v1383_v31  ;;  %v1485_v3 = vpop.permute.xlu2 %1484 }
 0x3b7   : > { %8921 = vtanh.f32 %v1455_v55  ;;  %v1456_v13 = vadd.f32 %v1425_v59, %v1385_v20  ;;  %v1457_v18 = vadd.f32 %v1426_v5, %v1386_v35  ;;  %v1458_v56 = vadd.f32 %v1427_v6, %v1387_v21 }
 0x3b8   : > { %8923 = vtanh.f32 %v1451_v60  ;;  %vm1489_vm1 = vcmp.eq.s32.totalorder %v1485_v3, 1  ;;  %v11093_v3 = vld [vmem:[#allocation7] sm:$0xff] }
 0x3b9   : > { %8925 = vtanh.f32 %v1452_v61 }
 0x3ba   : > { %8927 = vtanh.f32 %v1453_v57 }
 0x3bb   : > { %8929 = vtanh.f32 %v1454_v14 }
 0x3bc   : > { %v1416_v22 = vpop.f32.mrf.mxu0  ;;  %8931 = vtanh.f32 %v1456_v13 }
 0x3bd   : > { %v8922_v26 = vpop.eup %8921  ;;  %v1428_v27 = vrot.slane %v1416_v22, 4  ;;  %v1429_v28 = vrot.slane %v1416_v22, 5  ;;  %v1430_v30 = vrot.slane %v1416_v22, 6  ;;  %v1431_v32 = vrot.slane %v1416_v22, 7 }
 0x3be   : > { %v8924_v2 = vpop.eup %8923  ;;  %8933 = vtanh.f32 %v1457_v18  ;;  %v1432_v36 = vrot.slane %v1416_v22, 1  ;;  %v1433_v4 = vrot.slane %v1416_v22, 2  ;;  %v1434_v19 = vrot.slane %v1416_v22, 3 }
 0x3bf   : > { %v8926_v38 = vpop.eup %8925  ;;  %v1459_v40 = vadd.f32 %v1428_v27, %v1388_v41  ;;  %v1460_v46 = vadd.f32 %v1429_v28, %v1389_v42  ;;  %8935 = vtanh.f32 %v1458_v56  ;;  %v1507_v9 = vrot.slane %v8924_v2, 4  ;;  %v11038_v56 = vld [vmem:[#allocation7 + $0x78] sm:$0xff] }
 0x3c0   : > { %v8928_v47 = vpop.eup %8927  ;;  %v1508_v49 = vrot.slane %v8926_v38, 3  ;;  %v1461_v45 = vadd.f32 %v1430_v30, %v1390_v24  ;;  %v1462_v63 = vadd.f32 %v1431_v32, %v1391_v23  ;;  %v1464_v52 = vadd.f32 %v1432_v36, %v1393_v25 }
 0x3c1   : > { %v8930_v62 = vpop.eup %8929  ;;  %8937 = vtanh.f32 %v1459_v40  ;;  %v1510_v48 = vrot.slane %v8928_v47, 2  ;;  %v1465_v39 = vadd.f32 %v1433_v4, %v1394_v34  ;;  %v1466_v50 = vadd.f32 %v1434_v19, %v1395_v12  ;;  %v1488_v34 = vpop.permute.xlu0 %1487 }
 0x3c2   : > { %v8932_v58 = vpop.eup %8931  ;;  %8939 = vtanh.f32 %v1460_v46  ;;  %v1509_v0 = vsel %vm609_vm2, %v1508_v49, %v1507_v9  ;;  %v1512_v51 = vrot.slane %v8930_v62, 1  ;;  %v1463_v53 = vadd.f32 %v1416_v22, %v1392_v54  ;;  %v11051_v46 = vld [vmem:[#allocation7 + $0x60] sm:$0xff]  ;;  %v11056_v49 = vld [vmem:[#allocation7 + $0x58] sm:$0xff] }
 0x3c3   : > { %v1511_v37 = vsel %vm612_vm3, %v1510_v48, %v1509_v0  ;;  %8941 = vtanh.f32 %v1461_v45  ;;  %v1515_v29 = vrot.slane %v8932_v58, 7  ;;  %vm1490_vm9 = vcmp.eq.s32.totalorder %v1488_v34, 1  ;;  %v1596_v34 = vld [vmem:[%s10437_s0 + $0x90] sm:$0x4] }
 0x3c4   : > { %v8934_v31 = vpop.eup %8933  ;;  %v1513_v20 = vsel %vm615_vm4, %v1512_v51, %v1511_v37  ;;  %8943 = vtanh.f32 %v1462_v63  ;;  %v11063_v63 = vld [vmem:[#allocation7 + $0x50] sm:$0xff]  ;;  %v11066_v51 = vld [vmem:[#allocation7 + $0x48] sm:$0xff]  ;;  %v11072_v37 = vld [vmem:[#allocation7 + $0x38] sm:$0xff] }
 0x3c5   : > { %v8936_v1 = vpop.eup %8935  ;;  %v1514_v55 = vsel %vm618_vm5, %v8922_v26, %v1513_v20  ;;  %v1517_v35 = vrot.slane %v8934_v31, 6  ;;  %8945 = vtanh.f32 %v1464_v52  ;;  %v11041_v26 = vld [vmem:[#allocation7 + $0x70] sm:$0xff]  ;;  %v11069_v52 = vld [vmem:[#allocation7 + $0x40] sm:$0xff]  ;;  %v11078_v31 = vld [vmem:[#allocation7 + $0x28] sm:$0xff] }
 0x3c6   : > { %v1516_v59 = vsel %vm621_vm6, %v1515_v29, %v1514_v55  ;;  %v1519_v60 = vrot.slane %v8936_v1, 5  ;;  %8947 = vtanh.f32 %v1465_v39  ;;  %v11075_v39 = vld [vmem:[#allocation7 + $0x30] sm:$0xff]  ;;  %v11081_v20 = vld [vmem:[#allocation7 + $0x20] sm:$0xff]  ;;  %v11084_v29 = vld [vmem:[#allocation7 + $0x18] sm:$0xff] }
 0x3c7   : > { %v8938_v61 = vpop.eup %8937  ;;  %v1518_v57 = vsel %vm624_vm7, %v1517_v35, %v1516_v59  ;;  %8949 = vtanh.f32 %v1466_v50  ;;  %v11087_v50 = vld [vmem:[#allocation7 + $0x10] sm:$0xff]  ;;  %v11090_v1 = vld [vmem:[#allocation7 + $0x8] sm:$0xff]  ;;  %v1589_v35 = vld [vmem:[%s10437_s0 + $0x20] sm:$0x4] }
 0x3c8   : > { %v8940_v5 = vpop.eup %8939  ;;  %v1520_v21 = vsel %vm627_vm8, %v1519_v60, %v1518_v57  ;;  %v1521_v6 = vrot.slane %v8938_v61, 4  ;;  %8951 = vtanh.f32 %v1463_v53  ;;  %v1587_v53 = vld [vmem:[%s10437_s0] sm:$0x4]  ;;  %v1588_v55 = vld [vmem:[%s10437_s0 + $0x10] sm:$0x4] }
 0x3c9   : > { %v8942_v14 = vpop.eup %8941  ;;  %v1537_v7 = vsel %vm1489_vm1, %v1520_v21, 0.0  ;;  %v11034_v10 = vsel %vm1489_vm1, %v1520_v21, %v10980_v11  ;;  %v1522_v13 = vrot.slane %v8940_v5, 3  ;;  %v1590_v59 = vld [vmem:[%s10437_s0 + $0x30] sm:$0x4]  ;;  %v1591_v60 = vld [vmem:[%s10437_s0 + $0x40] sm:$0x4]  ;;  %v1603_v61 = vunpack.c.l.bf16 %v1587_v53 }
 0x3ca   : > { %v8944_v15 = vpop.eup %8943  ;;  %v1541_v16 = vrot.slane %v1537_v7, 1  ;;  %v1542_v17 = vrot.slane %v1537_v7, 2  ;;  %v1543_v18 = vrot.slane %v1537_v7, 3  ;;  %1569 = vst [vmem:[#allocation3 + $0x4] sm:$0x1] %v1537_v7  ;;  %1635 = vmatmul.f32.vlgmr.msrb.gmra.mxu1 %v11034_v10  ;;  %v1544_v41 = vrot.slane %v1537_v7, 4 }
 0x3cb   : > { %v1523_v42 = vsel %vm609_vm2, %v1522_v13, %v1521_v6  ;;  %3403 = vmatpush.msrb.mxu1 %v11038_v56  ;;  %v8946_v8 = vpop.eup %8945  ;;  %v1545_v22 = vrot.slane %v1537_v7, 5  ;;  %v1524_v11 = vrot.slane %v8942_v14, 2  ;;  %v1546_v23 = vrot.slane %v1537_v7, 6  ;;  %v1593_v21 = vld [vmem:[%s10437_s0 + $0x60] sm:$0x4] }
 0x3cc   : > { %1570 = vst [vmem:[#allocation3 + $0x24] sm:$0x1] %v1541_v16  ;;  %v8948_v24 = vpop.eup %8947  ;;  %v1526_v25 = vrot.slane %v8944_v15, 1  ;;  %v1547_v28 = vrot.slane %v1537_v7, 7  ;;  %v1529_v2 = vrot.slane %v8946_v8, 7  ;;  %v1604_v57 = vunpack.c.l.bf16 %v1588_v55 }
 0x3cd   : > { %1571 = vst [vmem:[#allocation3 + $0x44] sm:$0x1] %v1542_v17  ;;  %3404 = vmatpush.msrb.mxu1 %v11041_v26  ;;  %v8950_v27 = vpop.eup %8949  ;;  %v1525_v30 = vsel %vm612_vm3, %v1524_v11, %v1523_v42  ;;  %v1531_v4 = vrot.slane %v8948_v24, 6  ;;  %v1605_v5 = vunpack.c.l.bf16 %v1589_v35  ;;  %v1594_v6 = vld [vmem:[%s10437_s0 + $0x70] sm:$0x4]  ;;  %v1606_v7 = vunpack.c.l.bf16 %v1590_v59 }
 0x3ce   : > { %1572 = vst [vmem:[#allocation3 + $0x64] sm:$0x1] %v1543_v18  ;;  %v8952_v32 = vpop.eup %8951  ;;  %v1527_v43 = vsel %vm615_vm4, %v1526_v25, %v1525_v30  ;;  %v1533_v40 = vrot.slane %v8950_v27, 5  ;;  %v1607_v13 = vunpack.c.l.bf16 %v1591_v60  ;;  %v1592_v15 = vld [vmem:[%s10437_s0 + $0x50] sm:$0x4]  ;;  %v1609_v42 = vunpack.c.l.bf16 %v1593_v21 }
 0x3cf   : > { %1573 = vst [vmem:[#allocation3 + $0x84] sm:$0x1] %v1544_v41  ;;  %3405 = vmatpush.msrb.mxu1 %v11046_v33  ;;  %v1528_v36 = vsel %vm618_vm5, %v8952_v32, %v1527_v43  ;;  %v1610_v8 = vunpack.c.l.bf16 %v1594_v6  ;;  %v1595_v43 = vld [vmem:[%s10437_s0 + $0x80] sm:$0x4] }
 0x3d0   : > { %1574 = vst [vmem:[#allocation3 + $0xa4] sm:$0x1] %v1545_v22  ;;  %v1530_v38 = vsel %vm621_vm6, %v1529_v2, %v1528_v36  ;;  %v1600_v36 = vld [vmem:[%s10437_s0 + $0xd0] sm:$0x4] }
 0x3d1   : > { %1575 = vst [vmem:[#allocation3 + $0xc4] sm:$0x1] %v1546_v23  ;;  %3406 = vmatpush.msrb.mxu1 %v11051_v46  ;;  %v1532_v9 = vsel %vm624_vm7, %v1531_v4, %v1530_v38  ;;  %v1597_v38 = vld [vmem:[%s10437_s0 + $0xa0] sm:$0x4] }
 0x3d2   : > { %1576 = vst [vmem:[#allocation3 + $0xe4] sm:$0x1] %v1547_v28  ;;  %v1534_v47 = vsel %vm627_vm8, %v1533_v40, %v1532_v9  ;;  %v1608_v28 = vunpack.c.l.bf16 %v1592_v15  ;;  %v1598_v9 = vld [vmem:[%s10437_s0 + $0xb0] sm:$0x4] }
 0x3d3   : > { %3407 = vmatpush.msrb.mxu1 %v11056_v49  ;;  %v1538_v12 = vsel %vm1490_vm9, %v1534_v47, 0.0  ;;  %v11060_v19 = vsel %vm1490_vm9, %v1534_v47, %v10995_v44  ;;  %v1599_v47 = vld [vmem:[%s10437_s0 + $0xc0] sm:$0x4] }
 0x3d4   : > { %v1548_v45 = vrot.slane %v1538_v12, 1  ;;  %v1549_v62 = vrot.slane %v1538_v12, 2  ;;  %v1550_v54 = vrot.slane %v1538_v12, 3  ;;  %1577 = vst [vmem:[#allocation3 + $0x104] sm:$0x1] %v1538_v12  ;;  %1638 = vmatmul.f32.gmra.mxu1 %v11060_v19  ;;  %v1551_v48 = vrot.slane %v1538_v12, 4 }
 0x3d5   : > { %3408 = vmatpush.msrb.mxu1 %v11063_v63  ;;  %v1552_v58 = vrot.slane %v1538_v12, 5  ;;  %v1553_v0 = vrot.slane %v1538_v12, 6  ;;  %v1554_v44 = vrot.slane %v1538_v12, 7  ;;  %v1601_v12 = vld [vmem:[%s10437_s0 + $0xe0] sm:$0x4]  ;;  %v1615_v53 = vunpack.c.l.bf16 %v1599_v47 }
 0x3d6   : > { %1578 = vst [vmem:[#allocation3 + $0x124] sm:$0x1] %v1548_v45  ;;  %v1611_v45 = vunpack.c.l.bf16 %v1595_v43  ;;  %v1617_v55 = vunpack.c.l.bf16 %v1601_v12 }
 0x3d7   : > { %1579 = vst [vmem:[#allocation3 + $0x144] sm:$0x1] %v1549_v62  ;;  %3409 = vmatpush.msrb.mxu1 %v11066_v51  ;;  %v1612_v62 = vunpack.c.l.bf16 %v1596_v34 }
 0x3d8   : > { %1580 = vst [vmem:[#allocation3 + $0x164] sm:$0x1] %v1550_v54  ;;  %v1616_v54 = vunpack.c.l.bf16 %v1600_v36 }
 0x3d9   : > { %1581 = vst [vmem:[#allocation3 + $0x184] sm:$0x1] %v1551_v48  ;;  %3410 = vmatpush.msrb.mxu1 %v11069_v52  ;;  %v1613_v48 = vunpack.c.l.bf16 %v1597_v38 }
 0x3da   : > { %1582 = vst [vmem:[#allocation3 + $0x1a4] sm:$0x1] %v1552_v58 }
 0x3db   : > { %1583 = vst [vmem:[#allocation3 + $0x1c4] sm:$0x1] %v1553_v0  ;;  %3411 = vmatpush.msrb.mxu1 %v11072_v37 }
 0x3dc   : > { %1584 = vst [vmem:[#allocation3 + $0x1e4] sm:$0x1] %v1554_v44  ;;  %v1614_v44 = vunpack.c.l.bf16 %v1598_v9 }
 0x3dd   : > { %3412 = vmatpush.msrb.mxu1 %v11075_v39 }
 0x3df   : > { %3413 = vmatpush.msrb.mxu1 %v11078_v31 }
 0x3e1   : > { %3414 = vmatpush.msrb.mxu1 %v11081_v20 }
 0x3e3   : > { %3415 = vmatpush.msrb.mxu1 %v11084_v29 }
 0x3e5   : > { %3416 = vmatpush.msrb.mxu1 %v11087_v50 }
 0x3e7   : > { %3417 = vmatpush.msrb.mxu1 %v11090_v1 }
 0x3e9   : > { %3418 = vmatpush.msrb.mxu1 %v11093_v3 }
 0x447   : > { %v1636_v14 = vpop.f32.mrf.mxu1 }
 0x448   : > { %v1644_v16 = vrot.slane %v1636_v14, 3  ;;  %v1645_v17 = vrot.slane %v1636_v14, 4  ;;  %v1646_v18 = vrot.slane %v1636_v14, 5  ;;  %v1647_v41 = vrot.slane %v1636_v14, 6 }
 0x449   : > { %v1648_v22 = vrot.slane %v1636_v14, 7  ;;  %v1649_v11 = vrot.slane %v1636_v14, 1  ;;  %v1650_v27 = vrot.slane %v1636_v14, 2  ;;  %v1679_v40 = vadd.f32 %v1636_v14, %v1608_v28 }
 0x44a   : > { %v1674_v24 = vadd.f32 %v1644_v16, %v1603_v61  ;;  %v1675_v23 = vadd.f32 %v1645_v17, %v1604_v57  ;;  %v1676_v25 = vadd.f32 %v1646_v18, %v1605_v5  ;;  %v1677_v30 = vadd.f32 %v1647_v41, %v1606_v7  ;;  %v1602_v57 = vld [vmem:[%s10437_s0 + $0xf0] sm:$0x4] }
 0x44b   : > { %v1678_v32 = vadd.f32 %v1648_v22, %v1607_v13  ;;  %v1680_v2 = vadd.f32 %v1649_v11, %v1609_v42  ;;  %v1681_v4 = vadd.f32 %v1650_v27, %v1610_v8  ;;  %v1618_v22 = vunpack.c.l.bf16 %v1602_v57 }
 0x44c   : > { %8953 = vtanh.f32 %v1674_v24 }
 0x44d   : > { %8955 = vtanh.f32 %v1675_v23 }
 0x44e   : > { %8957 = vtanh.f32 %v1676_v25 }
 0x44f   : > { %8959 = vtanh.f32 %v1677_v30 }
 0x450   : > { %8961 = vtanh.f32 %v1678_v32 }
 0x451   : > { %8963 = vtanh.f32 %v1680_v2  ;;  %v1639_v0 = vpop.f32.mrf.mxu1  ;;  %v1708_v2 = vpop.permute.xlu1 %1707 }
 0x452   : > { %v8954_v58 = vpop.eup %8953  ;;  %8965 = vtanh.f32 %v1681_v4  ;;  %v1651_v59 = vrot.slane %v1639_v0, 3  ;;  %v1652_v60 = vrot.slane %v1639_v0, 4  ;;  %v1653_v61 = vrot.slane %v1639_v0, 5 }
 0x453   : > { %v8956_v35 = vpop.eup %8955  ;;  %8967 = vtanh.f32 %v1679_v40  ;;  %v1654_v21 = vrot.slane %v1639_v0, 6  ;;  %v1730_v6 = vrot.slane %v8954_v58, 5  ;;  %v1655_v7 = vrot.slane %v1639_v0, 7 }
 0x454   : > { %v8958_v5 = vpop.eup %8957  ;;  %v1731_v14 = vrot.slane %v8956_v35, 4  ;;  %v1682_v15 = vadd.f32 %v1651_v59, %v1611_v45  ;;  %v1683_v16 = vadd.f32 %v1652_v60, %v1612_v62  ;;  %v1656_v18 = vrot.slane %v1639_v0, 1 }
 0x455   : > { %v8960_v13 = vpop.eup %8959  ;;  %v1733_v17 = vrot.slane %v8958_v5, 3  ;;  %v1657_v11 = vrot.slane %v1639_v0, 2  ;;  %v1684_v27 = vadd.f32 %v1653_v61, %v1613_v48  ;;  %v1685_v32 = vadd.f32 %v1654_v21, %v1614_v44 }
 0x456   : > { %v8962_v41 = vpop.eup %8961  ;;  %v1732_v42 = vsel %vm609_vm2, %v1731_v14, %v1730_v6  ;;  %v1735_v8 = vrot.slane %v8960_v13, 2  ;;  %8969 = vtanh.f32 %v1682_v15  ;;  %v1686_v4 = vadd.f32 %v1655_v7, %v1615_v53 }
 0x457   : > { %v8964_v24 = vpop.eup %8963  ;;  %v1734_v23 = vsel %vm612_vm3, %v1733_v17, %v1732_v42  ;;  %v1737_v25 = vrot.slane %v8962_v41, 1  ;;  %8971 = vtanh.f32 %v1683_v16  ;;  %v1688_v38 = vadd.f32 %v1656_v18, %v1617_v55 }
 0x458   : > { %v8966_v28 = vpop.eup %8965  ;;  %v1736_v30 = vsel %vm615_vm4, %v1735_v8, %v1734_v23  ;;  %v1740_v36 = vrot.slane %v8964_v24, 7  ;;  %v1687_v40 = vadd.f32 %v1639_v0, %v1616_v54  ;;  %8973 = vtanh.f32 %v1684_v27  ;;  %v1711_v8 = vpop.permute.xlu2 %1710 }
 0x459   : > { %v8968_v43 = vpop.eup %8967  ;;  %v1738_v34 = vsel %vm618_vm5, %v1737_v25, %v1736_v30  ;;  %v1742_v47 = vrot.slane %v8966_v28, 6  ;;  %v1689_v45 = vadd.f32 %v1657_v11, %v1618_v22  ;;  %8975 = vtanh.f32 %v1685_v32 }
 0x45a   : > { %v1739_v9 = vsel %vm621_vm6, %v8968_v43, %v1738_v34  ;;  %vm1712_vm10 = vcmp.eq.s32.totalorder %v1708_v2, 1  ;;  %8977 = vtanh.f32 %v1686_v4  ;;  %vm1713_vm11 = vcmp.eq.s32.totalorder %v1711_v8, 1  ;;  %v1818_v8 = vld [vmem:[%s10437_s0 + $0x80] sm:$0x8] }
 0x45b   : > { %v1741_v12 = vsel %vm624_vm7, %v1740_v36, %v1739_v9  ;;  %8979 = vtanh.f32 %v1688_v38  ;;  %v1810_v38 = vld [vmem:[%s10437_s0] sm:$0x8] }
 0x45c   : > { %v1743_v62 = vsel %vm627_vm8, %v1742_v47, %v1741_v12  ;;  %v8970_v48 = vpop.eup %8969  ;;  %8981 = vtanh.f32 %v1687_v40  ;;  %v1811_v40 = vld [vmem:[%s10437_s0 + $0x10] sm:$0x8]  ;;  %v1812_v9 = vld [vmem:[%s10437_s0 + $0x20] sm:$0x8] }
 0x45d   : > { %v1760_v58 = vsel %vm1712_vm10, %v1743_v62, 0.0  ;;  %v11120_v44 = vsel %vm1712_vm10, %v1743_v62, %v11034_v10  ;;  %v8972_v53 = vpop.eup %8971  ;;  %8983 = vtanh.f32 %v1689_v45  ;;  %v1744_v61 = vrot.slane %v8970_v48, 5  ;;  %v1813_v47 = vld [vmem:[%s10437_s0 + $0x30] sm:$0x8]  ;;  %v1814_v12 = vld [vmem:[%s10437_s0 + $0x40] sm:$0x8] }
 0x45e   : > { %v1764_v54 = vrot.slane %v1760_v58, 1  ;;  %v1765_v0 = vrot.slane %v1760_v58, 2  ;;  %v1766_v55 = vrot.slane %v1760_v58, 3  ;;  %1792 = vst [vmem:[#allocation3 + $0x5] sm:$0x1] %v1760_v58  ;;  %1858 = vmatmul.f32.vlgmr.msrb.gmra.mxu2 %v11120_v44  ;;  %v1767_v35 = vrot.slane %v1760_v58, 4  ;;  %v8974_v59 = vpop.eup %8973 }
 0x45f   : > { %3626 = vmatpush.msrb.mxu2 %v11038_v56  ;;  %v1768_v60 = vrot.slane %v1760_v58, 5  ;;  %v1745_v57 = vrot.slane %v8972_v53, 4  ;;  %v8976_v10 = vpop.eup %8975  ;;  %v1769_v5 = vrot.slane %v1760_v58, 6  ;;  %v1747_v21 = vrot.slane %v8974_v59, 3  ;;  %v1817_v53 = vld [vmem:[%s10437_s0 + $0x70] sm:$0x8] }
 0x460   : > { %1793 = vst [vmem:[#allocation3 + $0x25] sm:$0x1] %v1764_v54  ;;  %v8978_v6 = vpop.eup %8977  ;;  %v1770_v14 = vrot.slane %v1760_v58, 7  ;;  %v1749_v13 = vrot.slane %v8976_v10, 2  ;;  %v1826_v45 = vunpack.c.l.bf16 %v1810_v38  ;;  %v1827_v62 = vunpack.c.l.bf16 %v1811_v40  ;;  %v1815_v58 = vld [vmem:[%s10437_s0 + $0x50] sm:$0x8] }
 0x461   : > { %1794 = vst [vmem:[#allocation3 + $0x45] sm:$0x1] %v1765_v0  ;;  %3627 = vmatpush.msrb.mxu2 %v11041_v26  ;;  %v1746_v7 = vsel %vm609_vm2, %v1745_v57, %v1744_v61  ;;  %v8980_v15 = vpop.eup %8979  ;;  %v1751_v17 = vrot.slane %v8978_v6, 1  ;;  %v1828_v48 = vunpack.c.l.bf16 %v1812_v9  ;;  %v1829_v0 = vunpack.c.l.bf16 %v1813_v47  ;;  %v1816_v6 = vld [vmem:[%s10437_s0 + $0x60] sm:$0x8] }
 0x462   : > { %1795 = vst [vmem:[#allocation3 + $0x65] sm:$0x1] %v1766_v55  ;;  %v1748_v16 = vsel %vm612_vm3, %v1747_v21, %v1746_v7  ;;  %v8982_v18 = vpop.eup %8981  ;;  %v1754_v11 = vrot.slane %v8980_v15, 7  ;;  %v1830_v55 = vunpack.c.l.bf16 %v1814_v12  ;;  %v1831_v57 = vunpack.c.l.bf16 %v1815_v58 }
 0x463   : > { %1796 = vst [vmem:[#allocation3 + $0x85] sm:$0x1] %v1767_v35  ;;  %3628 = vmatpush.msrb.mxu2 %v11046_v33  ;;  %v1750_v41 = vsel %vm615_vm4, %v1749_v13, %v1748_v16  ;;  %v8984_v42 = vpop.eup %8983  ;;  %v1833_v10 = vunpack.c.l.bf16 %v1817_v53 }
 0x464   : > { %1797 = vst [vmem:[#allocation3 + $0xa5] sm:$0x1] %v1768_v60  ;;  %v1752_v22 = vsel %vm618_vm5, %v1751_v17, %v1750_v41  ;;  %v1756_v23 = vrot.slane %v8984_v42, 6 }
 0x465   : > { %1798 = vst [vmem:[#allocation3 + $0xc5] sm:$0x1] %v1769_v5  ;;  %3629 = vmatpush.msrb.mxu2 %v11051_v46  ;;  %v1753_v24 = vsel %vm621_vm6, %v8982_v18, %v1752_v22  ;;  %v1832_v18 = vunpack.c.l.bf16 %v1816_v6  ;;  %v1819_v22 = vld [vmem:[%s10437_s0 + $0x90] sm:$0x8] }
 0x466   : > { %1799 = vst [vmem:[#allocation3 + $0xe5] sm:$0x1] %v1770_v14  ;;  %v1755_v25 = vsel %vm624_vm7, %v1754_v11, %v1753_v24  ;;  %v11161_v11 = vld [vmem:[%s10437_s0 + $0xe0] sm:$0x8] }
 0x467   : > { %3630 = vmatpush.msrb.mxu2 %v11056_v49  ;;  %v1757_v27 = vsel %vm627_vm8, %v1756_v23, %v1755_v25  ;;  %v1820_v24 = vld [vmem:[%s10437_s0 + $0xa0] sm:$0x8]  ;;  %v1821_v23 = vld [vmem:[%s10437_s0 + $0xb0] sm:$0x8] }
 0x468   : > { %v1761_v28 = vsel %vm1713_vm11, %v1757_v27, 0.0  ;;  %v11136_v30 = vsel %vm1713_vm11, %v1757_v27, %v11060_v19  ;;  %v1822_v25 = vld [vmem:[%s10437_s0 + $0xc0] sm:$0x8]  ;;  %v1836_v38 = vunpack.c.l.bf16 %v1820_v24  ;;  %v1837_v40 = vunpack.c.l.bf16 %v1821_v23 }
 0x469   : > { %3631 = vmatpush.msrb.mxu2 %v11063_v63  ;;  %v1771_v32 = vrot.slane %v1761_v28, 1  ;;  %v1772_v43 = vrot.slane %v1761_v28, 2  ;;  %v1773_v2 = vrot.slane %v1761_v28, 3  ;;  %1800 = vst [vmem:[#allocation3 + $0x105] sm:$0x1] %v1761_v28  ;;  %v1774_v34 = vrot.slane %v1761_v28, 4 }
 0x46a   : > { %1861 = vmatmul.f32.gmra.mxu2 %v11136_v30  ;;  %v1775_v36 = vrot.slane %v1761_v28, 5  ;;  %v1776_v4 = vrot.slane %v1761_v28, 6  ;;  %v1777_v19 = vrot.slane %v1761_v28, 7  ;;  %v1823_v28 = vld [vmem:[%s10437_s0 + $0xd0] sm:$0x8]  ;;  %v1838_v9 = vunpack.c.l.bf16 %v1822_v25 }
 0x46b   : > { %3632 = vmatpush.msrb.mxu2 %v11066_v51  ;;  %1801 = vst [vmem:[#allocation3 + $0x125] sm:$0x1] %v1771_v32  ;;  %v1839_v58 = vunpack.c.l.bf16 %v1823_v28 }
 0x46c   : > { %1802 = vst [vmem:[#allocation3 + $0x145] sm:$0x1] %v1772_v43  ;;  %v1834_v43 = vunpack.c.l.bf16 %v1818_v8 }
 0x46d   : > { %3633 = vmatpush.msrb.mxu2 %v11069_v52  ;;  %1803 = vst [vmem:[#allocation3 + $0x165] sm:$0x1] %v1773_v2  ;;  %v1835_v2 = vunpack.c.l.bf16 %v1819_v22 }
 0x46e   : > { %1804 = vst [vmem:[#allocation3 + $0x185] sm:$0x1] %v1774_v34  ;;  %v1840_v34 = vunpack.c.l.bf16 %v11161_v11 }
 0x46f   : > { %3634 = vmatpush.msrb.mxu2 %v11072_v37  ;;  %1805 = vst [vmem:[#allocation3 + $0x1a5] sm:$0x1] %v1775_v36 }
 0x470   : > { %1806 = vst [vmem:[#allocation3 + $0x1c5] sm:$0x1] %v1776_v4 }
 0x471   : > { %3635 = vmatpush.msrb.mxu2 %v11075_v39  ;;  %1807 = vst [vmem:[#allocation3 + $0x1e5] sm:$0x1] %v1777_v19 }
 0x473   : > { %3636 = vmatpush.msrb.mxu2 %v11078_v31 }
 0x475   : > { %3637 = vmatpush.msrb.mxu2 %v11081_v20 }
 0x477   : > { %3638 = vmatpush.msrb.mxu2 %v11084_v29 }
 0x479   : > { %3639 = vmatpush.msrb.mxu2 %v11087_v50 }
 0x47b   : > { %3640 = vmatpush.msrb.mxu2 %v11090_v1 }
 0x47d   : > { %3641 = vmatpush.msrb.mxu2 %v11093_v3 }
 0x4e1   : > { %v1859_v54 = vpop.f32.mrf.mxu2 }
 0x4e2   : > { %v1867_v35 = vrot.slane %v1859_v54, 2  ;;  %v1868_v59 = vrot.slane %v1859_v54, 3  ;;  %v1869_v60 = vrot.slane %v1859_v54, 4  ;;  %v1870_v61 = vrot.slane %v1859_v54, 5 }
 0x4e3   : > { %v1871_v5 = vrot.slane %v1859_v54, 6  ;;  %v1872_v21 = vrot.slane %v1859_v54, 7  ;;  %v1873_v15 = vrot.slane %v1859_v54, 1  ;;  %v1903_v27 = vadd.f32 %v1859_v54, %v1832_v18 }
 0x4e4   : > { %v1897_v14 = vadd.f32 %v1867_v35, %v1826_v45  ;;  %v1898_v7 = vadd.f32 %v1868_v59, %v1827_v62  ;;  %v1899_v13 = vadd.f32 %v1869_v60, %v1828_v48  ;;  %v1900_v16 = vadd.f32 %v1870_v61, %v1829_v0  ;;  %v1825_v48 = vld [vmem:[%s10437_s0 + $0xf0] sm:$0x8] }
 0x4e5   : > { %v1901_v17 = vadd.f32 %v1871_v5, %v1830_v55  ;;  %v1902_v41 = vadd.f32 %v1872_v21, %v1831_v57  ;;  %v1904_v42 = vadd.f32 %v1873_v15, %v1833_v10 }
 0x4e6   : > { %8985 = vtanh.f32 %v1897_v14  ;;  %v1841_v14 = vunpack.c.l.bf16 %v1825_v48 }
 0x4e7   : > { %8987 = vtanh.f32 %v1898_v7 }
 0x4e8   : > { %8989 = vtanh.f32 %v1899_v13 }
 0x4e9   : > { %8991 = vtanh.f32 %v1900_v16 }
 0x4ea   : > { %8993 = vtanh.f32 %v1901_v17 }
 0x4eb   : > { %8995 = vtanh.f32 %v1902_v41 }
 0x4ec   : > { %v8986_v32 = vpop.eup %8985  ;;  %8997 = vtanh.f32 %v1904_v42  ;;  %v1931_v42 = vpop.permute.xlu1 %1930 }
 0x4ed   : > { %v8988_v36 = vpop.eup %8987  ;;  %v1862_v4 = vpop.f32.mrf.mxu2  ;;  %v1953_v19 = vrot.slane %v8986_v32, 6  ;;  %8999 = vtanh.f32 %v1903_v27  ;;  %vm1935_vm12 = vcmp.eq.s32.totalorder %v1931_v42, 1 }
 0x4ee   : > { %v8990_v47 = vpop.eup %8989  ;;  %v1874_v12 = vrot.slane %v1862_v4, 2  ;;  %v1875_v45 = vrot.slane %v1862_v4, 3  ;;  %v1876_v62 = vrot.slane %v1862_v4, 4  ;;  %v1877_v54 = vrot.slane %v1862_v4, 5 }
 0x4ef   : > { %v8992_v53 = vpop.eup %8991  ;;  %v1954_v0 = vrot.slane %v8988_v36, 5  ;;  %v1956_v55 = vrot.slane %v8990_v47, 4  ;;  %v1878_v61 = vrot.slane %v1862_v4, 6  ;;  %v1879_v57 = vrot.slane %v1862_v4, 7 }
 0x4f0   : > { %v8994_v35 = vpop.eup %8993  ;;  %v1905_v59 = vadd.f32 %v1874_v12, %v1834_v43  ;;  %v1906_v60 = vadd.f32 %v1875_v45, %v1835_v2  ;;  %v1958_v21 = vrot.slane %v8992_v53, 3  ;;  %v1880_v15 = vrot.slane %v1862_v4, 1 }
 0x4f1   : > { %v8996_v10 = vpop.eup %8995  ;;  %v1955_v5 = vsel %vm609_vm2, %v1954_v0, %v1953_v19  ;;  %v1960_v6 = vrot.slane %v8994_v35, 2  ;;  %v1907_v16 = vadd.f32 %v1876_v62, %v1836_v38  ;;  %v1908_v41 = vadd.f32 %v1877_v54, %v1837_v40 }
 0x4f2   : > { %v8998_v7 = vpop.eup %8997  ;;  %9001 = vtanh.f32 %v1905_v59  ;;  %v1957_v13 = vsel %vm612_vm3, %v1956_v55, %v1955_v5  ;;  %v1962_v18 = vrot.slane %v8996_v10, 1  ;;  %v1909_v22 = vadd.f32 %v1878_v61, %v1838_v9  ;;  %v1934_v10 = vpop.permute.xlu2 %1933 }
 0x4f3   : > { %9003 = vtanh.f32 %v1906_v60  ;;  %v1959_v17 = vsel %vm615_vm4, %v1958_v21, %v1957_v13  ;;  %v1910_v11 = vadd.f32 %v1879_v57, %v1839_v58  ;;  %v9000_v24 = vpop.eup %8999  ;;  %v1965_v25 = vrot.slane %v8998_v7, 7 }
 0x4f4   : > { %v1961_v8 = vsel %vm618_vm5, %v1960_v6, %v1959_v17  ;;  %9005 = vtanh.f32 %v1907_v16  ;;  %v1912_v28 = vadd.f32 %v1880_v15, %v1841_v14  ;;  %v1911_v32 = vadd.f32 %v1862_v4, %v1840_v34 }
 0x4f5   : > { %v1963_v23 = vsel %vm621_vm6, %v1962_v18, %v1961_v8  ;;  %9007 = vtanh.f32 %v1908_v41  ;;  %vm1936_vm13 = vcmp.eq.s32.totalorder %v1934_v10, 1 }
 0x4f6   : > { %v1964_v27 = vsel %vm624_vm7, %v9000_v24, %v1963_v23  ;;  %9009 = vtanh.f32 %v1909_v22  ;;  %v2038_v22 = vld [vmem:[%s10437_s0 + $0x50] sm:$0x8] }
 0x4f7   : > { %v1966_v43 = vsel %vm627_vm8, %v1965_v25, %v1964_v27  ;;  %9011 = vtanh.f32 %v1910_v11 }
 0x4f8   : > { %v9002_v2 = vpop.eup %9001  ;;  %v1983_v36 = vsel %vm1935_vm12, %v1966_v43, 0.0  ;;  %v11177_v19 = vsel %vm1935_vm12, %v1966_v43, %v11120_v44  ;;  %9013 = vtanh.f32 %v1912_v28 }
 0x4f9   : > { %v9004_v38 = vpop.eup %9003  ;;  %v1987_v40 = vrot.slane %v1983_v36, 1  ;;  %v1988_v9 = vrot.slane %v1983_v36, 2  ;;  %v1989_v47 = vrot.slane %v1983_v36, 3  ;;  %2015 = vst [vmem:[#allocation3 + $0x6] sm:$0x1] %v1983_v36  ;;  %2081 = vmatmul.f32.vlgmr.msrb.gmra.mxu3 %v11177_v19  ;;  %v1990_v12 = vrot.slane %v1983_v36, 4 }
 0x4fa   : > { %3849 = vmatpush.msrb.mxu3 %v11038_v56  ;;  %v9006_v34 = vpop.eup %9005  ;;  %9015 = vtanh.f32 %v1911_v32  ;;  %v1991_v4 = vrot.slane %v1983_v36, 5  ;;  %v1967_v45 = vrot.slane %v9002_v2, 6  ;;  %v1968_v62 = vrot.slane %v9004_v38, 5  ;;  %v2040_v38 = vld [vmem:[%s10437_s0 + $0x70] sm:$0x8] }
 0x4fb   : > { %2016 = vst [vmem:[#allocation3 + $0x26] sm:$0x1] %v1987_v40  ;;  %v9008_v44 = vpop.eup %9007  ;;  %v1992_v48 = vrot.slane %v1983_v36, 6  ;;  %v1970_v58 = vrot.slane %v9006_v34, 4  ;;  %v1993_v54 = vrot.slane %v1983_v36, 7 }
 0x4fc   : > { %2017 = vst [vmem:[#allocation3 + $0x46] sm:$0x1] %v1988_v9  ;;  %3850 = vmatpush.msrb.mxu3 %v11041_v26  ;;  %v9010_v53 = vpop.eup %9009  ;;  %v1969_v0 = vsel %vm609_vm2, %v1968_v62, %v1967_v45  ;;  %v1972_v55 = vrot.slane %v9008_v44, 3  ;;  %v2041_v34 = vld [vmem:[%s10437_s0 + $0x80] sm:$0x8] }
 0x4fd   : > { %2018 = vst [vmem:[#allocation3 + $0x66] sm:$0x1] %v1989_v47  ;;  %v9012_v35 = vpop.eup %9011  ;;  %v1971_v56 = vsel %vm612_vm3, %v1970_v58, %v1969_v0  ;;  %v1974_v59 = vrot.slane %v9010_v53, 2  ;;  %v11218_v62 = vld [vmem:[%s10437_s0 + $0xf0] sm:$0x8]  ;;  %v2057_v0 = vunpack.c.l.bf16 %v2041_v34 }
 0x4fe   : > { %2019 = vst [vmem:[#allocation3 + $0x86] sm:$0x1] %v1990_v12  ;;  %3851 = vmatpush.msrb.mxu3 %v11046_v33  ;;  %v1973_v60 = vsel %vm615_vm4, %v1972_v55, %v1971_v56  ;;  %v1976_v61 = vrot.slane %v9012_v35, 1  ;;  %v9014_v57 = vpop.eup %9013  ;;  %v2056_v12 = vunpack.c.l.bf16 %v2040_v38  ;;  %v2043_v44 = vld [vmem:[%s10437_s0 + $0xa0] sm:$0x8]  ;;  %v2064_v35 = vunpack.c.l.bf16 %v11218_v62 }
 0x4ff   : > { %2020 = vst [vmem:[#allocation3 + $0xa6] sm:$0x1] %v1991_v4  ;;  %v1975_v26 = vsel %vm618_vm5, %v1974_v59, %v1973_v60  ;;  %v1979_v6 = vrot.slane %v9014_v57, 7  ;;  %v2042_v4 = vld [vmem:[%s10437_s0 + $0x90] sm:$0x8]  ;;  %v2059_v60 = vunpack.c.l.bf16 %v2043_v44  ;;  %v11237_v44 = vld [vmem:[#allocation7 + $0x78] sm:$0xff] }
 0x500   : > { %2021 = vst [vmem:[#allocation3 + $0xc6] sm:$0x1] %v1992_v48  ;;  %3852 = vmatpush.msrb.mxu3 %v11051_v46  ;;  %v9016_v5 = vpop.eup %9015  ;;  %v1977_v21 = vsel %vm621_vm6, %v1976_v61, %v1975_v26  ;;  %v2044_v48 = vld [vmem:[%s10437_s0 + $0xb0] sm:$0x8]  ;;  %v2045_v58 = vld [vmem:[%s10437_s0 + $0xc0] sm:$0x8]  ;;  %v2058_v55 = vunpack.c.l.bf16 %v2042_v4 }
 0x501   : > { %2022 = vst [vmem:[#allocation3 + $0xe6] sm:$0x1] %v1993_v54  ;;  %v1978_v14 = vsel %vm624_vm7, %v9016_v5, %v1977_v21  ;;  %v2046_v53 = vld [vmem:[%s10437_s0 + $0xd0] sm:$0x8]  ;;  %v2047_v54 = vld [vmem:[%s10437_s0 + $0xe0] sm:$0x8]  ;;  %v2060_v61 = vunpack.c.l.bf16 %v2044_v48  ;;  %v2061_v5 = vunpack.c.l.bf16 %v2045_v58 }
 0x502   : > { %3853 = vmatpush.msrb.mxu3 %v11056_v49  ;;  %v1980_v33 = vsel %vm627_vm8, %v1979_v6, %v1978_v14  ;;  %v2062_v21 = vunpack.c.l.bf16 %v2046_v53  ;;  %v2063_v6 = vunpack.c.l.bf16 %v2047_v54 }
 0x503   : > { %v1984_v7 = vsel %vm1936_vm13, %v1980_v33, 0.0  ;;  %v11193_v13 = vsel %vm1936_vm13, %v1980_v33, %v11136_v30 }
 0x504   : > { %3854 = vmatpush.msrb.mxu3 %v11063_v63  ;;  %v1994_v15 = vrot.slane %v1984_v7, 1  ;;  %v1995_v46 = vrot.slane %v1984_v7, 2  ;;  %v1996_v16 = vrot.slane %v1984_v7, 3  ;;  %2023 = vst [vmem:[#allocation3 + $0x106] sm:$0x1] %v1984_v7  ;;  %v1997_v17 = vrot.slane %v1984_v7, 4 }
 0x505   : > { %2084 = vmatmul.f32.gmra.mxu3 %v11193_v13  ;;  %v1998_v18 = vrot.slane %v1984_v7, 5  ;;  %v1999_v49 = vrot.slane %v1984_v7, 6  ;;  %v2000_v30 = vrot.slane %v1984_v7, 7  ;;  %v2033_v63 = vld [vmem:[%s10437_s0] sm:$0x8] }
 0x506   : > { %3855 = vmatpush.msrb.mxu3 %v11066_v51  ;;  %2024 = vst [vmem:[#allocation3 + $0x126] sm:$0x1] %v1994_v15  ;;  %v2034_v51 = vld [vmem:[%s10437_s0 + $0x10] sm:$0x8]  ;;  %v2049_v41 = vunpack.c.l.bf16 %v2033_v63 }
 0x507   : > { %2025 = vst [vmem:[#allocation3 + $0x146] sm:$0x1] %v1995_v46  ;;  %v2050_v42 = vunpack.c.l.bf16 %v2034_v51 }
 0x508   : > { %3856 = vmatpush.msrb.mxu3 %v11069_v52  ;;  %2026 = vst [vmem:[#allocation3 + $0x166] sm:$0x1] %v1996_v16  ;;  %v2035_v52 = vld [vmem:[%s10437_s0 + $0x20] sm:$0x8] }
 0x509   : > { %2027 = vst [vmem:[#allocation3 + $0x186] sm:$0x1] %v1997_v17  ;;  %v2051_v8 = vunpack.c.l.bf16 %v2035_v52 }
 0x50a   : > { %3857 = vmatpush.msrb.mxu3 %v11072_v37  ;;  %2028 = vst [vmem:[#allocation3 + $0x1a6] sm:$0x1] %v1998_v18  ;;  %v2036_v37 = vld [vmem:[%s10437_s0 + $0x30] sm:$0x8] }
 0x50b   : > { %2029 = vst [vmem:[#allocation3 + $0x1c6] sm:$0x1] %v1999_v49  ;;  %v2052_v11 = vunpack.c.l.bf16 %v2036_v37 }
 0x50c   : > { %3858 = vmatpush.msrb.mxu3 %v11075_v39  ;;  %2030 = vst [vmem:[#allocation3 + $0x1e6] sm:$0x1] %v2000_v30  ;;  %v2037_v39 = vld [vmem:[%s10437_s0 + $0x40] sm:$0x8] }
 0x50e   : > { %3859 = vmatpush.msrb.mxu3 %v11078_v31  ;;  %v2039_v31 = vld [vmem:[%s10437_s0 + $0x60] sm:$0x8] }
 0x50f   : > { %v2055_v27 = vunpack.c.l.bf16 %v2039_v31 }
 0x510   : > { %3860 = vmatpush.msrb.mxu3 %v11081_v20 }
 0x512   : > { %3861 = vmatpush.msrb.mxu3 %v11084_v29  ;;  %v2053_v29 = vunpack.c.l.bf16 %v2037_v39 }
 0x514   : > { %3862 = vmatpush.msrb.mxu3 %v11087_v50 }
 0x516   : > { %3863 = vmatpush.msrb.mxu3 %v11090_v1 }
 0x518   : > { %3864 = vmatpush.msrb.mxu3 %v11093_v3  ;;  %v2054_v3 = vunpack.c.l.bf16 %v2038_v22 }
 0x57c   : > { %v2082_v20 = vpop.f32.mrf.mxu3 }
 0x57d   : > { %v2090_v24 = vrot.slane %v2082_v20, 1  ;;  %v2091_v50 = vrot.slane %v2082_v20, 2  ;;  %v2092_v23 = vrot.slane %v2082_v20, 3  ;;  %v2093_v1 = vrot.slane %v2082_v20, 4 }
 0x57e   : > { %v2094_v25 = vrot.slane %v2082_v20, 5  ;;  %v2095_v28 = vrot.slane %v2082_v20, 6  ;;  %v2096_v36 = vrot.slane %v2082_v20, 7  ;;  %v2127_v59 = vadd.f32 %v2082_v20, %v2056_v12 }
 0x57f   : > { %v2120_v32 = vadd.f32 %v2090_v24, %v2049_v41  ;;  %v2121_v43 = vadd.f32 %v2091_v50, %v2050_v42  ;;  %v2122_v2 = vadd.f32 %v2092_v23, %v2051_v8  ;;  %v2123_v40 = vadd.f32 %v2093_v1, %v2052_v11  ;;  %v2154_v1 = vpop.permute.xlu0 %2153 }
 0x580   : > { %v2124_v9 = vadd.f32 %v2094_v25, %v2053_v29  ;;  %v2125_v47 = vadd.f32 %v2095_v28, %v2054_v3  ;;  %v2126_v45 = vadd.f32 %v2096_v36, %v2055_v27  ;;  %vm2158_vm14 = vcmp.eq.s32.totalorder %v2154_v1, 1  ;;  %v11290_v1 = vld [vmem:[#allocation7 + $0x8] sm:$0xff] }
 0x581   : > { %9017 = vtanh.f32 %v2120_v32 }
 0x582   : > { %9019 = vtanh.f32 %v2121_v43 }
 0x583   : > { %9021 = vtanh.f32 %v2122_v2 }
 0x584   : > { %9023 = vtanh.f32 %v2123_v40 }
 0x585   : > { %9025 = vtanh.f32 %v2124_v9 }
 0x586   : > { %9027 = vtanh.f32 %v2125_v47 }
 0x587   : > { %v9018_v56 = vpop.eup %9017  ;;  %9029 = vtanh.f32 %v2126_v45 }
 0x588   : > { %v9020_v57 = vpop.eup %9019  ;;  %v2085_v10 = vpop.f32.mrf.mxu3  ;;  %v2176_v26 = vrot.slane %v9018_v56, 7  ;;  %9031 = vtanh.f32 %v2127_v59 }
 0x589   : > { %v9022_v14 = vpop.eup %9021  ;;  %v2097_v33 = vrot.slane %v2085_v10, 1  ;;  %v2098_v7 = vrot.slane %v2085_v10, 2  ;;  %v2099_v15 = vrot.slane %v2085_v10, 3  ;;  %v2100_v46 = vrot.slane %v2085_v10, 4 }
 0x58a   : > { %v9024_v16 = vpop.eup %9023  ;;  %v2177_v17 = vrot.slane %v9020_v57, 6  ;;  %v2179_v18 = vrot.slane %v9022_v14, 5  ;;  %v2101_v49 = vrot.slane %v2085_v10, 5  ;;  %v2102_v30 = vrot.slane %v2085_v10, 6  ;;  %v2157_v14 = vpop.permute.xlu1 %2156 }
 0x58b   : > { %v9026_v63 = vpop.eup %9025  ;;  %v2128_v51 = vadd.f32 %v2097_v33, %v2057_v0  ;;  %v2129_v52 = vadd.f32 %v2098_v7, %v2058_v55  ;;  %v2103_v37 = vrot.slane %v2085_v10, 7  ;;  %v2181_v42 = vrot.slane %v9024_v16, 4 }
 0x58c   : > { %v9028_v39 = vpop.eup %9027  ;;  %v2178_v41 = vsel %vm609_vm2, %v2177_v17, %v2176_v26  ;;  %v2130_v8 = vadd.f32 %v2099_v15, %v2059_v60  ;;  %v2131_v22 = vadd.f32 %v2100_v46, %v2060_v61  ;;  %v2183_v11 = vrot.slane %v9026_v63, 3  ;;  %v11250_v15 = vld [vmem:[#allocation7 + $0x60] sm:$0xff] }
 0x58d   : > { %v9030_v31 = vpop.eup %9029  ;;  %9033 = vtanh.f32 %v2128_v51  ;;  %v2180_v20 = vsel %vm612_vm3, %v2179_v18, %v2178_v41  ;;  %v2132_v29 = vadd.f32 %v2101_v49, %v2061_v5  ;;  %v2185_v50 = vrot.slane %v9028_v39, 2  ;;  %v11245_v5 = vld [vmem:[#allocation7 + $0x68] sm:$0xff]  ;;  %v11255_v18 = vld [vmem:[#allocation7 + $0x58] sm:$0xff]  ;;  %v11262_v51 = vld [vmem:[#allocation7 + $0x50] sm:$0xff] }
 0x58e   : > { %9035 = vtanh.f32 %v2129_v52  ;;  %v2182_v24 = vsel %vm615_vm4, %v2181_v42, %v2180_v20  ;;  %v2133_v23 = vadd.f32 %v2102_v30, %v2062_v21  ;;  %v2187_v3 = vrot.slane %v9030_v31, 1  ;;  %v9032_v32 = vpop.eup %9031  ;;  %v11266_v42 = vld [vmem:[#allocation7 + $0x48] sm:$0xff]  ;;  %v11272_v20 = vld [vmem:[#allocation7 + $0x38] sm:$0xff] }
 0x58f   : > { %v2184_v25 = vsel %vm618_vm5, %v2183_v11, %v2182_v24  ;;  %v2134_v27 = vadd.f32 %v2103_v37, %v2063_v6  ;;  %9037 = vtanh.f32 %v2130_v8  ;;  %v2135_v9 = vadd.f32 %v2085_v10, %v2064_v35  ;;  %v11240_v35 = vld [vmem:[#allocation7 + $0x70] sm:$0xff]  ;;  %v11281_v24 = vld [vmem:[#allocation7 + $0x20] sm:$0xff] }
 0x590   : > { %v2186_v28 = vsel %vm621_vm6, %v2185_v50, %v2184_v25  ;;  %9039 = vtanh.f32 %v2131_v22  ;;  %vm2159_vm15 = vcmp.eq.s32.totalorder %v2157_v14, 1  ;;  %v11275_v11 = vld [vmem:[#allocation7 + $0x30] sm:$0xff]  ;;  %v11284_v50 = vld [vmem:[#allocation7 + $0x18] sm:$0xff]  ;;  %v11293_v25 = vld [vmem:[#allocation7] sm:$0xff] }
 0x591   : > { %v2188_v43 = vsel %vm624_vm7, %v2187_v3, %v2186_v28  ;;  %9041 = vtanh.f32 %v2132_v29  ;;  %v11278_v29 = vld [vmem:[#allocation7 + $0x28] sm:$0xff]  ;;  %v2256_v3 = vld [vmem:[%s10437_s0 + $0x4] sm:$0x1] }
 0x592   : > { %v2189_v2 = vsel %vm627_vm8, %v9032_v32, %v2188_v43  ;;  %9043 = vtanh.f32 %v2133_v23  ;;  %v11287_v23 = vld [vmem:[#allocation7 + $0x10] sm:$0xff]  ;;  %v2258_v28 = vld [vmem:[%s10437_s0 + $0x24] sm:$0x1] }
 0x593   : > { %v9034_v36 = vpop.eup %9033  ;;  %v2206_v38 = vsel %vm2158_vm14, %v2189_v2, 0.0  ;;  %v11234_v40 = vsel %vm2158_vm14, %v2189_v2, %v11177_v19  ;;  %9045 = vtanh.f32 %v2134_v27  ;;  %v2257_v27 = vld [vmem:[%s10437_s0 + $0x14] sm:$0x1]  ;;  %v2260_v43 = vld [vmem:[%s10437_s0 + $0x44] sm:$0x1] }
 0x594   : > { %v9036_v47 = vpop.eup %9035  ;;  %v2210_v12 = vrot.slane %v2206_v38, 1  ;;  %v2211_v34 = vrot.slane %v2206_v38, 2  ;;  %v2212_v4 = vrot.slane %v2206_v38, 3  ;;  %2238 = vst [vmem:[#allocation3 + $0x7] sm:$0x1] %v2206_v38  ;;  %2304 = vmatmul.f32.vlgmr.msra.gmra.mxu0 %v11234_v40  ;;  %v2213_v62 = vrot.slane %v2206_v38, 4 }
 0x595   : > { %v9038_v45 = vpop.eup %9037  ;;  %4072 = vmatpush.msra.mxu0 %v11237_v44  ;;  %v2214_v58 = vrot.slane %v2206_v38, 5  ;;  %v2190_v19 = vrot.slane %v9034_v36, 7  ;;  %v2191_v53 = vrot.slane %v9036_v47, 6  ;;  %v2215_v55 = vrot.slane %v2206_v38, 6  ;;  %v2259_v32 = vld [vmem:[%s10437_s0 + $0x34] sm:$0x1] }
 0x596   : > { %v9040_v48 = vpop.eup %9039  ;;  %2239 = vst [vmem:[#allocation3 + $0x27] sm:$0x1] %v2210_v12  ;;  %v2193_v54 = vrot.slane %v9038_v45, 5  ;;  %9047 = vtanh.f32 %v2135_v9  ;;  %v2216_v59 = vrot.slane %v2206_v38, 7  ;;  %v2261_v2 = vld [vmem:[%s10437_s0 + $0x54] sm:$0x1]  ;;  %v2272_v38 = vunpack.c.l.bf16 %v2256_v3 }
 0x597   : > { %v9042_v0 = vpop.eup %9041  ;;  %2240 = vst [vmem:[#allocation3 + $0x47] sm:$0x1] %v2211_v34  ;;  %4073 = vmatpush.msra.mxu0 %v11240_v35  ;;  %v2192_v60 = vsel %vm609_vm2, %v2191_v53, %v2190_v19  ;;  %v2195_v61 = vrot.slane %v9040_v48, 4  ;;  %v2262_v36 = vld [vmem:[%s10437_s0 + $0x64] sm:$0x1]  ;;  %v2273_v9 = vunpack.c.l.bf16 %v2257_v27  ;;  %v2274_v47 = vunpack.c.l.bf16 %v2258_v28 }
 0x598   : > { %v9044_v56 = vpop.eup %9043  ;;  %2241 = vst [vmem:[#allocation3 + $0x67] sm:$0x1] %v2212_v4  ;;  %v2194_v10 = vsel %vm612_vm3, %v2193_v54, %v2192_v60  ;;  %v2197_v26 = vrot.slane %v9042_v0, 3  ;;  %v2263_v12 = vld [vmem:[%s10437_s0 + $0x74] sm:$0x1]  ;;  %v2275_v34 = vunpack.c.l.bf16 %v2259_v32  ;;  %v2276_v45 = vunpack.c.l.bf16 %v2260_v43 }
 0x599   : > { %v9046_v57 = vpop.eup %9045  ;;  %2242 = vst [vmem:[#allocation3 + $0x87] sm:$0x1] %v2213_v62  ;;  %4074 = vmatpush.msra.mxu0 %v11245_v5  ;;  %v2196_v21 = vsel %vm615_vm4, %v2195_v61, %v2194_v10  ;;  %v2199_v6 = vrot.slane %v9044_v56, 2  ;;  %v2277_v62 = vunpack.c.l.bf16 %v2261_v2  ;;  %v2278_v48 = vunpack.c.l.bf16 %v2262_v36 }
 0x59a   : > { %2243 = vst [vmem:[#allocation3 + $0xa7] sm:$0x1] %v2214_v58  ;;  %v2198_v33 = vsel %vm618_vm5, %v2197_v26, %v2196_v21  ;;  %v2201_v7 = vrot.slane %v9046_v57, 1 }
 0x59b   : > { %2244 = vst [vmem:[#allocation3 + $0xc7] sm:$0x1] %v2215_v55  ;;  %4075 = vmatpush.msra.mxu0 %v11250_v15  ;;  %v2200_v46 = vsel %vm621_vm6, %v2199_v6, %v2198_v33  ;;  %v2279_v55 = vunpack.c.l.bf16 %v2263_v12  ;;  %v2264_v33 = vld [vmem:[%s10437_s0 + $0x84] sm:$0x1] }
 0x59c   : > { %2245 = vst [vmem:[#allocation3 + $0xe7] sm:$0x1] %v2216_v59  ;;  %v9048_v16 = vpop.eup %9047  ;;  %v2202_v17 = vsel %vm624_vm7, %v2201_v7, %v2200_v46  ;;  %v2265_v7 = vld [vmem:[%s10437_s0 + $0x94] sm:$0x1]  ;;  %v2266_v46 = vld [vmem:[%s10437_s0 + $0xa4] sm:$0x1] }
 0x59d   : > { %4076 = vmatpush.msra.mxu0 %v11255_v18  ;;  %v2203_v49 = vsel %vm627_vm8, %v9048_v16, %v2202_v17  ;;  %v2267_v16 = vld [vmem:[%s10437_s0 + $0xb4] sm:$0x1]  ;;  %v2268_v17 = vld [vmem:[%s10437_s0 + $0xc4] sm:$0x1] }
 0x59e   : > { %v2207_v30 = vsel %vm2159_vm15, %v2203_v49, 0.0  ;;  %v11260_v63 = vsel %vm2159_vm15, %v2203_v49, %v11193_v13  ;;  %v11269_v13 = vld [vmem:[#allocation7 + $0x40] sm:$0xff]  ;;  %v2269_v49 = vld [vmem:[%s10437_s0 + $0xd4] sm:$0x1]  ;;  %v2283_v28 = vunpack.c.l.bf16 %v2267_v16  ;;  %v2284_v32 = vunpack.c.l.bf16 %v2268_v17 }
 0x59f   : > { %4077 = vmatpush.msra.mxu0 %v11262_v51  ;;  %v2217_v52 = vrot.slane %v2207_v30, 1  ;;  %v2218_v37 = vrot.slane %v2207_v30, 2  ;;  %v2219_v39 = vrot.slane %v2207_v30, 3  ;;  %2246 = vst [vmem:[#allocation3 + $0x107] sm:$0x1] %v2207_v30  ;;  %v2220_v41 = vrot.slane %v2207_v30, 4 }
 0x5a0   : > { %2307 = vmatmul.f32.gmra.mxu0 %v11260_v63  ;;  %v2221_v8 = vrot.slane %v2207_v30, 5  ;;  %v2222_v22 = vrot.slane %v2207_v30, 6  ;;  %v2223_v31 = vrot.slane %v2207_v30, 7  ;;  %v2285_v43 = vunpack.c.l.bf16 %v2269_v49 }
 0x5a1   : > { %4078 = vmatpush.msra.mxu0 %v11266_v42  ;;  %2247 = vst [vmem:[#allocation3 + $0x127] sm:$0x1] %v2217_v52  ;;  %v2270_v52 = vld [vmem:[%s10437_s0 + $0xe4] sm:$0x1] }
 0x5a2   : > { %2248 = vst [vmem:[#allocation3 + $0x147] sm:$0x1] %v2218_v37  ;;  %v2271_v37 = vld [vmem:[%s10437_s0 + $0xf4] sm:$0x1] }
 0x5a3   : > { %4079 = vmatpush.msra.mxu0 %v11269_v13  ;;  %2249 = vst [vmem:[#allocation3 + $0x167] sm:$0x1] %v2219_v39 }
 0x5a4   : > { %2250 = vst [vmem:[#allocation3 + $0x187] sm:$0x1] %v2220_v41  ;;  %v2280_v41 = vunpack.c.l.bf16 %v2264_v33 }
 0x5a5   : > { %4080 = vmatpush.msra.mxu0 %v11272_v20  ;;  %2251 = vst [vmem:[#allocation3 + $0x1a7] sm:$0x1] %v2221_v8  ;;  %v2281_v8 = vunpack.c.l.bf16 %v2265_v7 }
 0x5a6   : > { %2252 = vst [vmem:[#allocation3 + $0x1c7] sm:$0x1] %v2222_v22  ;;  %v2282_v22 = vunpack.c.l.bf16 %v2266_v46 }
 0x5a7   : > { %4081 = vmatpush.msra.mxu0 %v11275_v11  ;;  %2253 = vst [vmem:[#allocation3 + $0x1e7] sm:$0x1] %v2223_v31 }
 0x5a9   : > { %4082 = vmatpush.msra.mxu0 %v11278_v29 }
 0x5ab   : > { %4083 = vmatpush.msra.mxu0 %v11281_v24 }
 0x5ad   : > { %4084 = vmatpush.msra.mxu0 %v11284_v50 }
 0x5af   : > { %4085 = vmatpush.msra.mxu0 %v11287_v23 }
 0x5b1   : > { %4086 = vmatpush.msra.mxu0 %v11290_v1 }
 0x5b3   : > { %4087 = vmatpush.msra.mxu0 %v11293_v25 }
 0x611   : > { %v2305_v4 = vpop.f32.mrf.mxu0 }
 0x612   : > { %v2313_v58 = vrot.slane %v2305_v4, 1  ;;  %v2314_v19 = vrot.slane %v2305_v4, 2  ;;  %v2315_v53 = vrot.slane %v2305_v4, 3  ;;  %v2316_v54 = vrot.slane %v2305_v4, 4 }
 0x613   : > { %v2343_v0 = vadd.f32 %v2305_v4, %v2272_v38  ;;  %v2317_v56 = vrot.slane %v2305_v4, 5  ;;  %v2318_v59 = vrot.slane %v2305_v4, 6  ;;  %v2319_v57 = vrot.slane %v2305_v4, 7 }
 0x614   : > { %v2344_v60 = vadd.f32 %v2313_v58, %v2273_v9  ;;  %v2345_v61 = vadd.f32 %v2314_v19, %v2274_v47  ;;  %v2346_v10 = vadd.f32 %v2315_v53, %v2275_v34  ;;  %v2347_v26 = vadd.f32 %v2316_v54, %v2276_v45 }
 0x615   : > { %9049 = vtanh.f32 %v2343_v0  ;;  %v2348_v21 = vadd.f32 %v2317_v56, %v2277_v62  ;;  %v2349_v6 = vadd.f32 %v2318_v59, %v2278_v48  ;;  %v2350_v14 = vadd.f32 %v2319_v57, %v2279_v55 }
 0x616   : > { %9051 = vtanh.f32 %v2344_v60  ;;  %v2286_v9 = vunpack.c.l.bf16 %v2270_v52  ;;  %v2287_v47 = vunpack.c.l.bf16 %v2271_v37 }
 0x617   : > { %9053 = vtanh.f32 %v2345_v61 }
 0x618   : > { %9055 = vtanh.f32 %v2346_v10 }
 0x619   : > { %9057 = vtanh.f32 %v2347_v26 }
 0x61a   : > { %9059 = vtanh.f32 %v2348_v21  ;;  %v2377_v21 = vpop.permute.xlu2 %2376 }
 0x61b   : > { %v9050_v30 = vpop.eup %9049  ;;  %9061 = vtanh.f32 %v2349_v6  ;;  %vm2381_vm0 = vcmp.eq.s32.totalorder %v2377_v21, 1 }
 0x61c   : > { %v9052_v39 = vpop.eup %9051  ;;  %9063 = vtanh.f32 %v2350_v14 }
 0x61d   : > { %v9054_v31 = vpop.eup %9053  ;;  %v2308_v3 = vpop.f32.mrf.mxu0  ;;  %v2399_v27 = vrot.slane %v9052_v39, 7 }
 0x61e   : > { %v9056_v2 = vpop.eup %9055  ;;  %v2320_v36 = vrot.slane %v2308_v3, 1  ;;  %v2321_v38 = vrot.slane %v2308_v3, 2  ;;  %v2322_v34 = vrot.slane %v2308_v3, 3  ;;  %v2401_v45 = vrot.slane %v9054_v31, 6 }
 0x61f   : > { %v9058_v12 = vpop.eup %9057  ;;  %v2400_v4 = vsel %vm609_vm2, %v2399_v27, %v9050_v30  ;;  %v2323_v62 = vrot.slane %v2308_v3, 4  ;;  %v2351_v58 = vadd.f32 %v2308_v3, %v2280_v41  ;;  %v2403_v53 = vrot.slane %v9056_v2, 5 }
 0x620   : > { %v9060_v48 = vpop.eup %9059  ;;  %v2352_v19 = vadd.f32 %v2320_v36, %v2281_v8  ;;  %v2405_v54 = vrot.slane %v9058_v12, 4  ;;  %v2402_v55 = vsel %vm612_vm3, %v2401_v45, %v2400_v4  ;;  %v2324_v59 = vrot.slane %v2308_v3, 5 }
 0x621   : > { %v9062_v0 = vpop.eup %9061  ;;  %v2407_v56 = vrot.slane %v9060_v48, 3  ;;  %v2325_v60 = vrot.slane %v2308_v3, 6  ;;  %v2404_v57 = vsel %vm615_vm4, %v2403_v53, %v2402_v55  ;;  %v2326_v10 = vrot.slane %v2308_v3, 7 }
 0x622   : > { %v9064_v61 = vpop.eup %9063  ;;  %9065 = vtanh.f32 %v2352_v19  ;;  %v2353_v26 = vadd.f32 %v2321_v38, %v2282_v22  ;;  %v2406_v6 = vsel %vm618_vm5, %v2405_v54, %v2404_v57  ;;  %v2409_v14 = vrot.slane %v9062_v0, 2  ;;  %v2380_v0 = vpop.permute.xlu1 %2379 }
 0x623   : > { %v2354_v33 = vadd.f32 %v2322_v34, %v2283_v28  ;;  %v2355_v7 = vadd.f32 %v2323_v62, %v2284_v32  ;;  %9067 = vtanh.f32 %v2351_v58  ;;  %v2408_v46 = vsel %vm621_vm6, %v2407_v56, %v2406_v6 }
 0x624   : > { %v2411_v16 = vrot.slane %v9064_v61, 1  ;;  %v2410_v17 = vsel %vm624_vm7, %v2409_v14, %v2408_v46  ;;  %v2356_v49 = vadd.f32 %v2324_v59, %v2285_v43  ;;  %9069 = vtanh.f32 %v2353_v26  ;;  %v2480_v46 = vld [vmem:[%s10437_s0 + $0x14] sm:$0x1] }
 0x625   : > { %v2357_v52 = vadd.f32 %v2325_v60, %v2286_v9  ;;  %9071 = vtanh.f32 %v2354_v33  ;;  %v2358_v41 = vadd.f32 %v2326_v10, %v2287_v47  ;;  %vm2382_vm1 = vcmp.eq.s32.totalorder %v2380_v0, 1  ;;  %v2487_v0 = vld [vmem:[%s10437_s0 + $0x84] sm:$0x1] }
 0x626   : > { %v2412_v30 = vsel %vm627_vm8, %v2411_v16, %v2410_v17  ;;  %9073 = vtanh.f32 %v2355_v7  ;;  %v2479_v16 = vld [vmem:[%s10437_s0 + $0x4] sm:$0x1] }
 0x627   : > { %v2429_v37 = vsel %vm2381_vm0, %v2412_v30, 0.0  ;;  %v11320_v39 = vsel %vm2381_vm0, %v2412_v30, %v11234_v40  ;;  %9075 = vtanh.f32 %v2356_v49  ;;  %v2481_v17 = vld [vmem:[%s10437_s0 + $0x24] sm:$0x1]  ;;  %v2482_v49 = vld [vmem:[%s10437_s0 + $0x34] sm:$0x1] }
 0x628   : > { %v9066_v8 = vpop.eup %9065  ;;  %v2433_v22 = vrot.slane %v2429_v37, 1  ;;  %v2434_v31 = vrot.slane %v2429_v37, 2  ;;  %v2435_v3 = vrot.slane %v2429_v37, 3  ;;  %2461 = vst [vmem:[#allocation3 + $0x8] sm:$0x1] %v2429_v37  ;;  %2527 = vmatmul.f32.vlgmr.msra.gmra.mxu1 %v11320_v39  ;;  %v2436_v27 = vrot.slane %v2429_v37, 4 }
 0x629   : > { %4295 = vmatpush.msra.mxu1 %v11237_v44  ;;  %v9068_v28 = vpop.eup %9067  ;;  %v2437_v32 = vrot.slane %v2429_v37, 5  ;;  %9077 = vtanh.f32 %v2357_v52  ;;  %v2413_v43 = vrot.slane %v9066_v8, 7  ;;  %v2438_v2 = vrot.slane %v2429_v37, 6  ;;  %v2483_v30 = vld [vmem:[%s10437_s0 + $0x44] sm:$0x1] }
 0x62a   : > { %2462 = vst [vmem:[#allocation3 + $0x28] sm:$0x1] %v2433_v22  ;;  %v9070_v40 = vpop.eup %9069  ;;  %9079 = vtanh.f32 %v2358_v41  ;;  %v2439_v38 = vrot.slane %v2429_v37, 7  ;;  %v2484_v52 = vld [vmem:[%s10437_s0 + $0x54] sm:$0x1]  ;;  %v2496_v41 = vunpack.c.l.bf16 %v2480_v46  ;;  %v2495_v8 = vunpack.c.l.bf16 %v2479_v16 }
 0x62b   : > { %2463 = vst [vmem:[#allocation3 + $0x48] sm:$0x1] %v2434_v31  ;;  %4296 = vmatpush.msra.mxu1 %v11240_v35  ;;  %v9072_v36 = vpop.eup %9071  ;;  %v2414_v9 = vsel %vm609_vm2, %v2413_v43, %v9068_v28  ;;  %v2415_v47 = vrot.slane %v9070_v40, 6  ;;  %v2485_v37 = vld [vmem:[%s10437_s0 + $0x64] sm:$0x1]  ;;  %v2497_v22 = vunpack.c.l.bf16 %v2481_v17  ;;  %v2499_v28 = vunpack.c.l.bf16 %v2483_v30 }
 0x62c   : > { %2464 = vst [vmem:[#allocation3 + $0x68] sm:$0x1] %v2435_v3  ;;  %v9074_v12 = vpop.eup %9073  ;;  %v2417_v34 = vrot.slane %v9072_v36, 5  ;;  %v2486_v31 = vld [vmem:[%s10437_s0 + $0x74] sm:$0x1]  ;;  %v2498_v3 = vunpack.c.l.bf16 %v2482_v49  ;;  %v2501_v43 = vunpack.c.l.bf16 %v2485_v37 }
 0x62d   : > { %2465 = vst [vmem:[#allocation3 + $0x88] sm:$0x1] %v2436_v27  ;;  %4297 = vmatpush.msra.mxu1 %v11245_v5  ;;  %v2416_v4 = vsel %vm612_vm3, %v2415_v47, %v2414_v9  ;;  %v2419_v45 = vrot.slane %v9074_v12, 4  ;;  %v9076_v62 = vpop.eup %9075  ;;  %v2502_v47 = vunpack.c.l.bf16 %v2486_v31 }
 0x62e   : > { %2466 = vst [vmem:[#allocation3 + $0xa8] sm:$0x1] %v2437_v32  ;;  %v2418_v48 = vsel %vm615_vm4, %v2417_v34, %v2416_v4  ;;  %v2421_v53 = vrot.slane %v9076_v62, 3  ;;  %v2500_v32 = vunpack.c.l.bf16 %v2484_v52 }
 0x62f   : > { %2467 = vst [vmem:[#allocation3 + $0xc8] sm:$0x1] %v2438_v2  ;;  %4298 = vmatpush.msra.mxu1 %v11250_v15  ;;  %v9078_v58 = vpop.eup %9077  ;;  %v2420_v19 = vsel %vm618_vm5, %v2419_v45, %v2418_v48 }
 0x630   : > { %2468 = vst [vmem:[#allocation3 + $0xe8] sm:$0x1] %v2439_v38  ;;  %v9080_v54 = vpop.eup %9079  ;;  %v2423_v55 = vrot.slane %v9078_v58, 2  ;;  %v2422_v56 = vsel %vm621_vm6, %v2421_v53, %v2420_v19 }
 0x631   : > { %4299 = vmatpush.msra.mxu1 %v11255_v18  ;;  %v2425_v59 = vrot.slane %v9080_v54, 1 }
 0x632   : > { %v2424_v60 = vsel %vm624_vm7, %v2423_v55, %v2422_v56  ;;  %v2488_v55 = vld [vmem:[%s10437_s0 + $0x94] sm:$0x1] }
 0x633   : > { %4300 = vmatpush.msra.mxu1 %v11262_v51  ;;  %v2426_v61 = vsel %vm627_vm8, %v2425_v59, %v2424_v60  ;;  %v2489_v59 = vld [vmem:[%s10437_s0 + $0xa4] sm:$0x1]  ;;  %v2490_v60 = vld [vmem:[%s10437_s0 + $0xb4] sm:$0x1] }
 0x634   : > { %v2430_v57 = vsel %vm2382_vm1, %v2426_v61, 0.0  ;;  %v11337_v10 = vsel %vm2382_vm1, %v2426_v61, %v11260_v63  ;;  %v2491_v61 = vld [vmem:[%s10437_s0 + $0xc4] sm:$0x1]  ;;  %v2505_v17 = vunpack.c.l.bf16 %v2489_v59  ;;  %v2506_v49 = vunpack.c.l.bf16 %v2490_v60 }
 0x635   : > { %4301 = vmatpush.msra.mxu1 %v11266_v42  ;;  %v2440_v26 = vrot.slane %v2430_v57, 1  ;;  %v2441_v21 = vrot.slane %v2430_v57, 2  ;;  %v2442_v6 = vrot.slane %v2430_v57, 3  ;;  %2469 = vst [vmem:[#allocation3 + $0x108] sm:$0x1] %v2430_v57  ;;  %v2443_v14 = vrot.slane %v2430_v57, 4 }
 0x636   : > { %2530 = vmatmul.f32.gmra.mxu1 %v11337_v10  ;;  %v2444_v33 = vrot.slane %v2430_v57, 5  ;;  %v2445_v7 = vrot.slane %v2430_v57, 6  ;;  %v2446_v63 = vrot.slane %v2430_v57, 7  ;;  %v2507_v30 = vunpack.c.l.bf16 %v2491_v61 }
 0x637   : > { %4302 = vmatpush.msra.mxu1 %v11269_v13  ;;  %2470 = vst [vmem:[#allocation3 + $0x128] sm:$0x1] %v2440_v26  ;;  %v2492_v26 = vld [vmem:[%s10437_s0 + $0xd4] sm:$0x1] }
 0x638   : > { %2471 = vst [vmem:[#allocation3 + $0x148] sm:$0x1] %v2441_v21  ;;  %v2493_v21 = vld [vmem:[%s10437_s0 + $0xe4] sm:$0x1] }
 0x639   : > { %4303 = vmatpush.msra.mxu1 %v11272_v20  ;;  %2472 = vst [vmem:[#allocation3 + $0x168] sm:$0x1] %v2442_v6  ;;  %v2494_v6 = vld [vmem:[%s10437_s0 + $0xf4] sm:$0x1] }
 0x63a   : > { %2473 = vst [vmem:[#allocation3 + $0x188] sm:$0x1] %v2443_v14  ;;  %v2510_v31 = vunpack.c.l.bf16 %v2494_v6 }
 0x63b   : > { %4304 = vmatpush.msra.mxu1 %v11275_v11  ;;  %2474 = vst [vmem:[#allocation3 + $0x1a8] sm:$0x1] %v2444_v33  ;;  %v2503_v33 = vunpack.c.l.bf16 %v2487_v0 }
 0x63c   : > { %2475 = vst [vmem:[#allocation3 + $0x1c8] sm:$0x1] %v2445_v7  ;;  %v2504_v7 = vunpack.c.l.bf16 %v2488_v55 }
 0x63d   : > { %4305 = vmatpush.msra.mxu1 %v11278_v29  ;;  %2476 = vst [vmem:[#allocation3 + $0x1e8] sm:$0x1] %v2446_v63 }
 0x63f   : > { %4306 = vmatpush.msra.mxu1 %v11281_v24 }
 0x641   : > { %4307 = vmatpush.msra.mxu1 %v11284_v50 }
 0x643   : > { %4308 = vmatpush.msra.mxu1 %v11287_v23 }
 0x645   : > { %4309 = vmatpush.msra.mxu1 %v11290_v1 }
 0x647   : > { %4310 = vmatpush.msra.mxu1 %v11293_v25 }
 0x6a5   : > { %v2528_v27 = vpop.f32.mrf.mxu1 }
 0x6a6   : > { %v2536_v40 = vrot.slane %v2528_v27, 7  ;;  %v2537_v2 = vrot.slane %v2528_v27, 1  ;;  %v2538_v36 = vrot.slane %v2528_v27, 2  ;;  %v2539_v38 = vrot.slane %v2528_v27, 3 }
 0x6a7   : > { %v2567_v9 = vadd.f32 %v2528_v27, %v2496_v41  ;;  %v2540_v12 = vrot.slane %v2528_v27, 4  ;;  %v2541_v34 = vrot.slane %v2528_v27, 5  ;;  %v2542_v62 = vrot.slane %v2528_v27, 6 }
 0x6a8   : > { %v2566_v4 = vadd.f32 %v2536_v40, %v2495_v8  ;;  %v2568_v45 = vadd.f32 %v2537_v2, %v2497_v22  ;;  %v2569_v48 = vadd.f32 %v2538_v36, %v2498_v3  ;;  %v2570_v58 = vadd.f32 %v2539_v38, %v2499_v28 }
 0x6a9   : > { %9081 = vtanh.f32 %v2567_v9  ;;  %v2571_v19 = vadd.f32 %v2540_v12, %v2500_v32  ;;  %v2572_v53 = vadd.f32 %v2541_v34, %v2501_v43  ;;  %v2573_v54 = vadd.f32 %v2542_v62, %v2502_v47  ;;  %v2600_v62 = vpop.permute.xlu2 %2599 }
 0x6aa   : > { %9083 = vtanh.f32 %v2566_v4  ;;  %v2508_v8 = vunpack.c.l.bf16 %v2492_v26  ;;  %v2509_v22 = vunpack.c.l.bf16 %v2493_v21  ;;  %vm2604_vm9 = vcmp.eq.s32.totalorder %v2600_v62, 1 }
 0x6ab   : > { %9085 = vtanh.f32 %v2568_v45 }
 0x6ac   : > { %9087 = vtanh.f32 %v2569_v48 }
 0x6ad   : > { %9089 = vtanh.f32 %v2570_v58 }
 0x6ae   : > { %9091 = vtanh.f32 %v2571_v19 }
 0x6af   : > { %v9082_v56 = vpop.eup %9081  ;;  %9093 = vtanh.f32 %v2572_v53 }
 0x6b0   : > { %v9084_v57 = vpop.eup %9083  ;;  %9095 = vtanh.f32 %v2573_v54 }
 0x6b1   : > { %v9086_v14 = vpop.eup %9085  ;;  %v2622_v63 = vrot.slane %v9084_v57, 1 }
 0x6b2   : > { %v9088_v46 = vpop.eup %9087  ;;  %v2624_v16 = vrot.slane %v9086_v14, 7 }
 0x6b3   : > { %v9090_v52 = vpop.eup %9089  ;;  %v2531_v37 = vpop.f32.mrf.mxu1  ;;  %v2623_v41 = vsel %vm609_vm2, %v9082_v56, %v2622_v63  ;;  %v2626_v43 = vrot.slane %v9088_v46, 6 }
 0x6b4   : > { %v9092_v3 = vpop.eup %9091  ;;  %v2543_v27 = vrot.slane %v2531_v37, 7  ;;  %v2544_v28 = vrot.slane %v2531_v37, 1  ;;  %v2545_v32 = vrot.slane %v2531_v37, 2  ;;  %v2575_v2 = vadd.f32 %v2531_v37, %v2504_v7 }
 0x6b5   : > { %v9094_v40 = vpop.eup %9093  ;;  %v2625_v36 = vsel %vm612_vm3, %v2624_v16, %v2623_v41  ;;  %v2628_v38 = vrot.slane %v9090_v52, 5  ;;  %v2546_v9 = vrot.slane %v2531_v37, 3  ;;  %v2630_v4 = vrot.slane %v9092_v3, 4 }
 0x6b6   : > { %v9096_v47 = vpop.eup %9095  ;;  %v2574_v12 = vadd.f32 %v2543_v27, %v2503_v33  ;;  %v2627_v34 = vsel %vm615_vm4, %v2626_v43, %v2625_v36  ;;  %v2632_v45 = vrot.slane %v9094_v40, 3  ;;  %v2547_v19 = vrot.slane %v2531_v37, 4 }
 0x6b7   : > { %v2629_v48 = vsel %vm618_vm5, %v2628_v38, %v2627_v34  ;;  %v2634_v58 = vrot.slane %v9096_v47, 2  ;;  %v2548_v53 = vrot.slane %v2531_v37, 5  ;;  %v2549_v0 = vrot.slane %v2531_v37, 6 }
 0x6b8   : > { %9097 = vtanh.f32 %v2574_v12  ;;  %v2631_v54 = vsel %vm621_vm6, %v2630_v4, %v2629_v48  ;;  %v2576_v55 = vadd.f32 %v2544_v28, %v2505_v17  ;;  %v2577_v59 = vadd.f32 %v2545_v32, %v2506_v49 }
 0x6b9   : > { %9099 = vtanh.f32 %v2575_v2  ;;  %v2633_v56 = vsel %vm624_vm7, %v2632_v45, %v2631_v54  ;;  %v2578_v60 = vadd.f32 %v2546_v9, %v2507_v30  ;;  %v2579_v57 = vadd.f32 %v2547_v19, %v2508_v8  ;;  %v2603_v2 = vpop.permute.xlu0 %2602  ;;  %v2707_v19 = vld [vmem:[%s10437_s0 + $0x54] sm:$0x2] }
 0x6ba   : > { %v2635_v61 = vsel %vm627_vm8, %v2634_v58, %v2633_v56  ;;  %9101 = vtanh.f32 %v2576_v55  ;;  %v2580_v6 = vadd.f32 %v2548_v53, %v2509_v22  ;;  %v2581_v63 = vadd.f32 %v2549_v0, %v2510_v31  ;;  %v2706_v58 = vld [vmem:[%s10437_s0 + $0x44] sm:$0x2]  ;;  %v2709_v55 = vld [vmem:[%s10437_s0 + $0x74] sm:$0x2] }
 0x6bb   : > { %v2652_v26 = vsel %vm2604_vm9, %v2635_v61, 0.0  ;;  %v11374_v21 = vsel %vm2604_vm9, %v2635_v61, %v11320_v39  ;;  %9103 = vtanh.f32 %v2577_v59  ;;  %vm2605_vm10 = vcmp.eq.s32.totalorder %v2603_v2, 1  ;;  %v2708_v53 = vld [vmem:[%s10437_s0 + $0x64] sm:$0x2] }
 0x6bc   : > { %v2656_v14 = vrot.slane %v2652_v26, 1  ;;  %v2657_v33 = vrot.slane %v2652_v26, 2  ;;  %v2658_v7 = vrot.slane %v2652_v26, 3  ;;  %2684 = vst [vmem:[#allocation3 + $0x9] sm:$0x1] %v2652_v26  ;;  %2750 = vmatmul.f32.vlgmr.msra.gmra.mxu2 %v11374_v21  ;;  %v2659_v46 = vrot.slane %v2652_v26, 4 }
 0x6bd   : > { %9105 = vtanh.f32 %v2578_v60  ;;  %4518 = vmatpush.msra.mxu2 %v11237_v44  ;;  %v2660_v17 = vrot.slane %v2652_v26, 5  ;;  %v2661_v39 = vrot.slane %v2652_v26, 6  ;;  %v2662_v37 = vrot.slane %v2652_v26, 7 }
 0x6be   : > { %v9098_v16 = vpop.eup %9097  ;;  %2685 = vst [vmem:[#allocation3 + $0x29] sm:$0x1] %v2656_v14  ;;  %9107 = vtanh.f32 %v2579_v57  ;;  %v2723_v59 = vunpack.c.l.bf16 %v2707_v19  ;;  %v2725_v26 = vunpack.c.l.bf16 %v2709_v55 }
 0x6bf   : > { %v9100_v49 = vpop.eup %9099  ;;  %2686 = vst [vmem:[#allocation3 + $0x49] sm:$0x1] %v2657_v33  ;;  %9109 = vtanh.f32 %v2580_v6  ;;  %v2636_v30 = vrot.slane %v9098_v16, 1  ;;  %4519 = vmatpush.msra.mxu2 %v11240_v35 }
 0x6c0   : > { %v9102_v52 = vpop.eup %9101  ;;  %2687 = vst [vmem:[#allocation3 + $0x69] sm:$0x1] %v2658_v7  ;;  %9111 = vtanh.f32 %v2581_v63 }
 0x6c1   : > { %v9104_v41 = vpop.eup %9103  ;;  %2688 = vst [vmem:[#allocation3 + $0x89] sm:$0x1] %v2659_v46  ;;  %v2637_v8 = vsel %vm609_vm2, %v9100_v49, %v2636_v30  ;;  %v2638_v44 = vrot.slane %v9102_v52, 7  ;;  %4520 = vmatpush.msra.mxu2 %v11245_v5  ;;  %v2710_v52 = vld [vmem:[%s10437_s0 + $0x84] sm:$0x2] }
 0x6c2   : > { %2689 = vst [vmem:[#allocation3 + $0xa9] sm:$0x1] %v2660_v17  ;;  %v2640_v22 = vrot.slane %v9104_v41, 6  ;;  %v2712_v41 = vld [vmem:[%s10437_s0 + $0xa4] sm:$0x2] }
 0x6c3   : > { %v9106_v31 = vpop.eup %9105  ;;  %2690 = vst [vmem:[#allocation3 + $0xc9] sm:$0x1] %v2661_v39  ;;  %v2639_v3 = vsel %vm612_vm3, %v2638_v44, %v2637_v8  ;;  %4521 = vmatpush.msra.mxu2 %v11250_v15  ;;  %v2713_v44 = vld [vmem:[%s10437_s0 + $0xb4] sm:$0x2] }
 0x6c4   : > { %v9108_v35 = vpop.eup %9107  ;;  %2691 = vst [vmem:[#allocation3 + $0xe9] sm:$0x1] %v2662_v37  ;;  %v2641_v27 = vsel %vm615_vm4, %v2640_v22, %v2639_v3  ;;  %v2642_v28 = vrot.slane %v9106_v31, 5  ;;  %v2711_v37 = vld [vmem:[%s10437_s0 + $0x94] sm:$0x2] }
 0x6c5   : > { %v9110_v32 = vpop.eup %9109  ;;  %v2644_v43 = vrot.slane %v9108_v35, 4  ;;  %4522 = vmatpush.msra.mxu2 %v11255_v18  ;;  %v2714_v22 = vld [vmem:[%s10437_s0 + $0xc4] sm:$0x2]  ;;  %v2715_v31 = vld [vmem:[%s10437_s0 + $0xd4] sm:$0x2] }
 0x6c6   : > { %v9112_v40 = vpop.eup %9111  ;;  %v2643_v5 = vsel %vm618_vm5, %v2642_v28, %v2641_v27  ;;  %v2646_v36 = vrot.slane %v9110_v32, 3  ;;  %v2716_v27 = vld [vmem:[%s10437_s0 + $0xe4] sm:$0x2]  ;;  %v2717_v28 = vld [vmem:[%s10437_s0 + $0xf4] sm:$0x2] }
 0x6c7   : > { %v2645_v38 = vsel %vm621_vm6, %v2644_v43, %v2643_v5  ;;  %v2648_v9 = vrot.slane %v9112_v40, 2  ;;  %4523 = vmatpush.msra.mxu2 %v11262_v51  ;;  %v2726_v43 = vunpack.c.l.bf16 %v2710_v52  ;;  %v2728_v40 = vunpack.c.l.bf16 %v2712_v41 }
 0x6c8   : > { %v2647_v15 = vsel %vm624_vm7, %v2646_v36, %v2645_v38  ;;  %v2727_v36 = vunpack.c.l.bf16 %v2711_v37  ;;  %v2729_v38 = vunpack.c.l.bf16 %v2713_v44 }
 0x6c9   : > { %v2649_v47 = vsel %vm627_vm8, %v2648_v9, %v2647_v15  ;;  %4524 = vmatpush.msra.mxu2 %v11266_v42  ;;  %v2730_v9 = vunpack.c.l.bf16 %v2714_v22  ;;  %v2731_v15 = vunpack.c.l.bf16 %v2715_v31 }
 0x6ca   : > { %v2653_v12 = vsel %vm2605_vm10, %v2649_v47, 0.0  ;;  %v11392_v18 = vsel %vm2605_vm10, %v2649_v47, %v11337_v10  ;;  %v2705_v10 = vld [vmem:[%s10437_s0 + $0x34] sm:$0x2] }
 0x6cb   : > { %v2663_v34 = vrot.slane %v2653_v12, 1  ;;  %v2664_v4 = vrot.slane %v2653_v12, 2  ;;  %v2665_v45 = vrot.slane %v2653_v12, 3  ;;  %2692 = vst [vmem:[#allocation3 + $0x109] sm:$0x1] %v2653_v12  ;;  %2753 = vmatmul.f32.gmra.mxu2 %v11392_v18  ;;  %v2666_v62 = vrot.slane %v2653_v12, 4 }
 0x6cc   : > { %4525 = vmatpush.msra.mxu2 %v11269_v13  ;;  %v2667_v51 = vrot.slane %v2653_v12, 5  ;;  %v2668_v48 = vrot.slane %v2653_v12, 6  ;;  %v2669_v42 = vrot.slane %v2653_v12, 7  ;;  %v2704_v13 = vld [vmem:[%s10437_s0 + $0x24] sm:$0x2] }
 0x6cd   : > { %2693 = vst [vmem:[#allocation3 + $0x129] sm:$0x1] %v2663_v34 }
 0x6ce   : > { %2694 = vst [vmem:[#allocation3 + $0x149] sm:$0x1] %v2664_v4  ;;  %4526 = vmatpush.msra.mxu2 %v11272_v20  ;;  %v2702_v20 = vld [vmem:[%s10437_s0 + $0x4] sm:$0x2] }
 0x6cf   : > { %2695 = vst [vmem:[#allocation3 + $0x169] sm:$0x1] %v2665_v45  ;;  %v2718_v54 = vunpack.c.l.bf16 %v2702_v20  ;;  %v2732_v45 = vunpack.c.l.bf16 %v2716_v27 }
 0x6d0   : > { %2696 = vst [vmem:[#allocation3 + $0x189] sm:$0x1] %v2666_v62  ;;  %4527 = vmatpush.msra.mxu2 %v11275_v11  ;;  %v2703_v11 = vld [vmem:[%s10437_s0 + $0x14] sm:$0x2]  ;;  %v2733_v62 = vunpack.c.l.bf16 %v2717_v28 }
 0x6d1   : > { %2697 = vst [vmem:[#allocation3 + $0x1a9] sm:$0x1] %v2667_v51  ;;  %v2719_v0 = vunpack.c.l.bf16 %v2703_v11 }
 0x6d2   : > { %2698 = vst [vmem:[#allocation3 + $0x1c9] sm:$0x1] %v2668_v48  ;;  %4528 = vmatpush.msra.mxu2 %v11278_v29  ;;  %v2720_v29 = vunpack.c.l.bf16 %v2704_v13 }
 0x6d3   : > { %2699 = vst [vmem:[#allocation3 + $0x1e9] sm:$0x1] %v2669_v42 }
 0x6d4   : > { %4529 = vmatpush.msra.mxu2 %v11281_v24  ;;  %v2721_v24 = vunpack.c.l.bf16 %v2705_v10 }
 0x6d6   : > { %4530 = vmatpush.msra.mxu2 %v11284_v50  ;;  %v2722_v50 = vunpack.c.l.bf16 %v2706_v58 }
 0x6d8   : > { %4531 = vmatpush.msra.mxu2 %v11287_v23  ;;  %v2724_v23 = vunpack.c.l.bf16 %v2708_v53 }
 0x6da   : > { %4532 = vmatpush.msra.mxu2 %v11290_v1 }
 0x6dc   : > { %4533 = vmatpush.msra.mxu2 %v11293_v25 }
 0x73f   : > { %v2751_v56 = vpop.f32.mrf.mxu2 }
 0x740   : > { %v2759_v60 = vrot.slane %v2751_v56, 6  ;;  %v2760_v1 = vrot.slane %v2751_v56, 7  ;;  %v2761_v61 = vrot.slane %v2751_v56, 1  ;;  %v2762_v25 = vrot.slane %v2751_v56, 2 }
 0x741   : > { %v2791_v57 = vadd.f32 %v2751_v56, %v2720_v29  ;;  %v2763_v6 = vrot.slane %v2751_v56, 3  ;;  %v2764_v14 = vrot.slane %v2751_v56, 4  ;;  %v2765_v63 = vrot.slane %v2751_v56, 5 }
 0x742   : > { %v2789_v33 = vadd.f32 %v2759_v60, %v2718_v54  ;;  %v2790_v7 = vadd.f32 %v2760_v1, %v2719_v0  ;;  %v2792_v46 = vadd.f32 %v2761_v61, %v2721_v24  ;;  %v2793_v16 = vadd.f32 %v2762_v25, %v2722_v50  ;;  %v2823_v24 = vpop.permute.xlu1 %2822 }
 0x743   : > { %9113 = vtanh.f32 %v2791_v57  ;;  %v2794_v17 = vadd.f32 %v2763_v6, %v2723_v59  ;;  %v2795_v49 = vadd.f32 %v2764_v14, %v2724_v23  ;;  %v2796_v39 = vadd.f32 %v2765_v63, %v2725_v26 }
 0x744   : > { %9115 = vtanh.f32 %v2789_v33  ;;  %vm2827_vm11 = vcmp.eq.s32.totalorder %v2823_v24, 1  ;;  %v11469_v24 = vld [vmem:[#allocation7 + $0x30] sm:$0xff] }
 0x745   : > { %9117 = vtanh.f32 %v2790_v7 }
 0x746   : > { %9119 = vtanh.f32 %v2792_v46 }
 0x747   : > { %9121 = vtanh.f32 %v2793_v16 }
 0x748   : > { %9123 = vtanh.f32 %v2794_v17 }
 0x749   : > { %v9114_v30 = vpop.eup %9113  ;;  %9125 = vtanh.f32 %v2795_v49 }
 0x74a   : > { %v9116_v8 = vpop.eup %9115  ;;  %9127 = vtanh.f32 %v2796_v39  ;;  %v11431_v39 = vld [vmem:[#allocation7 + $0x78] sm:$0xff] }
 0x74b   : > { %v9118_v3 = vpop.eup %9117  ;;  %v2845_v35 = vrot.slane %v9116_v8, 2  ;;  %v11434_v8 = vld [vmem:[#allocation7 + $0x70] sm:$0xff] }
 0x74c   : > { %v9120_v32 = vpop.eup %9119  ;;  %v2846_v2 = vrot.slane %v9118_v3, 1 }
 0x74d   : > { %v9122_v5 = vpop.eup %9121  ;;  %v2849_v4 = vrot.slane %v9120_v32, 7 }
 0x74e   : > { %v9124_v47 = vpop.eup %9123  ;;  %v2754_v12 = vpop.f32.mrf.mxu2  ;;  %v2847_v34 = vsel %vm609_vm2, %v2846_v2, %v2845_v35  ;;  %v2851_v20 = vrot.slane %v9122_v5, 6  ;;  %v11437_v35 = vld [vmem:[#allocation7 + $0x68] sm:$0xff]  ;;  %v11442_v5 = vld [vmem:[#allocation7 + $0x60] sm:$0xff] }
 0x74f   : > { %v9126_v51 = vpop.eup %9125  ;;  %v2766_v48 = vrot.slane %v2754_v12, 6  ;;  %v2767_v42 = vrot.slane %v2754_v12, 7  ;;  %v2768_v13 = vrot.slane %v2754_v12, 1  ;;  %v2799_v10 = vadd.f32 %v2754_v12, %v2728_v40 }
 0x750   : > { %v9128_v11 = vpop.eup %9127  ;;  %v2848_v58 = vsel %vm612_vm3, %v9114_v30, %v2847_v34  ;;  %v2853_v19 = vrot.slane %v9124_v47, 5  ;;  %v2769_v53 = vrot.slane %v2754_v12, 2  ;;  %v2855_v55 = vrot.slane %v9126_v51, 4  ;;  %v2826_v47 = vpop.permute.xlu2 %2825 }
 0x751   : > { %v2797_v29 = vadd.f32 %v2766_v48, %v2726_v43  ;;  %v2798_v54 = vadd.f32 %v2767_v42, %v2727_v36  ;;  %v2850_v0 = vsel %vm615_vm4, %v2849_v4, %v2848_v58  ;;  %v2857_v50 = vrot.slane %v9128_v11, 3  ;;  %v11447_v4 = vld [vmem:[#allocation7 + $0x58] sm:$0xff]  ;;  %v11452_v48 = vld [vmem:[#allocation7 + $0x50] sm:$0xff]  ;;  %v11459_v11 = vld [vmem:[#allocation7 + $0x48] sm:$0xff] }
 0x752   : > { %v2852_v56 = vsel %vm618_vm5, %v2851_v20, %v2850_v0  ;;  %v2770_v59 = vrot.slane %v2754_v12, 3  ;;  %v2771_v23 = vrot.slane %v2754_v12, 4  ;;  %v2772_v1 = vrot.slane %v2754_v12, 5 }
 0x753   : > { %9129 = vtanh.f32 %v2797_v29  ;;  %v2854_v60 = vsel %vm621_vm6, %v2853_v19, %v2852_v56  ;;  %v2800_v61 = vadd.f32 %v2768_v13, %v2729_v38  ;;  %v2801_v57 = vadd.f32 %v2769_v53, %v2730_v9  ;;  %v11463_v29 = vld [vmem:[#allocation7 + $0x40] sm:$0xff]  ;;  %v11472_v56 = vld [vmem:[#allocation7 + $0x28] sm:$0xff] }
 0x754   : > { %9131 = vtanh.f32 %v2798_v54  ;;  %v2856_v25 = vsel %vm624_vm7, %v2855_v55, %v2854_v60  ;;  %v2802_v26 = vadd.f32 %v2770_v59, %v2731_v15  ;;  %v2803_v14 = vadd.f32 %v2771_v23, %v2732_v45  ;;  %v11478_v59 = vld [vmem:[#allocation7 + $0x18] sm:$0xff]  ;;  %v11481_v23 = vld [vmem:[#allocation7 + $0x10] sm:$0xff]  ;;  %v11484_v60 = vld [vmem:[#allocation7 + $0x8] sm:$0xff] }
 0x755   : > { %v2858_v6 = vsel %vm627_vm8, %v2857_v50, %v2856_v25  ;;  %9133 = vtanh.f32 %v2800_v61  ;;  %v2804_v63 = vadd.f32 %v2772_v1, %v2733_v62  ;;  %vm2828_vm12 = vcmp.eq.s32.totalorder %v2826_v47, 1  ;;  %v11475_v50 = vld [vmem:[#allocation7 + $0x20] sm:$0xff]  ;;  %v2928_v61 = vld [vmem:[%s10437_s0 + $0x34] sm:$0x2] }
 0x756   : > { %v2875_v33 = vsel %vm2827_vm11, %v2858_v6, 0.0  ;;  %v11428_v7 = vsel %vm2827_vm11, %v2858_v6, %v11374_v21  ;;  %9135 = vtanh.f32 %v2801_v57  ;;  %v11487_v1 = vld [vmem:[#allocation7] sm:$0xff]  ;;  %v2926_v57 = vld [vmem:[%s10437_s0 + $0x14] sm:$0x2] }
 0x757   : > { %9137 = vtanh.f32 %v2799_v10  ;;  %v2879_v46 = vrot.slane %v2875_v33, 1  ;;  %v2880_v16 = vrot.slane %v2875_v33, 2  ;;  %v2881_v17 = vrot.slane %v2875_v33, 3  ;;  %2907 = vst [vmem:[#allocation3 + $0xa] sm:$0x1] %v2875_v33  ;;  %2973 = vmatmul.f32.vlgmr.msra.gmra.mxu3 %v11428_v7 }
 0x758   : > { %v2882_v49 = vrot.slane %v2875_v33, 4  ;;  %9139 = vtanh.f32 %v2802_v26  ;;  %4741 = vmatpush.msra.mxu3 %v11431_v39  ;;  %v2883_v52 = vrot.slane %v2875_v33, 5  ;;  %v2884_v37 = vrot.slane %v2875_v33, 6  ;;  %v2925_v25 = vld [vmem:[%s10437_s0 + $0x4] sm:$0x2] }
 0x759   : > { %v9130_v30 = vpop.eup %9129  ;;  %2908 = vst [vmem:[#allocation3 + $0x2a] sm:$0x1] %v2879_v46  ;;  %9141 = vtanh.f32 %v2803_v14  ;;  %v2885_v22 = vrot.slane %v2875_v33, 7  ;;  %v2927_v26 = vld [vmem:[%s10437_s0 + $0x24] sm:$0x2]  ;;  %v2941_v46 = vunpack.c.l.bf16 %v2925_v25 }
 0x75a   : > { %v9132_v21 = vpop.eup %9131  ;;  %2909 = vst [vmem:[#allocation3 + $0x4a] sm:$0x1] %v2880_v16  ;;  %9143 = vtanh.f32 %v2804_v63  ;;  %v2859_v41 = vrot.slane %v9130_v30, 2  ;;  %4742 = vmatpush.msra.mxu3 %v11434_v8  ;;  %v2929_v6 = vld [vmem:[%s10437_s0 + $0x44] sm:$0x2]  ;;  %v2944_v63 = vunpack.c.l.bf16 %v2928_v61  ;;  %v2942_v16 = vunpack.c.l.bf16 %v2926_v57 }
 0x75b   : > { %v9134_v44 = vpop.eup %9133  ;;  %2910 = vst [vmem:[#allocation3 + $0x6a] sm:$0x1] %v2881_v17  ;;  %v2860_v31 = vrot.slane %v9132_v21, 1  ;;  %v2930_v14 = vld [vmem:[%s10437_s0 + $0x54] sm:$0x2]  ;;  %v2943_v17 = vunpack.c.l.bf16 %v2927_v26 }
 0x75c   : > { %v9136_v3 = vpop.eup %9135  ;;  %2911 = vst [vmem:[#allocation3 + $0x8a] sm:$0x1] %v2882_v49  ;;  %4743 = vmatpush.msra.mxu3 %v11437_v35  ;;  %v2863_v32 = vrot.slane %v9134_v44, 7  ;;  %v2931_v33 = vld [vmem:[%s10437_s0 + $0x64] sm:$0x2]  ;;  %v2946_v21 = vunpack.c.l.bf16 %v2930_v14 }
 0x75d   : > { %v9138_v27 = vpop.eup %9137  ;;  %2912 = vst [vmem:[#allocation3 + $0xaa] sm:$0x1] %v2883_v52  ;;  %v2861_v28 = vsel %vm609_vm2, %v2860_v31, %v2859_v41  ;;  %v2865_v2 = vrot.slane %v9136_v3, 6  ;;  %v2932_v49 = vld [vmem:[%s10437_s0 + $0x74] sm:$0x2]  ;;  %v2945_v52 = vunpack.c.l.bf16 %v2929_v6 }
 0x75e   : > { %v9140_v43 = vpop.eup %9139  ;;  %2913 = vst [vmem:[#allocation3 + $0xca] sm:$0x1] %v2884_v37  ;;  %v2862_v40 = vsel %vm612_vm3, %v9138_v27, %v2861_v28  ;;  %4744 = vmatpush.msra.mxu3 %v11442_v5  ;;  %v2947_v37 = vunpack.c.l.bf16 %v2931_v33  ;;  %v2948_v27 = vunpack.c.l.bf16 %v2932_v49 }
 0x75f   : > { %v9142_v36 = vpop.eup %9141  ;;  %2914 = vst [vmem:[#allocation3 + $0xea] sm:$0x1] %v2885_v22  ;;  %v2864_v38 = vsel %vm615_vm4, %v2863_v32, %v2862_v40  ;;  %v2867_v9 = vrot.slane %v9140_v43, 5 }
 0x760   : > { %v9144_v15 = vpop.eup %9143  ;;  %v2866_v12 = vsel %vm618_vm5, %v2865_v2, %v2864_v38  ;;  %v2869_v34 = vrot.slane %v9142_v36, 4  ;;  %4745 = vmatpush.msra.mxu3 %v11447_v4 }
 0x761   : > { %v2868_v45 = vsel %vm621_vm6, %v2867_v9, %v2866_v12  ;;  %v2871_v62 = vrot.slane %v9144_v15, 3  ;;  %v2936_v12 = vld [vmem:[%s10437_s0 + $0xb4] sm:$0x2] }
 0x762   : > { %v2870_v51 = vsel %vm624_vm7, %v2869_v34, %v2868_v45  ;;  %4746 = vmatpush.msra.mxu3 %v11452_v48  ;;  %v2933_v45 = vld [vmem:[%s10437_s0 + $0x84] sm:$0x2] }
 0x763   : > { %v2872_v42 = vsel %vm627_vm8, %v2871_v62, %v2870_v51  ;;  %v2934_v62 = vld [vmem:[%s10437_s0 + $0x94] sm:$0x2]  ;;  %v2935_v51 = vld [vmem:[%s10437_s0 + $0xa4] sm:$0x2]  ;;  %v2949_v61 = vunpack.c.l.bf16 %v2933_v45 }
 0x764   : > { %v2876_v13 = vsel %vm2828_vm12, %v2872_v42, 0.0  ;;  %v11457_v20 = vsel %vm2828_vm12, %v2872_v42, %v11392_v18  ;;  %4747 = vmatpush.msra.mxu3 %v11459_v11  ;;  %v11466_v18 = vld [vmem:[#allocation7 + $0x38] sm:$0xff]  ;;  %v2950_v25 = vunpack.c.l.bf16 %v2934_v62  ;;  %v2951_v26 = vunpack.c.l.bf16 %v2935_v51 }
 0x765   : > { %v2886_v10 = vrot.slane %v2876_v13, 1  ;;  %v2887_v58 = vrot.slane %v2876_v13, 2  ;;  %v2888_v19 = vrot.slane %v2876_v13, 3  ;;  %2915 = vst [vmem:[#allocation3 + $0x10a] sm:$0x1] %v2876_v13  ;;  %2976 = vmatmul.f32.gmra.mxu3 %v11457_v20  ;;  %v2889_v53 = vrot.slane %v2876_v13, 4 }
 0x766   : > { %4748 = vmatpush.msra.mxu3 %v11463_v29  ;;  %v2890_v54 = vrot.slane %v2876_v13, 5  ;;  %v2891_v0 = vrot.slane %v2876_v13, 6  ;;  %v2892_v55 = vrot.slane %v2876_v13, 7  ;;  %v2937_v13 = vld [vmem:[%s10437_s0 + $0xc4] sm:$0x2] }
 0x767   : > { %2916 = vst [vmem:[#allocation3 + $0x12a] sm:$0x1] %v2886_v10  ;;  %v2938_v10 = vld [vmem:[%s10437_s0 + $0xd4] sm:$0x2] }
 0x768   : > { %2917 = vst [vmem:[#allocation3 + $0x14a] sm:$0x1] %v2887_v58  ;;  %4749 = vmatpush.msra.mxu3 %v11466_v18  ;;  %v2939_v58 = vld [vmem:[%s10437_s0 + $0xe4] sm:$0x2] }
 0x769   : > { %2918 = vst [vmem:[#allocation3 + $0x16a] sm:$0x1] %v2888_v19 }
 0x76a   : > { %2919 = vst [vmem:[#allocation3 + $0x18a] sm:$0x1] %v2889_v53  ;;  %4750 = vmatpush.msra.mxu3 %v11469_v24  ;;  %v2952_v53 = vunpack.c.l.bf16 %v2936_v12 }
 0x76b   : > { %2920 = vst [vmem:[#allocation3 + $0x1aa] sm:$0x1] %v2890_v54 }
 0x76c   : > { %2921 = vst [vmem:[#allocation3 + $0x1ca] sm:$0x1] %v2891_v0  ;;  %4751 = vmatpush.msra.mxu3 %v11472_v56  ;;  %v2940_v0 = vld [vmem:[%s10437_s0 + $0xf4] sm:$0x2] }
 0x76d   : > { %2922 = vst [vmem:[#allocation3 + $0x1ea] sm:$0x1] %v2892_v55 }
 0x76e   : > { %4752 = vmatpush.msra.mxu3 %v11475_v50 }
 0x770   : > { %4753 = vmatpush.msra.mxu3 %v11478_v59 }
 0x772   : > { %4754 = vmatpush.msra.mxu3 %v11481_v23 }
 0x774   : > { %4755 = vmatpush.msra.mxu3 %v11484_v60 }
 0x776   : > { %4756 = vmatpush.msra.mxu3 %v11487_v1 }
 0x7da   : > { %v2974_v30 = vpop.f32.mrf.mxu3 }
 0x7db   : > { %v2982_v41 = vrot.slane %v2974_v30, 5  ;;  %v2983_v44 = vrot.slane %v2974_v30, 6  ;;  %v2984_v22 = vrot.slane %v2974_v30, 7  ;;  %v2985_v31 = vrot.slane %v2974_v30, 1 }
 0x7dc   : > { %v3015_v3 = vadd.f32 %v2974_v30, %v2944_v63  ;;  %v2986_v28 = vrot.slane %v2974_v30, 2  ;;  %v2987_v32 = vrot.slane %v2974_v30, 3  ;;  %v2988_v36 = vrot.slane %v2974_v30, 4 }
 0x7dd   : > { %v3012_v43 = vadd.f32 %v2982_v41, %v2941_v46  ;;  %v3013_v40 = vadd.f32 %v2983_v44, %v2942_v16  ;;  %v3014_v2 = vadd.f32 %v2984_v22, %v2943_v17  ;;  %v3016_v38 = vadd.f32 %v2985_v31, %v2945_v52 }
 0x7de   : > { %9145 = vtanh.f32 %v3015_v3  ;;  %v3017_v9 = vadd.f32 %v2986_v28, %v2946_v21  ;;  %v3018_v15 = vadd.f32 %v2987_v32, %v2947_v37  ;;  %v3019_v47 = vadd.f32 %v2988_v36, %v2948_v27 }
 0x7df   : > { %9147 = vtanh.f32 %v3012_v43  ;;  %v2953_v63 = vunpack.c.l.bf16 %v2937_v13  ;;  %v2954_v46 = vunpack.c.l.bf16 %v2938_v10  ;;  %v2955_v16 = vunpack.c.l.bf16 %v2939_v58 }
 0x7e0   : > { %9149 = vtanh.f32 %v3013_v40  ;;  %v2956_v21 = vunpack.c.l.bf16 %v2940_v0 }
 0x7e1   : > { %9151 = vtanh.f32 %v3014_v2 }
 0x7e2   : > { %9153 = vtanh.f32 %v3016_v38 }
 0x7e3   : > { %9155 = vtanh.f32 %v3017_v9  ;;  %v3046_v9 = vpop.permute.xlu1 %3045 }
 0x7e4   : > { %v9146_v34 = vpop.eup %9145  ;;  %9157 = vtanh.f32 %v3018_v15  ;;  %vm3050_vm13 = vcmp.eq.s32.totalorder %v3046_v9, 1 }
 0x7e5   : > { %v9148_v42 = vpop.eup %9147  ;;  %9159 = vtanh.f32 %v3019_v47 }
 0x7e6   : > { %v9150_v19 = vpop.eup %9149  ;;  %v3068_v54 = vrot.slane %v9148_v42, 3 }
 0x7e7   : > { %v9152_v55 = vpop.eup %9151  ;;  %v3069_v57 = vrot.slane %v9150_v19, 2 }
 0x7e8   : > { %v9154_v6 = vpop.eup %9153  ;;  %v2977_v14 = vpop.f32.mrf.mxu3  ;;  %v3071_v33 = vrot.slane %v9152_v55, 1 }
 0x7e9   : > { %v9156_v17 = vpop.eup %9155  ;;  %v2989_v49 = vrot.slane %v2977_v14, 5  ;;  %v2990_v30 = vrot.slane %v2977_v14, 6  ;;  %v2991_v52 = vrot.slane %v2977_v14, 7  ;;  %v3023_v41 = vadd.f32 %v2977_v14, %v2952_v53 }
 0x7ea   : > { %v9158_v37 = vpop.eup %9157  ;;  %v3070_v44 = vsel %vm609_vm2, %v3069_v57, %v3068_v54  ;;  %v3074_v22 = vrot.slane %v9154_v6, 7  ;;  %v2992_v31 = vrot.slane %v2977_v14, 1  ;;  %v3076_v43 = vrot.slane %v9156_v17, 6 }
 0x7eb   : > { %v9160_v3 = vpop.eup %9159  ;;  %v3020_v27 = vadd.f32 %v2989_v49, %v2949_v61  ;;  %v3021_v28 = vadd.f32 %v2990_v30, %v2950_v25  ;;  %v3072_v32 = vsel %vm612_vm3, %v3071_v33, %v3070_v44  ;;  %v3078_v2 = vrot.slane %v9158_v37, 5 }
 0x7ec   : > { %v3073_v40 = vsel %vm615_vm4, %v9146_v34, %v3072_v32  ;;  %v3080_v36 = vrot.slane %v9160_v3, 4  ;;  %v2993_v38 = vrot.slane %v2977_v14, 2  ;;  %v2994_v47 = vrot.slane %v2977_v14, 3 }
 0x7ed   : > { %9161 = vtanh.f32 %v3020_v27  ;;  %v3075_v15 = vsel %vm618_vm5, %v3074_v22, %v3073_v40  ;;  %v2995_v12 = vrot.slane %v2977_v14, 4  ;;  %v3022_v62 = vadd.f32 %v2991_v52, %v2951_v26 }
 0x7ee   : > { %9163 = vtanh.f32 %v3021_v28  ;;  %v3077_v45 = vsel %vm621_vm6, %v3076_v43, %v3075_v15  ;;  %v3024_v51 = vadd.f32 %v2992_v31, %v2953_v63  ;;  %v3025_v13 = vadd.f32 %v2993_v38, %v2954_v46  ;;  %v3049_v31 = vpop.permute.xlu2 %3048 }
 0x7ef   : > { %v3079_v42 = vsel %vm624_vm7, %v3078_v2, %v3077_v45  ;;  %v3026_v10 = vadd.f32 %v2994_v47, %v2955_v16  ;;  %9165 = vtanh.f32 %v3022_v62  ;;  %v3027_v53 = vadd.f32 %v2995_v12, %v2956_v21  ;;  %v3148_v62 = vld [vmem:[%s10437_s0 + $0x4] sm:$0x4] }
 0x7f0   : > { %v3081_v34 = vsel %vm627_vm8, %v3080_v36, %v3079_v42  ;;  %9167 = vtanh.f32 %v3024_v51  ;;  %vm3051_vm14 = vcmp.eq.s32.totalorder %v3049_v31, 1  ;;  %v3149_v51 = vld [vmem:[%s10437_s0 + $0x14] sm:$0x4]  ;;  %v3150_v42 = vld [vmem:[%s10437_s0 + $0x24] sm:$0x4] }
 0x7f1   : > { %v3098_v58 = vsel %vm3050_vm13, %v3081_v34, 0.0  ;;  %v11514_v19 = vsel %vm3050_vm13, %v3081_v34, %v11428_v7  ;;  %9169 = vtanh.f32 %v3023_v41  ;;  %v3153_v34 = vld [vmem:[%s10437_s0 + $0x54] sm:$0x4] }
 0x7f2   : > { %v3102_v54 = vrot.slane %v3098_v58, 1  ;;  %v3103_v0 = vrot.slane %v3098_v58, 2  ;;  %v3104_v55 = vrot.slane %v3098_v58, 3  ;;  %3130 = vst [vmem:[#allocation3 + $0xb] sm:$0x1] %v3098_v58  ;;  %3196 = vmatmul.f32.vlgmr.msrb.gmra.mxu0 %v11514_v19  ;;  %v3105_v25 = vrot.slane %v3098_v58, 4 }
 0x7f3   : > { %v9162_v61 = vpop.eup %9161  ;;  %9171 = vtanh.f32 %v3025_v13  ;;  %4964 = vmatpush.msrb.mxu0 %v11431_v39  ;;  %v3106_v26 = vrot.slane %v3098_v58, 5  ;;  %v3107_v6 = vrot.slane %v3098_v58, 6  ;;  %v3108_v63 = vrot.slane %v3098_v58, 7  ;;  %v3151_v13 = vld [vmem:[%s10437_s0 + $0x34] sm:$0x4] }
 0x7f4   : > { %v9164_v57 = vpop.eup %9163  ;;  %3131 = vst [vmem:[#allocation3 + $0x2b] sm:$0x1] %v3102_v54  ;;  %9173 = vtanh.f32 %v3026_v10  ;;  %v3082_v7 = vrot.slane %v9162_v61, 3  ;;  %v3164_v10 = vunpack.c.l.bf16 %v3148_v62  ;;  %v3165_v58 = vunpack.c.l.bf16 %v3149_v51  ;;  %v3154_v54 = vld [vmem:[%s10437_s0 + $0x64] sm:$0x4] }
 0x7f5   : > { %3132 = vst [vmem:[#allocation3 + $0x4b] sm:$0x1] %v3103_v0  ;;  %9175 = vtanh.f32 %v3027_v53  ;;  %v3083_v14 = vrot.slane %v9164_v57, 2  ;;  %4965 = vmatpush.msrb.mxu0 %v11434_v8  ;;  %v9166_v33 = vpop.eup %9165  ;;  %v3166_v53 = vunpack.c.l.bf16 %v3150_v42  ;;  %v3155_v0 = vld [vmem:[%s10437_s0 + $0x74] sm:$0x4]  ;;  %v3167_v61 = vunpack.c.l.bf16 %v3151_v13 }
 0x7f6   : > { %3133 = vst [vmem:[#allocation3 + $0x6b] sm:$0x1] %v3104_v55  ;;  %v9168_v46 = vpop.eup %9167  ;;  %v3085_v17 = vrot.slane %v9166_v33, 1  ;;  %v3152_v57 = vld [vmem:[%s10437_s0 + $0x44] sm:$0x4]  ;;  %v3170_v33 = vunpack.c.l.bf16 %v3154_v54 }
 0x7f7   : > { %3134 = vst [vmem:[#allocation3 + $0x8b] sm:$0x1] %v3105_v25  ;;  %v3084_v16 = vsel %vm609_vm2, %v3083_v14, %v3082_v7  ;;  %4966 = vmatpush.msrb.mxu0 %v11437_v35  ;;  %v9170_v49 = vpop.eup %9169  ;;  %v3088_v21 = vrot.slane %v9168_v46, 7  ;;  %v3169_v25 = vunpack.c.l.bf16 %v3153_v34 }
 0x7f8   : > { %3135 = vst [vmem:[#allocation3 + $0xab] sm:$0x1] %v3106_v26  ;;  %v3086_v52 = vsel %vm612_vm3, %v3085_v17, %v3084_v16 }
 0x7f9   : > { %v9172_v30 = vpop.eup %9171  ;;  %3136 = vst [vmem:[#allocation3 + $0xcb] sm:$0x1] %v3107_v6  ;;  %4967 = vmatpush.msrb.mxu0 %v11442_v5  ;;  %v3087_v41 = vsel %vm615_vm4, %v9170_v49, %v3086_v52 }
 0x7fa   : > { %v9174_v37 = vpop.eup %9173  ;;  %3137 = vst [vmem:[#allocation3 + $0xeb] sm:$0x1] %v3108_v63  ;;  %v3090_v44 = vrot.slane %v9172_v30, 6  ;;  %v3089_v3 = vsel %vm618_vm5, %v3088_v21, %v3087_v41  ;;  %v3171_v63 = vunpack.c.l.bf16 %v3155_v0  ;;  %v3168_v21 = vunpack.c.l.bf16 %v3152_v57 }
 0x7fb   : > { %v9176_v22 = vpop.eup %9175  ;;  %v3092_v27 = vrot.slane %v9174_v37, 5  ;;  %4968 = vmatpush.msrb.mxu0 %v11447_v4 }
 0x7fc   : > { %v3091_v28 = vsel %vm621_vm6, %v3090_v44, %v3089_v3  ;;  %v3094_v32 = vrot.slane %v9176_v22, 4  ;;  %v3160_v3 = vld [vmem:[%s10437_s0 + $0xc4] sm:$0x4] }
 0x7fd   : > { %v3093_v43 = vsel %vm624_vm7, %v3092_v27, %v3091_v28  ;;  %4969 = vmatpush.msrb.mxu0 %v11452_v48  ;;  %v3156_v27 = vld [vmem:[%s10437_s0 + $0x84] sm:$0x4]  ;;  %v3157_v28 = vld [vmem:[%s10437_s0 + $0x94] sm:$0x4] }
 0x7fe   : > { %v3095_v40 = vsel %vm627_vm8, %v3094_v32, %v3093_v43  ;;  %v3158_v32 = vld [vmem:[%s10437_s0 + $0xa4] sm:$0x4]  ;;  %v3173_v62 = vunpack.c.l.bf16 %v3157_v28 }
 0x7ff   : > { %v3099_v2 = vsel %vm3051_vm14, %v3095_v40, 0.0  ;;  %v11531_v36 = vsel %vm3051_vm14, %v3095_v40, %v11457_v20  ;;  %4970 = vmatpush.msrb.mxu0 %v11459_v11  ;;  %v3159_v40 = vld [vmem:[%s10437_s0 + $0xb4] sm:$0x4]  ;;  %v3174_v42 = vunpack.c.l.bf16 %v3158_v32 }
 0x800   : > { %v3109_v38 = vrot.slane %v3099_v2, 1  ;;  %v3110_v9 = vrot.slane %v3099_v2, 2  ;;  %v3111_v15 = vrot.slane %v3099_v2, 3  ;;  %3138 = vst [vmem:[#allocation3 + $0x10b] sm:$0x1] %v3099_v2  ;;  %3199 = vmatmul.f32.gmra.mxu0 %v11531_v36  ;;  %v3112_v47 = vrot.slane %v3099_v2, 4 }
 0x801   : > { %4971 = vmatpush.msrb.mxu0 %v11463_v29  ;;  %v3113_v12 = vrot.slane %v3099_v2, 5  ;;  %v3114_v45 = vrot.slane %v3099_v2, 6  ;;  %v3115_v20 = vrot.slane %v3099_v2, 7  ;;  %v3161_v2 = vld [vmem:[%s10437_s0 + $0xd4] sm:$0x4] }
 0x802   : > { %3139 = vst [vmem:[#allocation3 + $0x12b] sm:$0x1] %v3109_v38  ;;  %v3162_v38 = vld [vmem:[%s10437_s0 + $0xe4] sm:$0x4] }
 0x803   : > { %3140 = vst [vmem:[#allocation3 + $0x14b] sm:$0x1] %v3110_v9  ;;  %4972 = vmatpush.msrb.mxu0 %v11466_v18  ;;  %v3178_v54 = vunpack.c.l.bf16 %v3162_v38 }
 0x804   : > { %3141 = vst [vmem:[#allocation3 + $0x16b] sm:$0x1] %v3111_v15  ;;  %v3176_v15 = vunpack.c.l.bf16 %v3160_v3 }
 0x805   : > { %3142 = vst [vmem:[#allocation3 + $0x18b] sm:$0x1] %v3112_v47  ;;  %4973 = vmatpush.msrb.mxu0 %v11469_v24 }
 0x806   : > { %3143 = vst [vmem:[#allocation3 + $0x1ab] sm:$0x1] %v3113_v12  ;;  %v3163_v12 = vld [vmem:[%s10437_s0 + $0xf4] sm:$0x4] }
 0x807   : > { %3144 = vst [vmem:[#allocation3 + $0x1cb] sm:$0x1] %v3114_v45  ;;  %4974 = vmatpush.msrb.mxu0 %v11472_v56  ;;  %v3179_v57 = vunpack.c.l.bf16 %v3163_v12 }
 0x808   : > { %3145 = vst [vmem:[#allocation3 + $0x1eb] sm:$0x1] %v3115_v20  ;;  %v3172_v20 = vunpack.c.l.bf16 %v3156_v27 }
 0x809   : > { %4975 = vmatpush.msrb.mxu0 %v11475_v50 }
 0x80b   : > { %4976 = vmatpush.msrb.mxu0 %v11478_v59 }
 0x80d   : > { %4977 = vmatpush.msrb.mxu0 %v11481_v23 }
 0x80f   : > { %4978 = vmatpush.msrb.mxu0 %v11484_v60 }
 0x811   : > { %4979 = vmatpush.msrb.mxu0 %v11487_v1 }
 0x86f   : > { %v3197_v55 = vpop.f32.mrf.mxu0 }
 0x870   : > { %v3205_v26 = vrot.slane %v3197_v55, 4  ;;  %v3206_v7 = vrot.slane %v3197_v55, 5  ;;  %v3207_v6 = vrot.slane %v3197_v55, 6  ;;  %v3208_v14 = vrot.slane %v3197_v55, 7 }
 0x871   : > { %v3209_v46 = vrot.slane %v3197_v55, 1  ;;  %v3210_v16 = vrot.slane %v3197_v55, 2  ;;  %v3211_v52 = vrot.slane %v3197_v55, 3  ;;  %v3239_v31 = vadd.f32 %v3197_v55, %v3168_v21 }
 0x872   : > { %v3235_v17 = vadd.f32 %v3205_v26, %v3164_v10  ;;  %v3236_v49 = vadd.f32 %v3206_v7, %v3165_v58  ;;  %v3237_v30 = vadd.f32 %v3207_v6, %v3166_v53  ;;  %v3238_v37 = vadd.f32 %v3208_v14, %v3167_v61 }
 0x873   : > { %v3240_v41 = vadd.f32 %v3209_v46, %v3169_v25  ;;  %v3241_v44 = vadd.f32 %v3210_v16, %v3170_v33  ;;  %v3242_v22 = vadd.f32 %v3211_v52, %v3171_v63  ;;  %v3175_v58 = vunpack.c.l.bf16 %v3159_v40 }
 0x874   : > { %9177 = vtanh.f32 %v3235_v17  ;;  %v3177_v53 = vunpack.c.l.bf16 %v3161_v2 }
 0x875   : > { %9179 = vtanh.f32 %v3236_v49 }
 0x876   : > { %9181 = vtanh.f32 %v3237_v30 }
 0x877   : > { %9183 = vtanh.f32 %v3238_v37 }
 0x878   : > { %9185 = vtanh.f32 %v3240_v41 }
 0x879   : > { %9187 = vtanh.f32 %v3241_v44  ;;  %v3269_v44 = vpop.permute.xlu0 %3268 }
 0x87a   : > { %v9178_v43 = vpop.eup %9177  ;;  %9189 = vtanh.f32 %v3242_v22  ;;  %vm3273_vm15 = vcmp.eq.s32.totalorder %v3269_v44, 1 }
 0x87b   : > { %v9180_v9 = vpop.eup %9179  ;;  %9191 = vtanh.f32 %v3239_v31  ;;  %v3291_v47 = vrot.slane %v9178_v43, 4 }
 0x87c   : > { %v9182_v45 = vpop.eup %9181  ;;  %v3292_v51 = vrot.slane %v9180_v9, 3 }
 0x87d   : > { %v9184_v13 = vpop.eup %9183  ;;  %v3200_v34 = vpop.f32.mrf.mxu0  ;;  %v3294_v10 = vrot.slane %v9182_v45, 2 }
 0x87e   : > { %v9186_v0 = vpop.eup %9185  ;;  %v3212_v55 = vrot.slane %v3200_v34, 4  ;;  %v3213_v61 = vrot.slane %v3200_v34, 5  ;;  %v3214_v25 = vrot.slane %v3200_v34, 6  ;;  %v3215_v7 = vrot.slane %v3200_v34, 7 }
 0x87f   : > { %v9188_v26 = vpop.eup %9187  ;;  %v3247_v6 = vadd.f32 %v3200_v34, %v3176_v15  ;;  %v3293_v14 = vsel %vm609_vm2, %v3292_v51, %v3291_v47  ;;  %v3296_v33 = vrot.slane %v9184_v13, 1  ;;  %v3299_v49 = vrot.slane %v9186_v0, 7 }
 0x880   : > { %v9190_v63 = vpop.eup %9189  ;;  %v3243_v46 = vadd.f32 %v3212_v55, %v3172_v20  ;;  %v3244_v16 = vadd.f32 %v3213_v61, %v3173_v62  ;;  %v3295_v17 = vsel %vm612_vm3, %v3294_v10, %v3293_v14  ;;  %v3301_v21 = vrot.slane %v9188_v26, 6  ;;  %v3272_v14 = vpop.permute.xlu1 %3271 }
 0x881   : > { %v9192_v30 = vpop.eup %9191  ;;  %v3297_v52 = vsel %vm615_vm4, %v3296_v33, %v3295_v17  ;;  %v3303_v37 = vrot.slane %v9190_v63, 5  ;;  %v3216_v41 = vrot.slane %v3200_v34, 1  ;;  %v3217_v31 = vrot.slane %v3200_v34, 2 }
 0x882   : > { %9193 = vtanh.f32 %v3243_v46  ;;  %v3298_v22 = vsel %vm618_vm5, %v9192_v30, %v3297_v52  ;;  %v3218_v3 = vrot.slane %v3200_v34, 3  ;;  %v3245_v28 = vadd.f32 %v3214_v25, %v3174_v42 }
 0x883   : > { %9195 = vtanh.f32 %v3244_v16  ;;  %v3300_v27 = vsel %vm621_vm6, %v3299_v49, %v3298_v22  ;;  %v3246_v32 = vadd.f32 %v3215_v7, %v3175_v58  ;;  %v3248_v40 = vadd.f32 %v3216_v41, %v3177_v53  ;;  %v3375_v41 = vld [vmem:[%s10437_s0 + $0x44] sm:$0x4] }
 0x884   : > { %v3302_v43 = vsel %vm624_vm7, %v3301_v21, %v3300_v27  ;;  %v3249_v38 = vadd.f32 %v3217_v31, %v3178_v54  ;;  %9197 = vtanh.f32 %v3245_v28  ;;  %v3250_v47 = vadd.f32 %v3218_v3, %v3179_v57  ;;  %v3377_v31 = vld [vmem:[%s10437_s0 + $0x64] sm:$0x4]  ;;  %v3378_v3 = vld [vmem:[%s10437_s0 + $0x74] sm:$0x4] }
 0x885   : > { %v3304_v2 = vsel %vm627_vm8, %v3303_v37, %v3302_v43  ;;  %9199 = vtanh.f32 %v3246_v32  ;;  %vm3274_vm0 = vcmp.eq.s32.totalorder %v3272_v14, 1  ;;  %v3376_v43 = vld [vmem:[%s10437_s0 + $0x54] sm:$0x4] }
 0x886   : > { %v3321_v9 = vsel %vm3273_vm15, %v3304_v2, 0.0  ;;  %v11568_v15 = vsel %vm3273_vm15, %v3304_v2, %v11514_v19  ;;  %9201 = vtanh.f32 %v3247_v6  ;;  %v3394_v2 = vunpack.c.l.bf16 %v3378_v3 }
 0x887   : > { %v3325_v12 = vrot.slane %v3321_v9, 1  ;;  %v3326_v45 = vrot.slane %v3321_v9, 2  ;;  %v3327_v20 = vrot.slane %v3321_v9, 3  ;;  %3353 = vst [vmem:[#allocation3 + $0xc] sm:$0x1] %v3321_v9  ;;  %3419 = vmatmul.f32.vlgmr.msrb.gmra.mxu1 %v11568_v15  ;;  %v3328_v51 = vrot.slane %v3321_v9, 4 }
 0x888   : > { %v9194_v62 = vpop.eup %9193  ;;  %9203 = vtanh.f32 %v3248_v40  ;;  %5187 = vmatpush.msrb.mxu1 %v11431_v39  ;;  %v3329_v13 = vrot.slane %v3321_v9, 5  ;;  %v3330_v34 = vrot.slane %v3321_v9, 6  ;;  %v3331_v53 = vrot.slane %v3321_v9, 7 }
 0x889   : > { %v9196_v42 = vpop.eup %9195  ;;  %3354 = vst [vmem:[#allocation3 + $0x2c] sm:$0x1] %v3325_v12  ;;  %9205 = vtanh.f32 %v3249_v38  ;;  %v3305_v19 = vrot.slane %v9194_v62, 4  ;;  %v3393_v40 = vunpack.c.l.bf16 %v3377_v31  ;;  %v3392_v62 = vunpack.c.l.bf16 %v3376_v43 }
 0x88a   : > { %3355 = vst [vmem:[#allocation3 + $0x4c] sm:$0x1] %v3326_v45  ;;  %9207 = vtanh.f32 %v3250_v47  ;;  %v3306_v10 = vrot.slane %v9196_v42, 3  ;;  %5188 = vmatpush.msrb.mxu1 %v11434_v8  ;;  %v9198_v58 = vpop.eup %9197 }
 0x88b   : > { %3356 = vst [vmem:[#allocation3 + $0x6c] sm:$0x1] %v3327_v20  ;;  %v9200_v54 = vpop.eup %9199  ;;  %v3308_v55 = vrot.slane %v9198_v58, 2  ;;  %v11609_v58 = vld [vmem:[%s10437_s0 + $0xd4] sm:$0x4] }
 0x88c   : > { %3357 = vst [vmem:[#allocation3 + $0x8c] sm:$0x1] %v3328_v51  ;;  %v3307_v0 = vsel %vm609_vm2, %v3306_v10, %v3305_v19  ;;  %5189 = vmatpush.msrb.mxu1 %v11437_v35  ;;  %v9202_v39 = vpop.eup %9201  ;;  %v3310_v61 = vrot.slane %v9200_v54, 1  ;;  %v3380_v10 = vld [vmem:[%s10437_s0 + $0x94] sm:$0x4] }
 0x88d   : > { %3358 = vst [vmem:[#allocation3 + $0xac] sm:$0x1] %v3329_v13  ;;  %v3309_v57 = vsel %vm612_vm3, %v3308_v55, %v3307_v0  ;;  %v3381_v54 = vld [vmem:[%s10437_s0 + $0xa4] sm:$0x4]  ;;  %v3382_v0 = vld [vmem:[%s10437_s0 + $0xb4] sm:$0x4] }
 0x88e   : > { %v9204_v25 = vpop.eup %9203  ;;  %3359 = vst [vmem:[#allocation3 + $0xcc] sm:$0x1] %v3330_v34  ;;  %5190 = vmatpush.msrb.mxu1 %v11442_v5  ;;  %v3311_v26 = vsel %vm615_vm4, %v3310_v61, %v3309_v57  ;;  %v3379_v34 = vld [vmem:[%s10437_s0 + $0x84] sm:$0x4] }
 0x88f   : > { %v9206_v8 = vpop.eup %9205  ;;  %3360 = vst [vmem:[#allocation3 + $0xec] sm:$0x1] %v3331_v53  ;;  %v3313_v7 = vrot.slane %v9204_v25, 7  ;;  %v3312_v33 = vsel %vm618_vm5, %v9202_v39, %v3311_v26  ;;  %v3383_v55 = vld [vmem:[%s10437_s0 + $0xc4] sm:$0x4]  ;;  %v3395_v61 = vunpack.c.l.bf16 %v3379_v34  ;;  %v11628_v34 = vld [vmem:[#allocation7 + $0x78] sm:$0xff] }
 0x890   : > { %v9208_v6 = vpop.eup %9207  ;;  %v3315_v63 = vrot.slane %v9206_v8, 6  ;;  %5191 = vmatpush.msrb.mxu1 %v11447_v4  ;;  %v3385_v57 = vld [vmem:[%s10437_s0 + $0xe4] sm:$0x4]  ;;  %v3386_v8 = vld [vmem:[%s10437_s0 + $0xf4] sm:$0x4] }
 0x891   : > { %v3314_v35 = vsel %vm621_vm6, %v3313_v7, %v3312_v33  ;;  %v3317_v46 = vrot.slane %v9208_v6, 5  ;;  %v3396_v7 = vunpack.c.l.bf16 %v3380_v10  ;;  %v3400_v6 = vunpack.c.l.bf16 %v11609_v58 }
 0x892   : > { %v3316_v16 = vsel %vm624_vm7, %v3315_v63, %v3314_v35  ;;  %5192 = vmatpush.msrb.mxu1 %v11452_v48 }
 0x893   : > { %v3318_v5 = vsel %vm627_vm8, %v3317_v46, %v3316_v16  ;;  %v3397_v46 = vunpack.c.l.bf16 %v3381_v54  ;;  %v3398_v16 = vunpack.c.l.bf16 %v3382_v0  ;;  %v11631_v0 = vld [vmem:[#allocation7 + $0x70] sm:$0xff] }
 0x894   : > { %v3322_v17 = vsel %vm3274_vm0, %v3318_v5, 0.0  ;;  %v11585_v49 = vsel %vm3274_vm0, %v3318_v5, %v11531_v36  ;;  %5193 = vmatpush.msrb.mxu1 %v11459_v11  ;;  %v3371_v11 = vld [vmem:[%s10437_s0 + $0x4] sm:$0x4]  ;;  %v3399_v5 = vunpack.c.l.bf16 %v3383_v55 }
 0x895   : > { %v3332_v30 = vrot.slane %v3322_v17, 1  ;;  %v3333_v52 = vrot.slane %v3322_v17, 2  ;;  %v3334_v21 = vrot.slane %v3322_v17, 3  ;;  %3361 = vst [vmem:[#allocation3 + $0x10c] sm:$0x1] %v3322_v17  ;;  %3422 = vmatmul.f32.gmra.mxu1 %v11585_v49  ;;  %v3335_v4 = vrot.slane %v3322_v17, 4 }
 0x896   : > { %5194 = vmatpush.msrb.mxu1 %v11463_v29  ;;  %v3336_v37 = vrot.slane %v3322_v17, 5  ;;  %v3337_v48 = vrot.slane %v3322_v17, 6  ;;  %v3338_v36 = vrot.slane %v3322_v17, 7  ;;  %v3372_v29 = vld [vmem:[%s10437_s0 + $0x14] sm:$0x4]  ;;  %v3387_v44 = vunpack.c.l.bf16 %v3371_v11 }
 0x897   : > { %3362 = vst [vmem:[#allocation3 + $0x12c] sm:$0x1] %v3332_v30 }
 0x898   : > { %3363 = vst [vmem:[#allocation3 + $0x14c] sm:$0x1] %v3333_v52  ;;  %5195 = vmatpush.msrb.mxu1 %v11466_v18  ;;  %v3373_v18 = vld [vmem:[%s10437_s0 + $0x24] sm:$0x4] }
 0x899   : > { %3364 = vst [vmem:[#allocation3 + $0x16c] sm:$0x1] %v3334_v21  ;;  %v3389_v22 = vunpack.c.l.bf16 %v3373_v18  ;;  %v3401_v21 = vunpack.c.l.bf16 %v3385_v57 }
 0x89a   : > { %3365 = vst [vmem:[#allocation3 + $0x18c] sm:$0x1] %v3335_v4  ;;  %5196 = vmatpush.msrb.mxu1 %v11469_v24  ;;  %v3374_v24 = vld [vmem:[%s10437_s0 + $0x34] sm:$0x4]  ;;  %v3402_v4 = vunpack.c.l.bf16 %v3386_v8  ;;  %v11635_v8 = vld [vmem:[#allocation7 + $0x68] sm:$0xff] }
 0x89b   : > { %3366 = vst [vmem:[#allocation3 + $0x1ac] sm:$0x1] %v3336_v37  ;;  %v3390_v27 = vunpack.c.l.bf16 %v3374_v24 }
 0x89c   : > { %3367 = vst [vmem:[#allocation3 + $0x1cc] sm:$0x1] %v3337_v48  ;;  %5197 = vmatpush.msrb.mxu1 %v11472_v56  ;;  %v3388_v56 = vunpack.c.l.bf16 %v3372_v29 }
 0x89d   : > { %3368 = vst [vmem:[#allocation3 + $0x1ec] sm:$0x1] %v3338_v36 }
 0x89e   : > { %5198 = vmatpush.msrb.mxu1 %v11475_v50 }
 0x8a0   : > { %5199 = vmatpush.msrb.mxu1 %v11478_v59  ;;  %v3391_v59 = vunpack.c.l.bf16 %v3375_v41 }
 0x8a2   : > { %5200 = vmatpush.msrb.mxu1 %v11481_v23 }
 0x8a4   : > { %5201 = vmatpush.msrb.mxu1 %v11484_v60 }
 0x8a6   : > { %5202 = vmatpush.msrb.mxu1 %v11487_v1 }
 0x904   : > { %v3420_v50 = vpop.f32.mrf.mxu1 }
 0x905   : > { %v3428_v28 = vrot.slane %v3420_v50, 3  ;;  %v3429_v23 = vrot.slane %v3420_v50, 4  ;;  %v3430_v32 = vrot.slane %v3420_v50, 5  ;;  %v3431_v60 = vrot.slane %v3420_v50, 6 }
 0x906   : > { %v3432_v1 = vrot.slane %v3420_v50, 7  ;;  %v3433_v38 = vrot.slane %v3420_v50, 1  ;;  %v3434_v45 = vrot.slane %v3420_v50, 2  ;;  %v3463_v19 = vadd.f32 %v3420_v50, %v3392_v62 }
 0x907   : > { %v3458_v9 = vadd.f32 %v3428_v28, %v3387_v44  ;;  %v3459_v47 = vadd.f32 %v3429_v23, %v3388_v56  ;;  %v3460_v12 = vadd.f32 %v3430_v32, %v3389_v22  ;;  %v3461_v20 = vadd.f32 %v3431_v60, %v3390_v27 }
 0x908   : > { %v3462_v51 = vadd.f32 %v3432_v1, %v3391_v59  ;;  %v3464_v42 = vadd.f32 %v3433_v38, %v3393_v40  ;;  %v3465_v13 = vadd.f32 %v3434_v45, %v3394_v2  ;;  %v3492_v59 = vpop.permute.xlu2 %3491 }
 0x909   : > { %9209 = vtanh.f32 %v3458_v9  ;;  %vm3496_vm1 = vcmp.eq.s32.totalorder %v3492_v59, 1  ;;  %v11669_v59 = vld [vmem:[#allocation7 + $0x28] sm:$0xff] }
 0x90a   : > { %9211 = vtanh.f32 %v3459_v47 }
 0x90b   : > { %9213 = vtanh.f32 %v3460_v12 }
 0x90c   : > { %9215 = vtanh.f32 %v3461_v20 }
 0x90d   : > { %9217 = vtanh.f32 %v3462_v51 }
 0x90e   : > { %9219 = vtanh.f32 %v3464_v42 }
 0x90f   : > { %v9210_v53 = vpop.eup %9209  ;;  %9221 = vtanh.f32 %v3465_v13 }
 0x910   : > { %v9212_v39 = vpop.eup %9211  ;;  %v3514_v25 = vrot.slane %v9210_v53, 5  ;;  %9223 = vtanh.f32 %v3463_v19 }
 0x911   : > { %v9214_v26 = vpop.eup %9213  ;;  %v3515_v14 = vrot.slane %v9212_v39, 4 }
 0x912   : > { %v9216_v33 = vpop.eup %9215  ;;  %v3423_v63 = vpop.f32.mrf.mxu1  ;;  %v3517_v35 = vrot.slane %v9214_v26, 3 }
 0x913   : > { %v9218_v17 = vpop.eup %9217  ;;  %v3435_v30 = vrot.slane %v3423_v63, 3  ;;  %v3436_v52 = vrot.slane %v3423_v63, 4  ;;  %v3437_v48 = vrot.slane %v3423_v63, 5  ;;  %v3438_v36 = vrot.slane %v3423_v63, 6 }
 0x914   : > { %v9220_v37 = vpop.eup %9219  ;;  %v3516_v11 = vsel %vm609_vm2, %v3515_v14, %v3514_v25  ;;  %v3519_v29 = vrot.slane %v9216_v33, 2  ;;  %v3521_v56 = vrot.slane %v9218_v17, 1  ;;  %v3439_v50 = vrot.slane %v3423_v63, 7  ;;  %v11639_v14 = vld [vmem:[#allocation7 + $0x60] sm:$0xff]  ;;  %v3495_v17 = vpop.permute.xlu1 %3494 }
 0x915   : > { %v9222_v18 = vpop.eup %9221  ;;  %v3466_v24 = vadd.f32 %v3435_v30, %v3395_v61  ;;  %v3467_v41 = vadd.f32 %v3436_v52, %v3396_v7  ;;  %v3518_v44 = vsel %vm612_vm3, %v3517_v35, %v3516_v11  ;;  %v3524_v31 = vrot.slane %v9220_v37, 7  ;;  %v11648_v37 = vld [vmem:[#allocation7 + $0x50] sm:$0xff]  ;;  %v11653_v11 = vld [vmem:[#allocation7 + $0x48] sm:$0xff] }
 0x916   : > { %v3520_v22 = vsel %vm615_vm4, %v3519_v29, %v3518_v44  ;;  %v3526_v3 = vrot.slane %v9222_v18, 6  ;;  %v9224_v27 = vpop.eup %9223  ;;  %v3440_v23 = vrot.slane %v3423_v63, 1  ;;  %v3441_v32 = vrot.slane %v3423_v63, 2 }
 0x917   : > { %9225 = vtanh.f32 %v3466_v24  ;;  %v3522_v28 = vsel %vm618_vm5, %v3521_v56, %v3520_v22  ;;  %v3468_v43 = vadd.f32 %v3437_v48, %v3397_v46  ;;  %v3469_v1 = vadd.f32 %v3438_v36, %v3398_v16  ;;  %v11643_v16 = vld [vmem:[#allocation7 + $0x58] sm:$0xff]  ;;  %v11660_v22 = vld [vmem:[#allocation7 + $0x40] sm:$0xff] }
 0x918   : > { %9227 = vtanh.f32 %v3467_v41  ;;  %v3523_v60 = vsel %vm621_vm6, %v9224_v27, %v3522_v28  ;;  %v3470_v2 = vadd.f32 %v3439_v50, %v3399_v5  ;;  %v3472_v9 = vadd.f32 %v3440_v23, %v3401_v21  ;;  %v11663_v50 = vld [vmem:[#allocation7 + $0x38] sm:$0xff]  ;;  %v11666_v27 = vld [vmem:[#allocation7 + $0x30] sm:$0xff]  ;;  %v11672_v28 = vld [vmem:[#allocation7 + $0x20] sm:$0xff] }
 0x919   : > { %v3525_v40 = vsel %vm624_vm7, %v3524_v31, %v3523_v60  ;;  %9229 = vtanh.f32 %v3468_v43  ;;  %v3473_v45 = vadd.f32 %v3441_v32, %v3402_v4  ;;  %v3471_v20 = vadd.f32 %v3423_v63, %v3400_v6  ;;  %v11675_v23 = vld [vmem:[#allocation7 + $0x18] sm:$0xff]  ;;  %v11678_v32 = vld [vmem:[#allocation7 + $0x10] sm:$0xff]  ;;  %v11681_v60 = vld [vmem:[#allocation7 + $0x8] sm:$0xff] }
 0x91a   : > { %v3527_v38 = vsel %vm627_vm8, %v3526_v3, %v3525_v40  ;;  %9231 = vtanh.f32 %v3469_v1  ;;  %vm3497_vm9 = vcmp.eq.s32.totalorder %v3495_v17, 1  ;;  %v11684_v43 = vld [vmem:[#allocation7] sm:$0xff]  ;;  %v3595_v40 = vld [vmem:[%s10437_s0 + $0x14] sm:$0x8] }
 0x91b   : > { %v3544_v47 = vsel %vm3496_vm1, %v3527_v38, 0.0  ;;  %v11625_v12 = vsel %vm3496_vm1, %v3527_v38, %v11568_v15  ;;  %9233 = vtanh.f32 %v3470_v2  ;;  %v3594_v1 = vld [vmem:[%s10437_s0 + $0x4] sm:$0x8]  ;;  %v3597_v38 = vld [vmem:[%s10437_s0 + $0x34] sm:$0x8] }
 0x91c   : > { %v3548_v62 = vrot.slane %v3544_v47, 1  ;;  %v3549_v51 = vrot.slane %v3544_v47, 2  ;;  %v3550_v42 = vrot.slane %v3544_v47, 3  ;;  %3576 = vst [vmem:[#allocation3 + $0xd] sm:$0x1] %v3544_v47  ;;  %3642 = vmatmul.f32.vlgmr.msrb.gmra.mxu2 %v11625_v12  ;;  %v3551_v19 = vrot.slane %v3544_v47, 4 }
 0x91d   : > { %v9226_v13 = vpop.eup %9225  ;;  %5410 = vmatpush.msrb.mxu2 %v11628_v34  ;;  %v3552_v58 = vrot.slane %v3544_v47, 5  ;;  %9235 = vtanh.f32 %v3472_v9  ;;  %v3553_v53 = vrot.slane %v3544_v47, 6  ;;  %v3554_v39 = vrot.slane %v3544_v47, 7  ;;  %v3596_v2 = vld [vmem:[%s10437_s0 + $0x24] sm:$0x8] }
 0x91e   : > { %v9228_v10 = vpop.eup %9227  ;;  %3577 = vst [vmem:[#allocation3 + $0x2d] sm:$0x1] %v3548_v62  ;;  %v3528_v15 = vrot.slane %v9226_v13, 5  ;;  %9237 = vtanh.f32 %v3473_v45  ;;  %v3598_v9 = vld [vmem:[%s10437_s0 + $0x44] sm:$0x8]  ;;  %v3610_v47 = vunpack.c.l.bf16 %v3594_v1  ;;  %v3611_v45 = vunpack.c.l.bf16 %v3595_v40 }
 0x91f   : > { %3578 = vst [vmem:[#allocation3 + $0x4d] sm:$0x1] %v3549_v51  ;;  %v3529_v54 = vrot.slane %v9228_v10, 4  ;;  %5411 = vmatpush.msrb.mxu2 %v11631_v0  ;;  %v9230_v55 = vpop.eup %9229  ;;  %9239 = vtanh.f32 %v3471_v20  ;;  %v3612_v20 = vunpack.c.l.bf16 %v3596_v2  ;;  %v3599_v62 = vld [vmem:[%s10437_s0 + $0x54] sm:$0x8]  ;;  %v3613_v13 = vunpack.c.l.bf16 %v3597_v38 }
 0x920   : > { %3579 = vst [vmem:[#allocation3 + $0x6d] sm:$0x1] %v3550_v42  ;;  %v9232_v61 = vpop.eup %9231  ;;  %v3531_v57 = vrot.slane %v9230_v55, 3  ;;  %v3601_v51 = vld [vmem:[%s10437_s0 + $0x74] sm:$0x8]  ;;  %v3615_v55 = vunpack.c.l.bf16 %v3599_v62 }
 0x921   : > { %3580 = vst [vmem:[#allocation3 + $0x8d] sm:$0x1] %v3551_v19  ;;  %v3530_v25 = vsel %vm609_vm2, %v3529_v54, %v3528_v15  ;;  %5412 = vmatpush.msrb.mxu2 %v11635_v8  ;;  %v3533_v26 = vrot.slane %v9232_v61, 2  ;;  %v9234_v7 = vpop.eup %9233  ;;  %v3614_v19 = vunpack.c.l.bf16 %v3598_v9  ;;  %v3609_v38 = vld [vmem:[%s10437_s0 + $0xf4] sm:$0x8] }
 0x922   : > { %3581 = vst [vmem:[#allocation3 + $0xad] sm:$0x1] %v3552_v58  ;;  %v3532_v6 = vsel %vm612_vm3, %v3531_v57, %v3530_v25  ;;  %v3535_v35 = vrot.slane %v9234_v7, 1  ;;  %v3600_v25 = vld [vmem:[%s10437_s0 + $0x64] sm:$0x8] }
 0x923   : > { %3582 = vst [vmem:[#allocation3 + $0xcd] sm:$0x1] %v3553_v53  ;;  %5413 = vmatpush.msrb.mxu2 %v11639_v14  ;;  %v9236_v33 = vpop.eup %9235  ;;  %v3534_v63 = vsel %vm615_vm4, %v3533_v26, %v3532_v6 }
 0x924   : > { %3583 = vst [vmem:[#allocation3 + $0xed] sm:$0x1] %v3554_v39  ;;  %v9238_v46 = vpop.eup %9237  ;;  %v3536_v30 = vsel %vm618_vm5, %v3535_v35, %v3534_v63  ;;  %v3538_v52 = vrot.slane %v9236_v33, 7  ;;  %v3617_v39 = vunpack.c.l.bf16 %v3601_v51  ;;  %v3616_v35 = vunpack.c.l.bf16 %v3600_v25 }
 0x925   : > { %5414 = vmatpush.msrb.mxu2 %v11643_v16  ;;  %v9240_v5 = vpop.eup %9239  ;;  %v3540_v4 = vrot.slane %v9238_v46, 6 }
 0x926   : > { %v3537_v21 = vsel %vm621_vm6, %v9240_v5, %v3536_v30  ;;  %v3602_v30 = vld [vmem:[%s10437_s0 + $0x84] sm:$0x8] }
 0x927   : > { %5415 = vmatpush.msrb.mxu2 %v11648_v37  ;;  %v3539_v48 = vsel %vm624_vm7, %v3538_v52, %v3537_v21  ;;  %v3603_v52 = vld [vmem:[%s10437_s0 + $0x94] sm:$0x8] }
 0x928   : > { %v3541_v36 = vsel %vm627_vm8, %v3540_v4, %v3539_v48  ;;  %v11698_v4 = vld [vmem:[%s10437_s0 + $0xe4] sm:$0x8] }
 0x929   : > { %5416 = vmatpush.msrb.mxu2 %v11653_v11  ;;  %v3545_v29 = vsel %vm3497_vm9, %v3541_v36, 0.0  ;;  %v11657_v18 = vsel %vm3497_vm9, %v3541_v36, %v11585_v49  ;;  %v3604_v48 = vld [vmem:[%s10437_s0 + $0xa4] sm:$0x8]  ;;  %v3605_v36 = vld [vmem:[%s10437_s0 + $0xb4] sm:$0x8]  ;;  %v3624_v40 = vunpack.c.l.bf16 %v11698_v4 }
 0x92a   : > { %v3555_v24 = vrot.slane %v3545_v29, 1  ;;  %v3556_v41 = vrot.slane %v3545_v29, 2  ;;  %v3557_v44 = vrot.slane %v3545_v29, 3  ;;  %3584 = vst [vmem:[#allocation3 + $0x10d] sm:$0x1] %v3545_v29  ;;  %3645 = vmatmul.f32.gmra.mxu2 %v11657_v18  ;;  %v3558_v56 = vrot.slane %v3545_v29, 4 }
 0x92b   : > { %5417 = vmatpush.msrb.mxu2 %v11660_v22  ;;  %v3559_v31 = vrot.slane %v3545_v29, 5  ;;  %v3560_v3 = vrot.slane %v3545_v29, 6  ;;  %v3561_v49 = vrot.slane %v3545_v29, 7  ;;  %v3620_v9 = vunpack.c.l.bf16 %v3604_v48 }
 0x92c   : > { %3585 = vst [vmem:[#allocation3 + $0x12d] sm:$0x1] %v3555_v24  ;;  %v3621_v62 = vunpack.c.l.bf16 %v3605_v36 }
 0x92d   : > { %3586 = vst [vmem:[#allocation3 + $0x14d] sm:$0x1] %v3556_v41  ;;  %5418 = vmatpush.msrb.mxu2 %v11663_v50  ;;  %v3606_v41 = vld [vmem:[%s10437_s0 + $0xc4] sm:$0x8] }
 0x92e   : > { %3587 = vst [vmem:[#allocation3 + $0x16d] sm:$0x1] %v3557_v44  ;;  %v3607_v44 = vld [vmem:[%s10437_s0 + $0xd4] sm:$0x8]  ;;  %v3622_v51 = vunpack.c.l.bf16 %v3606_v41 }
 0x92f   : > { %3588 = vst [vmem:[#allocation3 + $0x18d] sm:$0x1] %v3558_v56  ;;  %5419 = vmatpush.msrb.mxu2 %v11666_v27 }
 0x930   : > { %3589 = vst [vmem:[#allocation3 + $0x1ad] sm:$0x1] %v3559_v31  ;;  %v3618_v31 = vunpack.c.l.bf16 %v3602_v30 }
 0x931   : > { %3590 = vst [vmem:[#allocation3 + $0x1cd] sm:$0x1] %v3560_v3  ;;  %5420 = vmatpush.msrb.mxu2 %v11669_v59  ;;  %v3619_v3 = vunpack.c.l.bf16 %v3603_v52 }
 0x932   : > { %3591 = vst [vmem:[#allocation3 + $0x1ed] sm:$0x1] %v3561_v49 }
 0x933   : > { %5421 = vmatpush.msrb.mxu2 %v11672_v28 }
 0x935   : > { %5422 = vmatpush.msrb.mxu2 %v11675_v23 }
 0x937   : > { %5423 = vmatpush.msrb.mxu2 %v11678_v32 }
 0x939   : > { %5424 = vmatpush.msrb.mxu2 %v11681_v60 }
 0x93b   : > { %5425 = vmatpush.msrb.mxu2 %v11684_v43 }
 0x99f   : > { %v3643_v42 = vpop.f32.mrf.mxu2 }
 0x9a0   : > { %v3651_v10 = vrot.slane %v3643_v42, 2  ;;  %v3652_v58 = vrot.slane %v3643_v42, 3  ;;  %v3653_v15 = vrot.slane %v3643_v42, 4  ;;  %v3654_v53 = vrot.slane %v3643_v42, 5 }
 0x9a1   : > { %v3655_v54 = vrot.slane %v3643_v42, 6  ;;  %v3656_v61 = vrot.slane %v3643_v42, 7  ;;  %v3657_v6 = vrot.slane %v3643_v42, 1  ;;  %v3687_v17 = vadd.f32 %v3643_v42, %v3616_v35 }
 0x9a2   : > { %v3681_v57 = vadd.f32 %v3651_v10, %v3610_v47  ;;  %v3682_v26 = vadd.f32 %v3652_v58, %v3611_v45  ;;  %v3683_v7 = vadd.f32 %v3653_v15, %v3612_v20  ;;  %v3684_v33 = vadd.f32 %v3654_v53, %v3613_v13 }
 0x9a3   : > { %v3685_v63 = vadd.f32 %v3655_v54, %v3614_v19  ;;  %v3686_v46 = vadd.f32 %v3656_v61, %v3615_v55  ;;  %v3688_v5 = vadd.f32 %v3657_v6, %v3617_v39  ;;  %v3623_v42 = vunpack.c.l.bf16 %v3607_v44  ;;  %v3715_v6 = vpop.permute.xlu2 %3714 }
 0x9a4   : > { %9241 = vtanh.f32 %v3681_v57  ;;  %v3625_v61 = vunpack.c.l.bf16 %v3609_v38  ;;  %vm3719_vm10 = vcmp.eq.s32.totalorder %v3715_v6, 1 }
 0x9a5   : > { %9243 = vtanh.f32 %v3682_v26 }
 0x9a6   : > { %9245 = vtanh.f32 %v3683_v7 }
 0x9a7   : > { %9247 = vtanh.f32 %v3684_v33 }
 0x9a8   : > { %9249 = vtanh.f32 %v3685_v63 }
 0x9a9   : > { %9251 = vtanh.f32 %v3686_v46 }
 0x9aa   : > { %v9242_v21 = vpop.eup %9241  ;;  %9253 = vtanh.f32 %v3688_v5 }
 0x9ab   : > { %v9244_v29 = vpop.eup %9243  ;;  %v3737_v24 = vrot.slane %v9242_v21, 6  ;;  %9255 = vtanh.f32 %v3687_v17 }
 0x9ac   : > { %v9246_v56 = vpop.eup %9245  ;;  %v3738_v49 = vrot.slane %v9244_v29, 5 }
 0x9ad   : > { %v9248_v1 = vpop.eup %9247  ;;  %v3740_v2 = vrot.slane %v9246_v56, 4  ;;  %v3646_v45 = vpop.f32.mrf.mxu2 }
 0x9ae   : > { %v9250_v47 = vpop.eup %9249  ;;  %v3739_v20 = vsel %vm609_vm2, %v3738_v49, %v3737_v24  ;;  %v3658_v19 = vrot.slane %v3646_v45, 2  ;;  %v3659_v10 = vrot.slane %v3646_v45, 3  ;;  %v3660_v58 = vrot.slane %v3646_v45, 4 }
 0x9af   : > { %v9252_v13 = vpop.eup %9251  ;;  %v3742_v15 = vrot.slane %v9248_v1, 3  ;;  %v3661_v54 = vrot.slane %v3646_v45, 5  ;;  %v3741_v55 = vsel %vm612_vm3, %v3740_v2, %v3739_v20  ;;  %v3744_v39 = vrot.slane %v9250_v47, 2 }
 0x9b0   : > { %v9254_v53 = vpop.eup %9253  ;;  %v3689_v25 = vadd.f32 %v3658_v19, %v3618_v31  ;;  %v3690_v57 = vadd.f32 %v3659_v10, %v3619_v3  ;;  %v3746_v7 = vrot.slane %v9252_v13, 1  ;;  %v3662_v35 = vrot.slane %v3646_v45, 6 }
 0x9b1   : > { %v3743_v26 = vsel %vm615_vm4, %v3742_v15, %v3741_v55  ;;  %v3749_v63 = vrot.slane %v9254_v53, 7  ;;  %v3663_v46 = vrot.slane %v3646_v45, 7  ;;  %v9256_v5 = vpop.eup %9255  ;;  %v3664_v30 = vrot.slane %v3646_v45, 1 }
 0x9b2   : > { %v3745_v33 = vsel %vm618_vm5, %v3744_v39, %v3743_v26  ;;  %9257 = vtanh.f32 %v3689_v25  ;;  %v3691_v52 = vadd.f32 %v3660_v58, %v3620_v9  ;;  %v3692_v4 = vadd.f32 %v3661_v54, %v3621_v62  ;;  %v3718_v39 = vpop.permute.xlu0 %3717 }
 0x9b3   : > { %v3747_v17 = vsel %vm621_vm6, %v3746_v7, %v3745_v33  ;;  %9259 = vtanh.f32 %v3690_v57  ;;  %v3693_v48 = vadd.f32 %v3662_v35, %v3622_v51  ;;  %v3694_v29 = vadd.f32 %v3663_v46, %v3623_v42 }
 0x9b4   : > { %v3748_v21 = vsel %vm624_vm7, %v9256_v5, %v3747_v17  ;;  %9261 = vtanh.f32 %v3691_v52  ;;  %v3696_v44 = vadd.f32 %v3664_v30, %v3625_v61  ;;  %v3695_v49 = vadd.f32 %v3646_v45, %v3624_v40 }
 0x9b5   : > { %v3750_v36 = vsel %vm627_vm8, %v3749_v63, %v3748_v21  ;;  %9263 = vtanh.f32 %v3692_v4  ;;  %vm3720_vm11 = vcmp.eq.s32.totalorder %v3718_v39, 1  ;;  %v3817_v21 = vld [vmem:[%s10437_s0 + $0x4] sm:$0x8]  ;;  %v3818_v4 = vld [vmem:[%s10437_s0 + $0x14] sm:$0x8] }
 0x9b6   : > { %v3767_v24 = vsel %vm3719_vm10, %v3750_v36, 0.0  ;;  %v11714_v41 = vsel %vm3719_vm10, %v3750_v36, %v11625_v12  ;;  %9265 = vtanh.f32 %v3693_v48  ;;  %v3819_v48 = vld [vmem:[%s10437_s0 + $0x24] sm:$0x8]  ;;  %v3820_v36 = vld [vmem:[%s10437_s0 + $0x34] sm:$0x8] }
 0x9b7   : > { %v3771_v56 = vrot.slane %v3767_v24, 1  ;;  %v3772_v31 = vrot.slane %v3767_v24, 2  ;;  %v3773_v3 = vrot.slane %v3767_v24, 3  ;;  %3799 = vst [vmem:[#allocation3 + $0xe] sm:$0x1] %v3767_v24  ;;  %3865 = vmatmul.f32.vlgmr.msrb.gmra.mxu3 %v11714_v41  ;;  %v3774_v1 = vrot.slane %v3767_v24, 4 }
 0x9b8   : > { %5633 = vmatpush.msrb.mxu3 %v11628_v34  ;;  %v9258_v2 = vpop.eup %9257  ;;  %v3775_v38 = vrot.slane %v3767_v24, 5  ;;  %9267 = vtanh.f32 %v3694_v29  ;;  %v3776_v12 = vrot.slane %v3767_v24, 6  ;;  %v3777_v62 = vrot.slane %v3767_v24, 7  ;;  %v3821_v29 = vld [vmem:[%s10437_s0 + $0x44] sm:$0x8] }
 0x9b9   : > { %3800 = vst [vmem:[#allocation3 + $0x2e] sm:$0x1] %v3771_v56  ;;  %v9260_v9 = vpop.eup %9259  ;;  %9269 = vtanh.f32 %v3696_v44  ;;  %v3751_v47 = vrot.slane %v9258_v2, 6  ;;  %v3833_v24 = vunpack.c.l.bf16 %v3817_v21  ;;  %v3834_v44 = vunpack.c.l.bf16 %v3818_v4  ;;  %v3825_v39 = vld [vmem:[%s10437_s0 + $0x84] sm:$0x8] }
 0x9ba   : > { %3801 = vst [vmem:[#allocation3 + $0x4e] sm:$0x1] %v3772_v31  ;;  %5634 = vmatpush.msrb.mxu3 %v11631_v0  ;;  %v9262_v20 = vpop.eup %9261  ;;  %v3752_v51 = vrot.slane %v9260_v9, 5  ;;  %9271 = vtanh.f32 %v3695_v49  ;;  %v3835_v56 = vunpack.c.l.bf16 %v3819_v48  ;;  %v3822_v31 = vld [vmem:[%s10437_s0 + $0x54] sm:$0x8]  ;;  %v3837_v2 = vunpack.c.l.bf16 %v3821_v29 }
 0x9bb   : > { %3802 = vst [vmem:[#allocation3 + $0x6e] sm:$0x1] %v3773_v3  ;;  %v9264_v40 = vpop.eup %9263  ;;  %v3754_v45 = vrot.slane %v9262_v20, 4  ;;  %v3823_v3 = vld [vmem:[%s10437_s0 + $0x64] sm:$0x8] }
 0x9bc   : > { %3803 = vst [vmem:[#allocation3 + $0x8e] sm:$0x1] %v3774_v1  ;;  %5635 = vmatpush.msrb.mxu3 %v11635_v8  ;;  %v3753_v42 = vsel %vm609_vm2, %v3752_v51, %v3751_v47  ;;  %v3756_v13 = vrot.slane %v9264_v40, 3  ;;  %v9266_v19 = vpop.eup %9265  ;;  %v3836_v1 = vunpack.c.l.bf16 %v3820_v36  ;;  %v3839_v51 = vunpack.c.l.bf16 %v3823_v3 }
 0x9bd   : > { %3804 = vst [vmem:[#allocation3 + $0xae] sm:$0x1] %v3775_v38  ;;  %v3755_v10 = vsel %vm612_vm3, %v3754_v45, %v3753_v42  ;;  %v3758_v53 = vrot.slane %v9266_v19, 2 }
 0x9be   : > { %3805 = vst [vmem:[#allocation3 + $0xce] sm:$0x1] %v3776_v12  ;;  %5636 = vmatpush.msrb.mxu3 %v11639_v14  ;;  %v9268_v58 = vpop.eup %9267  ;;  %v3757_v15 = vsel %vm615_vm4, %v3756_v13, %v3755_v10  ;;  %v3824_v10 = vld [vmem:[%s10437_s0 + $0x74] sm:$0x8] }
 0x9bf   : > { %3806 = vst [vmem:[#allocation3 + $0xee] sm:$0x1] %v3777_v62  ;;  %v9270_v54 = vpop.eup %9269  ;;  %v3760_v55 = vrot.slane %v9268_v58, 1  ;;  %v3759_v61 = vsel %vm618_vm5, %v3758_v53, %v3757_v15  ;;  %v3838_v62 = vunpack.c.l.bf16 %v3822_v31 }
 0x9c0   : > { %5637 = vmatpush.msrb.mxu3 %v11643_v16  ;;  %v9272_v25 = vpop.eup %9271  ;;  %v3763_v26 = vrot.slane %v9270_v54, 7  ;;  %v3840_v54 = vunpack.c.l.bf16 %v3824_v10 }
 0x9c1   : > { %v3761_v57 = vsel %vm621_vm6, %v3760_v55, %v3759_v61  ;;  %v3826_v61 = vld [vmem:[%s10437_s0 + $0x94] sm:$0x8] }
 0x9c2   : > { %5638 = vmatpush.msrb.mxu3 %v11648_v37  ;;  %v3762_v7 = vsel %vm624_vm7, %v9272_v25, %v3761_v57  ;;  %v3827_v25 = vld [vmem:[%s10437_s0 + $0xa4] sm:$0x8] }
 0x9c3   : > { %v3764_v6 = vsel %vm627_vm8, %v3763_v26, %v3762_v7  ;;  %v3828_v7 = vld [vmem:[%s10437_s0 + $0xb4] sm:$0x8]  ;;  %v3843_v21 = vunpack.c.l.bf16 %v3827_v25 }
 0x9c4   : > { %5639 = vmatpush.msrb.mxu3 %v11653_v11  ;;  %v3768_v33 = vsel %vm3720_vm11, %v3764_v6, 0.0  ;;  %v11732_v63 = vsel %vm3720_vm11, %v3764_v6, %v11657_v18  ;;  %v3829_v6 = vld [vmem:[%s10437_s0 + $0xc4] sm:$0x8]  ;;  %v3844_v36 = vunpack.c.l.bf16 %v3828_v7 }
 0x9c5   : > { %v3778_v35 = vrot.slane %v3768_v33, 1  ;;  %v3779_v46 = vrot.slane %v3768_v33, 2  ;;  %v3780_v5 = vrot.slane %v3768_v33, 3  ;;  %3807 = vst [vmem:[#allocation3 + $0x10e] sm:$0x1] %v3768_v33  ;;  %3868 = vmatmul.f32.gmra.mxu3 %v11732_v63  ;;  %v3781_v17 = vrot.slane %v3768_v33, 4 }
 0x9c6   : > { %5640 = vmatpush.msrb.mxu3 %v11660_v22  ;;  %v3782_v30 = vrot.slane %v3768_v33, 5  ;;  %v3783_v52 = vrot.slane %v3768_v33, 6  ;;  %v3784_v18 = vrot.slane %v3768_v33, 7  ;;  %v3830_v33 = vld [vmem:[%s10437_s0 + $0xd4] sm:$0x8]  ;;  %v3845_v29 = vunpack.c.l.bf16 %v3829_v6 }
 0x9c7   : > { %3808 = vst [vmem:[#allocation3 + $0x12e] sm:$0x1] %v3778_v35 }
 0x9c8   : > { %3809 = vst [vmem:[#allocation3 + $0x14e] sm:$0x1] %v3779_v46  ;;  %5641 = vmatpush.msrb.mxu3 %v11663_v50 }
 0x9c9   : > { %3810 = vst [vmem:[#allocation3 + $0x16e] sm:$0x1] %v3780_v5  ;;  %v3831_v5 = vld [vmem:[%s10437_s0 + $0xe4] sm:$0x8] }
 0x9ca   : > { %3811 = vst [vmem:[#allocation3 + $0x18e] sm:$0x1] %v3781_v17  ;;  %5642 = vmatpush.msrb.mxu3 %v11666_v27 }
 0x9cb   : > { %3812 = vst [vmem:[#allocation3 + $0x1ae] sm:$0x1] %v3782_v30  ;;  %v3841_v30 = vunpack.c.l.bf16 %v3825_v39 }
 0x9cc   : > { %3813 = vst [vmem:[#allocation3 + $0x1ce] sm:$0x1] %v3783_v52  ;;  %5643 = vmatpush.msrb.mxu3 %v11669_v59  ;;  %v3842_v52 = vunpack.c.l.bf16 %v3826_v61 }
 0x9cd   : > { %3814 = vst [vmem:[#allocation3 + $0x1ee] sm:$0x1] %v3784_v18 }
 0x9ce   : > { %5644 = vmatpush.msrb.mxu3 %v11672_v28 }
 0x9d0   : > { %5645 = vmatpush.msrb.mxu3 %v11675_v23 }
 0x9d2   : > { %5646 = vmatpush.msrb.mxu3 %v11678_v32 }
 0x9d4   : > { %5647 = vmatpush.msrb.mxu3 %v11681_v60 }
 0x9d6   : > { %5648 = vmatpush.msrb.mxu3 %v11684_v43 }
 0xa3a   : > { %v3866_v49 = vpop.f32.mrf.mxu3 }
 0xa3b   : > { %v3874_v38 = vrot.slane %v3866_v49, 1  ;;  %v3875_v9 = vrot.slane %v3866_v49, 2  ;;  %v3876_v12 = vrot.slane %v3866_v49, 3  ;;  %v3877_v47 = vrot.slane %v3866_v49, 4 }
 0xa3c   : > { %v3878_v20 = vrot.slane %v3866_v49, 5  ;;  %v3879_v40 = vrot.slane %v3866_v49, 6  ;;  %v3880_v19 = vrot.slane %v3866_v49, 7  ;;  %v3911_v26 = vadd.f32 %v3866_v49, %v3840_v54 }
 0xa3d   : > { %v3904_v45 = vadd.f32 %v3874_v38, %v3833_v24  ;;  %v3905_v42 = vadd.f32 %v3875_v9, %v3834_v44  ;;  %v3906_v13 = vadd.f32 %v3876_v12, %v3835_v56  ;;  %v3907_v58 = vadd.f32 %v3877_v47, %v3836_v1 }
 0xa3e   : > { %v3908_v15 = vadd.f32 %v3878_v20, %v3837_v2  ;;  %v3909_v53 = vadd.f32 %v3879_v40, %v3838_v62  ;;  %v3910_v55 = vadd.f32 %v3880_v19, %v3839_v51  ;;  %v3846_v24 = vunpack.c.l.bf16 %v3830_v33 }
 0xa3f   : > { %9273 = vtanh.f32 %v3904_v45  ;;  %v3847_v49 = vunpack.c.l.bf16 %v3831_v5  ;;  %v3938_v45 = vpop.permute.xlu1 %3937 }
 0xa40   : > { %9275 = vtanh.f32 %v3905_v42  ;;  %vm3942_vm12 = vcmp.eq.s32.totalorder %v3938_v45, 1 }
 0xa41   : > { %9277 = vtanh.f32 %v3906_v13 }
 0xa42   : > { %9279 = vtanh.f32 %v3907_v58 }
 0xa43   : > { %9281 = vtanh.f32 %v3908_v15  ;;  %v3832_v15 = vld [vmem:[%s10437_s0 + $0xf4] sm:$0x8] }
 0xa44   : > { %9283 = vtanh.f32 %v3909_v53  ;;  %v3848_v6 = vunpack.c.l.bf16 %v3832_v15 }
 0xa45   : > { %v9274_v57 = vpop.eup %9273  ;;  %9285 = vtanh.f32 %v3910_v55 }
 0xa46   : > { %v9276_v35 = vpop.eup %9275  ;;  %v3960_v46 = vrot.slane %v9274_v57, 7  ;;  %9287 = vtanh.f32 %v3911_v26 }
 0xa47   : > { %v9278_v17 = vpop.eup %9277  ;;  %v3961_v18 = vrot.slane %v9276_v35, 6 }
 0xa48   : > { %v9280_v4 = vpop.eup %9279  ;;  %v3963_v48 = vrot.slane %v9278_v17, 5  ;;  %v3869_v56 = vpop.f32.mrf.mxu3 }
 0xa49   : > { %v9282_v44 = vpop.eup %9281  ;;  %v3962_v31 = vsel %vm609_vm2, %v3961_v18, %v3960_v46  ;;  %v3965_v3 = vrot.slane %v9280_v4, 4  ;;  %v3881_v2 = vrot.slane %v3869_v56, 1  ;;  %v3882_v38 = vrot.slane %v3869_v56, 2 }
 0xa4a   : > { %v9284_v1 = vpop.eup %9283  ;;  %v3883_v9 = vrot.slane %v3869_v56, 3  ;;  %v3884_v12 = vrot.slane %v3869_v56, 4  ;;  %v3964_v20 = vsel %vm612_vm3, %v3963_v48, %v3962_v31  ;;  %v3967_v62 = vrot.slane %v9282_v44, 3 }
 0xa4b   : > { %v9286_v47 = vpop.eup %9285  ;;  %v3969_v51 = vrot.slane %v9284_v1, 2  ;;  %v3885_v40 = vrot.slane %v3869_v56, 5  ;;  %v3912_v42 = vadd.f32 %v3881_v2, %v3841_v30  ;;  %v3913_v13 = vadd.f32 %v3882_v38, %v3842_v52 }
 0xa4c   : > { %v3966_v19 = vsel %vm615_vm4, %v3965_v3, %v3964_v20  ;;  %v3971_v10 = vrot.slane %v9286_v47, 1  ;;  %v3886_v53 = vrot.slane %v3869_v56, 6  ;;  %v3887_v54 = vrot.slane %v3869_v56, 7  ;;  %v9288_v25 = vpop.eup %9287 }
 0xa4d   : > { %v3968_v58 = vsel %vm618_vm5, %v3967_v62, %v3966_v19  ;;  %v3914_v55 = vadd.f32 %v3883_v9, %v3843_v21  ;;  %9289 = vtanh.f32 %v3912_v42  ;;  %v3915_v61 = vadd.f32 %v3884_v12, %v3844_v36 }
 0xa4e   : > { %v3970_v39 = vsel %vm621_vm6, %v3969_v51, %v3968_v58  ;;  %9291 = vtanh.f32 %v3913_v13  ;;  %v3916_v26 = vadd.f32 %v3885_v40, %v3845_v29  ;;  %v3917_v33 = vadd.f32 %v3886_v53, %v3846_v24  ;;  %v4044_v53 = vld [vmem:[%s10437_s0 + $0x48] sm:$0x1] }
 0xa4f   : > { %v3972_v57 = vsel %vm624_vm7, %v3971_v10, %v3970_v39  ;;  %9293 = vtanh.f32 %v3914_v55  ;;  %v3918_v5 = vadd.f32 %v3887_v54, %v3847_v49  ;;  %v3919_v48 = vadd.f32 %v3869_v56, %v3848_v6  ;;  %v4045_v54 = vld [vmem:[%s10437_s0 + $0x58] sm:$0x1]  ;;  %v4046_v55 = vld [vmem:[%s10437_s0 + $0x68] sm:$0x1] }
 0xa50   : > { %v3973_v7 = vsel %vm627_vm8, %v9288_v25, %v3972_v57  ;;  %9295 = vtanh.f32 %v3915_v61  ;;  %v4047_v25 = vld [vmem:[%s10437_s0 + $0x78] sm:$0x1] }
 0xa51   : > { %v3990_v35 = vsel %vm3942_vm12, %v3973_v7, 0.0  ;;  %v11768_v46 = vsel %vm3942_vm12, %v3973_v7, %v11714_v41  ;;  %9297 = vtanh.f32 %v3916_v26  ;;  %v4061_v26 = vunpack.c.l.bf16 %v4045_v54 }
 0xa52   : > { %v3994_v17 = vrot.slane %v3990_v35, 1  ;;  %v3995_v30 = vrot.slane %v3990_v35, 2  ;;  %v3996_v52 = vrot.slane %v3990_v35, 3  ;;  %4022 = vst [vmem:[#allocation3 + $0xf] sm:$0x1] %v3990_v35  ;;  %4088 = vmatmul.f32.vlgmr.msra.gmra.mxu0 %v11768_v46  ;;  %v3997_v18 = vrot.slane %v3990_v35, 4 }
 0xa53   : > { %5856 = vmatpush.msra.mxu0 %v11628_v34  ;;  %v9290_v21 = vpop.eup %9289  ;;  %v3998_v4 = vrot.slane %v3990_v35, 5  ;;  %9299 = vtanh.f32 %v3917_v33  ;;  %v3999_v41 = vrot.slane %v3990_v35, 6  ;;  %v4000_v44 = vrot.slane %v3990_v35, 7 }
 0xa54   : > { %4023 = vst [vmem:[#allocation3 + $0x2f] sm:$0x1] %v3994_v17  ;;  %v9292_v36 = vpop.eup %9291  ;;  %9301 = vtanh.f32 %v3918_v5  ;;  %v3974_v29 = vrot.slane %v9290_v21, 7  ;;  %v4063_v35 = vunpack.c.l.bf16 %v4047_v25 }
 0xa55   : > { %4024 = vst [vmem:[#allocation3 + $0x4f] sm:$0x1] %v3995_v30  ;;  %5857 = vmatpush.msra.mxu0 %v11631_v0  ;;  %v9294_v24 = vpop.eup %9293  ;;  %v3975_v31 = vrot.slane %v9292_v36, 6  ;;  %9303 = vtanh.f32 %v3919_v48 }
 0xa56   : > { %4025 = vst [vmem:[#allocation3 + $0x6f] sm:$0x1] %v3996_v52  ;;  %v9296_v3 = vpop.eup %9295  ;;  %v3977_v49 = vrot.slane %v9294_v24, 5  ;;  %v4048_v24 = vld [vmem:[%s10437_s0 + $0x88] sm:$0x1] }
 0xa57   : > { %4026 = vst [vmem:[#allocation3 + $0x8f] sm:$0x1] %v3997_v18  ;;  %5858 = vmatpush.msra.mxu0 %v11635_v8  ;;  %v3976_v34 = vsel %vm609_vm2, %v3975_v31, %v3974_v29  ;;  %v3979_v56 = vrot.slane %v9296_v3, 4  ;;  %v9298_v1 = vpop.eup %9297  ;;  %v3941_v8 = vpop.permute.xlu2 %3940  ;;  %v4050_v31 = vld [vmem:[%s10437_s0 + $0xa8] sm:$0x1] }
 0xa58   : > { %4027 = vst [vmem:[#allocation3 + $0xaf] sm:$0x1] %v3998_v4  ;;  %v3978_v2 = vsel %vm612_vm3, %v3977_v49, %v3976_v34  ;;  %v3981_v9 = vrot.slane %v9298_v1, 3  ;;  %vm3943_vm13 = vcmp.eq.s32.totalorder %v3941_v8, 1  ;;  %v4051_v49 = vld [vmem:[%s10437_s0 + $0xb8] sm:$0x1] }
 0xa59   : > { %4028 = vst [vmem:[#allocation3 + $0xcf] sm:$0x1] %v3999_v41  ;;  %5859 = vmatpush.msra.mxu0 %v11639_v14  ;;  %v9300_v0 = vpop.eup %9299  ;;  %v3980_v38 = vsel %vm615_vm4, %v3979_v56, %v3978_v2  ;;  %v4052_v34 = vld [vmem:[%s10437_s0 + $0xc8] sm:$0x1]  ;;  %v4053_v56 = vld [vmem:[%s10437_s0 + $0xd8] sm:$0x1] }
 0xa5a   : > { %4029 = vst [vmem:[#allocation3 + $0xef] sm:$0x1] %v4000_v44  ;;  %v9302_v12 = vpop.eup %9301  ;;  %v3983_v47 = vrot.slane %v9300_v0, 2  ;;  %v3982_v20 = vsel %vm618_vm5, %v3981_v9, %v3980_v38  ;;  %v4049_v44 = vld [vmem:[%s10437_s0 + $0x98] sm:$0x1] }
 0xa5b   : > { %5860 = vmatpush.msra.mxu0 %v11643_v16  ;;  %v3985_v62 = vrot.slane %v9302_v12, 1  ;;  %v9304_v40 = vpop.eup %9303  ;;  %v4054_v0 = vld [vmem:[%s10437_s0 + $0xe8] sm:$0x1]  ;;  %v4055_v38 = vld [vmem:[%s10437_s0 + $0xf8] sm:$0x1]  ;;  %v4064_v12 = vunpack.c.l.bf16 %v4048_v24 }
 0xa5c   : > { %v3984_v51 = vsel %vm621_vm6, %v3983_v47, %v3982_v20  ;;  %v4065_v47 = vunpack.c.l.bf16 %v4049_v44  ;;  %v4066_v20 = vunpack.c.l.bf16 %v4050_v31  ;;  %v11828_v44 = vld [vmem:[#allocation7 + $0x70] sm:$0xff] }
 0xa5d   : > { %5861 = vmatpush.msra.mxu0 %v11648_v37  ;;  %v3986_v14 = vsel %vm624_vm7, %v3985_v62, %v3984_v51 }
 0xa5e   : > { %v3987_v45 = vsel %vm627_vm8, %v9304_v40, %v3986_v14  ;;  %v4067_v40 = vunpack.c.l.bf16 %v4051_v49  ;;  %v4068_v14 = vunpack.c.l.bf16 %v4052_v34 }
 0xa5f   : > { %5862 = vmatpush.msra.mxu0 %v11653_v11  ;;  %v3991_v42 = vsel %vm3943_vm13, %v3987_v45, 0.0  ;;  %v11786_v13 = vsel %vm3943_vm13, %v3987_v45, %v11732_v63  ;;  %v4043_v63 = vld [vmem:[%s10437_s0 + $0x38] sm:$0x1]  ;;  %v4069_v45 = vunpack.c.l.bf16 %v4053_v56  ;;  %v11831_v56 = vld [vmem:[#allocation7 + $0x68] sm:$0xff] }
 0xa60   : > { %v4001_v16 = vrot.slane %v3991_v42, 1  ;;  %v4002_v19 = vrot.slane %v3991_v42, 2  ;;  %v4003_v10 = vrot.slane %v3991_v42, 3  ;;  %4030 = vst [vmem:[#allocation3 + $0x10f] sm:$0x1] %v3991_v42  ;;  %4091 = vmatmul.f32.gmra.mxu0 %v11786_v13  ;;  %v4004_v58 = vrot.slane %v3991_v42, 4 }
 0xa61   : > { %5863 = vmatpush.msra.mxu0 %v11660_v22  ;;  %v4005_v37 = vrot.slane %v3991_v42, 5  ;;  %v4006_v15 = vrot.slane %v3991_v42, 6  ;;  %v4007_v11 = vrot.slane %v3991_v42, 7  ;;  %v4040_v22 = vld [vmem:[%s10437_s0 + $0x8] sm:$0x1] }
 0xa62   : > { %4031 = vst [vmem:[#allocation3 + $0x12f] sm:$0x1] %v4001_v16 }
 0xa63   : > { %4032 = vst [vmem:[#allocation3 + $0x14f] sm:$0x1] %v4002_v19  ;;  %5864 = vmatpush.msra.mxu0 %v11663_v50  ;;  %v4041_v50 = vld [vmem:[%s10437_s0 + $0x18] sm:$0x1] }
 0xa64   : > { %4033 = vst [vmem:[#allocation3 + $0x16f] sm:$0x1] %v4003_v10  ;;  %v4057_v39 = vunpack.c.l.bf16 %v4041_v50 }
 0xa65   : > { %4034 = vst [vmem:[#allocation3 + $0x18f] sm:$0x1] %v4004_v58  ;;  %5865 = vmatpush.msra.mxu0 %v11666_v27  ;;  %v4042_v27 = vld [vmem:[%s10437_s0 + $0x28] sm:$0x1]  ;;  %v4070_v58 = vunpack.c.l.bf16 %v4054_v0 }
 0xa66   : > { %4035 = vst [vmem:[#allocation3 + $0x1af] sm:$0x1] %v4005_v37  ;;  %v4058_v61 = vunpack.c.l.bf16 %v4042_v27  ;;  %v4071_v37 = vunpack.c.l.bf16 %v4055_v38  ;;  %v11835_v38 = vld [vmem:[#allocation7 + $0x60] sm:$0xff] }
 0xa67   : > { %4036 = vst [vmem:[#allocation3 + $0x1cf] sm:$0x1] %v4006_v15  ;;  %5866 = vmatpush.msra.mxu0 %v11669_v59  ;;  %v4056_v59 = vunpack.c.l.bf16 %v4040_v22 }
 0xa68   : > { %4037 = vst [vmem:[#allocation3 + $0x1ef] sm:$0x1] %v4007_v11 }
 0xa69   : > { %5867 = vmatpush.msra.mxu0 %v11672_v28  ;;  %v4059_v28 = vunpack.c.l.bf16 %v4043_v63 }
 0xa6b   : > { %5868 = vmatpush.msra.mxu0 %v11675_v23  ;;  %v4060_v23 = vunpack.c.l.bf16 %v4044_v53 }
 0xa6d   : > { %5869 = vmatpush.msra.mxu0 %v11678_v32  ;;  %v4062_v32 = vunpack.c.l.bf16 %v4046_v55 }
 0xa6f   : > { %5870 = vmatpush.msra.mxu0 %v11681_v60 }
 0xa71   : > { %5871 = vmatpush.msra.mxu0 %v11684_v43 }
 0xacf   : > { %v4089_v57 = vpop.f32.mrf.mxu0 }
 0xad0   : > { %v4097_v7 = vrot.slane %v4089_v57, 1  ;;  %v4098_v60 = vrot.slane %v4089_v57, 2  ;;  %v4099_v6 = vrot.slane %v4089_v57, 3  ;;  %v4100_v43 = vrot.slane %v4089_v57, 4 }
 0xad1   : > { %v4127_v33 = vadd.f32 %v4089_v57, %v4056_v59  ;;  %v4101_v5 = vrot.slane %v4089_v57, 5  ;;  %v4102_v17 = vrot.slane %v4089_v57, 6  ;;  %v4103_v18 = vrot.slane %v4089_v57, 7 }
 0xad2   : > { %v4128_v30 = vadd.f32 %v4097_v7, %v4057_v39  ;;  %v4129_v52 = vadd.f32 %v4098_v60, %v4058_v61  ;;  %v4130_v21 = vadd.f32 %v4099_v6, %v4059_v28  ;;  %v4131_v4 = vadd.f32 %v4100_v43, %v4060_v23  ;;  %v4161_v39 = vpop.permute.xlu1 %4160 }
 0xad3   : > { %9305 = vtanh.f32 %v4127_v33  ;;  %v4132_v48 = vadd.f32 %v4101_v5, %v4061_v26  ;;  %v4133_v36 = vadd.f32 %v4102_v17, %v4062_v32  ;;  %v4134_v41 = vadd.f32 %v4103_v18, %v4063_v35 }
 0xad4   : > { %9307 = vtanh.f32 %v4128_v30  ;;  %vm4165_vm14 = vcmp.eq.s32.totalorder %v4161_v39, 1  ;;  %v11860_v39 = vld [vmem:[#allocation7 + $0x38] sm:$0xff] }
 0xad5   : > { %9309 = vtanh.f32 %v4129_v52 }
 0xad6   : > { %9311 = vtanh.f32 %v4130_v21 }
 0xad7   : > { %9313 = vtanh.f32 %v4131_v4 }
 0xad8   : > { %9315 = vtanh.f32 %v4132_v48 }
 0xad9   : > { %v9306_v29 = vpop.eup %9305  ;;  %9317 = vtanh.f32 %v4133_v36 }
 0xada   : > { %v9308_v3 = vpop.eup %9307  ;;  %9319 = vtanh.f32 %v4134_v41  ;;  %v11825_v41 = vld [vmem:[#allocation7 + $0x78] sm:$0xff] }
 0xadb   : > { %v9310_v1 = vpop.eup %9309  ;;  %v4183_v2 = vrot.slane %v9308_v3, 7 }
 0xadc   : > { %v9312_v9 = vpop.eup %9311  ;;  %v4185_v8 = vrot.slane %v9310_v1, 6 }
 0xadd   : > { %v9314_v62 = vpop.eup %9313  ;;  %v4184_v51 = vsel %vm609_vm2, %v4183_v2, %v9306_v29  ;;  %v4092_v16 = vpop.f32.mrf.mxu0  ;;  %v4187_v10 = vrot.slane %v9312_v9, 5 }
 0xade   : > { %v9316_v42 = vpop.eup %9315  ;;  %v4186_v19 = vsel %vm612_vm3, %v4185_v8, %v4184_v51  ;;  %v4104_v11 = vrot.slane %v4092_v16, 1  ;;  %v4105_v22 = vrot.slane %v4092_v16, 2  ;;  %v4106_v50 = vrot.slane %v4092_v16, 3 }
 0xadf   : > { %v9318_v15 = vpop.eup %9317  ;;  %v4189_v27 = vrot.slane %v9314_v62, 4  ;;  %v4135_v53 = vadd.f32 %v4092_v16, %v4064_v12  ;;  %v4188_v54 = vsel %vm615_vm4, %v4187_v10, %v4186_v19  ;;  %v4191_v55 = vrot.slane %v9316_v42, 3  ;;  %v11839_v62 = vld [vmem:[#allocation7 + $0x58] sm:$0xff]  ;;  %v4164_v42 = vpop.permute.xlu2 %4163  ;;  %v11844_v10 = vld [vmem:[#allocation7 + $0x50] sm:$0xff] }
 0xae0   : > { %v9320_v63 = vpop.eup %9319  ;;  %v4107_v59 = vrot.slane %v4092_v16, 4  ;;  %v4136_v61 = vadd.f32 %v4104_v11, %v4065_v47  ;;  %v4193_v28 = vrot.slane %v9318_v15, 2  ;;  %v4108_v26 = vrot.slane %v4092_v16, 5  ;;  %v11849_v11 = vld [vmem:[#allocation7 + $0x48] sm:$0xff] }
 0xae1   : > { %v4190_v25 = vsel %vm618_vm5, %v4189_v27, %v4188_v54  ;;  %v4195_v57 = vrot.slane %v9320_v63, 1  ;;  %v4109_v32 = vrot.slane %v4092_v16, 6  ;;  %v4110_v7 = vrot.slane %v4092_v16, 7  ;;  %v11856_v63 = vld [vmem:[#allocation7 + $0x40] sm:$0xff] }
 0xae2   : > { %v4192_v23 = vsel %vm621_vm6, %v4191_v55, %v4190_v25  ;;  %9321 = vtanh.f32 %v4136_v61  ;;  %v4137_v6 = vadd.f32 %v4105_v22, %v4066_v20  ;;  %v4138_v43 = vadd.f32 %v4106_v50, %v4067_v40 }
 0xae3   : > { %v4194_v60 = vsel %vm624_vm7, %v4193_v28, %v4192_v23  ;;  %9323 = vtanh.f32 %v4135_v53  ;;  %v4139_v35 = vadd.f32 %v4107_v59, %v4068_v14  ;;  %v4140_v30 = vadd.f32 %v4108_v26, %v4069_v45  ;;  %v11869_v23 = vld [vmem:[#allocation7 + $0x20] sm:$0xff]  ;;  %v11872_v26 = vld [vmem:[#allocation7 + $0x18] sm:$0xff] }
 0xae4   : > { %v4196_v33 = vsel %vm627_vm8, %v4195_v57, %v4194_v60  ;;  %9325 = vtanh.f32 %v4137_v6  ;;  %v4141_v4 = vadd.f32 %v4109_v32, %v4070_v58  ;;  %v4142_v36 = vadd.f32 %v4110_v7, %v4071_v37  ;;  %v11866_v57 = vld [vmem:[#allocation7 + $0x28] sm:$0xff]  ;;  %v11875_v32 = vld [vmem:[#allocation7 + $0x10] sm:$0xff]  ;;  %v11881_v60 = vld [vmem:[#allocation7] sm:$0xff] }
 0xae5   : > { %v4213_v5 = vsel %vm4165_vm14, %v4196_v33, 0.0  ;;  %v11822_v17 = vsel %vm4165_vm14, %v4196_v33, %v11768_v46  ;;  %9327 = vtanh.f32 %v4138_v43  ;;  %vm4166_vm15 = vcmp.eq.s32.totalorder %v4164_v42, 1  ;;  %v11878_v7 = vld [vmem:[#allocation7 + $0x8] sm:$0xff]  ;;  %v4264_v6 = vld [vmem:[%s10437_s0 + $0x18] sm:$0x1] }
 0xae6   : > { %v4217_v52 = vrot.slane %v4213_v5, 1  ;;  %v4218_v18 = vrot.slane %v4213_v5, 2  ;;  %v4219_v21 = vrot.slane %v4213_v5, 3  ;;  %4245 = vst [vmem:[#allocation3 + $0x10] sm:$0x1] %v4213_v5  ;;  %4311 = vmatmul.f32.vlgmr.msra.gmra.mxu1 %v11822_v17  ;;  %v4220_v48 = vrot.slane %v4213_v5, 4 }
 0xae7   : > { %6079 = vmatpush.msra.mxu1 %v11825_v41  ;;  %v4221_v29 = vrot.slane %v4213_v5, 5  ;;  %9329 = vtanh.f32 %v4139_v35  ;;  %v4222_v24 = vrot.slane %v4213_v5, 6  ;;  %v4223_v3 = vrot.slane %v4213_v5, 7  ;;  %v4263_v43 = vld [vmem:[%s10437_s0 + $0x8] sm:$0x1] }
 0xae8   : > { %4246 = vst [vmem:[#allocation3 + $0x30] sm:$0x1] %v4217_v52  ;;  %v9322_v46 = vpop.eup %9321  ;;  %9331 = vtanh.f32 %v4140_v30  ;;  %v4265_v33 = vld [vmem:[%s10437_s0 + $0x28] sm:$0x1]  ;;  %v4266_v35 = vld [vmem:[%s10437_s0 + $0x38] sm:$0x1] }
 0xae9   : > { %4247 = vst [vmem:[#allocation3 + $0x50] sm:$0x1] %v4218_v18  ;;  %6080 = vmatpush.msra.mxu1 %v11828_v44  ;;  %v9324_v31 = vpop.eup %9323  ;;  %9333 = vtanh.f32 %v4141_v4  ;;  %v4197_v49 = vrot.slane %v9322_v46, 7  ;;  %v4267_v5 = vld [vmem:[%s10437_s0 + $0x48] sm:$0x1]  ;;  %v4280_v18 = vunpack.c.l.bf16 %v4264_v6  ;;  %v4281_v4 = vunpack.c.l.bf16 %v4265_v33 }
 0xaea   : > { %4248 = vst [vmem:[#allocation3 + $0x70] sm:$0x1] %v4219_v21  ;;  %v9326_v34 = vpop.eup %9325  ;;  %9335 = vtanh.f32 %v4142_v36  ;;  %v4268_v30 = vld [vmem:[%s10437_s0 + $0x58] sm:$0x1]  ;;  %v4269_v52 = vld [vmem:[%s10437_s0 + $0x68] sm:$0x1]  ;;  %v4279_v21 = vunpack.c.l.bf16 %v4263_v43  ;;  %v4282_v36 = vunpack.c.l.bf16 %v4266_v35  ;;  %v4283_v46 = vunpack.c.l.bf16 %v4267_v5 }
 0xaeb   : > { %4249 = vst [vmem:[#allocation3 + $0x90] sm:$0x1] %v4220_v48  ;;  %6081 = vmatpush.msra.mxu1 %v11831_v56  ;;  %v4198_v1 = vsel %vm609_vm2, %v4197_v49, %v9324_v31  ;;  %v4199_v2 = vrot.slane %v9326_v34, 6  ;;  %v9328_v0 = vpop.eup %9327  ;;  %v4270_v48 = vld [vmem:[%s10437_s0 + $0x78] sm:$0x1]  ;;  %v4285_v31 = vunpack.c.l.bf16 %v4269_v52 }
 0xaec   : > { %4250 = vst [vmem:[#allocation3 + $0xb0] sm:$0x1] %v4221_v29  ;;  %v4201_v47 = vrot.slane %v9328_v0, 5  ;;  %v4286_v0 = vunpack.c.l.bf16 %v4270_v48  ;;  %v4276_v43 = vld [vmem:[%s10437_s0 + $0xd8] sm:$0x1] }
 0xaed   : > { %4251 = vst [vmem:[#allocation3 + $0xd0] sm:$0x1] %v4222_v24  ;;  %6082 = vmatpush.msra.mxu1 %v11835_v38  ;;  %v9330_v9 = vpop.eup %9329  ;;  %v4200_v12 = vsel %vm612_vm3, %v4199_v2, %v4198_v1  ;;  %v4284_v24 = vunpack.c.l.bf16 %v4268_v30  ;;  %v4277_v52 = vld [vmem:[%s10437_s0 + $0xe8] sm:$0x1] }
 0xaee   : > { %4252 = vst [vmem:[#allocation3 + $0xf0] sm:$0x1] %v4223_v3  ;;  %v9332_v8 = vpop.eup %9331  ;;  %v4203_v20 = vrot.slane %v9330_v9, 4  ;;  %v4202_v40 = vsel %vm615_vm4, %v4201_v47, %v4200_v12 }
 0xaef   : > { %6083 = vmatpush.msra.mxu1 %v11839_v62  ;;  %v9334_v51 = vpop.eup %9333  ;;  %v4205_v14 = vrot.slane %v9332_v8, 3 }
 0xaf0   : > { %v9336_v45 = vpop.eup %9335  ;;  %v4204_v16 = vsel %vm618_vm5, %v4203_v20, %v4202_v40  ;;  %v4207_v19 = vrot.slane %v9334_v51, 2 }
 0xaf1   : > { %6084 = vmatpush.msra.mxu1 %v11844_v10  ;;  %v4206_v58 = vsel %vm621_vm6, %v4205_v14, %v4204_v16  ;;  %v4209_v37 = vrot.slane %v9336_v45, 1 }
 0xaf2   : > { %v4208_v15 = vsel %vm624_vm7, %v4207_v19, %v4206_v58  ;;  %v4384_v58 = vpop.permute.xlu0 %4383 }
 0xaf3   : > { %6085 = vmatpush.msra.mxu1 %v11849_v11  ;;  %v4210_v22 = vsel %vm627_vm8, %v4209_v37, %v4208_v15  ;;  %v4271_v37 = vld [vmem:[%s10437_s0 + $0x88] sm:$0x1]  ;;  %vm4388_vm0 = vcmp.eq.s32.totalorder %v4384_v58, 1 }
 0xaf4   : > { %v4214_v50 = vsel %vm4166_vm15, %v4210_v22, 0.0  ;;  %v11854_v27 = vsel %vm4166_vm15, %v4210_v22, %v11786_v13  ;;  %v11863_v13 = vld [vmem:[#allocation7 + $0x30] sm:$0xff]  ;;  %v4272_v22 = vld [vmem:[%s10437_s0 + $0x98] sm:$0x1]  ;;  %v4287_v35 = vunpack.c.l.bf16 %v4271_v37 }
 0xaf5   : > { %6086 = vmatpush.msra.mxu1 %v11856_v63  ;;  %v4224_v53 = vrot.slane %v4214_v50, 1  ;;  %v4225_v54 = vrot.slane %v4214_v50, 2  ;;  %v4226_v55 = vrot.slane %v4214_v50, 3  ;;  %4253 = vst [vmem:[#allocation3 + $0x110] sm:$0x1] %v4214_v50  ;;  %v4227_v59 = vrot.slane %v4214_v50, 4 }
 0xaf6   : > { %4314 = vmatmul.f32.gmra.mxu1 %v11854_v27  ;;  %v4228_v61 = vrot.slane %v4214_v50, 5  ;;  %v4229_v25 = vrot.slane %v4214_v50, 6  ;;  %v4230_v28 = vrot.slane %v4214_v50, 7  ;;  %v4288_v5 = vunpack.c.l.bf16 %v4272_v22 }
 0xaf7   : > { %6087 = vmatpush.msra.mxu1 %v11860_v39  ;;  %4254 = vst [vmem:[#allocation3 + $0x130] sm:$0x1] %v4224_v53  ;;  %v4273_v53 = vld [vmem:[%s10437_s0 + $0xa8] sm:$0x1] }
 0xaf8   : > { %4255 = vst [vmem:[#allocation3 + $0x150] sm:$0x1] %v4225_v54 }
 0xaf9   : > { %6088 = vmatpush.msra.mxu1 %v11863_v13  ;;  %4256 = vst [vmem:[#allocation3 + $0x170] sm:$0x1] %v4226_v55 }
 0xafa   : > { %4257 = vst [vmem:[#allocation3 + $0x190] sm:$0x1] %v4227_v59  ;;  %v4274_v59 = vld [vmem:[%s10437_s0 + $0xb8] sm:$0x1] }
 0xafb   : > { %6089 = vmatpush.msra.mxu1 %v11866_v57  ;;  %4258 = vst [vmem:[#allocation3 + $0x1b0] sm:$0x1] %v4228_v61  ;;  %v4275_v61 = vld [vmem:[%s10437_s0 + $0xc8] sm:$0x1] }
 0xafc   : > { %4259 = vst [vmem:[#allocation3 + $0x1d0] sm:$0x1] %v4229_v25 }
 0xafd   : > { %6090 = vmatpush.msra.mxu1 %v11869_v23  ;;  %4260 = vst [vmem:[#allocation3 + $0x1f0] sm:$0x1] %v4230_v28 }
 0xaff   : > { %6091 = vmatpush.msra.mxu1 %v11872_v26 }
 0xb01   : > { %6092 = vmatpush.msra.mxu1 %v11875_v32 }
 0xb03   : > { %6093 = vmatpush.msra.mxu1 %v11878_v7 }
 0xb05   : > { %6094 = vmatpush.msra.mxu1 %v11881_v60 }
 0xb63   : > { %v4312_v29 = vpop.f32.mrf.mxu1 }
 0xb64   : > { %v4320_v3 = vrot.slane %v4312_v29, 7  ;;  %v4321_v49 = vrot.slane %v4312_v29, 1  ;;  %v4322_v34 = vrot.slane %v4312_v29, 2  ;;  %v4323_v1 = vrot.slane %v4312_v29, 3 }
 0xb65   : > { %v4351_v2 = vadd.f32 %v4312_v29, %v4280_v18  ;;  %v4324_v9 = vrot.slane %v4312_v29, 4  ;;  %v4325_v12 = vrot.slane %v4312_v29, 5  ;;  %v4326_v20 = vrot.slane %v4312_v29, 6 }
 0xb66   : > { %v4350_v47 = vadd.f32 %v4320_v3, %v4279_v21  ;;  %v4352_v8 = vadd.f32 %v4321_v49, %v4281_v4  ;;  %v4353_v51 = vadd.f32 %v4322_v34, %v4282_v36  ;;  %v4354_v40 = vadd.f32 %v4323_v1, %v4283_v46  ;;  %v4278_v34 = vld [vmem:[%s10437_s0 + $0xf8] sm:$0x1] }
 0xb67   : > { %9337 = vtanh.f32 %v4351_v2  ;;  %v4355_v14 = vadd.f32 %v4324_v9, %v4284_v24  ;;  %v4356_v45 = vadd.f32 %v4325_v12, %v4285_v31  ;;  %v4357_v42 = vadd.f32 %v4326_v20, %v4286_v0 }
 0xb68   : > { %9339 = vtanh.f32 %v4350_v47  ;;  %v4289_v18 = vunpack.c.l.bf16 %v4273_v53  ;;  %v4290_v29 = vunpack.c.l.bf16 %v4274_v59  ;;  %v4291_v46 = vunpack.c.l.bf16 %v4275_v61 }
 0xb69   : > { %9341 = vtanh.f32 %v4352_v8  ;;  %v4292_v1 = vunpack.c.l.bf16 %v4276_v43  ;;  %v4293_v12 = vunpack.c.l.bf16 %v4277_v52 }
 0xb6a   : > { %9343 = vtanh.f32 %v4353_v51 }
 0xb6b   : > { %9345 = vtanh.f32 %v4354_v40 }
 0xb6c   : > { %9347 = vtanh.f32 %v4355_v14 }
 0xb6d   : > { %v9338_v16 = vpop.eup %9337  ;;  %9349 = vtanh.f32 %v4356_v45  ;;  %v4294_v45 = vunpack.c.l.bf16 %v4278_v34 }
 0xb6e   : > { %v9340_v19 = vpop.eup %9339  ;;  %9351 = vtanh.f32 %v4357_v42 }
 0xb6f   : > { %v9342_v15 = vpop.eup %9341  ;;  %v4406_v50 = vrot.slane %v9340_v19, 1 }
 0xb70   : > { %v9344_v54 = vpop.eup %9343  ;;  %v4408_v55 = vrot.slane %v9342_v15, 7 }
 0xb71   : > { %v9346_v25 = vpop.eup %9345  ;;  %v4407_v28 = vsel %vm609_vm2, %v9338_v16, %v4406_v50  ;;  %v4410_v6 = vrot.slane %v9344_v54, 6 }
 0xb72   : > { %v9348_v33 = vpop.eup %9347  ;;  %v4409_v30 = vsel %vm612_vm3, %v4408_v55, %v4407_v28  ;;  %v4412_v36 = vrot.slane %v9346_v25, 5 }
 0xb73   : > { %v9350_v21 = vpop.eup %9349  ;;  %v4315_v4 = vpop.f32.mrf.mxu1  ;;  %v4411_v48 = vsel %vm615_vm4, %v4410_v6, %v4409_v30  ;;  %v4414_v49 = vrot.slane %v9348_v33, 4 }
 0xb74   : > { %v9352_v24 = vpop.eup %9351  ;;  %v4327_v31 = vrot.slane %v4315_v4, 7  ;;  %v4328_v3 = vrot.slane %v4315_v4, 1  ;;  %v4329_v2 = vrot.slane %v4315_v4, 2  ;;  %v4413_v0 = vsel %vm618_vm5, %v4412_v36, %v4411_v48 }
 0xb75   : > { %v4416_v9 = vrot.slane %v9350_v21, 3  ;;  %v4415_v8 = vsel %vm621_vm6, %v4414_v49, %v4413_v0  ;;  %v4418_v20 = vrot.slane %v9352_v24, 2  ;;  %v4330_v51 = vrot.slane %v4315_v4, 3 }
 0xb76   : > { %v4358_v47 = vadd.f32 %v4327_v31, %v4287_v35  ;;  %v4359_v40 = vadd.f32 %v4315_v4, %v4288_v5  ;;  %v4331_v42 = vrot.slane %v4315_v4, 4  ;;  %v4332_v19 = vrot.slane %v4315_v4, 5 }
 0xb77   : > { %v4417_v14 = vsel %vm624_vm7, %v4416_v9, %v4415_v8  ;;  %v4360_v37 = vadd.f32 %v4328_v3, %v4289_v18  ;;  %v4333_v50 = vrot.slane %v4315_v4, 6  ;;  %v4361_v53 = vadd.f32 %v4329_v2, %v4290_v29 }
 0xb78   : > { %9353 = vtanh.f32 %v4358_v47  ;;  %v4419_v16 = vsel %vm627_vm8, %v4418_v20, %v4417_v14  ;;  %v4362_v61 = vadd.f32 %v4330_v51, %v4291_v46  ;;  %v4363_v28 = vadd.f32 %v4331_v42, %v4292_v1  ;;  %v4387_v1 = vpop.permute.xlu1 %4386 }
 0xb79   : > { %v4436_v15 = vsel %vm4388_vm0, %v4419_v16, 0.0  ;;  %v11910_v22 = vsel %vm4388_vm0, %v4419_v16, %v11822_v17  ;;  %9355 = vtanh.f32 %v4359_v40  ;;  %v4364_v43 = vadd.f32 %v4332_v19, %v4293_v12 }
 0xb7a   : > { %v4440_v54 = vrot.slane %v4436_v15, 1  ;;  %v4441_v55 = vrot.slane %v4436_v15, 2  ;;  %v4442_v59 = vrot.slane %v4436_v15, 3  ;;  %4468 = vst [vmem:[#allocation3 + $0x11] sm:$0x1] %v4436_v15  ;;  %4534 = vmatmul.f32.vlgmr.msra.gmra.mxu2 %v11910_v22  ;;  %v4443_v25 = vrot.slane %v4436_v15, 4 }
 0xb7b   : > { %6302 = vmatpush.msra.mxu2 %v11825_v41  ;;  %v4444_v6 = vrot.slane %v4436_v15, 5  ;;  %9357 = vtanh.f32 %v4360_v37  ;;  %v4445_v17 = vrot.slane %v4436_v15, 6  ;;  %v4365_v58 = vadd.f32 %v4333_v50, %v4294_v45  ;;  %v4488_v37 = vld [vmem:[%s10437_s0 + $0x28] sm:$0x2]  ;;  %v4487_v50 = vld [vmem:[%s10437_s0 + $0x18] sm:$0x2] }
 0xb7c   : > { %4469 = vst [vmem:[#allocation3 + $0x31] sm:$0x1] %v4440_v54  ;;  %9359 = vtanh.f32 %v4361_v53  ;;  %v4446_v35 = vrot.slane %v4436_v15, 7  ;;  %vm4389_vm1 = vcmp.eq.s32.totalorder %v4387_v1, 1  ;;  %v4486_v15 = vld [vmem:[%s10437_s0 + $0x8] sm:$0x2] }
 0xb7d   : > { %4470 = vst [vmem:[#allocation3 + $0x51] sm:$0x1] %v4441_v55  ;;  %6303 = vmatpush.msra.mxu2 %v11828_v44  ;;  %9361 = vtanh.f32 %v4362_v61  ;;  %v4489_v53 = vld [vmem:[%s10437_s0 + $0x38] sm:$0x2]  ;;  %v4490_v54 = vld [vmem:[%s10437_s0 + $0x48] sm:$0x2]  ;;  %v4504_v61 = vunpack.c.l.bf16 %v4488_v37 }
 0xb7e   : > { %v9354_v33 = vpop.eup %9353  ;;  %4471 = vst [vmem:[#allocation3 + $0x71] sm:$0x1] %v4442_v59  ;;  %9363 = vtanh.f32 %v4363_v28  ;;  %v4491_v55 = vld [vmem:[%s10437_s0 + $0x58] sm:$0x2]  ;;  %v4492_v59 = vld [vmem:[%s10437_s0 + $0x68] sm:$0x2]  ;;  %v4503_v28 = vunpack.c.l.bf16 %v4487_v50 }
 0xb7f   : > { %4472 = vst [vmem:[#allocation3 + $0x91] sm:$0x1] %v4443_v25  ;;  %v4420_v5 = vrot.slane %v9354_v33, 1  ;;  %6304 = vmatpush.msra.mxu2 %v11831_v56  ;;  %9365 = vtanh.f32 %v4364_v43  ;;  %v9356_v30 = vpop.eup %9355  ;;  %v4502_v25 = vunpack.c.l.bf16 %v4486_v15  ;;  %v4505_v43 = vunpack.c.l.bf16 %v4489_v53  ;;  %v4500_v37 = vld [vmem:[%s10437_s0 + $0xe8] sm:$0x2] }
 0xb80   : > { %4473 = vst [vmem:[#allocation3 + $0xb1] sm:$0x1] %v4444_v6  ;;  %9367 = vtanh.f32 %v4365_v58  ;;  %v4493_v6 = vld [vmem:[%s10437_s0 + $0x78] sm:$0x2]  ;;  %v4506_v58 = vunpack.c.l.bf16 %v4490_v54  ;;  %v4507_v33 = vunpack.c.l.bf16 %v4491_v55 }
 0xb81   : > { %4474 = vst [vmem:[#allocation3 + $0xd1] sm:$0x1] %v4445_v17  ;;  %6305 = vmatpush.msra.mxu2 %v11835_v38  ;;  %v9358_v52 = vpop.eup %9357  ;;  %v4421_v18 = vsel %vm609_vm2, %v9356_v30, %v4420_v5 }
 0xb82   : > { %4475 = vst [vmem:[#allocation3 + $0xf1] sm:$0x1] %v4446_v35  ;;  %v9360_v21 = vpop.eup %9359  ;;  %v4422_v4 = vrot.slane %v9358_v52, 7  ;;  %v4508_v35 = vunpack.c.l.bf16 %v4492_v59  ;;  %v4501_v59 = vld [vmem:[%s10437_s0 + $0xf8] sm:$0x2] }
 0xb83   : > { %6306 = vmatpush.msra.mxu2 %v11839_v62  ;;  %v9362_v48 = vpop.eup %9361  ;;  %v4424_v36 = vrot.slane %v9360_v21, 6 }
 0xb84   : > { %v9364_v29 = vpop.eup %9363  ;;  %v4423_v46 = vsel %vm612_vm3, %v4422_v4, %v4421_v18  ;;  %v4426_v24 = vrot.slane %v9362_v48, 5  ;;  %v4509_v4 = vunpack.c.l.bf16 %v4493_v6 }
 0xb85   : > { %6307 = vmatpush.msra.mxu2 %v11844_v10  ;;  %v9366_v31 = vpop.eup %9365  ;;  %v4425_v3 = vsel %vm615_vm4, %v4424_v36, %v4423_v46  ;;  %v4428_v49 = vrot.slane %v9364_v29, 4 }
 0xb86   : > { %v9368_v34 = vpop.eup %9367  ;;  %v4427_v2 = vsel %vm618_vm5, %v4426_v24, %v4425_v3  ;;  %v4430_v0 = vrot.slane %v9366_v31, 3 }
 0xb87   : > { %6308 = vmatpush.msra.mxu2 %v11849_v11  ;;  %v4429_v9 = vsel %vm621_vm6, %v4428_v49, %v4427_v2  ;;  %v4432_v12 = vrot.slane %v9368_v34, 2 }
 0xb88   : > { %v4431_v47 = vsel %vm624_vm7, %v4430_v0, %v4429_v9  ;;  %v4607_v9 = vpop.permute.xlu2 %4606 }
 0xb89   : > { %6309 = vmatpush.msra.mxu2 %v11856_v63  ;;  %v4433_v8 = vsel %vm627_vm8, %v4432_v12, %v4431_v47  ;;  %v4494_v47 = vld [vmem:[%s10437_s0 + $0x88] sm:$0x2]  ;;  %vm4611_vm9 = vcmp.eq.s32.totalorder %v4607_v9, 1 }
 0xb8a   : > { %v4437_v20 = vsel %vm4389_vm1, %v4433_v8, 0.0  ;;  %v11929_v51 = vsel %vm4389_vm1, %v4433_v8, %v11854_v27  ;;  %v4495_v8 = vld [vmem:[%s10437_s0 + $0x98] sm:$0x2]  ;;  %v4510_v50 = vunpack.c.l.bf16 %v4494_v47 }
 0xb8b   : > { %6310 = vmatpush.msra.mxu2 %v11860_v39  ;;  %v4447_v40 = vrot.slane %v4437_v20, 1  ;;  %v4448_v14 = vrot.slane %v4437_v20, 2  ;;  %v4449_v45 = vrot.slane %v4437_v20, 3  ;;  %4476 = vst [vmem:[#allocation3 + $0x111] sm:$0x1] %v4437_v20  ;;  %v4450_v42 = vrot.slane %v4437_v20, 4 }
 0xb8c   : > { %4537 = vmatmul.f32.gmra.mxu2 %v11929_v51  ;;  %v4451_v16 = vrot.slane %v4437_v20, 5  ;;  %v4452_v19 = vrot.slane %v4437_v20, 6  ;;  %v4453_v27 = vrot.slane %v4437_v20, 7  ;;  %v4511_v53 = vunpack.c.l.bf16 %v4495_v8 }
 0xb8d   : > { %6311 = vmatpush.msra.mxu2 %v11863_v13  ;;  %4477 = vst [vmem:[#allocation3 + $0x131] sm:$0x1] %v4447_v40 }
 0xb8e   : > { %4478 = vst [vmem:[#allocation3 + $0x151] sm:$0x1] %v4448_v14  ;;  %v4496_v14 = vld [vmem:[%s10437_s0 + $0xa8] sm:$0x2] }
 0xb8f   : > { %6312 = vmatpush.msra.mxu2 %v11866_v57  ;;  %4479 = vst [vmem:[#allocation3 + $0x171] sm:$0x1] %v4449_v45 }
 0xb90   : > { %4480 = vst [vmem:[#allocation3 + $0x191] sm:$0x1] %v4450_v42  ;;  %v4497_v42 = vld [vmem:[%s10437_s0 + $0xb8] sm:$0x2] }
 0xb91   : > { %6313 = vmatpush.msra.mxu2 %v11869_v23  ;;  %4481 = vst [vmem:[#allocation3 + $0x1b1] sm:$0x1] %v4451_v16 }
 0xb92   : > { %4482 = vst [vmem:[#allocation3 + $0x1d1] sm:$0x1] %v4452_v19  ;;  %v4498_v19 = vld [vmem:[%s10437_s0 + $0xc8] sm:$0x2] }
 0xb93   : > { %6314 = vmatpush.msra.mxu2 %v11872_v26  ;;  %4483 = vst [vmem:[#allocation3 + $0x1f1] sm:$0x1] %v4453_v27  ;;  %v4499_v27 = vld [vmem:[%s10437_s0 + $0xd8] sm:$0x2] }
 0xb95   : > { %6315 = vmatpush.msra.mxu2 %v11875_v32 }
 0xb97   : > { %6316 = vmatpush.msra.mxu2 %v11878_v7 }
 0xb99   : > { %6317 = vmatpush.msra.mxu2 %v11881_v60 }
 0xbfd   : > { %v4535_v17 = vpop.f32.mrf.mxu2 }
 0xbfe   : > { %v4543_v5 = vrot.slane %v4535_v17, 6  ;;  %v4544_v30 = vrot.slane %v4535_v17, 7  ;;  %v4545_v52 = vrot.slane %v4535_v17, 1  ;;  %v4546_v18 = vrot.slane %v4535_v17, 2 }
 0xbff   : > { %v4575_v21 = vadd.f32 %v4535_v17, %v4504_v61  ;;  %v4547_v48 = vrot.slane %v4535_v17, 3  ;;  %v4548_v36 = vrot.slane %v4535_v17, 4  ;;  %v4549_v24 = vrot.slane %v4535_v17, 5 }
 0xc00   : > { %v4573_v29 = vadd.f32 %v4543_v5, %v4502_v25  ;;  %v4574_v46 = vadd.f32 %v4544_v30, %v4503_v28  ;;  %v4576_v31 = vadd.f32 %v4545_v52, %v4505_v43  ;;  %v4577_v3 = vadd.f32 %v4546_v18, %v4506_v58 }
 0xc01   : > { %9369 = vtanh.f32 %v4575_v21  ;;  %v4578_v49 = vadd.f32 %v4547_v48, %v4507_v33  ;;  %v4579_v34 = vadd.f32 %v4548_v36, %v4508_v35  ;;  %v4580_v1 = vadd.f32 %v4549_v24, %v4509_v4 }
 0xc02   : > { %9371 = vtanh.f32 %v4573_v29  ;;  %v4512_v25 = vunpack.c.l.bf16 %v4496_v14  ;;  %v4513_v43 = vunpack.c.l.bf16 %v4497_v42  ;;  %v4514_v33 = vunpack.c.l.bf16 %v4498_v19 }
 0xc03   : > { %9373 = vtanh.f32 %v4574_v46  ;;  %v4515_v35 = vunpack.c.l.bf16 %v4499_v27  ;;  %v4516_v5 = vunpack.c.l.bf16 %v4500_v37  ;;  %v4517_v4 = vunpack.c.l.bf16 %v4501_v59 }
 0xc04   : > { %9375 = vtanh.f32 %v4576_v31 }
 0xc05   : > { %9377 = vtanh.f32 %v4577_v3 }
 0xc06   : > { %9379 = vtanh.f32 %v4578_v49 }
 0xc07   : > { %v9370_v2 = vpop.eup %9369  ;;  %9381 = vtanh.f32 %v4579_v34 }
 0xc08   : > { %v9372_v0 = vpop.eup %9371  ;;  %9383 = vtanh.f32 %v4580_v1 }
 0xc09   : > { %v9374_v12 = vpop.eup %9373  ;;  %v4629_v20 = vrot.slane %v9372_v0, 2 }
 0xc0a   : > { %v9376_v40 = vpop.eup %9375  ;;  %v4630_v45 = vrot.slane %v9374_v12, 1 }
 0xc0b   : > { %v9378_v16 = vpop.eup %9377  ;;  %v4633_v55 = vrot.slane %v9376_v40, 7 }
 0xc0c   : > { %v9380_v15 = vpop.eup %9379  ;;  %v4631_v54 = vsel %vm609_vm2, %v4630_v45, %v4629_v20  ;;  %v4635_v6 = vrot.slane %v9378_v16, 6 }
 0xc0d   : > { %v9382_v61 = vpop.eup %9381  ;;  %v4632_v28 = vsel %vm612_vm3, %v9370_v2, %v4631_v54  ;;  %v4637_v18 = vrot.slane %v9380_v15, 5 }
 0xc0e   : > { %v9384_v17 = vpop.eup %9383  ;;  %v4634_v58 = vsel %vm615_vm4, %v4633_v55, %v4632_v28  ;;  %v4639_v21 = vrot.slane %v9382_v61, 4 }
 0xc0f   : > { %v4538_v30 = vpop.f32.mrf.mxu2  ;;  %v4636_v52 = vsel %vm618_vm5, %v4635_v6, %v4634_v58  ;;  %v4641_v46 = vrot.slane %v9384_v17, 3 }
 0xc10   : > { %v4550_v48 = vrot.slane %v4538_v30, 6  ;;  %v4551_v36 = vrot.slane %v4538_v30, 7  ;;  %v4552_v29 = vrot.slane %v4538_v30, 1  ;;  %v4583_v24 = vadd.f32 %v4538_v30, %v4512_v25 }
 0xc11   : > { %v4638_v31 = vsel %vm621_vm6, %v4637_v18, %v4636_v52  ;;  %v4553_v3 = vrot.slane %v4538_v30, 2  ;;  %v4554_v49 = vrot.slane %v4538_v30, 3  ;;  %v4555_v0 = vrot.slane %v4538_v30, 4 }
 0xc12   : > { %v4581_v34 = vadd.f32 %v4550_v48, %v4510_v50  ;;  %v4582_v1 = vadd.f32 %v4551_v36, %v4511_v53  ;;  %v4640_v2 = vsel %vm624_vm7, %v4639_v21, %v4638_v31  ;;  %v4556_v47 = vrot.slane %v4538_v30, 5  ;;  %v4711_v31 = vld [vmem:[%s10437_s0 + $0x28] sm:$0x2] }
 0xc13   : > { %v4642_v12 = vsel %vm627_vm8, %v4641_v46, %v4640_v2  ;;  %v4584_v8 = vadd.f32 %v4552_v29, %v4513_v43  ;;  %v4585_v20 = vadd.f32 %v4553_v3, %v4514_v33  ;;  %v4586_v45 = vadd.f32 %v4554_v49, %v4515_v35  ;;  %v4713_v3 = vld [vmem:[%s10437_s0 + $0x48] sm:$0x2] }
 0xc14   : > { %9385 = vtanh.f32 %v4581_v34  ;;  %v4659_v40 = vsel %vm4611_vm9, %v4642_v12, 0.0  ;;  %v11966_v14 = vsel %vm4611_vm9, %v4642_v12, %v11910_v22  ;;  %v4587_v15 = vadd.f32 %v4555_v0, %v4516_v5  ;;  %v4715_v49 = vld [vmem:[%s10437_s0 + $0x68] sm:$0x2]  ;;  %v4716_v0 = vld [vmem:[%s10437_s0 + $0x78] sm:$0x2] }
 0xc15   : > { %9387 = vtanh.f32 %v4582_v1  ;;  %v4663_v42 = vrot.slane %v4659_v40, 1  ;;  %v4664_v16 = vrot.slane %v4659_v40, 2  ;;  %v4665_v19 = vrot.slane %v4659_v40, 3  ;;  %4691 = vst [vmem:[#allocation3 + $0x12] sm:$0x1] %v4659_v40  ;;  %4757 = vmatmul.f32.vlgmr.msra.gmra.mxu3 %v11966_v14 }
 0xc16   : > { %9389 = vtanh.f32 %v4583_v24  ;;  %v4666_v27 = vrot.slane %v4659_v40, 4  ;;  %6525 = vmatpush.msra.mxu3 %v11825_v41  ;;  %v4667_v37 = vrot.slane %v4659_v40, 5  ;;  %v4588_v50 = vadd.f32 %v4556_v47, %v4517_v4 }
 0xc17   : > { %4692 = vst [vmem:[#allocation3 + $0x32] sm:$0x1] %v4663_v42  ;;  %9391 = vtanh.f32 %v4584_v8  ;;  %v4668_v9 = vrot.slane %v4659_v40, 6  ;;  %v4669_v22 = vrot.slane %v4659_v40, 7  ;;  %v4727_v2 = vunpack.c.l.bf16 %v4711_v31 }
 0xc18   : > { %4693 = vst [vmem:[#allocation3 + $0x52] sm:$0x1] %v4664_v16  ;;  %9393 = vtanh.f32 %v4585_v20  ;;  %6526 = vmatpush.msra.mxu3 %v11828_v44 }
 0xc19   : > { %4694 = vst [vmem:[#allocation3 + $0x72] sm:$0x1] %v4665_v19  ;;  %9395 = vtanh.f32 %v4586_v45  ;;  %v4732_v45 = vunpack.c.l.bf16 %v4716_v0 }
 0xc1a   : > { %v9386_v53 = vpop.eup %9385  ;;  %4695 = vst [vmem:[#allocation3 + $0x92] sm:$0x1] %v4666_v27  ;;  %9397 = vtanh.f32 %v4587_v15  ;;  %6527 = vmatpush.msra.mxu3 %v11831_v56 }
 0xc1b   : > { %v9388_v54 = vpop.eup %9387  ;;  %4696 = vst [vmem:[#allocation3 + $0xb2] sm:$0x1] %v4667_v37  ;;  %9399 = vtanh.f32 %v4588_v50  ;;  %v4643_v41 = vrot.slane %v9386_v53, 2 }
 0xc1c   : > { %v9390_v55 = vpop.eup %9389  ;;  %4697 = vst [vmem:[#allocation3 + $0xd2] sm:$0x1] %v4668_v9  ;;  %v4644_v59 = vrot.slane %v9388_v54, 1  ;;  %6528 = vmatpush.msra.mxu3 %v11835_v38  ;;  %v4610_v38 = vpop.permute.xlu1 %4609 }
 0xc1d   : > { %v9392_v61 = vpop.eup %9391  ;;  %4698 = vst [vmem:[#allocation3 + $0xf2] sm:$0x1] %v4669_v22  ;;  %vm4612_vm10 = vcmp.eq.s32.totalorder %v4610_v38, 1  ;;  %v4723_v38 = vld [vmem:[%s10437_s0 + $0xe8] sm:$0x2] }
 0xc1e   : > { %v9394_v44 = vpop.eup %9393  ;;  %v4645_v25 = vsel %vm609_vm2, %v4644_v59, %v4643_v41  ;;  %v4647_v28 = vrot.slane %v9392_v61, 7  ;;  %6529 = vmatpush.msra.mxu3 %v11839_v62  ;;  %v4830_v61 = vpop.permute.xlu2 %4829 }
 0xc1f   : > { %v9396_v6 = vpop.eup %9395  ;;  %v4646_v56 = vsel %vm612_vm3, %v9390_v55, %v4645_v25  ;;  %v4649_v43 = vrot.slane %v9394_v44, 6  ;;  %v4717_v55 = vld [vmem:[%s10437_s0 + $0x88] sm:$0x2]  ;;  %v4718_v44 = vld [vmem:[%s10437_s0 + $0x98] sm:$0x2]  ;;  %vm4834_vm11 = vcmp.eq.s32.totalorder %v4830_v61, 1 }
 0xc20   : > { %v9398_v17 = vpop.eup %9397  ;;  %v4648_v58 = vsel %vm615_vm4, %v4647_v28, %v4646_v56  ;;  %v4651_v33 = vrot.slane %v9396_v6, 5  ;;  %6530 = vmatpush.msra.mxu3 %v11844_v10  ;;  %v4720_v25 = vld [vmem:[%s10437_s0 + $0xb8] sm:$0x2] }
 0xc21   : > { %v9400_v35 = vpop.eup %9399  ;;  %v4650_v5 = vsel %vm618_vm5, %v4649_v43, %v4648_v58  ;;  %v4653_v30 = vrot.slane %v9398_v17, 4  ;;  %v4719_v43 = vld [vmem:[%s10437_s0 + $0xa8] sm:$0x2] }
 0xc22   : > { %v4652_v52 = vsel %vm621_vm6, %v4651_v33, %v4650_v5  ;;  %v4655_v18 = vrot.slane %v9400_v35, 3  ;;  %6531 = vmatpush.msra.mxu3 %v11849_v11  ;;  %v4721_v17 = vld [vmem:[%s10437_s0 + $0xc8] sm:$0x2]  ;;  %v4722_v35 = vld [vmem:[%s10437_s0 + $0xd8] sm:$0x2] }
 0xc23   : > { %v4654_v62 = vsel %vm624_vm7, %v4653_v30, %v4652_v52  ;;  %v4733_v30 = vunpack.c.l.bf16 %v4717_v55  ;;  %v4734_v52 = vunpack.c.l.bf16 %v4718_v44 }
 0xc24   : > { %v4656_v21 = vsel %vm627_vm8, %v4655_v18, %v4654_v62  ;;  %6532 = vmatpush.msra.mxu3 %v11856_v63 }
 0xc25   : > { %v4660_v4 = vsel %vm4612_vm10, %v4656_v21, 0.0  ;;  %v11985_v10 = vsel %vm4612_vm10, %v4656_v21, %v11929_v51  ;;  %v4710_v51 = vld [vmem:[%s10437_s0 + $0x18] sm:$0x2]  ;;  %v4736_v21 = vunpack.c.l.bf16 %v4720_v25  ;;  %v12031_v25 = vld [vmem:[#allocation7 + $0x68] sm:$0xff] }
 0xc26   : > { %v4670_v48 = vrot.slane %v4660_v4, 1  ;;  %v4671_v36 = vrot.slane %v4660_v4, 2  ;;  %v4672_v29 = vrot.slane %v4660_v4, 3  ;;  %4699 = vst [vmem:[#allocation3 + $0x112] sm:$0x1] %v4660_v4  ;;  %4760 = vmatmul.f32.gmra.mxu3 %v11985_v10  ;;  %v4673_v46 = vrot.slane %v4660_v4, 4 }
 0xc27   : > { %6533 = vmatpush.msra.mxu3 %v11860_v39  ;;  %v4674_v11 = vrot.slane %v4660_v4, 5  ;;  %v4675_v24 = vrot.slane %v4660_v4, 6  ;;  %v4676_v63 = vrot.slane %v4660_v4, 7  ;;  %v4712_v39 = vld [vmem:[%s10437_s0 + $0x38] sm:$0x2] }
 0xc28   : > { %4700 = vst [vmem:[#allocation3 + $0x132] sm:$0x1] %v4670_v48  ;;  %v4728_v34 = vunpack.c.l.bf16 %v4712_v39  ;;  %v4735_v48 = vunpack.c.l.bf16 %v4719_v43  ;;  %v4739_v39 = vunpack.c.l.bf16 %v4723_v38 }
 0xc29   : > { %4701 = vst [vmem:[#allocation3 + $0x152] sm:$0x1] %v4671_v36  ;;  %6534 = vmatpush.msra.mxu3 %v11863_v13  ;;  %v4709_v13 = vld [vmem:[%s10437_s0 + $0x8] sm:$0x2]  ;;  %v4737_v36 = vunpack.c.l.bf16 %v4721_v17 }
 0xc2a   : > { %4702 = vst [vmem:[#allocation3 + $0x172] sm:$0x1] %v4672_v29  ;;  %v4725_v1 = vunpack.c.l.bf16 %v4709_v13 }
 0xc2b   : > { %4703 = vst [vmem:[#allocation3 + $0x192] sm:$0x1] %v4673_v46  ;;  %6535 = vmatpush.msra.mxu3 %v11866_v57  ;;  %v4714_v57 = vld [vmem:[%s10437_s0 + $0x58] sm:$0x2] }
 0xc2c   : > { %4704 = vst [vmem:[#allocation3 + $0x1b2] sm:$0x1] %v4674_v11  ;;  %v4730_v47 = vunpack.c.l.bf16 %v4714_v57  ;;  %v4724_v57 = vld [vmem:[%s10437_s0 + $0xf8] sm:$0x2] }
 0xc2d   : > { %4705 = vst [vmem:[#allocation3 + $0x1d2] sm:$0x1] %v4675_v24  ;;  %6536 = vmatpush.msra.mxu3 %v11869_v23  ;;  %v4726_v23 = vunpack.c.l.bf16 %v4710_v51 }
 0xc2e   : > { %4706 = vst [vmem:[#allocation3 + $0x1f2] sm:$0x1] %v4676_v63  ;;  %v4738_v63 = vunpack.c.l.bf16 %v4722_v35  ;;  %v12038_v35 = vld [vmem:[#allocation7 + $0x58] sm:$0xff] }
 0xc2f   : > { %6537 = vmatpush.msra.mxu3 %v11872_v26  ;;  %v4729_v26 = vunpack.c.l.bf16 %v4713_v3 }
 0xc31   : > { %6538 = vmatpush.msra.mxu3 %v11875_v32  ;;  %v4731_v32 = vunpack.c.l.bf16 %v4715_v49 }
 0xc33   : > { %6539 = vmatpush.msra.mxu3 %v11878_v7 }
 0xc35   : > { %6540 = vmatpush.msra.mxu3 %v11881_v60 }
 0xc98   : > { %v4758_v12 = vpop.f32.mrf.mxu3 }
 0xc99   : > { %v4766_v8 = vrot.slane %v4758_v12, 5  ;;  %v4767_v7 = vrot.slane %v4758_v12, 6  ;;  %v4768_v20 = vrot.slane %v4758_v12, 7  ;;  %v4769_v60 = vrot.slane %v4758_v12, 1 }
 0xc9a   : > { %v4799_v40 = vadd.f32 %v4758_v12, %v4728_v34  ;;  %v4770_v42 = vrot.slane %v4758_v12, 2  ;;  %v4771_v16 = vrot.slane %v4758_v12, 3  ;;  %v4772_v15 = vrot.slane %v4758_v12, 4 }
 0xc9b   : > { %v4796_v19 = vadd.f32 %v4766_v8, %v4725_v1  ;;  %v4797_v27 = vadd.f32 %v4767_v7, %v4726_v23  ;;  %v4798_v37 = vadd.f32 %v4768_v20, %v4727_v2  ;;  %v4800_v50 = vadd.f32 %v4769_v60, %v4729_v26 }
 0xc9c   : > { %9401 = vtanh.f32 %v4799_v40  ;;  %v4801_v9 = vadd.f32 %v4770_v42, %v4730_v47  ;;  %v4802_v22 = vadd.f32 %v4771_v16, %v4731_v32  ;;  %v4803_v53 = vadd.f32 %v4772_v15, %v4732_v45 }
 0xc9d   : > { %9403 = vtanh.f32 %v4796_v19  ;;  %v4740_v8 = vunpack.c.l.bf16 %v4724_v57 }
 0xc9e   : > { %9405 = vtanh.f32 %v4797_v27 }
 0xc9f   : > { %9407 = vtanh.f32 %v4798_v37 }
 0xca0   : > { %9409 = vtanh.f32 %v4800_v50 }
 0xca1   : > { %9411 = vtanh.f32 %v4801_v9 }
 0xca2   : > { %v9402_v54 = vpop.eup %9401  ;;  %9413 = vtanh.f32 %v4802_v22  ;;  %v12025_v22 = vld [vmem:[#allocation7 + $0x78] sm:$0xff] }
 0xca3   : > { %v9404_v41 = vpop.eup %9403  ;;  %9415 = vtanh.f32 %v4803_v53 }
 0xca4   : > { %v9406_v59 = vpop.eup %9405  ;;  %v4852_v28 = vrot.slane %v9404_v41, 3  ;;  %v12028_v41 = vld [vmem:[#allocation7 + $0x70] sm:$0xff] }
 0xca5   : > { %v9408_v6 = vpop.eup %9407  ;;  %v4853_v56 = vrot.slane %v9406_v59, 2 }
 0xca6   : > { %v9410_v58 = vpop.eup %9409  ;;  %v4855_v33 = vrot.slane %v9408_v6, 1 }
 0xca7   : > { %v9412_v5 = vpop.eup %9411  ;;  %v4854_v18 = vsel %vm609_vm2, %v4853_v56, %v4852_v28  ;;  %v4858_v24 = vrot.slane %v9410_v58, 7  ;;  %v12034_v56 = vld [vmem:[#allocation7 + $0x60] sm:$0xff] }
 0xca8   : > { %v9414_v62 = vpop.eup %9413  ;;  %v4856_v4 = vsel %vm612_vm3, %v4855_v33, %v4854_v18  ;;  %v4860_v3 = vrot.slane %v9412_v5, 6  ;;  %v12042_v18 = vld [vmem:[#allocation7 + $0x50] sm:$0xff] }
 0xca9   : > { %v9416_v29 = vpop.eup %9415  ;;  %v4761_v46 = vpop.f32.mrf.mxu3  ;;  %v4857_v11 = vsel %vm615_vm4, %v9402_v54, %v4856_v4  ;;  %v4862_v34 = vrot.slane %v9414_v62, 5 }
 0xcaa   : > { %v4773_v13 = vrot.slane %v4761_v46, 5  ;;  %v4774_v51 = vrot.slane %v4761_v46, 6  ;;  %v4775_v31 = vrot.slane %v4761_v46, 7  ;;  %v4859_v49 = vsel %vm618_vm5, %v4858_v24, %v4857_v11 }
 0xcab   : > { %v4864_v1 = vrot.slane %v9416_v29, 4  ;;  %v4776_v23 = vrot.slane %v4761_v46, 1  ;;  %v4861_v12 = vsel %vm621_vm6, %v4860_v3, %v4859_v49  ;;  %v4777_v26 = vrot.slane %v4761_v46, 2  ;;  %v12059_v3 = vld [vmem:[#allocation7 + $0x38] sm:$0xff] }
 0xcac   : > { %v4804_v2 = vadd.f32 %v4773_v13, %v4733_v30  ;;  %v4805_v0 = vadd.f32 %v4774_v51, %v4734_v52  ;;  %v4807_v47 = vadd.f32 %v4761_v46, %v4736_v21  ;;  %v4863_v32 = vsel %vm624_vm7, %v4862_v34, %v4861_v12 }
 0xcad   : > { %v4778_v7 = vrot.slane %v4761_v46, 3  ;;  %v4865_v20 = vsel %vm627_vm8, %v4864_v1, %v4863_v32  ;;  %v4779_v60 = vrot.slane %v4761_v46, 4  ;;  %v4806_v40 = vadd.f32 %v4775_v31, %v4735_v48  ;;  %v4833_v48 = vpop.permute.xlu0 %4832  ;;  %v12047_v46 = vld [vmem:[#allocation7 + $0x48] sm:$0xff]  ;;  %v12075_v32 = vld [vmem:[#allocation7 + $0x10] sm:$0xff] }
 0xcae   : > { %9417 = vtanh.f32 %v4804_v2  ;;  %v4882_v45 = vsel %vm4834_vm11, %v4865_v20, 0.0  ;;  %v12022_v42 = vsel %vm4834_vm11, %v4865_v20, %v11966_v14  ;;  %v4808_v16 = vadd.f32 %v4776_v23, %v4737_v36  ;;  %v12063_v23 = vld [vmem:[#allocation7 + $0x30] sm:$0xff]  ;;  %v4936_v20 = vld [vmem:[%s10437_s0 + $0x48] sm:$0x4] }
 0xcaf   : > { %9419 = vtanh.f32 %v4805_v0  ;;  %v4886_v19 = vrot.slane %v4882_v45, 1  ;;  %v4887_v27 = vrot.slane %v4882_v45, 2  ;;  %v4888_v37 = vrot.slane %v4882_v45, 3  ;;  %4914 = vst [vmem:[#allocation3 + $0x13] sm:$0x1] %v4882_v45  ;;  %4980 = vmatmul.f32.vlgmr.msrb.gmra.mxu0 %v12022_v42 }
 0xcb0   : > { %v4809_v15 = vadd.f32 %v4777_v26, %v4738_v63  ;;  %9421 = vtanh.f32 %v4807_v47  ;;  %v4889_v50 = vrot.slane %v4882_v45, 4  ;;  %v4810_v9 = vadd.f32 %v4778_v7, %v4739_v39  ;;  %6748 = vmatpush.msrb.mxu0 %v12025_v22  ;;  %v12052_v39 = vld [vmem:[#allocation7 + $0x40] sm:$0xff]  ;;  %v12072_v47 = vld [vmem:[#allocation7 + $0x18] sm:$0xff] }
 0xcb1   : > { %v4890_v53 = vrot.slane %v4882_v45, 5  ;;  %4915 = vst [vmem:[#allocation3 + $0x33] sm:$0x1] %v4886_v19  ;;  %v4811_v54 = vadd.f32 %v4779_v60, %v4740_v8  ;;  %9423 = vtanh.f32 %v4806_v40  ;;  %v4891_v14 = vrot.slane %v4882_v45, 6  ;;  %v12069_v26 = vld [vmem:[#allocation7 + $0x20] sm:$0xff]  ;;  %v12078_v8 = vld [vmem:[#allocation7 + $0x8] sm:$0xff] }
 0xcb2   : > { %4916 = vst [vmem:[#allocation3 + $0x53] sm:$0x1] %v4887_v27  ;;  %9425 = vtanh.f32 %v4808_v16  ;;  %6749 = vmatpush.msrb.mxu0 %v12028_v41  ;;  %v4892_v59 = vrot.slane %v4882_v45, 7  ;;  %vm4835_vm12 = vcmp.eq.s32.totalorder %v4833_v48, 1  ;;  %v12081_v7 = vld [vmem:[#allocation7] sm:$0xff] }
 0xcb3   : > { %4917 = vst [vmem:[#allocation3 + $0x73] sm:$0x1] %v4888_v37  ;;  %9427 = vtanh.f32 %v4809_v15  ;;  %v4932_v60 = vld [vmem:[%s10437_s0 + $0x8] sm:$0x4]  ;;  %v4933_v40 = vld [vmem:[%s10437_s0 + $0x18] sm:$0x4]  ;;  %v4952_v37 = vunpack.c.l.bf16 %v4936_v20 }
 0xcb4   : > { %v9418_v55 = vpop.eup %9417  ;;  %4918 = vst [vmem:[#allocation3 + $0x93] sm:$0x1] %v4889_v50  ;;  %9429 = vtanh.f32 %v4810_v9  ;;  %6750 = vmatpush.msrb.mxu0 %v12031_v25  ;;  %v4934_v45 = vld [vmem:[%s10437_s0 + $0x28] sm:$0x4]  ;;  %v4935_v16 = vld [vmem:[%s10437_s0 + $0x38] sm:$0x4]  ;;  %v4948_v15 = vunpack.c.l.bf16 %v4932_v60  ;;  %v4949_v50 = vunpack.c.l.bf16 %v4933_v40 }
 0xcb5   : > { %v9420_v61 = vpop.eup %9419  ;;  %v4866_v44 = vrot.slane %v9418_v55, 3  ;;  %4919 = vst [vmem:[#allocation3 + $0xb3] sm:$0x1] %v4890_v53  ;;  %9431 = vtanh.f32 %v4811_v54  ;;  %v4937_v19 = vld [vmem:[%s10437_s0 + $0x58] sm:$0x4]  ;;  %v4950_v9 = vunpack.c.l.bf16 %v4934_v45 }
 0xcb6   : > { %v4867_v28 = vrot.slane %v9420_v61, 2  ;;  %v9422_v6 = vpop.eup %9421  ;;  %4920 = vst [vmem:[#allocation3 + $0xd3] sm:$0x1] %v4891_v14  ;;  %6751 = vmatpush.msrb.mxu0 %v12034_v56  ;;  %v4938_v27 = vld [vmem:[%s10437_s0 + $0x68] sm:$0x4]  ;;  %v4951_v14 = vunpack.c.l.bf16 %v4935_v16  ;;  %v4953_v55 = vunpack.c.l.bf16 %v4937_v19 }
 0xcb7   : > { %v9424_v43 = vpop.eup %9423  ;;  %4921 = vst [vmem:[#allocation3 + $0xf3] sm:$0x1] %v4892_v59  ;;  %v4939_v53 = vld [vmem:[%s10437_s0 + $0x78] sm:$0x4]  ;;  %v4954_v59 = vunpack.c.l.bf16 %v4938_v27  ;;  %v4946_v60 = vld [vmem:[%s10437_s0 + $0xe8] sm:$0x4] }
 0xcb8   : > { %v4868_v17 = vsel %vm609_vm2, %v4867_v28, %v4866_v44  ;;  %v9426_v58 = vpop.eup %9425  ;;  %v4869_v33 = vrot.slane %v9424_v43, 1  ;;  %6752 = vmatpush.msrb.mxu0 %v12038_v35  ;;  %v4945_v20 = vld [vmem:[%s10437_s0 + $0xd8] sm:$0x4] }
 0xcb9   : > { %v9428_v38 = vpop.eup %9427  ;;  %v4872_v52 = vrot.slane %v9426_v58, 7  ;;  %v4947_v27 = vld [vmem:[%s10437_s0 + $0xf8] sm:$0x4] }
 0xcba   : > { %v9430_v5 = vpop.eup %9429  ;;  %v4870_v30 = vsel %vm612_vm3, %v4869_v33, %v4868_v17  ;;  %6753 = vmatpush.msrb.mxu0 %v12042_v18  ;;  %v4874_v4 = vrot.slane %v9428_v38, 6  ;;  %v4955_v17 = vunpack.c.l.bf16 %v4939_v53 }
 0xcbb   : > { %v9432_v62 = vpop.eup %9431  ;;  %v4871_v21 = vsel %vm615_vm4, %v9422_v6, %v4870_v30  ;;  %v4876_v29 = vrot.slane %v9430_v5, 5 }
 0xcbc   : > { %v4873_v36 = vsel %vm618_vm5, %v4872_v52, %v4871_v21  ;;  %6754 = vmatpush.msrb.mxu0 %v12047_v46  ;;  %v4878_v24 = vrot.slane %v9432_v62, 4 }
 0xcbd   : > { %v4875_v11 = vsel %vm621_vm6, %v4874_v4, %v4873_v36 }
 0xcbe   : > { %v4877_v63 = vsel %vm624_vm7, %v4876_v29, %v4875_v11  ;;  %6755 = vmatpush.msrb.mxu0 %v12052_v39  ;;  %v4940_v11 = vld [vmem:[%s10437_s0 + $0x88] sm:$0x4] }
 0xcbf   : > { %v4879_v13 = vsel %vm627_vm8, %v4878_v24, %v4877_v63  ;;  %v5053_v63 = vpop.permute.xlu1 %5052  ;;  %v4956_v45 = vunpack.c.l.bf16 %v4940_v11 }
 0xcc0   : > { %v4883_v51 = vsel %vm4835_vm12, %v4879_v13, 0.0  ;;  %v12057_v31 = vsel %vm4835_vm12, %v4879_v13, %v11985_v10  ;;  %6756 = vmatpush.msrb.mxu0 %v12059_v3  ;;  %v12066_v10 = vld [vmem:[#allocation7 + $0x28] sm:$0xff]  ;;  %v4941_v13 = vld [vmem:[%s10437_s0 + $0x98] sm:$0x4]  ;;  %vm5057_vm13 = vcmp.eq.s32.totalorder %v5053_v63, 1 }
 0xcc1   : > { %v4893_v57 = vrot.slane %v4883_v51, 1  ;;  %v4894_v49 = vrot.slane %v4883_v51, 2  ;;  %v4895_v34 = vrot.slane %v4883_v51, 3  ;;  %4922 = vst [vmem:[#allocation3 + $0x113] sm:$0x1] %v4883_v51  ;;  %4983 = vmatmul.f32.gmra.mxu0 %v12057_v31  ;;  %v4896_v1 = vrot.slane %v4883_v51, 4 }
 0xcc2   : > { %6757 = vmatpush.msrb.mxu0 %v12063_v23  ;;  %v4897_v2 = vrot.slane %v4883_v51, 5  ;;  %v4898_v0 = vrot.slane %v4883_v51, 6  ;;  %v4899_v12 = vrot.slane %v4883_v51, 7  ;;  %v4944_v51 = vld [vmem:[%s10437_s0 + $0xc8] sm:$0x4] }
 0xcc3   : > { %4923 = vst [vmem:[#allocation3 + $0x133] sm:$0x1] %v4893_v57 }
 0xcc4   : > { %4924 = vst [vmem:[#allocation3 + $0x153] sm:$0x1] %v4894_v49  ;;  %6758 = vmatpush.msrb.mxu0 %v12066_v10 }
 0xcc5   : > { %4925 = vst [vmem:[#allocation3 + $0x173] sm:$0x1] %v4895_v34 }
 0xcc6   : > { %4926 = vst [vmem:[#allocation3 + $0x193] sm:$0x1] %v4896_v1  ;;  %6759 = vmatpush.msrb.mxu0 %v12069_v26  ;;  %v4942_v1 = vld [vmem:[%s10437_s0 + $0xa8] sm:$0x4] }
 0xcc7   : > { %4927 = vst [vmem:[#allocation3 + $0x1b3] sm:$0x1] %v4897_v2  ;;  %v4943_v2 = vld [vmem:[%s10437_s0 + $0xb8] sm:$0x4]  ;;  %v4958_v53 = vunpack.c.l.bf16 %v4942_v1 }
 0xcc8   : > { %4928 = vst [vmem:[#allocation3 + $0x1d3] sm:$0x1] %v4898_v0  ;;  %6760 = vmatpush.msrb.mxu0 %v12072_v47 }
 0xcc9   : > { %4929 = vst [vmem:[#allocation3 + $0x1f3] sm:$0x1] %v4899_v12 }
 0xcca   : > { %6761 = vmatpush.msrb.mxu0 %v12075_v32 }
 0xccc   : > { %6762 = vmatpush.msrb.mxu0 %v12078_v8 }
 0xcce   : > { %6763 = vmatpush.msrb.mxu0 %v12081_v7 }
 0xd2c   : > { %v4981_v54 = vpop.f32.mrf.mxu0 }
 0xd2d   : > { %v4989_v61 = vrot.slane %v4981_v54, 4  ;;  %v4990_v44 = vrot.slane %v4981_v54, 5  ;;  %v4991_v28 = vrot.slane %v4981_v54, 6  ;;  %v4992_v6 = vrot.slane %v4981_v54, 7 }
 0xd2e   : > { %v5023_v43 = vadd.f32 %v4981_v54, %v4952_v37  ;;  %v4993_v58 = vrot.slane %v4981_v54, 1  ;;  %v4994_v33 = vrot.slane %v4981_v54, 2  ;;  %v4995_v52 = vrot.slane %v4981_v54, 3 }
 0xd2f   : > { %v5019_v38 = vadd.f32 %v4989_v61, %v4948_v15  ;;  %v5020_v5 = vadd.f32 %v4990_v44, %v4949_v50  ;;  %v5021_v30 = vadd.f32 %v4991_v28, %v4950_v9  ;;  %v5022_v62 = vadd.f32 %v4992_v6, %v4951_v14 }
 0xd30   : > { %9433 = vtanh.f32 %v5023_v43  ;;  %v5024_v21 = vadd.f32 %v4993_v58, %v4953_v55  ;;  %v5025_v4 = vadd.f32 %v4994_v33, %v4954_v59  ;;  %v5026_v48 = vadd.f32 %v4995_v52, %v4955_v17 }
 0xd31   : > { %9435 = vtanh.f32 %v5019_v38  ;;  %v4957_v15 = vunpack.c.l.bf16 %v4941_v13  ;;  %v4960_v50 = vunpack.c.l.bf16 %v4944_v51  ;;  %v4959_v55 = vunpack.c.l.bf16 %v4943_v2 }
 0xd32   : > { %9437 = vtanh.f32 %v5020_v5  ;;  %v4961_v59 = vunpack.c.l.bf16 %v4945_v20  ;;  %v4962_v61 = vunpack.c.l.bf16 %v4946_v60  ;;  %v4963_v17 = vunpack.c.l.bf16 %v4947_v27 }
 0xd33   : > { %9439 = vtanh.f32 %v5021_v30 }
 0xd34   : > { %9441 = vtanh.f32 %v5022_v62 }
 0xd35   : > { %9443 = vtanh.f32 %v5024_v21 }
 0xd36   : > { %v9434_v36 = vpop.eup %9433  ;;  %9445 = vtanh.f32 %v5025_v4 }
 0xd37   : > { %v9436_v29 = vpop.eup %9435  ;;  %9447 = vtanh.f32 %v5026_v48 }
 0xd38   : > { %v9438_v24 = vpop.eup %9437  ;;  %v5075_v57 = vrot.slane %v9436_v29, 4 }
 0xd39   : > { %v9440_v49 = vpop.eup %9439  ;;  %v5076_v34 = vrot.slane %v9438_v24, 3 }
 0xd3a   : > { %v9442_v0 = vpop.eup %9441  ;;  %v5078_v12 = vrot.slane %v9440_v49, 2 }
 0xd3b   : > { %v9444_v40 = vpop.eup %9443  ;;  %v5077_v16 = vsel %vm609_vm2, %v5076_v34, %v5075_v57  ;;  %v5080_v19 = vrot.slane %v9442_v0, 1 }
 0xd3c   : > { %v9446_v37 = vpop.eup %9445  ;;  %v5079_v9 = vsel %vm612_vm3, %v5078_v12, %v5077_v16  ;;  %v5083_v6 = vrot.slane %v9444_v40, 7 }
 0xd3d   : > { %v9448_v54 = vpop.eup %9447  ;;  %v5081_v14 = vsel %vm615_vm4, %v5080_v19, %v5079_v9  ;;  %v5085_v43 = vrot.slane %v9446_v37, 6 }
 0xd3e   : > { %v4984_v44 = vpop.f32.mrf.mxu0  ;;  %v5082_v28 = vsel %vm618_vm5, %v9434_v36, %v5081_v14  ;;  %v5087_v62 = vrot.slane %v9448_v54, 5 }
 0xd3f   : > { %v4996_v58 = vrot.slane %v4984_v44, 4  ;;  %v4997_v33 = vrot.slane %v4984_v44, 5  ;;  %v4998_v38 = vrot.slane %v4984_v44, 6  ;;  %v4999_v5 = vrot.slane %v4984_v44, 7 }
 0xd40   : > { %v5031_v30 = vadd.f32 %v4984_v44, %v4960_v50  ;;  %v5084_v52 = vsel %vm621_vm6, %v5083_v6, %v5082_v28  ;;  %v5000_v21 = vrot.slane %v4984_v44, 1  ;;  %v5001_v11 = vrot.slane %v4984_v44, 2  ;;  %v5056_v6 = vpop.permute.xlu2 %5055 }
 0xd41   : > { %v5027_v4 = vadd.f32 %v4996_v58, %v4956_v45  ;;  %v5028_v48 = vadd.f32 %v4997_v33, %v4957_v15  ;;  %v5086_v29 = vsel %vm624_vm7, %v5085_v43, %v5084_v52  ;;  %v5002_v36 = vrot.slane %v4984_v44, 3 }
 0xd42   : > { %v5088_v24 = vsel %vm627_vm8, %v5087_v62, %v5086_v29  ;;  %v5029_v13 = vadd.f32 %v4998_v38, %v4958_v53  ;;  %v5030_v51 = vadd.f32 %v4999_v5, %v4959_v55  ;;  %v5032_v34 = vadd.f32 %v5000_v21, %v4961_v59 }
 0xd43   : > { %9449 = vtanh.f32 %v5027_v4  ;;  %v5105_v57 = vsel %vm5057_vm13, %v5088_v24, 0.0  ;;  %v12110_v49 = vsel %vm5057_vm13, %v5088_v24, %v12022_v42  ;;  %v5033_v60 = vadd.f32 %v5001_v11, %v4962_v61  ;;  %v5155_v24 = vld [vmem:[%s10437_s0 + $0x8] sm:$0x4] }
 0xd44   : > { %9451 = vtanh.f32 %v5028_v48  ;;  %v5109_v1 = vrot.slane %v5105_v57, 1  ;;  %v5110_v2 = vrot.slane %v5105_v57, 2  ;;  %v5111_v0 = vrot.slane %v5105_v57, 3  ;;  %5137 = vst [vmem:[#allocation3 + $0x14] sm:$0x1] %v5105_v57  ;;  %5203 = vmatmul.f32.vlgmr.msrb.gmra.mxu1 %v12110_v49 }
 0xd45   : > { %9453 = vtanh.f32 %v5031_v30  ;;  %v5112_v12 = vrot.slane %v5105_v57, 4  ;;  %6971 = vmatpush.msrb.mxu1 %v12025_v22  ;;  %v5113_v20 = vrot.slane %v5105_v57, 5  ;;  %v5034_v40 = vadd.f32 %v5002_v36, %v4963_v17  ;;  %v5156_v36 = vld [vmem:[%s10437_s0 + $0x18] sm:$0x4] }
 0xd46   : > { %5138 = vst [vmem:[#allocation3 + $0x34] sm:$0x1] %v5109_v1  ;;  %9455 = vtanh.f32 %v5029_v13  ;;  %v5114_v63 = vrot.slane %v5105_v57, 6  ;;  %v5115_v42 = vrot.slane %v5105_v57, 7  ;;  %vm5058_vm14 = vcmp.eq.s32.totalorder %v5056_v6, 1 }
 0xd47   : > { %5139 = vst [vmem:[#allocation3 + $0x54] sm:$0x1] %v5110_v2  ;;  %9457 = vtanh.f32 %v5030_v51  ;;  %6972 = vmatpush.msrb.mxu1 %v12028_v41  ;;  %v5157_v13 = vld [vmem:[%s10437_s0 + $0x28] sm:$0x4]  ;;  %v5158_v51 = vld [vmem:[%s10437_s0 + $0x38] sm:$0x4]  ;;  %v5172_v1 = vunpack.c.l.bf16 %v5156_v36 }
 0xd48   : > { %5140 = vst [vmem:[#allocation3 + $0x74] sm:$0x1] %v5111_v0  ;;  %9459 = vtanh.f32 %v5032_v34  ;;  %v5159_v57 = vld [vmem:[%s10437_s0 + $0x48] sm:$0x4]  ;;  %v5171_v34 = vunpack.c.l.bf16 %v5155_v24  ;;  %v5173_v2 = vunpack.c.l.bf16 %v5157_v13 }
 0xd49   : > { %v9450_v45 = vpop.eup %9449  ;;  %5141 = vst [vmem:[#allocation3 + $0x94] sm:$0x1] %v5112_v12  ;;  %9461 = vtanh.f32 %v5033_v60  ;;  %6973 = vmatpush.msrb.mxu1 %v12031_v25  ;;  %v5161_v0 = vld [vmem:[%s10437_s0 + $0x68] sm:$0x4]  ;;  %v5162_v12 = vld [vmem:[%s10437_s0 + $0x78] sm:$0x4]  ;;  %v5174_v60 = vunpack.c.l.bf16 %v5158_v51 }
 0xd4a   : > { %v9452_v16 = vpop.eup %9451  ;;  %5142 = vst [vmem:[#allocation3 + $0xb4] sm:$0x1] %v5113_v20  ;;  %9463 = vtanh.f32 %v5034_v40  ;;  %v5089_v19 = vrot.slane %v9450_v45, 4  ;;  %v5175_v40 = vunpack.c.l.bf16 %v5159_v57  ;;  %v5167_v13 = vld [vmem:[%s10437_s0 + $0xc8] sm:$0x4] }
 0xd4b   : > { %v9454_v27 = vpop.eup %9453  ;;  %5143 = vst [vmem:[#allocation3 + $0xd4] sm:$0x1] %v5114_v63  ;;  %v5090_v37 = vrot.slane %v9452_v16, 3  ;;  %6974 = vmatpush.msrb.mxu1 %v12034_v56  ;;  %v5169_v51 = vld [vmem:[%s10437_s0 + $0xe8] sm:$0x4] }
 0xd4c   : > { %v9456_v15 = vpop.eup %9455  ;;  %5144 = vst [vmem:[#allocation3 + $0xf4] sm:$0x1] %v5115_v42 }
 0xd4d   : > { %v9458_v50 = vpop.eup %9457  ;;  %v5091_v9 = vsel %vm609_vm2, %v5090_v37, %v5089_v19  ;;  %v5092_v53 = vrot.slane %v9456_v15, 2  ;;  %6975 = vmatpush.msrb.mxu1 %v12038_v35  ;;  %v5160_v19 = vld [vmem:[%s10437_s0 + $0x58] sm:$0x4]  ;;  %v5177_v37 = vunpack.c.l.bf16 %v5161_v0  ;;  %v5178_v15 = vunpack.c.l.bf16 %v5162_v12 }
 0xd4e   : > { %v9460_v54 = vpop.eup %9459  ;;  %v5094_v14 = vrot.slane %v9458_v50, 1 }
 0xd4f   : > { %v9462_v55 = vpop.eup %9461  ;;  %v5093_v59 = vsel %vm612_vm3, %v5092_v53, %v5091_v9  ;;  %6976 = vmatpush.msrb.mxu1 %v12042_v18  ;;  %v5097_v28 = vrot.slane %v9460_v54, 7 }
 0xd50   : > { %v9464_v61 = vpop.eup %9463  ;;  %v5095_v44 = vsel %vm615_vm4, %v5094_v14, %v5093_v59  ;;  %v5099_v17 = vrot.slane %v9462_v55, 6  ;;  %v5176_v59 = vunpack.c.l.bf16 %v5160_v19 }
 0xd51   : > { %v5096_v43 = vsel %vm618_vm5, %v9454_v27, %v5095_v44  ;;  %6977 = vmatpush.msrb.mxu1 %v12047_v46  ;;  %v5101_v33 = vrot.slane %v9464_v61, 5 }
 0xd52   : > { %v5098_v58 = vsel %vm621_vm6, %v5097_v28, %v5096_v43 }
 0xd53   : > { %v5100_v38 = vsel %vm624_vm7, %v5099_v17, %v5098_v58  ;;  %6978 = vmatpush.msrb.mxu1 %v12052_v39  ;;  %v5276_v58 = vpop.permute.xlu1 %5275 }
 0xd54   : > { %v5102_v5 = vsel %vm627_vm8, %v5101_v33, %v5100_v38  ;;  %v5163_v33 = vld [vmem:[%s10437_s0 + $0x88] sm:$0x4]  ;;  %vm5280_vm15 = vcmp.eq.s32.totalorder %v5276_v58, 1 }
 0xd55   : > { %v5106_v30 = vsel %vm5058_vm14, %v5102_v5, 0.0  ;;  %v12129_v52 = vsel %vm5058_vm14, %v5102_v5, %v12057_v31  ;;  %6979 = vmatpush.msrb.mxu1 %v12059_v3 }
 0xd56   : > { %v5116_v62 = vrot.slane %v5106_v30, 1  ;;  %v5117_v21 = vrot.slane %v5106_v30, 2  ;;  %v5118_v4 = vrot.slane %v5106_v30, 3  ;;  %5145 = vst [vmem:[#allocation3 + $0x114] sm:$0x1] %v5106_v30  ;;  %5206 = vmatmul.f32.gmra.mxu1 %v12129_v52  ;;  %v5119_v48 = vrot.slane %v5106_v30, 4 }
 0xd57   : > { %6980 = vmatpush.msrb.mxu1 %v12063_v23  ;;  %v5120_v29 = vrot.slane %v5106_v30, 5  ;;  %v5121_v11 = vrot.slane %v5106_v30, 6  ;;  %v5122_v31 = vrot.slane %v5106_v30, 7  ;;  %v5164_v30 = vld [vmem:[%s10437_s0 + $0x98] sm:$0x4] }
 0xd58   : > { %5146 = vst [vmem:[#allocation3 + $0x134] sm:$0x1] %v5116_v62  ;;  %v12151_v62 = vld [vmem:[%s10437_s0 + $0xd8] sm:$0x4] }
 0xd59   : > { %5147 = vst [vmem:[#allocation3 + $0x154] sm:$0x1] %v5117_v21  ;;  %6981 = vmatpush.msrb.mxu1 %v12066_v10 }
 0xd5a   : > { %5148 = vst [vmem:[#allocation3 + $0x174] sm:$0x1] %v5118_v4 }
 0xd5b   : > { %5149 = vst [vmem:[#allocation3 + $0x194] sm:$0x1] %v5119_v48  ;;  %6982 = vmatpush.msrb.mxu1 %v12069_v26 }
 0xd5c   : > { %5150 = vst [vmem:[#allocation3 + $0x1b4] sm:$0x1] %v5120_v29  ;;  %v5165_v29 = vld [vmem:[%s10437_s0 + $0xa8] sm:$0x4] }
 0xd5d   : > { %5151 = vst [vmem:[#allocation3 + $0x1d4] sm:$0x1] %v5121_v11  ;;  %6983 = vmatpush.msrb.mxu1 %v12072_v47  ;;  %v5166_v11 = vld [vmem:[%s10437_s0 + $0xb8] sm:$0x4] }
 0xd5e   : > { %5152 = vst [vmem:[#allocation3 + $0x1f4] sm:$0x1] %v5122_v31 }
 0xd5f   : > { %6984 = vmatpush.msrb.mxu1 %v12075_v32 }
 0xd61   : > { %6985 = vmatpush.msrb.mxu1 %v12078_v8 }
 0xd63   : > { %6986 = vmatpush.msrb.mxu1 %v12081_v7 }
 0xdc1   : > { %v5204_v20 = vpop.f32.mrf.mxu1 }
 0xdc2   : > { %v5212_v63 = vrot.slane %v5204_v20, 3  ;;  %v5213_v42 = vrot.slane %v5204_v20, 4  ;;  %v5214_v45 = vrot.slane %v5204_v20, 5  ;;  %v5215_v16 = vrot.slane %v5204_v20, 6 }
 0xdc3   : > { %v5216_v27 = vrot.slane %v5204_v20, 7  ;;  %v5217_v50 = vrot.slane %v5204_v20, 1  ;;  %v5218_v14 = vrot.slane %v5204_v20, 2  ;;  %v5247_v6 = vadd.f32 %v5204_v20, %v5176_v59 }
 0xdc4   : > { %v5242_v9 = vadd.f32 %v5212_v63, %v5171_v34  ;;  %v5243_v53 = vadd.f32 %v5213_v42, %v5172_v1  ;;  %v5244_v54 = vadd.f32 %v5214_v45, %v5173_v2  ;;  %v5245_v55 = vadd.f32 %v5215_v16, %v5174_v60 }
 0xdc5   : > { %v5246_v61 = vadd.f32 %v5216_v27, %v5175_v40  ;;  %v5248_v44 = vadd.f32 %v5217_v50, %v5177_v37  ;;  %v5249_v28 = vadd.f32 %v5218_v14, %v5178_v15  ;;  %v5179_v34 = vunpack.c.l.bf16 %v5163_v33  ;;  %v5170_v40 = vld [vmem:[%s10437_s0 + $0xf8] sm:$0x4] }
 0xdc6   : > { %9465 = vtanh.f32 %v5242_v9  ;;  %v5180_v1 = vunpack.c.l.bf16 %v5164_v30  ;;  %v5184_v20 = vunpack.c.l.bf16 %v12151_v62  ;;  %v5181_v63 = vunpack.c.l.bf16 %v5165_v29 }
 0xdc7   : > { %9467 = vtanh.f32 %v5243_v53  ;;  %v5182_v42 = vunpack.c.l.bf16 %v5166_v11  ;;  %v5183_v27 = vunpack.c.l.bf16 %v5167_v13  ;;  %v5185_v37 = vunpack.c.l.bf16 %v5169_v51 }
 0xdc8   : > { %9469 = vtanh.f32 %v5244_v54  ;;  %v5186_v59 = vunpack.c.l.bf16 %v5170_v40 }
 0xdc9   : > { %9471 = vtanh.f32 %v5245_v55 }
 0xdca   : > { %9473 = vtanh.f32 %v5246_v61 }
 0xdcb   : > { %9475 = vtanh.f32 %v5248_v44 }
 0xdcc   : > { %v9466_v43 = vpop.eup %9465  ;;  %9477 = vtanh.f32 %v5249_v28 }
 0xdcd   : > { %v9468_v17 = vpop.eup %9467  ;;  %v5298_v38 = vrot.slane %v9466_v43, 5  ;;  %9479 = vtanh.f32 %v5247_v6 }
 0xdce   : > { %v9470_v5 = vpop.eup %9469  ;;  %v5299_v21 = vrot.slane %v9468_v17, 4 }
 0xdcf   : > { %v9472_v4 = vpop.eup %9471  ;;  %v5301_v48 = vrot.slane %v9470_v5, 3 }
 0xdd0   : > { %v9474_v31 = vpop.eup %9473  ;;  %v5300_v24 = vsel %vm609_vm2, %v5299_v21, %v5298_v38  ;;  %v5303_v36 = vrot.slane %v9472_v4, 2 }
 0xdd1   : > { %v9476_v57 = vpop.eup %9475  ;;  %v5302_v2 = vsel %vm612_vm3, %v5301_v48, %v5300_v24  ;;  %v5305_v0 = vrot.slane %v9474_v31, 1 }
 0xdd2   : > { %v9478_v12 = vpop.eup %9477  ;;  %v5304_v60 = vsel %vm615_vm4, %v5303_v36, %v5302_v2  ;;  %v5308_v19 = vrot.slane %v9476_v57, 7 }
 0xdd3   : > { %v5207_v45 = vpop.f32.mrf.mxu1  ;;  %v5306_v16 = vsel %vm618_vm5, %v5305_v0, %v5304_v60  ;;  %v9480_v15 = vpop.eup %9479  ;;  %v5310_v55 = vrot.slane %v9478_v12, 6 }
 0xdd4   : > { %v5219_v50 = vrot.slane %v5207_v45, 3  ;;  %v5220_v9 = vrot.slane %v5207_v45, 4  ;;  %v5221_v53 = vrot.slane %v5207_v45, 5  ;;  %v5222_v54 = vrot.slane %v5207_v45, 6 }
 0xdd5   : > { %v5307_v14 = vsel %vm621_vm6, %v9480_v15, %v5306_v16  ;;  %v5223_v61 = vrot.slane %v5207_v45, 7  ;;  %v5224_v43 = vrot.slane %v5207_v45, 1  ;;  %v5225_v33 = vrot.slane %v5207_v45, 2 }
 0xdd6   : > { %v5250_v44 = vadd.f32 %v5219_v50, %v5179_v34  ;;  %v5251_v28 = vadd.f32 %v5220_v9, %v5180_v1  ;;  %v5309_v6 = vsel %vm624_vm7, %v5308_v19, %v5307_v14  ;;  %v5252_v38 = vadd.f32 %v5221_v53, %v5181_v63 }
 0xdd7   : > { %v5311_v17 = vsel %vm627_vm8, %v5310_v55, %v5309_v6  ;;  %v5253_v5 = vadd.f32 %v5222_v54, %v5182_v42  ;;  %v5254_v21 = vadd.f32 %v5223_v61, %v5183_v27  ;;  %v5256_v24 = vadd.f32 %v5224_v43, %v5185_v37  ;;  %v5381_v55 = vld [vmem:[%s10437_s0 + $0x38] sm:$0x8] }
 0xdd8   : > { %9481 = vtanh.f32 %v5250_v44  ;;  %v5328_v30 = vsel %vm5280_vm15, %v5311_v17, 0.0  ;;  %v12169_v62 = vsel %vm5280_vm15, %v5311_v17, %v12110_v49  ;;  %v5257_v36 = vadd.f32 %v5225_v33, %v5186_v59  ;;  %v5382_v59 = vld [vmem:[%s10437_s0 + $0x48] sm:$0x8]  ;;  %v5385_v6 = vld [vmem:[%s10437_s0 + $0x78] sm:$0x8] }
 0xdd9   : > { %9483 = vtanh.f32 %v5251_v28  ;;  %v5332_v4 = vrot.slane %v5328_v30, 1  ;;  %v5333_v48 = vrot.slane %v5328_v30, 2  ;;  %v5334_v29 = vrot.slane %v5328_v30, 3  ;;  %5360 = vst [vmem:[#allocation3 + $0x15] sm:$0x1] %v5328_v30  ;;  %5426 = vmatmul.f32.vlgmr.msrb.gmra.mxu2 %v12169_v62 }
 0xdda   : > { %v5335_v11 = vrot.slane %v5328_v30, 4  ;;  %7194 = vmatpush.msrb.mxu2 %v12025_v22  ;;  %v5336_v31 = vrot.slane %v5328_v30, 5  ;;  %9485 = vtanh.f32 %v5252_v38  ;;  %v5255_v13 = vadd.f32 %v5207_v45, %v5184_v20  ;;  %v5279_v45 = vpop.permute.xlu2 %5278  ;;  %v5383_v28 = vld [vmem:[%s10437_s0 + $0x58] sm:$0x8] }
 0xddb   : > { %5361 = vst [vmem:[#allocation3 + $0x35] sm:$0x1] %v5332_v4  ;;  %v5337_v58 = vrot.slane %v5328_v30, 6  ;;  %9487 = vtanh.f32 %v5253_v5  ;;  %v5338_v49 = vrot.slane %v5328_v30, 7  ;;  %vm5281_vm0 = vcmp.eq.s32.totalorder %v5279_v45, 1 }
 0xddc   : > { %5362 = vst [vmem:[#allocation3 + $0x55] sm:$0x1] %v5333_v48  ;;  %7195 = vmatpush.msrb.mxu2 %v12028_v41  ;;  %9489 = vtanh.f32 %v5254_v21  ;;  %v5398_v17 = vunpack.c.l.bf16 %v5382_v59  ;;  %v5401_v30 = vunpack.c.l.bf16 %v5385_v6  ;;  %v5384_v4 = vld [vmem:[%s10437_s0 + $0x68] sm:$0x8] }
 0xddd   : > { %5363 = vst [vmem:[#allocation3 + $0x75] sm:$0x1] %v5334_v29  ;;  %9491 = vtanh.f32 %v5256_v24 }
 0xdde   : > { %v9482_v51 = vpop.eup %9481  ;;  %5364 = vst [vmem:[#allocation3 + $0x95] sm:$0x1] %v5335_v11  ;;  %7196 = vmatpush.msrb.mxu2 %v12031_v25  ;;  %9493 = vtanh.f32 %v5257_v36 }
 0xddf   : > { %v9484_v22 = vpop.eup %9483  ;;  %5365 = vst [vmem:[#allocation3 + $0xb5] sm:$0x1] %v5336_v31  ;;  %v5312_v57 = vrot.slane %v9482_v51, 5  ;;  %9495 = vtanh.f32 %v5255_v13  ;;  %v5400_v13 = vunpack.c.l.bf16 %v5384_v4 }
 0xde0   : > { %5366 = vst [vmem:[#allocation3 + $0xd5] sm:$0x1] %v5337_v58  ;;  %v5313_v34 = vrot.slane %v9484_v22, 4  ;;  %7197 = vmatpush.msrb.mxu2 %v12034_v56  ;;  %v9486_v1 = vpop.eup %9485 }
 0xde1   : > { %5367 = vst [vmem:[#allocation3 + $0xf5] sm:$0x1] %v5338_v49  ;;  %v9488_v41 = vpop.eup %9487  ;;  %v5315_v0 = vrot.slane %v9486_v1, 3  ;;  %v5386_v1 = vld [vmem:[%s10437_s0 + $0x88] sm:$0x8] }
 0xde2   : > { %v5314_v2 = vsel %vm609_vm2, %v5313_v34, %v5312_v57  ;;  %7198 = vmatpush.msrb.mxu2 %v12038_v35  ;;  %v9490_v12 = vpop.eup %9489  ;;  %v5317_v20 = vrot.slane %v9488_v41, 2  ;;  %v5499_v34 = vpop.permute.xlu0 %5498 }
 0xde3   : > { %v9492_v25 = vpop.eup %9491  ;;  %v5316_v60 = vsel %vm612_vm3, %v5315_v0, %v5314_v2  ;;  %v5319_v40 = vrot.slane %v9490_v12, 1  ;;  %v5387_v0 = vld [vmem:[%s10437_s0 + $0x98] sm:$0x8]  ;;  %v12210_v12 = vld [vmem:[%s10437_s0 + $0xe8] sm:$0x8]  ;;  %vm5503_vm1 = vcmp.eq.s32.totalorder %v5499_v34, 1 }
 0xde4   : > { %7199 = vmatpush.msrb.mxu2 %v12042_v18  ;;  %v9494_v63 = vpop.eup %9493  ;;  %v5318_v42 = vsel %vm615_vm4, %v5317_v20, %v5316_v60  ;;  %v5322_v19 = vrot.slane %v9492_v25, 7 }
 0xde5   : > { %v9496_v56 = vpop.eup %9495  ;;  %v5320_v16 = vsel %vm618_vm5, %v5319_v40, %v5318_v42  ;;  %v5324_v27 = vrot.slane %v9494_v63, 6  ;;  %v5388_v40 = vld [vmem:[%s10437_s0 + $0xa8] sm:$0x8]  ;;  %v5389_v63 = vld [vmem:[%s10437_s0 + $0xb8] sm:$0x8] }
 0xde6   : > { %7200 = vmatpush.msrb.mxu2 %v12047_v46  ;;  %v5321_v35 = vsel %vm621_vm6, %v9496_v56, %v5320_v16  ;;  %v5390_v16 = vld [vmem:[%s10437_s0 + $0xc8] sm:$0x8] }
 0xde7   : > { %v5323_v37 = vsel %vm624_vm7, %v5322_v19, %v5321_v35  ;;  %v5391_v19 = vld [vmem:[%s10437_s0 + $0xd8] sm:$0x8] }
 0xde8   : > { %7201 = vmatpush.msrb.mxu2 %v12052_v39  ;;  %v5325_v18 = vsel %vm627_vm8, %v5324_v27, %v5323_v37  ;;  %v5402_v27 = vunpack.c.l.bf16 %v5386_v1  ;;  %v5403_v37 = vunpack.c.l.bf16 %v5387_v0 }
 0xde9   : > { %v5329_v15 = vsel %vm5281_vm0, %v5325_v18, 0.0  ;;  %v12188_v50 = vsel %vm5281_vm0, %v5325_v18, %v12129_v52  ;;  %v5380_v52 = vld [vmem:[%s10437_s0 + $0x28] sm:$0x8] }
 0xdea   : > { %7202 = vmatpush.msrb.mxu2 %v12059_v3  ;;  %v5339_v9 = vrot.slane %v5329_v15, 1  ;;  %v5340_v53 = vrot.slane %v5329_v15, 2  ;;  %v5341_v54 = vrot.slane %v5329_v15, 3  ;;  %5368 = vst [vmem:[#allocation3 + $0x115] sm:$0x1] %v5329_v15  ;;  %v5342_v46 = vrot.slane %v5329_v15, 4 }
 0xdeb   : > { %5429 = vmatmul.f32.gmra.mxu2 %v12188_v50  ;;  %v5343_v14 = vrot.slane %v5329_v15, 5  ;;  %v5344_v39 = vrot.slane %v5329_v15, 6  ;;  %v5345_v3 = vrot.slane %v5329_v15, 7  ;;  %v5396_v44 = vunpack.c.l.bf16 %v5380_v52 }
 0xdec   : > { %7203 = vmatpush.msrb.mxu2 %v12063_v23  ;;  %5369 = vst [vmem:[#allocation3 + $0x135] sm:$0x1] %v5339_v9  ;;  %v5378_v23 = vld [vmem:[%s10437_s0 + $0x8] sm:$0x8]  ;;  %v5406_v52 = vunpack.c.l.bf16 %v5390_v16 }
 0xded   : > { %5370 = vst [vmem:[#allocation3 + $0x155] sm:$0x1] %v5340_v53  ;;  %v5394_v61 = vunpack.c.l.bf16 %v5378_v23  ;;  %v5408_v53 = vunpack.c.l.bf16 %v12210_v12 }
 0xdee   : > { %7204 = vmatpush.msrb.mxu2 %v12066_v10  ;;  %5371 = vst [vmem:[#allocation3 + $0x175] sm:$0x1] %v5341_v54  ;;  %v5379_v10 = vld [vmem:[%s10437_s0 + $0x18] sm:$0x8] }
 0xdef   : > { %5372 = vst [vmem:[#allocation3 + $0x195] sm:$0x1] %v5342_v46  ;;  %v5393_v46 = vld [vmem:[%s10437_s0 + $0xf8] sm:$0x8] }
 0xdf0   : > { %7205 = vmatpush.msrb.mxu2 %v12069_v26  ;;  %5373 = vst [vmem:[#allocation3 + $0x1b5] sm:$0x1] %v5343_v14  ;;  %v5395_v26 = vunpack.c.l.bf16 %v5379_v10  ;;  %v5404_v14 = vunpack.c.l.bf16 %v5388_v40 }
 0xdf1   : > { %5374 = vst [vmem:[#allocation3 + $0x1d5] sm:$0x1] %v5344_v39  ;;  %v5405_v39 = vunpack.c.l.bf16 %v5389_v63 }
 0xdf2   : > { %7206 = vmatpush.msrb.mxu2 %v12072_v47  ;;  %5375 = vst [vmem:[#allocation3 + $0x1f5] sm:$0x1] %v5345_v3  ;;  %v5397_v47 = vunpack.c.l.bf16 %v5381_v55  ;;  %v5407_v55 = vunpack.c.l.bf16 %v5391_v19 }
 0xdf4   : > { %7207 = vmatpush.msrb.mxu2 %v12075_v32 }
 0xdf6   : > { %7208 = vmatpush.msrb.mxu2 %v12078_v8 }
 0xdf8   : > { %7209 = vmatpush.msrb.mxu2 %v12081_v7  ;;  %v5399_v7 = vunpack.c.l.bf16 %v5383_v28 }
 0xe5c   : > { %v5427_v43 = vpop.f32.mrf.mxu2 }
 0xe5d   : > { %v5435_v33 = vrot.slane %v5427_v43, 2  ;;  %v5436_v32 = vrot.slane %v5427_v43, 3  ;;  %v5437_v38 = vrot.slane %v5427_v43, 4  ;;  %v5438_v8 = vrot.slane %v5427_v43, 5 }
 0xe5e   : > { %v5439_v5 = vrot.slane %v5427_v43, 6  ;;  %v5440_v21 = vrot.slane %v5427_v43, 7  ;;  %v5441_v31 = vrot.slane %v5427_v43, 1  ;;  %v5471_v51 = vadd.f32 %v5427_v43, %v5400_v13  ;;  %v9929_v13 = vld [vmem:[#allocation7 + $0x78] sm:$0xff] }
 0xe5f   : > { %v5465_v48 = vadd.f32 %v5435_v33, %v5394_v61  ;;  %v5466_v29 = vadd.f32 %v5436_v32, %v5395_v26  ;;  %v5467_v11 = vadd.f32 %v5437_v38, %v5396_v44  ;;  %v5468_v24 = vadd.f32 %v5438_v8, %v5397_v47 }
 0xe60   : > { %v5469_v36 = vadd.f32 %v5439_v5, %v5398_v17  ;;  %v5470_v58 = vadd.f32 %v5440_v21, %v5399_v7  ;;  %v5472_v49 = vadd.f32 %v5441_v31, %v5401_v30  ;;  %v5409_v47 = vunpack.c.l.bf16 %v5393_v46 }
 0xe61   : > { %9497 = vtanh.f32 %v5465_v48 }
 0xe62   : > { %9499 = vtanh.f32 %v5466_v29 }
 0xe63   : > { %9501 = vtanh.f32 %v5467_v11 }
 0xe64   : > { %9503 = vtanh.f32 %v5468_v24 }
 0xe65   : > { %9505 = vtanh.f32 %v5469_v36 }
 0xe66   : > { %9507 = vtanh.f32 %v5470_v58 }
 0xe67   : > { %v9498_v22 = vpop.eup %9497  ;;  %9509 = vtanh.f32 %v5472_v49 }
 0xe68   : > { %v9500_v57 = vpop.eup %9499  ;;  %v5521_v41 = vrot.slane %v9498_v22, 6  ;;  %9511 = vtanh.f32 %v5471_v51 }
 0xe69   : > { %v9502_v2 = vpop.eup %9501  ;;  %v5522_v20 = vrot.slane %v9500_v57, 5 }
 0xe6a   : > { %v9504_v25 = vpop.eup %9503  ;;  %v5524_v60 = vrot.slane %v9502_v2, 4 }
 0xe6b   : > { %v9506_v42 = vpop.eup %9505  ;;  %v5523_v56 = vsel %vm609_vm2, %v5522_v20, %v5521_v41  ;;  %v5526_v45 = vrot.slane %v9504_v25, 3  ;;  %v9931_v41 = vld [vmem:[#allocation7 + $0x68] sm:$0xff]  ;;  %v9932_v20 = vld [vmem:[#allocation7 + $0x60] sm:$0xff] }
 0xe6c   : > { %v9508_v35 = vpop.eup %9507  ;;  %v5525_v18 = vsel %vm612_vm3, %v5524_v60, %v5523_v56  ;;  %v5528_v15 = vrot.slane %v9506_v42, 2  ;;  %v9933_v42 = vld [vmem:[#allocation7 + $0x58] sm:$0xff] }
 0xe6d   : > { %v9510_v9 = vpop.eup %9509  ;;  %v5527_v54 = vsel %vm615_vm4, %v5526_v45, %v5525_v18  ;;  %v5530_v10 = vrot.slane %v9508_v35, 1 }
 0xe6e   : > { %v5430_v3 = vpop.f32.mrf.mxu2  ;;  %v5529_v23 = vsel %vm618_vm5, %v5528_v15, %v5527_v54  ;;  %v9512_v28 = vpop.eup %9511  ;;  %v5533_v43 = vrot.slane %v9510_v9, 7  ;;  %v9935_v54 = vld [vmem:[#allocation7 + $0x48] sm:$0xff] }
 0xe6f   : > { %v5442_v59 = vrot.slane %v5430_v3, 2  ;;  %v5443_v61 = vrot.slane %v5430_v3, 3  ;;  %v5444_v26 = vrot.slane %v5430_v3, 4  ;;  %v5445_v44 = vrot.slane %v5430_v3, 5  ;;  %v5502_v9 = vpop.permute.xlu1 %5501 }
 0xe70   : > { %v5531_v6 = vsel %vm621_vm6, %v5530_v10, %v5529_v23  ;;  %v5446_v17 = vrot.slane %v5430_v3, 6  ;;  %v5447_v8 = vrot.slane %v5430_v3, 7  ;;  %v5448_v7 = vrot.slane %v5430_v3, 1  ;;  %v9936_v23 = vld [vmem:[#allocation7 + $0x40] sm:$0xff] }
 0xe71   : > { %v5473_v33 = vadd.f32 %v5442_v59, %v5402_v27  ;;  %v5474_v32 = vadd.f32 %v5443_v61, %v5403_v37  ;;  %v5532_v38 = vsel %vm624_vm7, %v9512_v28, %v5531_v6  ;;  %v5475_v30 = vadd.f32 %v5444_v26, %v5404_v14  ;;  %v9934_v27 = vld [vmem:[#allocation7 + $0x50] sm:$0xff]  ;;  %v9937_v59 = vld [vmem:[#allocation7 + $0x38] sm:$0xff] }
 0xe72   : > { %v5534_v5 = vsel %vm627_vm8, %v5533_v43, %v5532_v38  ;;  %v5476_v21 = vadd.f32 %v5445_v44, %v5405_v39  ;;  %v5477_v29 = vadd.f32 %v5446_v17, %v5406_v52  ;;  %v5478_v49 = vadd.f32 %v5447_v8, %v5407_v55  ;;  %v9938_v6 = vld [vmem:[#allocation7 + $0x30] sm:$0xff]  ;;  %v9939_v17 = vld [vmem:[#allocation7 + $0x28] sm:$0xff] }
 0xe73   : > { %9513 = vtanh.f32 %v5473_v33  ;;  %v5551_v4 = vsel %vm5503_vm1, %v5534_v5, 0.0  ;;  %v12228_v48 = vsel %vm5503_vm1, %v5534_v5, %v12169_v62  ;;  %v5480_v51 = vadd.f32 %v5448_v7, %v5409_v47  ;;  %v9930_v62 = vld [vmem:[#allocation7 + $0x70] sm:$0xff]  ;;  %v9943_v8 = vld [vmem:[#allocation7 + $0x8] sm:$0xff]  ;;  %v9944_v5 = vld [vmem:[#allocation7] sm:$0xff] }
 0xe74   : > { %9515 = vtanh.f32 %v5474_v32  ;;  %v5555_v11 = vrot.slane %v5551_v4, 1  ;;  %v5556_v31 = vrot.slane %v5551_v4, 2  ;;  %v5557_v24 = vrot.slane %v5551_v4, 3  ;;  %5583 = vst [vmem:[#allocation3 + $0x16] sm:$0x1] %v5551_v4  ;;  %5649 = vmatmul.f32.vlgmr.msrb.gmra.mxu3 %v12228_v48  ;;  %v9941_v32 = vld [vmem:[#allocation7 + $0x18] sm:$0xff] }
 0xe75   : > { %v5558_v36 = vrot.slane %v5551_v4, 4  ;;  %7417 = vmatpush.msrb.mxu3 %v9929_v13  ;;  %v5559_v58 = vrot.slane %v5551_v4, 5  ;;  %9517 = vtanh.f32 %v5475_v30  ;;  %v5560_v22 = vrot.slane %v5551_v4, 6  ;;  %v9942_v38 = vld [vmem:[#allocation7 + $0x10] sm:$0xff]  ;;  %v5601_v7 = vld [vmem:[%s10437_s0 + $0x8] sm:$0x8] }
 0xe76   : > { %5584 = vst [vmem:[#allocation3 + $0x36] sm:$0x1] %v5555_v11  ;;  %9519 = vtanh.f32 %v5476_v21  ;;  %v5479_v57 = vadd.f32 %v5430_v3, %v5408_v53  ;;  %v5561_v34 = vrot.slane %v5551_v4, 7  ;;  %vm5504_vm9 = vcmp.eq.s32.totalorder %v5502_v9, 1  ;;  %v5602_v30 = vld [vmem:[%s10437_s0 + $0x18] sm:$0x8] }
 0xe77   : > { %5585 = vst [vmem:[#allocation3 + $0x56] sm:$0x1] %v5556_v31  ;;  %7418 = vmatpush.msrb.mxu3 %v9930_v62  ;;  %9521 = vtanh.f32 %v5477_v29  ;;  %v5603_v21 = vld [vmem:[%s10437_s0 + $0x28] sm:$0x8]  ;;  %v5604_v4 = vld [vmem:[%s10437_s0 + $0x38] sm:$0x8]  ;;  %v5617_v11 = vunpack.c.l.bf16 %v5601_v7  ;;  %v5618_v31 = vunpack.c.l.bf16 %v5602_v30 }
 0xe78   : > { %5586 = vst [vmem:[#allocation3 + $0x76] sm:$0x1] %v5557_v24  ;;  %9523 = vtanh.f32 %v5478_v49  ;;  %v5605_v29 = vld [vmem:[%s10437_s0 + $0x48] sm:$0x8]  ;;  %v5619_v24 = vunpack.c.l.bf16 %v5603_v21  ;;  %v5620_v49 = vunpack.c.l.bf16 %v5604_v4 }
 0xe79   : > { %v9514_v1 = vpop.eup %9513  ;;  %5587 = vst [vmem:[#allocation3 + $0x96] sm:$0x1] %v5558_v36  ;;  %7419 = vmatpush.msrb.mxu3 %v9931_v41  ;;  %9525 = vtanh.f32 %v5480_v51  ;;  %v5606_v36 = vld [vmem:[%s10437_s0 + $0x58] sm:$0x8]  ;;  %v5607_v13 = vld [vmem:[%s10437_s0 + $0x68] sm:$0x8]  ;;  %v5621_v51 = vunpack.c.l.bf16 %v5605_v29 }
 0xe7a   : > { %v9516_v2 = vpop.eup %9515  ;;  %5588 = vst [vmem:[#allocation3 + $0xb6] sm:$0x1] %v5559_v58  ;;  %v5535_v0 = vrot.slane %v9514_v1, 6  ;;  %9527 = vtanh.f32 %v5479_v57  ;;  %v5622_v41 = vunpack.c.l.bf16 %v5606_v36  ;;  %v5609_v9 = vld [vmem:[%s10437_s0 + $0x88] sm:$0x8] }
 0xe7b   : > { %5589 = vst [vmem:[#allocation3 + $0xd6] sm:$0x1] %v5560_v22  ;;  %v5536_v12 = vrot.slane %v9516_v2, 5  ;;  %7420 = vmatpush.msrb.mxu3 %v9932_v20  ;;  %v9518_v25 = vpop.eup %9517  ;;  %v5623_v2 = vunpack.c.l.bf16 %v5607_v13 }
 0xe7c   : > { %5590 = vst [vmem:[#allocation3 + $0xf6] sm:$0x1] %v5561_v34  ;;  %v9520_v60 = vpop.eup %9519  ;;  %v5538_v63 = vrot.slane %v9518_v25, 4 }
 0xe7d   : > { %v5537_v40 = vsel %vm609_vm2, %v5536_v12, %v5535_v0  ;;  %7421 = vmatpush.msrb.mxu3 %v9933_v42  ;;  %v9522_v56 = vpop.eup %9521  ;;  %v5540_v45 = vrot.slane %v9520_v60, 3 }
 0xe7e   : > { %v9524_v16 = vpop.eup %9523  ;;  %v5539_v19 = vsel %vm612_vm3, %v5538_v63, %v5537_v40  ;;  %v5542_v35 = vrot.slane %v9522_v56, 2  ;;  %v5608_v40 = vld [vmem:[%s10437_s0 + $0x78] sm:$0x8] }
 0xe7f   : > { %7422 = vmatpush.msrb.mxu3 %v9934_v27  ;;  %v9526_v37 = vpop.eup %9525  ;;  %v5541_v18 = vsel %vm615_vm4, %v5540_v45, %v5539_v19  ;;  %v5544_v15 = vrot.slane %v9524_v16, 1  ;;  %v5624_v45 = vunpack.c.l.bf16 %v5608_v40 }
 0xe80   : > { %v5543_v53 = vsel %vm618_vm5, %v5542_v35, %v5541_v18  ;;  %v9528_v46 = vpop.eup %9527  ;;  %v5547_v39 = vrot.slane %v9526_v37, 7 }
 0xe81   : > { %7423 = vmatpush.msrb.mxu3 %v9935_v54  ;;  %v5545_v14 = vsel %vm621_vm6, %v5544_v15, %v5543_v53  ;;  %v5722_v15 = vpop.permute.xlu2 %5721  ;;  %v5610_v53 = vld [vmem:[%s10437_s0 + $0x98] sm:$0x8] }
 0xe82   : > { %v5546_v3 = vsel %vm624_vm7, %v9528_v46, %v5545_v14  ;;  %vm5726_vm10 = vcmp.eq.s32.totalorder %v5722_v15, 1 }
 0xe83   : > { %7424 = vmatpush.msrb.mxu3 %v9936_v23  ;;  %v5548_v10 = vsel %vm627_vm8, %v5547_v39, %v5546_v3  ;;  %v5611_v39 = vld [vmem:[%s10437_s0 + $0xa8] sm:$0x8]  ;;  %v5612_v3 = vld [vmem:[%s10437_s0 + $0xb8] sm:$0x8] }
 0xe84   : > { %v5552_v52 = vsel %vm5504_vm9, %v5548_v10, 0.0  ;;  %v12239_v55 = vsel %vm5504_vm9, %v5548_v10, %v12188_v50  ;;  %v9940_v50 = vld [vmem:[#allocation7 + $0x20] sm:$0xff] }
 0xe85   : > { %7425 = vmatpush.msrb.mxu3 %v9937_v59  ;;  %v5562_v61 = vrot.slane %v5552_v52, 1  ;;  %v5563_v26 = vrot.slane %v5552_v52, 2  ;;  %v5564_v44 = vrot.slane %v5552_v52, 3  ;;  %5591 = vst [vmem:[#allocation3 + $0x116] sm:$0x1] %v5552_v52  ;;  %v5565_v28 = vrot.slane %v5552_v52, 4 }
 0xe86   : > { %5652 = vmatmul.f32.gmra.mxu3 %v12239_v55  ;;  %v5566_v43 = vrot.slane %v5552_v52, 5  ;;  %v5567_v47 = vrot.slane %v5552_v52, 6  ;;  %v5568_v33 = vrot.slane %v5552_v52, 7  ;;  %v5613_v59 = vld [vmem:[%s10437_s0 + $0xc8] sm:$0x8] }
 0xe87   : > { %7426 = vmatpush.msrb.mxu3 %v9938_v6  ;;  %5592 = vst [vmem:[#allocation3 + $0x136] sm:$0x1] %v5562_v61  ;;  %v5629_v30 = vunpack.c.l.bf16 %v5613_v59 }
 0xe88   : > { %5593 = vst [vmem:[#allocation3 + $0x156] sm:$0x1] %v5563_v26  ;;  %v5625_v26 = vunpack.c.l.bf16 %v5609_v9 }
 0xe89   : > { %7427 = vmatpush.msrb.mxu3 %v9939_v17  ;;  %5594 = vst [vmem:[#allocation3 + $0x176] sm:$0x1] %v5564_v44  ;;  %v5614_v17 = vld [vmem:[%s10437_s0 + $0xd8] sm:$0x8] }
 0xe8a   : > { %5595 = vst [vmem:[#allocation3 + $0x196] sm:$0x1] %v5565_v28 }
 0xe8b   : > { %7428 = vmatpush.msrb.mxu3 %v9940_v50  ;;  %5596 = vst [vmem:[#allocation3 + $0x1b6] sm:$0x1] %v5566_v43  ;;  %v5626_v43 = vunpack.c.l.bf16 %v5610_v53  ;;  %v5627_v50 = vunpack.c.l.bf16 %v5611_v39 }
 0xe8c   : > { %5597 = vst [vmem:[#allocation3 + $0x1d6] sm:$0x1] %v5567_v47 }
 0xe8d   : > { %7429 = vmatpush.msrb.mxu3 %v9941_v32  ;;  %5598 = vst [vmem:[#allocation3 + $0x1f6] sm:$0x1] %v5568_v33  ;;  %v5615_v33 = vld [vmem:[%s10437_s0 + $0xe8] sm:$0x8]  ;;  %v5628_v32 = vunpack.c.l.bf16 %v5612_v3 }
 0xe8e   : > { %v5631_v36 = vunpack.c.l.bf16 %v5615_v33 }
 0xe8f   : > { %7430 = vmatpush.msrb.mxu3 %v9942_v38 }
 0xe91   : > { %7431 = vmatpush.msrb.mxu3 %v9943_v8 }
 0xe93   : > { %7432 = vmatpush.msrb.mxu3 %v9944_v5 }
 0xef7   : > { %v5650_v58 = vpop.f32.mrf.mxu3 }
 0xef8   : > { %v5658_v22 = vrot.slane %v5650_v58, 1  ;;  %v5659_v62 = vrot.slane %v5650_v58, 2  ;;  %v5660_v57 = vrot.slane %v5650_v58, 3  ;;  %v5661_v34 = vrot.slane %v5650_v58, 4 }
 0xef9   : > { %v5662_v1 = vrot.slane %v5650_v58, 5  ;;  %v5663_v0 = vrot.slane %v5650_v58, 6  ;;  %v5664_v60 = vrot.slane %v5650_v58, 7  ;;  %v5695_v35 = vadd.f32 %v5650_v58, %v5624_v45 }
 0xefa   : > { %v5688_v12 = vadd.f32 %v5658_v22, %v5617_v11  ;;  %v5689_v20 = vadd.f32 %v5659_v62, %v5618_v31  ;;  %v5690_v25 = vadd.f32 %v5660_v57, %v5619_v24  ;;  %v5691_v63 = vadd.f32 %v5661_v34, %v5620_v49  ;;  %v5616_v34 = vld [vmem:[%s10437_s0 + $0xf8] sm:$0x8] }
 0xefb   : > { %v5692_v42 = vadd.f32 %v5662_v1, %v5621_v51  ;;  %v5693_v56 = vadd.f32 %v5663_v0, %v5622_v41  ;;  %v5694_v16 = vadd.f32 %v5664_v60, %v5623_v2  ;;  %v5630_v24 = vunpack.c.l.bf16 %v5614_v17 }
 0xefc   : > { %9529 = vtanh.f32 %v5688_v12 }
 0xefd   : > { %9531 = vtanh.f32 %v5689_v20 }
 0xefe   : > { %9533 = vtanh.f32 %v5690_v25 }
 0xeff   : > { %9535 = vtanh.f32 %v5691_v63 }
 0xf00   : > { %9537 = vtanh.f32 %v5692_v42  ;;  %v5632_v42 = vunpack.c.l.bf16 %v5616_v34 }
 0xf01   : > { %9539 = vtanh.f32 %v5693_v56 }
 0xf02   : > { %v9530_v19 = vpop.eup %9529  ;;  %9541 = vtanh.f32 %v5694_v16 }
 0xf03   : > { %v9532_v27 = vpop.eup %9531  ;;  %v5744_v37 = vrot.slane %v9530_v19, 7  ;;  %9543 = vtanh.f32 %v5695_v35 }
 0xf04   : > { %v9534_v18 = vpop.eup %9533  ;;  %v5745_v54 = vrot.slane %v9532_v27, 6 }
 0xf05   : > { %v9536_v46 = vpop.eup %9535  ;;  %v5747_v14 = vrot.slane %v9534_v18, 5 }
 0xf06   : > { %v9538_v23 = vpop.eup %9537  ;;  %v5746_v10 = vsel %vm609_vm2, %v5745_v54, %v5744_v37  ;;  %v5749_v52 = vrot.slane %v9536_v46, 4 }
 0xf07   : > { %v9540_v61 = vpop.eup %9539  ;;  %v5748_v44 = vsel %vm612_vm3, %v5747_v14, %v5746_v10  ;;  %v5751_v28 = vrot.slane %v9538_v23, 3 }
 0xf08   : > { %v9542_v6 = vpop.eup %9541  ;;  %v5750_v47 = vsel %vm615_vm4, %v5749_v52, %v5748_v44  ;;  %v5753_v5 = vrot.slane %v9540_v61, 2 }
 0xf09   : > { %v5653_v38 = vpop.f32.mrf.mxu3  ;;  %v5752_v8 = vsel %vm618_vm5, %v5751_v28, %v5750_v47  ;;  %v5755_v7 = vrot.slane %v9542_v6, 1  ;;  %v9544_v58 = vpop.eup %9543 }
 0xf0a   : > { %v5665_v21 = vrot.slane %v5653_v38, 1  ;;  %v5666_v4 = vrot.slane %v5653_v38, 2  ;;  %v5667_v29 = vrot.slane %v5653_v38, 3  ;;  %v5668_v11 = vrot.slane %v5653_v38, 4 }
 0xf0b   : > { %v5754_v31 = vsel %vm621_vm6, %v5753_v5, %v5752_v8  ;;  %v5669_v13 = vrot.slane %v5653_v38, 5  ;;  %v5670_v62 = vrot.slane %v5653_v38, 6  ;;  %v5671_v1 = vrot.slane %v5653_v38, 7 }
 0xf0c   : > { %v5696_v49 = vadd.f32 %v5665_v21, %v5625_v26  ;;  %v5697_v51 = vadd.f32 %v5666_v4, %v5626_v43  ;;  %v5756_v22 = vsel %vm624_vm7, %v5755_v7, %v5754_v31  ;;  %v5698_v41 = vadd.f32 %v5667_v29, %v5627_v50  ;;  %v5725_v26 = vpop.permute.xlu1 %5724  ;;  %v5824_v21 = vld [vmem:[%s10437_s0 + $0xc] sm:$0x1]  ;;  %v5825_v4 = vld [vmem:[%s10437_s0 + $0x1c] sm:$0x1] }
 0xf0d   : > { %v5757_v57 = vsel %vm627_vm8, %v9544_v58, %v5756_v22  ;;  %v5699_v2 = vadd.f32 %v5668_v11, %v5628_v32  ;;  %v5700_v20 = vadd.f32 %v5669_v13, %v5629_v30  ;;  %v5701_v56 = vadd.f32 %v5670_v62, %v5630_v24  ;;  %v5826_v29 = vld [vmem:[%s10437_s0 + $0x2c] sm:$0x1]  ;;  %v5827_v11 = vld [vmem:[%s10437_s0 + $0x3c] sm:$0x1] }
 0xf0e   : > { %9545 = vtanh.f32 %v5696_v49  ;;  %v5774_v0 = vsel %vm5726_vm10, %v5757_v57, 0.0  ;;  %v12268_v12 = vsel %vm5726_vm10, %v5757_v57, %v12228_v48  ;;  %v5702_v16 = vadd.f32 %v5671_v1, %v5631_v36  ;;  %v5828_v31 = vld [vmem:[%s10437_s0 + $0x4c] sm:$0x1]  ;;  %v5829_v24 = vld [vmem:[%s10437_s0 + $0x5c] sm:$0x1] }
 0xf0f   : > { %9547 = vtanh.f32 %v5697_v51  ;;  %v5778_v25 = vrot.slane %v5774_v0, 1  ;;  %v5779_v60 = vrot.slane %v5774_v0, 2  ;;  %v5780_v40 = vrot.slane %v5774_v0, 3  ;;  %5806 = vst [vmem:[#allocation3 + $0x17] sm:$0x1] %v5774_v0  ;;  %5872 = vmatmul.f32.vlgmr.msra.gmra.mxu0 %v12268_v12 }
 0xf10   : > { %v5781_v63 = vrot.slane %v5774_v0, 4  ;;  %v5782_v45 = vrot.slane %v5774_v0, 5  ;;  %9549 = vtanh.f32 %v5698_v41  ;;  %v5783_v19 = vrot.slane %v5774_v0, 6  ;;  %v5830_v36 = vld [vmem:[%s10437_s0 + $0x6c] sm:$0x1] }
 0xf11   : > { %5807 = vst [vmem:[#allocation3 + $0x37] sm:$0x1] %v5778_v25  ;;  %9551 = vtanh.f32 %v5699_v2  ;;  %v5784_v48 = vrot.slane %v5774_v0, 7  ;;  %v5703_v27 = vadd.f32 %v5653_v38, %v5632_v42  ;;  %vm5727_vm11 = vcmp.eq.s32.totalorder %v5725_v26, 1  ;;  %v5831_v51 = vld [vmem:[%s10437_s0 + $0x7c] sm:$0x1] }
 0xf12   : > { %5808 = vst [vmem:[#allocation3 + $0x57] sm:$0x1] %v5779_v60  ;;  %9553 = vtanh.f32 %v5700_v20  ;;  %v5840_v13 = vunpack.c.l.bf16 %v5824_v21  ;;  %v5841_v58 = vunpack.c.l.bf16 %v5825_v4  ;;  %v5842_v49 = vunpack.c.l.bf16 %v5826_v29  ;;  %v5837_v26 = vld [vmem:[%s10437_s0 + $0xdc] sm:$0x1] }
 0xf13   : > { %5809 = vst [vmem:[#allocation3 + $0x77] sm:$0x1] %v5780_v40  ;;  %9555 = vtanh.f32 %v5701_v56  ;;  %v5843_v22 = vunpack.c.l.bf16 %v5827_v11  ;;  %v5844_v57 = vunpack.c.l.bf16 %v5828_v31  ;;  %v5845_v34 = vunpack.c.l.bf16 %v5829_v24 }
 0xf14   : > { %v9546_v35 = vpop.eup %9545  ;;  %5810 = vst [vmem:[#allocation3 + $0x97] sm:$0x1] %v5781_v63  ;;  %9557 = vtanh.f32 %v5702_v16  ;;  %v5846_v1 = vunpack.c.l.bf16 %v5830_v36  ;;  %v5847_v60 = vunpack.c.l.bf16 %v5831_v51  ;;  %v5853_v4 = vunpack.c.l.bf16 %v5837_v26 }
 0xf15   : > { %v9548_v37 = vpop.eup %9547  ;;  %5811 = vst [vmem:[#allocation3 + $0xb7] sm:$0x1] %v5782_v45  ;;  %v5758_v18 = vrot.slane %v9546_v35, 7  ;;  %9559 = vtanh.f32 %v5703_v27 }
 0xf16   : > { %5812 = vst [vmem:[#allocation3 + $0xd7] sm:$0x1] %v5783_v19  ;;  %v5759_v15 = vrot.slane %v9548_v37, 6  ;;  %v9550_v9 = vpop.eup %9549 }
 0xf17   : > { %5813 = vst [vmem:[#allocation3 + $0xf7] sm:$0x1] %v5784_v48  ;;  %v9552_v53 = vpop.eup %9551  ;;  %v5761_v46 = vrot.slane %v9550_v9, 5  ;;  %v5945_v9 = vpop.permute.xlu2 %5944 }
 0xf18   : > { %v5760_v54 = vsel %vm609_vm2, %v5759_v15, %v5758_v18  ;;  %v9554_v14 = vpop.eup %9553  ;;  %v5763_v39 = vrot.slane %v9552_v53, 4  ;;  %v5832_v53 = vld [vmem:[%s10437_s0 + $0x8c] sm:$0x1]  ;;  %vm5949_vm12 = vcmp.eq.s32.totalorder %v5945_v9, 1 }
 0xf19   : > { %v9556_v3 = vpop.eup %9555  ;;  %v5762_v23 = vsel %vm612_vm3, %v5761_v46, %v5760_v54  ;;  %v5765_v10 = vrot.slane %v9554_v14, 3  ;;  %v5833_v54 = vld [vmem:[%s10437_s0 + $0x9c] sm:$0x1] }
 0xf1a   : > { %v9558_v52 = vpop.eup %9557  ;;  %v5764_v59 = vsel %vm615_vm4, %v5763_v39, %v5762_v23  ;;  %v5767_v61 = vrot.slane %v9556_v3, 2  ;;  %v5834_v3 = vld [vmem:[%s10437_s0 + $0xac] sm:$0x1]  ;;  %v5835_v23 = vld [vmem:[%s10437_s0 + $0xbc] sm:$0x1] }
 0xf1b   : > { %v5766_v44 = vsel %vm618_vm5, %v5765_v10, %v5764_v59  ;;  %v5769_v28 = vrot.slane %v9558_v52, 1  ;;  %v9560_v43 = vpop.eup %9559 }
 0xf1c   : > { %v5768_v6 = vsel %vm621_vm6, %v5767_v61, %v5766_v44  ;;  %v5836_v61 = vld [vmem:[%s10437_s0 + $0xcc] sm:$0x1] }
 0xf1d   : > { %v5770_v47 = vsel %vm624_vm7, %v5769_v28, %v5768_v6  ;;  %v5848_v28 = vunpack.c.l.bf16 %v5832_v53  ;;  %v5852_v21 = vunpack.c.l.bf16 %v5836_v61 }
 0xf1e   : > { %v5771_v17 = vsel %vm627_vm8, %v9560_v43, %v5770_v47  ;;  %v5838_v47 = vld [vmem:[%s10437_s0 + $0xec] sm:$0x1] }
 0xf1f   : > { %v5775_v33 = vsel %vm5727_vm11, %v5771_v17, 0.0  ;;  %v12279_v50 = vsel %vm5727_vm11, %v5771_v17, %v12239_v55  ;;  %v5839_v17 = vld [vmem:[%s10437_s0 + $0xfc] sm:$0x1]  ;;  %v5854_v24 = vunpack.c.l.bf16 %v5838_v47 }
 0xf20   : > { %v5785_v32 = vrot.slane %v5775_v33, 1  ;;  %v5786_v38 = vrot.slane %v5775_v33, 2  ;;  %v5787_v8 = vrot.slane %v5775_v33, 3  ;;  %5814 = vst [vmem:[#allocation3 + $0x117] sm:$0x1] %v5775_v33  ;;  %5875 = vmatmul.f32.gmra.mxu0 %v12279_v50  ;;  %v5788_v5 = vrot.slane %v5775_v33, 4 }
 0xf21   : > { %v5789_v7 = vrot.slane %v5775_v33, 5  ;;  %v5790_v30 = vrot.slane %v5775_v33, 6  ;;  %v5791_v55 = vrot.slane %v5775_v33, 7  ;;  %v5855_v36 = vunpack.c.l.bf16 %v5839_v17 }
 0xf22   : > { %5815 = vst [vmem:[#allocation3 + $0x137] sm:$0x1] %v5785_v32  ;;  %v5849_v32 = vunpack.c.l.bf16 %v5833_v54 }
 0xf23   : > { %5816 = vst [vmem:[#allocation3 + $0x157] sm:$0x1] %v5786_v38 }
 0xf24   : > { %5817 = vst [vmem:[#allocation3 + $0x177] sm:$0x1] %v5787_v8 }
 0xf25   : > { %5818 = vst [vmem:[#allocation3 + $0x197] sm:$0x1] %v5788_v5  ;;  %v5850_v5 = vunpack.c.l.bf16 %v5834_v3 }
 0xf26   : > { %5819 = vst [vmem:[#allocation3 + $0x1b7] sm:$0x1] %v5789_v7 }
 0xf27   : > { %5820 = vst [vmem:[#allocation3 + $0x1d7] sm:$0x1] %v5790_v30 }
 0xf28   : > { %5821 = vst [vmem:[#allocation3 + $0x1f7] sm:$0x1] %v5791_v55  ;;  %v5851_v55 = vunpack.c.l.bf16 %v5835_v23 }
 0xf8c   : > { %v5873_v62 = vpop.f32.mrf.mxu0 }
 0xf8d   : > { %v5881_v41 = vrot.slane %v5873_v62, 1  ;;  %v5882_v2 = vrot.slane %v5873_v62, 2  ;;  %v5883_v0 = vrot.slane %v5873_v62, 3  ;;  %v5884_v20 = vrot.slane %v5873_v62, 4 }
 0xf8e   : > { %v5911_v25 = vadd.f32 %v5873_v62, %v5840_v13  ;;  %v5885_v40 = vrot.slane %v5873_v62, 5  ;;  %v5886_v63 = vrot.slane %v5873_v62, 6  ;;  %v5887_v45 = vrot.slane %v5873_v62, 7 }
 0xf8f   : > { %v5912_v42 = vadd.f32 %v5881_v41, %v5841_v58  ;;  %v5913_v56 = vadd.f32 %v5882_v2, %v5842_v49  ;;  %v5914_v16 = vadd.f32 %v5883_v0, %v5843_v22  ;;  %v5915_v19 = vadd.f32 %v5884_v20, %v5844_v57 }
 0xf90   : > { %9561 = vtanh.f32 %v5911_v25  ;;  %v5916_v48 = vadd.f32 %v5885_v40, %v5845_v34  ;;  %v5917_v35 = vadd.f32 %v5886_v63, %v5846_v1  ;;  %v5918_v27 = vadd.f32 %v5887_v45, %v5847_v60 }
 0xf91   : > { %9563 = vtanh.f32 %v5912_v42 }
 0xf92   : > { %9565 = vtanh.f32 %v5913_v56 }
 0xf93   : > { %9567 = vtanh.f32 %v5914_v16 }
 0xf94   : > { %9569 = vtanh.f32 %v5915_v19 }
 0xf95   : > { %9571 = vtanh.f32 %v5916_v48 }
 0xf96   : > { %v9562_v37 = vpop.eup %9561  ;;  %9573 = vtanh.f32 %v5917_v35 }
 0xf97   : > { %v9564_v18 = vpop.eup %9563  ;;  %9575 = vtanh.f32 %v5918_v27 }
 0xf98   : > { %v9566_v15 = vpop.eup %9565  ;;  %v5967_v46 = vrot.slane %v9564_v18, 7 }
 0xf99   : > { %v9568_v14 = vpop.eup %9567  ;;  %v5969_v39 = vrot.slane %v9566_v15, 6 }
 0xf9a   : > { %v9570_v10 = vpop.eup %9569  ;;  %v5968_v52 = vsel %vm609_vm2, %v5967_v46, %v9562_v37  ;;  %v5971_v59 = vrot.slane %v9568_v14, 5 }
 0xf9b   : > { %v9572_v44 = vpop.eup %9571  ;;  %v5970_v6 = vsel %vm612_vm3, %v5969_v39, %v5968_v52  ;;  %v5973_v43 = vrot.slane %v9570_v10, 4 }
 0xf9c   : > { %v9574_v33 = vpop.eup %9573  ;;  %v5972_v38 = vsel %vm615_vm4, %v5971_v59, %v5970_v6  ;;  %v5975_v8 = vrot.slane %v9572_v44, 3 }
 0xf9d   : > { %v9576_v7 = vpop.eup %9575  ;;  %v5974_v30 = vsel %vm618_vm5, %v5973_v43, %v5972_v38  ;;  %v5876_v29 = vpop.f32.mrf.mxu0  ;;  %v5977_v31 = vrot.slane %v9574_v33, 2 }
 0xf9e   : > { %v5976_v11 = vsel %vm621_vm6, %v5975_v8, %v5974_v30  ;;  %v5888_v13 = vrot.slane %v5876_v29, 1  ;;  %v5889_v58 = vrot.slane %v5876_v29, 2  ;;  %v5890_v49 = vrot.slane %v5876_v29, 3 }
 0xf9f   : > { %v5979_v51 = vrot.slane %v9576_v7, 1  ;;  %v5919_v22 = vadd.f32 %v5876_v29, %v5848_v28  ;;  %v5978_v62 = vsel %vm624_vm7, %v5977_v31, %v5976_v11  ;;  %v5891_v57 = vrot.slane %v5876_v29, 4  ;;  %v5948_v28 = vpop.permute.xlu0 %5947  ;;  %v6047_v11 = vld [vmem:[%s10437_s0 + $0xc] sm:$0x1] }
 0xfa0   : > { %v5892_v34 = vrot.slane %v5876_v29, 5  ;;  %v5920_v1 = vadd.f32 %v5888_v13, %v5849_v32  ;;  %v5893_v2 = vrot.slane %v5876_v29, 6  ;;  %v5894_v0 = vrot.slane %v5876_v29, 7  ;;  %v6048_v29 = vld [vmem:[%s10437_s0 + $0x1c] sm:$0x1] }
 0xfa1   : > { %v5980_v41 = vsel %vm627_vm8, %v5979_v51, %v5978_v62  ;;  %v5921_v60 = vadd.f32 %v5889_v58, %v5850_v5  ;;  %v5922_v40 = vadd.f32 %v5890_v49, %v5851_v55  ;;  %v5923_v19 = vadd.f32 %v5891_v57, %v5852_v21  ;;  %v6049_v31 = vld [vmem:[%s10437_s0 + $0x2c] sm:$0x1]  ;;  %v6052_v13 = vld [vmem:[%s10437_s0 + $0x5c] sm:$0x1] }
 0xfa2   : > { %v5997_v20 = vsel %vm5949_vm12, %v5980_v41, 0.0  ;;  %v12308_v25 = vsel %vm5949_vm12, %v5980_v41, %v12268_v12  ;;  %9577 = vtanh.f32 %v5920_v1  ;;  %v5924_v48 = vadd.f32 %v5892_v34, %v5853_v4  ;;  %v6053_v58 = vld [vmem:[%s10437_s0 + $0x6c] sm:$0x1]  ;;  %v6054_v62 = vld [vmem:[%s10437_s0 + $0x7c] sm:$0x1] }
 0xfa3   : > { %v6001_v63 = vrot.slane %v5997_v20, 1  ;;  %v6002_v42 = vrot.slane %v5997_v20, 2  ;;  %v6003_v56 = vrot.slane %v5997_v20, 3  ;;  %6029 = vst [vmem:[#allocation3 + $0x18] sm:$0x1] %v5997_v20  ;;  %6095 = vmatmul.f32.vlgmr.msra.gmra.mxu1 %v12308_v25  ;;  %v6004_v45 = vrot.slane %v5997_v20, 4 }
 0xfa4   : > { %9579 = vtanh.f32 %v5919_v22  ;;  %v6005_v16 = vrot.slane %v5997_v20, 5  ;;  %v6006_v35 = vrot.slane %v5997_v20, 6  ;;  %v5925_v27 = vadd.f32 %v5893_v2, %v5854_v24  ;;  %v6050_v24 = vld [vmem:[%s10437_s0 + $0x3c] sm:$0x1] }
 0xfa5   : > { %6030 = vst [vmem:[#allocation3 + $0x38] sm:$0x1] %v6001_v63  ;;  %9581 = vtanh.f32 %v5921_v60  ;;  %v6007_v12 = vrot.slane %v5997_v20, 7  ;;  %v5926_v37 = vadd.f32 %v5894_v0, %v5855_v36  ;;  %vm5950_vm13 = vcmp.eq.s32.totalorder %v5948_v28, 1  ;;  %v6051_v36 = vld [vmem:[%s10437_s0 + $0x4c] sm:$0x1] }
 0xfa6   : > { %6031 = vst [vmem:[#allocation3 + $0x58] sm:$0x1] %v6002_v42  ;;  %9583 = vtanh.f32 %v5922_v40  ;;  %v6064_v49 = vunpack.c.l.bf16 %v6048_v29  ;;  %v6063_v51 = vunpack.c.l.bf16 %v6047_v11  ;;  %v6065_v22 = vunpack.c.l.bf16 %v6049_v31  ;;  %v6057_v28 = vld [vmem:[%s10437_s0 + $0xac] sm:$0x1] }
 0xfa7   : > { %6032 = vst [vmem:[#allocation3 + $0x78] sm:$0x1] %v6003_v56  ;;  %9585 = vtanh.f32 %v5923_v19  ;;  %v6066_v57 = vunpack.c.l.bf16 %v6050_v24  ;;  %v6067_v1 = vunpack.c.l.bf16 %v6051_v36  ;;  %v6068_v41 = vunpack.c.l.bf16 %v6052_v13 }
 0xfa8   : > { %6033 = vst [vmem:[#allocation3 + $0x98] sm:$0x1] %v6004_v45  ;;  %v9578_v18 = vpop.eup %9577  ;;  %9587 = vtanh.f32 %v5924_v48  ;;  %v6069_v2 = vunpack.c.l.bf16 %v6053_v58  ;;  %v6070_v42 = vunpack.c.l.bf16 %v6054_v62 }
 0xfa9   : > { %6034 = vst [vmem:[#allocation3 + $0xb8] sm:$0x1] %v6005_v16  ;;  %9589 = vtanh.f32 %v5925_v27  ;;  %v5981_v15 = vrot.slane %v9578_v18, 7 }
 0xfaa   : > { %6035 = vst [vmem:[#allocation3 + $0xd8] sm:$0x1] %v6006_v35  ;;  %v9580_v9 = vpop.eup %9579  ;;  %9591 = vtanh.f32 %v5926_v37 }
 0xfab   : > { %6036 = vst [vmem:[#allocation3 + $0xf8] sm:$0x1] %v6007_v12  ;;  %v9582_v53 = vpop.eup %9581  ;;  %v5982_v54 = vsel %vm609_vm2, %v5981_v15, %v9580_v9 }
 0xfac   : > { %v9584_v46 = vpop.eup %9583  ;;  %v5983_v14 = vrot.slane %v9582_v53, 6 }
 0xfad   : > { %v9586_v39 = vpop.eup %9585  ;;  %v5985_v3 = vrot.slane %v9584_v46, 5 }
 0xfae   : > { %v9588_v23 = vpop.eup %9587  ;;  %v5984_v10 = vsel %vm612_vm3, %v5983_v14, %v5982_v54  ;;  %v5987_v52 = vrot.slane %v9586_v39, 4 }
 0xfaf   : > { %v9590_v59 = vpop.eup %9589  ;;  %v5986_v61 = vsel %vm615_vm4, %v5985_v3, %v5984_v10  ;;  %v5989_v26 = vrot.slane %v9588_v23, 3  ;;  %v6056_v3 = vld [vmem:[%s10437_s0 + $0x9c] sm:$0x1] }
 0xfb0   : > { %v9592_v44 = vpop.eup %9591  ;;  %v5988_v6 = vsel %vm618_vm5, %v5987_v52, %v5986_v61  ;;  %v5991_v43 = vrot.slane %v9590_v59, 2  ;;  %v6168_v59 = vpop.permute.xlu1 %6167  ;;  %v6055_v61 = vld [vmem:[%s10437_s0 + $0x8c] sm:$0x1] }
 0xfb1   : > { %v5990_v47 = vsel %vm621_vm6, %v5989_v26, %v5988_v6  ;;  %v5993_v17 = vrot.slane %v9592_v44, 1  ;;  %vm6172_vm14 = vcmp.eq.s32.totalorder %v6168_v59, 1 }
 0xfb2   : > { %v5992_v33 = vsel %vm624_vm7, %v5991_v43, %v5990_v47 }
 0xfb3   : > { %v5994_v32 = vsel %vm627_vm8, %v5993_v17, %v5992_v33  ;;  %v6058_v17 = vld [vmem:[%s10437_s0 + $0xbc] sm:$0x1]  ;;  %v6059_v33 = vld [vmem:[%s10437_s0 + $0xcc] sm:$0x1] }
 0xfb4   : > { %v5998_v38 = vsel %vm5950_vm13, %v5994_v32, 0.0  ;;  %v12319_v8 = vsel %vm5950_vm13, %v5994_v32, %v12279_v50  ;;  %v6074_v24 = vunpack.c.l.bf16 %v6058_v17  ;;  %v6075_v36 = vunpack.c.l.bf16 %v6059_v33 }
 0xfb5   : > { %v6008_v5 = vrot.slane %v5998_v38, 1  ;;  %v6009_v7 = vrot.slane %v5998_v38, 2  ;;  %v6010_v30 = vrot.slane %v5998_v38, 3  ;;  %6037 = vst [vmem:[#allocation3 + $0x118] sm:$0x1] %v5998_v38  ;;  %6098 = vmatmul.f32.gmra.mxu1 %v12319_v8  ;;  %v6011_v55 = vrot.slane %v5998_v38, 4 }
 0xfb6   : > { %v6012_v21 = vrot.slane %v5998_v38, 5  ;;  %v6013_v4 = vrot.slane %v5998_v38, 6  ;;  %v6014_v50 = vrot.slane %v5998_v38, 7  ;;  %v6072_v38 = vunpack.c.l.bf16 %v6056_v3 }
 0xfb7   : > { %6038 = vst [vmem:[#allocation3 + $0x138] sm:$0x1] %v6008_v5 }
 0xfb8   : > { %6039 = vst [vmem:[#allocation3 + $0x158] sm:$0x1] %v6009_v7 }
 0xfb9   : > { %6040 = vst [vmem:[#allocation3 + $0x178] sm:$0x1] %v6010_v30  ;;  %v6060_v30 = vld [vmem:[%s10437_s0 + $0xdc] sm:$0x1] }
 0xfba   : > { %6041 = vst [vmem:[#allocation3 + $0x198] sm:$0x1] %v6011_v55  ;;  %v6061_v55 = vld [vmem:[%s10437_s0 + $0xec] sm:$0x1] }
 0xfbb   : > { %6042 = vst [vmem:[#allocation3 + $0x1b8] sm:$0x1] %v6012_v21  ;;  %v6071_v21 = vunpack.c.l.bf16 %v6055_v61 }
 0xfbc   : > { %6043 = vst [vmem:[#allocation3 + $0x1d8] sm:$0x1] %v6013_v4 }
 0xfbd   : > { %6044 = vst [vmem:[#allocation3 + $0x1f8] sm:$0x1] %v6014_v50  ;;  %v6073_v50 = vunpack.c.l.bf16 %v6057_v28 }
0x1020   : > { %v6096_v34 = vpop.f32.mrf.mxu1 }
0x1021   : > { %v6104_v0 = vrot.slane %v6096_v34, 7  ;;  %v6105_v20 = vrot.slane %v6096_v34, 1  ;;  %v6106_v60 = vrot.slane %v6096_v34, 2  ;;  %v6107_v40 = vrot.slane %v6096_v34, 3 }
0x1022   : > { %v6135_v63 = vadd.f32 %v6096_v34, %v6064_v49  ;;  %v6108_v56 = vrot.slane %v6096_v34, 4  ;;  %v6109_v45 = vrot.slane %v6096_v34, 5  ;;  %v6110_v48 = vrot.slane %v6096_v34, 6  ;;  %v6062_v34 = vld [vmem:[%s10437_s0 + $0xfc] sm:$0x1] }
0x1023   : > { %v6134_v16 = vadd.f32 %v6104_v0, %v6063_v51  ;;  %v6136_v19 = vadd.f32 %v6105_v20, %v6065_v22  ;;  %v6137_v35 = vadd.f32 %v6106_v60, %v6066_v57  ;;  %v6138_v27 = vadd.f32 %v6107_v40, %v6067_v1 }
0x1024   : > { %9593 = vtanh.f32 %v6135_v63  ;;  %v6139_v12 = vadd.f32 %v6108_v56, %v6068_v41  ;;  %v6140_v37 = vadd.f32 %v6109_v45, %v6069_v2  ;;  %v6141_v18 = vadd.f32 %v6110_v48, %v6070_v42 }
0x1025   : > { %9595 = vtanh.f32 %v6134_v16  ;;  %v6076_v49 = vunpack.c.l.bf16 %v6060_v30  ;;  %v6077_v51 = vunpack.c.l.bf16 %v6061_v55  ;;  %v6078_v16 = vunpack.c.l.bf16 %v6062_v34  ;;  %v6277_v34 = vld [vmem:[%s10437_s0 + $0x7c] sm:$0x2] }
0x1026   : > { %9597 = vtanh.f32 %v6136_v19 }
0x1027   : > { %9599 = vtanh.f32 %v6137_v35 }
0x1028   : > { %9601 = vtanh.f32 %v6138_v27 }
0x1029   : > { %9603 = vtanh.f32 %v6139_v12 }
0x102a   : > { %v9594_v15 = vpop.eup %9593  ;;  %9605 = vtanh.f32 %v6140_v37 }
0x102b   : > { %v9596_v9 = vpop.eup %9595  ;;  %9607 = vtanh.f32 %v6141_v18 }
0x102c   : > { %v9598_v53 = vpop.eup %9597  ;;  %v6190_v54 = vrot.slane %v9596_v9, 1 }
0x102d   : > { %v9600_v46 = vpop.eup %9599  ;;  %v6192_v14 = vrot.slane %v9598_v53, 7 }
0x102e   : > { %v9602_v39 = vpop.eup %9601  ;;  %v6191_v23 = vsel %vm609_vm2, %v9594_v15, %v6190_v54  ;;  %v6194_v10 = vrot.slane %v9600_v46, 6 }
0x102f   : > { %v9604_v52 = vpop.eup %9603  ;;  %v6193_v26 = vsel %vm612_vm3, %v6192_v14, %v6191_v23  ;;  %v6196_v44 = vrot.slane %v9602_v39, 5 }
0x1030   : > { %v9606_v6 = vpop.eup %9605  ;;  %v6195_v43 = vsel %vm615_vm4, %v6194_v10, %v6193_v26  ;;  %v6198_v47 = vrot.slane %v9604_v52, 4 }
0x1031   : > { %v9608_v32 = vpop.eup %9607  ;;  %v6197_v5 = vsel %vm618_vm5, %v6196_v44, %v6195_v43  ;;  %v6200_v7 = vrot.slane %v9606_v6, 3  ;;  %v6171_v43 = vpop.permute.xlu2 %6170 }
0x1032   : > { %v6199_v4 = vsel %vm621_vm6, %v6198_v47, %v6197_v5  ;;  %v6099_v29 = vpop.f32.mrf.mxu1  ;;  %v6202_v31 = vrot.slane %v9608_v32, 2  ;;  %vm6173_vm15 = vcmp.eq.s32.totalorder %v6171_v43, 1 }
0x1033   : > { %v6201_v11 = vsel %vm624_vm7, %v6200_v7, %v6199_v4  ;;  %v6111_v13 = vrot.slane %v6099_v29, 7  ;;  %v6112_v58 = vrot.slane %v6099_v29, 1  ;;  %v6113_v22 = vrot.slane %v6099_v29, 2 }
0x1034   : > { %v6143_v62 = vadd.f32 %v6099_v29, %v6072_v38  ;;  %v6203_v57 = vsel %vm627_vm8, %v6202_v31, %v6201_v11  ;;  %v6114_v1 = vrot.slane %v6099_v29, 3  ;;  %v6115_v20 = vrot.slane %v6099_v29, 4  ;;  %v6272_v31 = vld [vmem:[%s10437_s0 + $0x2c] sm:$0x2] }
0x1035   : > { %v6142_v41 = vadd.f32 %v6111_v13, %v6071_v21  ;;  %v6220_v2 = vsel %vm6172_vm14, %v6203_v57, 0.0  ;;  %v12348_v0 = vsel %vm6172_vm14, %v6203_v57, %v12308_v25  ;;  %v6116_v42 = vrot.slane %v6099_v29, 5  ;;  %v6273_v13 = vld [vmem:[%s10437_s0 + $0x3c] sm:$0x2] }
0x1036   : > { %v6224_v60 = vrot.slane %v6220_v2, 1  ;;  %v6225_v40 = vrot.slane %v6220_v2, 2  ;;  %v6226_v63 = vrot.slane %v6220_v2, 3  ;;  %6252 = vst [vmem:[#allocation3 + $0x19] sm:$0x1] %v6220_v2  ;;  %6318 = vmatmul.f32.vlgmr.msra.gmra.mxu2 %v12348_v0  ;;  %v6227_v56 = vrot.slane %v6220_v2, 4 }
0x1037   : > { %9609 = vtanh.f32 %v6142_v41  ;;  %v6228_v45 = vrot.slane %v6220_v2, 5  ;;  %v6117_v19 = vrot.slane %v6099_v29, 6  ;;  %v6144_v48 = vadd.f32 %v6112_v58, %v6073_v50  ;;  %v6274_v58 = vld [vmem:[%s10437_s0 + $0x4c] sm:$0x2] }
0x1038   : > { %6253 = vst [vmem:[#allocation3 + $0x39] sm:$0x1] %v6224_v60  ;;  %v6145_v35 = vadd.f32 %v6113_v22, %v6074_v24  ;;  %v6146_v27 = vadd.f32 %v6114_v1, %v6075_v36  ;;  %9611 = vtanh.f32 %v6143_v62  ;;  %v6229_v25 = vrot.slane %v6220_v2, 6  ;;  %v6270_v24 = vld [vmem:[%s10437_s0 + $0xc] sm:$0x2] }
0x1039   : > { %6254 = vst [vmem:[#allocation3 + $0x59] sm:$0x1] %v6225_v40  ;;  %v6147_v12 = vadd.f32 %v6115_v20, %v6076_v49  ;;  %v6230_v37 = vrot.slane %v6220_v2, 7  ;;  %v6148_v18 = vadd.f32 %v6116_v42, %v6077_v51  ;;  %9613 = vtanh.f32 %v6144_v48  ;;  %v6271_v36 = vld [vmem:[%s10437_s0 + $0x1c] sm:$0x2] }
0x103a   : > { %6255 = vst [vmem:[#allocation3 + $0x79] sm:$0x1] %v6226_v63  ;;  %v6149_v15 = vadd.f32 %v6117_v19, %v6078_v16  ;;  %9615 = vtanh.f32 %v6145_v35  ;;  %v6275_v49 = vld [vmem:[%s10437_s0 + $0x5c] sm:$0x2]  ;;  %v6276_v51 = vld [vmem:[%s10437_s0 + $0x6c] sm:$0x2]  ;;  %v6288_v22 = vunpack.c.l.bf16 %v6272_v31  ;;  %v6286_v62 = vunpack.c.l.bf16 %v6270_v24 }
0x103b   : > { %6256 = vst [vmem:[#allocation3 + $0x99] sm:$0x1] %v6227_v56  ;;  %9617 = vtanh.f32 %v6146_v27  ;;  %v6287_v57 = vunpack.c.l.bf16 %v6271_v36  ;;  %v6289_v1 = vunpack.c.l.bf16 %v6273_v13  ;;  %v6290_v2 = vunpack.c.l.bf16 %v6274_v58 }
0x103c   : > { %6257 = vst [vmem:[#allocation3 + $0xb9] sm:$0x1] %v6228_v45  ;;  %9619 = vtanh.f32 %v6147_v12  ;;  %v6291_v20 = vunpack.c.l.bf16 %v6275_v49  ;;  %v6292_v60 = vunpack.c.l.bf16 %v6276_v51  ;;  %v6293_v16 = vunpack.c.l.bf16 %v6277_v34 }
0x103d   : > { %v9610_v9 = vpop.eup %9609  ;;  %6258 = vst [vmem:[#allocation3 + $0xd9] sm:$0x1] %v6229_v25  ;;  %9621 = vtanh.f32 %v6148_v18 }
0x103e   : > { %6259 = vst [vmem:[#allocation3 + $0xf9] sm:$0x1] %v6230_v37  ;;  %v6204_v53 = vrot.slane %v9610_v9, 1  ;;  %v9612_v54 = vpop.eup %9611  ;;  %9623 = vtanh.f32 %v6149_v15 }
0x103f   : > { %v9614_v46 = vpop.eup %9613 }
0x1040   : > { %v6205_v14 = vsel %vm609_vm2, %v9612_v54, %v6204_v53  ;;  %v9616_v39 = vpop.eup %9615  ;;  %v6206_v3 = vrot.slane %v9614_v46, 7 }
0x1041   : > { %v9618_v23 = vpop.eup %9617  ;;  %v6208_v10 = vrot.slane %v9616_v39, 6 }
0x1042   : > { %v9620_v52 = vpop.eup %9619  ;;  %v6207_v59 = vsel %vm612_vm3, %v6206_v3, %v6205_v14  ;;  %v6210_v61 = vrot.slane %v9618_v23, 5 }
0x1043   : > { %v9622_v26 = vpop.eup %9621  ;;  %v6209_v44 = vsel %vm615_vm4, %v6208_v10, %v6207_v59  ;;  %v6212_v28 = vrot.slane %v9620_v52, 4  ;;  %v6280_v10 = vld [vmem:[%s10437_s0 + $0xac] sm:$0x2]  ;;  %v6391_v59 = vpop.permute.xlu1 %6390 }
0x1044   : > { %v9624_v6 = vpop.eup %9623  ;;  %v6211_v47 = vsel %vm618_vm5, %v6210_v61, %v6209_v44  ;;  %v6214_v17 = vrot.slane %v9622_v26, 3  ;;  %v6278_v61 = vld [vmem:[%s10437_s0 + $0x8c] sm:$0x2]  ;;  %v6279_v26 = vld [vmem:[%s10437_s0 + $0x9c] sm:$0x2]  ;;  %vm6395_vm0 = vcmp.eq.s32.totalorder %v6391_v59, 1 }
0x1045   : > { %v6213_v33 = vsel %vm621_vm6, %v6212_v28, %v6211_v47  ;;  %v6216_v32 = vrot.slane %v9624_v6, 2 }
0x1046   : > { %v6215_v38 = vsel %vm624_vm7, %v6214_v17, %v6213_v33  ;;  %v6281_v17 = vld [vmem:[%s10437_s0 + $0xbc] sm:$0x2]  ;;  %v6282_v33 = vld [vmem:[%s10437_s0 + $0xcc] sm:$0x2] }
0x1047   : > { %v6217_v5 = vsel %vm627_vm8, %v6216_v32, %v6215_v38  ;;  %v6296_v38 = vunpack.c.l.bf16 %v6280_v10  ;;  %v6297_v24 = vunpack.c.l.bf16 %v6281_v17  ;;  %v6298_v36 = vunpack.c.l.bf16 %v6282_v33  ;;  %v6394_v17 = vpop.permute.xlu2 %6393 }
0x1048   : > { %v6221_v7 = vsel %vm6173_vm15, %v6217_v5, 0.0  ;;  %v12359_v30 = vsel %vm6173_vm15, %v6217_v5, %v12319_v8  ;;  %vm6396_vm1 = vcmp.eq.s32.totalorder %v6394_v17, 1 }
0x1049   : > { %v6231_v55 = vrot.slane %v6221_v7, 1  ;;  %v6232_v21 = vrot.slane %v6221_v7, 2  ;;  %v6233_v4 = vrot.slane %v6221_v7, 3  ;;  %6260 = vst [vmem:[#allocation3 + $0x119] sm:$0x1] %v6221_v7  ;;  %6321 = vmatmul.f32.gmra.mxu2 %v12359_v30  ;;  %v6234_v50 = vrot.slane %v6221_v7, 4 }
0x104a   : > { %v6235_v29 = vrot.slane %v6221_v7, 5  ;;  %v6236_v11 = vrot.slane %v6221_v7, 6  ;;  %v6237_v8 = vrot.slane %v6221_v7, 7 }
0x104b   : > { %6261 = vst [vmem:[#allocation3 + $0x139] sm:$0x1] %v6231_v55  ;;  %v6283_v55 = vld [vmem:[%s10437_s0 + $0xdc] sm:$0x2] }
0x104c   : > { %6262 = vst [vmem:[#allocation3 + $0x159] sm:$0x1] %v6232_v21  ;;  %v6284_v21 = vld [vmem:[%s10437_s0 + $0xec] sm:$0x2]  ;;  %v6299_v51 = vunpack.c.l.bf16 %v6283_v55 }
0x104d   : > { %6263 = vst [vmem:[#allocation3 + $0x179] sm:$0x1] %v6233_v4  ;;  %v6294_v4 = vunpack.c.l.bf16 %v6278_v61 }
0x104e   : > { %6264 = vst [vmem:[#allocation3 + $0x199] sm:$0x1] %v6234_v50 }
0x104f   : > { %6265 = vst [vmem:[#allocation3 + $0x1b9] sm:$0x1] %v6235_v29 }
0x1050   : > { %6266 = vst [vmem:[#allocation3 + $0x1d9] sm:$0x1] %v6236_v11  ;;  %v6285_v11 = vld [vmem:[%s10437_s0 + $0xfc] sm:$0x2] }
0x1051   : > { %6267 = vst [vmem:[#allocation3 + $0x1f9] sm:$0x1] %v6237_v8  ;;  %v6295_v8 = vunpack.c.l.bf16 %v6279_v26 }
0x10b9   : > { %v6319_v41 = vpop.f32.mrf.mxu2 }
0x10ba   : > { %v6327_v40 = vrot.slane %v6319_v41, 6  ;;  %v6328_v63 = vrot.slane %v6319_v41, 7  ;;  %v6329_v42 = vrot.slane %v6319_v41, 1  ;;  %v6330_v56 = vrot.slane %v6319_v41, 2 }
0x10bb   : > { %v6359_v45 = vadd.f32 %v6319_v41, %v6288_v22  ;;  %v6331_v19 = vrot.slane %v6319_v41, 3  ;;  %v6332_v48 = vrot.slane %v6319_v41, 4  ;;  %v6333_v25 = vrot.slane %v6319_v41, 5 }
0x10bc   : > { %v6357_v35 = vadd.f32 %v6327_v40, %v6286_v62  ;;  %v6358_v27 = vadd.f32 %v6328_v63, %v6287_v57  ;;  %v6360_v12 = vadd.f32 %v6329_v42, %v6289_v1  ;;  %v6361_v37 = vadd.f32 %v6330_v56, %v6290_v2 }
0x10bd   : > { %9625 = vtanh.f32 %v6359_v45  ;;  %v6362_v18 = vadd.f32 %v6331_v19, %v6291_v20  ;;  %v6363_v15 = vadd.f32 %v6332_v48, %v6292_v60  ;;  %v6364_v9 = vadd.f32 %v6333_v25, %v6293_v16 }
0x10be   : > { %9627 = vtanh.f32 %v6357_v35  ;;  %v6300_v22 = vunpack.c.l.bf16 %v6284_v21  ;;  %v6301_v1 = vunpack.c.l.bf16 %v6285_v11 }
0x10bf   : > { %9629 = vtanh.f32 %v6358_v27 }
0x10c0   : > { %9631 = vtanh.f32 %v6360_v12 }
0x10c1   : > { %9633 = vtanh.f32 %v6361_v37 }
0x10c2   : > { %9635 = vtanh.f32 %v6362_v18 }
0x10c3   : > { %v9626_v53 = vpop.eup %9625  ;;  %9637 = vtanh.f32 %v6363_v15 }
0x10c4   : > { %v9628_v54 = vpop.eup %9627  ;;  %9639 = vtanh.f32 %v6364_v9 }
0x10c5   : > { %v9630_v46 = vpop.eup %9629  ;;  %v6413_v14 = vrot.slane %v9628_v54, 2 }
0x10c6   : > { %v9632_v39 = vpop.eup %9631  ;;  %v6414_v3 = vrot.slane %v9630_v46, 1 }
0x10c7   : > { %v9634_v23 = vpop.eup %9633  ;;  %v6417_v28 = vrot.slane %v9632_v39, 7 }
0x10c8   : > { %v9636_v52 = vpop.eup %9635  ;;  %v6415_v44 = vsel %vm609_vm2, %v6414_v3, %v6413_v14  ;;  %v6419_v47 = vrot.slane %v9634_v23, 6 }
0x10c9   : > { %v9638_v6 = vpop.eup %9637  ;;  %v6416_v43 = vsel %vm612_vm3, %v9626_v53, %v6415_v44  ;;  %v6421_v7 = vrot.slane %v9636_v52, 5 }
0x10ca   : > { %v9640_v32 = vpop.eup %9639  ;;  %v6418_v5 = vsel %vm615_vm4, %v6417_v28, %v6416_v43  ;;  %v6423_v29 = vrot.slane %v9638_v6, 4 }
0x10cb   : > { %v6420_v50 = vsel %vm618_vm5, %v6419_v47, %v6418_v5  ;;  %v6425_v49 = vrot.slane %v9640_v32, 3 }
0x10cc   : > { %v6422_v31 = vsel %vm621_vm6, %v6421_v7, %v6420_v50  ;;  %v6322_v13 = vpop.f32.mrf.mxu2 }
0x10cd   : > { %v6424_v58 = vsel %vm624_vm7, %v6423_v29, %v6422_v31  ;;  %v6334_v62 = vrot.slane %v6322_v13, 6  ;;  %v6335_v57 = vrot.slane %v6322_v13, 7  ;;  %v6367_v34 = vadd.f32 %v6322_v13, %v6296_v38 }
0x10ce   : > { %v6336_v41 = vrot.slane %v6322_v13, 1  ;;  %v6426_v2 = vsel %vm627_vm8, %v6425_v49, %v6424_v58  ;;  %v6337_v20 = vrot.slane %v6322_v13, 2  ;;  %v6338_v60 = vrot.slane %v6322_v13, 3  ;;  %v6494_v58 = vld [vmem:[%s10437_s0 + $0x1c] sm:$0x2] }
0x10cf   : > { %v6365_v40 = vadd.f32 %v6334_v62, %v6294_v4  ;;  %v6366_v63 = vadd.f32 %v6335_v57, %v6295_v8  ;;  %v6443_v42 = vsel %vm6395_vm0, %v6426_v2, 0.0  ;;  %v6339_v56 = vrot.slane %v6322_v13, 4  ;;  %v6495_v49 = vld [vmem:[%s10437_s0 + $0x2c] sm:$0x2] }
0x10d0   : > { %9641 = vtanh.f32 %v6367_v34  ;;  %v6447_v45 = vrot.slane %v6443_v42, 1  ;;  %v6448_v16 = vrot.slane %v6443_v42, 2  ;;  %v6449_v19 = vrot.slane %v6443_v42, 3  ;;  %6475 = vst [vmem:[#allocation3 + $0x1a] sm:$0x1] %v6443_v42 }
0x10d1   : > { %9643 = vtanh.f32 %v6365_v40  ;;  %v6450_v48 = vrot.slane %v6443_v42, 4  ;;  %v6451_v35 = vrot.slane %v6443_v42, 5  ;;  %v12388_v27 = vsel %vm6395_vm0, %v6426_v2, %v12348_v0  ;;  %v6499_v62 = vld [vmem:[%s10437_s0 + $0x6c] sm:$0x2]  ;;  %v6500_v2 = vld [vmem:[%s10437_s0 + $0x7c] sm:$0x2] }
0x10d2   : > { %9645 = vtanh.f32 %v6366_v63  ;;  %6476 = vst [vmem:[#allocation3 + $0x3a] sm:$0x1] %v6447_v45  ;;  %v6340_v25 = vrot.slane %v6322_v13, 5  ;;  %v6368_v12 = vadd.f32 %v6336_v41, %v6297_v24  ;;  %v6452_v37 = vrot.slane %v6443_v42, 6  ;;  %6541 = vmatmul.f32.vlgmr.msra.gmra.mxu3 %v12388_v27  ;;  %v6493_v13 = vld [vmem:[%s10437_s0 + $0xc] sm:$0x2] }
0x10d3   : > { %6477 = vst [vmem:[#allocation3 + $0x5a] sm:$0x1] %v6448_v16  ;;  %v6369_v18 = vadd.f32 %v6337_v20, %v6298_v36  ;;  %v6370_v15 = vadd.f32 %v6338_v60, %v6299_v51  ;;  %v6371_v9 = vadd.f32 %v6339_v56, %v6300_v22  ;;  %v6453_v53 = vrot.slane %v6443_v42, 7  ;;  %v6496_v36 = vld [vmem:[%s10437_s0 + $0x3c] sm:$0x2] }
0x10d4   : > { %6478 = vst [vmem:[#allocation3 + $0x7a] sm:$0x1] %v6449_v19  ;;  %v6372_v54 = vadd.f32 %v6340_v25, %v6301_v1  ;;  %9647 = vtanh.f32 %v6368_v12  ;;  %v6497_v51 = vld [vmem:[%s10437_s0 + $0x4c] sm:$0x2]  ;;  %v6498_v22 = vld [vmem:[%s10437_s0 + $0x5c] sm:$0x2]  ;;  %v6512_v57 = vunpack.c.l.bf16 %v6496_v36  ;;  %v6509_v34 = vunpack.c.l.bf16 %v6493_v13 }
0x10d5   : > { %6479 = vst [vmem:[#allocation3 + $0x9a] sm:$0x1] %v6450_v48  ;;  %9649 = vtanh.f32 %v6369_v18  ;;  %v6510_v1 = vunpack.c.l.bf16 %v6494_v58  ;;  %v6511_v41 = vunpack.c.l.bf16 %v6495_v49  ;;  %v6513_v60 = vunpack.c.l.bf16 %v6497_v51 }
0x10d6   : > { %v9642_v46 = vpop.eup %9641  ;;  %6480 = vst [vmem:[#allocation3 + $0xba] sm:$0x1] %v6451_v35  ;;  %9651 = vtanh.f32 %v6370_v15  ;;  %v6514_v40 = vunpack.c.l.bf16 %v6498_v22  ;;  %v6515_v63 = vunpack.c.l.bf16 %v6499_v62  ;;  %v6516_v48 = vunpack.c.l.bf16 %v6500_v2 }
0x10d7   : > { %v9644_v0 = vpop.eup %9643  ;;  %6481 = vst [vmem:[#allocation3 + $0xda] sm:$0x1] %v6452_v37  ;;  %9653 = vtanh.f32 %v6371_v9 }
0x10d8   : > { %v9646_v14 = vpop.eup %9645  ;;  %6482 = vst [vmem:[#allocation3 + $0xfa] sm:$0x1] %v6453_v53  ;;  %9655 = vtanh.f32 %v6372_v54  ;;  %v6427_v39 = vrot.slane %v9644_v0, 2 }
0x10d9   : > { %v6428_v3 = vrot.slane %v9646_v14, 1  ;;  %v6501_v14 = vld [vmem:[%s10437_s0 + $0x8c] sm:$0x2] }
0x10da   : > { %v9648_v23 = vpop.eup %9647 }
0x10db   : > { %v9650_v10 = vpop.eup %9649  ;;  %v6429_v52 = vsel %vm609_vm2, %v6428_v3, %v6427_v39  ;;  %v6431_v59 = vrot.slane %v9648_v23, 7  ;;  %v6504_v39 = vld [vmem:[%s10437_s0 + $0xbc] sm:$0x2] }
0x10dc   : > { %v9652_v61 = vpop.eup %9651  ;;  %v6430_v26 = vsel %vm612_vm3, %v9642_v46, %v6429_v52  ;;  %v6433_v44 = vrot.slane %v9650_v10, 6  ;;  %v6502_v23 = vld [vmem:[%s10437_s0 + $0x9c] sm:$0x2]  ;;  %v6503_v10 = vld [vmem:[%s10437_s0 + $0xac] sm:$0x2] }
0x10dd   : > { %v9654_v28 = vpop.eup %9653  ;;  %v6432_v6 = vsel %vm615_vm4, %v6431_v59, %v6430_v26  ;;  %v6435_v43 = vrot.slane %v9652_v61, 5  ;;  %v6505_v52 = vld [vmem:[%s10437_s0 + $0xcc] sm:$0x2]  ;;  %v6506_v26 = vld [vmem:[%s10437_s0 + $0xdc] sm:$0x2] }
0x10de   : > { %v9656_v47 = vpop.eup %9655  ;;  %v6434_v33 = vsel %vm618_vm5, %v6433_v44, %v6432_v6  ;;  %v6437_v32 = vrot.slane %v9654_v28, 4  ;;  %v6507_v44 = vld [vmem:[%s10437_s0 + $0xec] sm:$0x2]  ;;  %v6520_v6 = vunpack.c.l.bf16 %v6504_v39 }
0x10df   : > { %v6436_v38 = vsel %vm621_vm6, %v6435_v43, %v6434_v33  ;;  %v6439_v5 = vrot.slane %v9656_v47, 3  ;;  %v6508_v47 = vld [vmem:[%s10437_s0 + $0xfc] sm:$0x2]  ;;  %v6517_v33 = vunpack.c.l.bf16 %v6501_v14 }
0x10e0   : > { %v6438_v7 = vsel %vm624_vm7, %v6437_v32, %v6436_v38  ;;  %v6518_v32 = vunpack.c.l.bf16 %v6502_v23  ;;  %v6524_v36 = vunpack.c.l.bf16 %v6508_v47 }
0x10e1   : > { %v6440_v55 = vsel %vm627_vm8, %v6439_v5, %v6438_v7  ;;  %v6519_v5 = vunpack.c.l.bf16 %v6503_v10 }
0x10e2   : > { %v6444_v21 = vsel %vm6396_vm1, %v6440_v55, 0.0  ;;  %v12399_v4 = vsel %vm6396_vm1, %v6440_v55, %v12359_v30 }
0x10e3   : > { %v6454_v50 = vrot.slane %v6444_v21, 1  ;;  %v6455_v29 = vrot.slane %v6444_v21, 2  ;;  %v6456_v11 = vrot.slane %v6444_v21, 3  ;;  %6483 = vst [vmem:[#allocation3 + $0x11a] sm:$0x1] %v6444_v21  ;;  %6544 = vmatmul.f32.gmra.mxu3 %v12399_v4  ;;  %v6457_v8 = vrot.slane %v6444_v21, 4 }
0x10e4   : > { %v6458_v31 = vrot.slane %v6444_v21, 5  ;;  %v6459_v24 = vrot.slane %v6444_v21, 6  ;;  %v6460_v30 = vrot.slane %v6444_v21, 7  ;;  %v6521_v21 = vunpack.c.l.bf16 %v6505_v52 }
0x10e5   : > { %6484 = vst [vmem:[#allocation3 + $0x13a] sm:$0x1] %v6454_v50  ;;  %v6522_v50 = vunpack.c.l.bf16 %v6506_v26 }
0x10e6   : > { %6485 = vst [vmem:[#allocation3 + $0x15a] sm:$0x1] %v6455_v29  ;;  %v6523_v29 = vunpack.c.l.bf16 %v6507_v44 }
0x10e7   : > { %6486 = vst [vmem:[#allocation3 + $0x17a] sm:$0x1] %v6456_v11 }
0x10e8   : > { %6487 = vst [vmem:[#allocation3 + $0x19a] sm:$0x1] %v6457_v8 }
0x10e9   : > { %6488 = vst [vmem:[#allocation3 + $0x1ba] sm:$0x1] %v6458_v31 }
0x10ea   : > { %6489 = vst [vmem:[#allocation3 + $0x1da] sm:$0x1] %v6459_v24 }
0x10eb   : > { %6490 = vst [vmem:[#allocation3 + $0x1fa] sm:$0x1] %v6460_v30 }
0x1155   : > { %v6542_v20 = vpop.f32.mrf.mxu3 }
0x1156   : > { %v6550_v42 = vrot.slane %v6542_v20, 5  ;;  %v6551_v56 = vrot.slane %v6542_v20, 6  ;;  %v6552_v45 = vrot.slane %v6542_v20, 7  ;;  %v6553_v16 = vrot.slane %v6542_v20, 1 }
0x1157   : > { %v6583_v19 = vadd.f32 %v6542_v20, %v6512_v57  ;;  %v6554_v35 = vrot.slane %v6542_v20, 2  ;;  %v6555_v25 = vrot.slane %v6542_v20, 3  ;;  %v6556_v15 = vrot.slane %v6542_v20, 4 }
0x1158   : > { %v6580_v12 = vadd.f32 %v6550_v42, %v6509_v34  ;;  %v6581_v37 = vadd.f32 %v6551_v56, %v6510_v1  ;;  %v6582_v18 = vadd.f32 %v6552_v45, %v6511_v41  ;;  %v6584_v9 = vadd.f32 %v6553_v16, %v6513_v60  ;;  %v6614_v41 = vpop.permute.xlu0 %6613 }
0x1159   : > { %9657 = vtanh.f32 %v6583_v19  ;;  %v6585_v53 = vadd.f32 %v6554_v35, %v6514_v40  ;;  %v6586_v54 = vadd.f32 %v6555_v25, %v6515_v63  ;;  %v6587_v46 = vadd.f32 %v6556_v15, %v6516_v48 }
0x115a   : > { %9659 = vtanh.f32 %v6580_v12  ;;  %vm6618_vm9 = vcmp.eq.s32.totalorder %v6614_v41, 1  ;;  %v6722_v41 = vld [vmem:[%s10437_s0 + $0x6c] sm:$0x4] }
0x115b   : > { %9661 = vtanh.f32 %v6581_v37 }
0x115c   : > { %9663 = vtanh.f32 %v6582_v18 }
0x115d   : > { %9665 = vtanh.f32 %v6584_v9 }
0x115e   : > { %9667 = vtanh.f32 %v6585_v53 }
0x115f   : > { %v9658_v0 = vpop.eup %9657  ;;  %9669 = vtanh.f32 %v6586_v54 }
0x1160   : > { %v9660_v3 = vpop.eup %9659  ;;  %9671 = vtanh.f32 %v6587_v46 }
0x1161   : > { %v9662_v59 = vpop.eup %9661  ;;  %v6636_v61 = vrot.slane %v9660_v3, 3 }
0x1162   : > { %v9664_v28 = vpop.eup %9663  ;;  %v6637_v43 = vrot.slane %v9662_v59, 2 }
0x1163   : > { %v9666_v17 = vpop.eup %9665  ;;  %v6639_v38 = vrot.slane %v9664_v28, 1 }
0x1164   : > { %v9668_v7 = vpop.eup %9667  ;;  %v6638_v55 = vsel %vm609_vm2, %v6637_v43, %v6636_v61  ;;  %v6642_v24 = vrot.slane %v9666_v17, 7 }
0x1165   : > { %v9670_v11 = vpop.eup %9669  ;;  %v6640_v31 = vsel %vm612_vm3, %v6639_v38, %v6638_v55  ;;  %v6644_v30 = vrot.slane %v9668_v7, 6 }
0x1166   : > { %v6545_v8 = vpop.f32.mrf.mxu3  ;;  %v9672_v13 = vpop.eup %9671  ;;  %v6641_v62 = vsel %vm615_vm4, %v9658_v0, %v6640_v31  ;;  %v6646_v57 = vrot.slane %v9670_v11, 5 }
0x1167   : > { %v6557_v58 = vrot.slane %v6545_v8, 5  ;;  %v6558_v49 = vrot.slane %v6545_v8, 6  ;;  %v6559_v51 = vrot.slane %v6545_v8, 7  ;;  %v6591_v22 = vadd.f32 %v6545_v8, %v6520_v6 }
0x1168   : > { %v6648_v34 = vrot.slane %v9672_v13, 4  ;;  %v6560_v1 = vrot.slane %v6545_v8, 1  ;;  %v6643_v60 = vsel %vm618_vm5, %v6642_v24, %v6641_v62  ;;  %v6561_v63 = vrot.slane %v6545_v8, 2  ;;  %v6721_v62 = vld [vmem:[%s10437_s0 + $0x5c] sm:$0x4] }
0x1169   : > { %v6588_v2 = vadd.f32 %v6557_v58, %v6517_v33  ;;  %v6589_v20 = vadd.f32 %v6558_v49, %v6518_v32  ;;  %9673 = vtanh.f32 %v6591_v22  ;;  %v6645_v40 = vsel %vm621_vm6, %v6644_v30, %v6643_v60  ;;  %v6617_v32 = vpop.permute.xlu1 %6616  ;;  %v6717_v49 = vld [vmem:[%s10437_s0 + $0x1c] sm:$0x4] }
0x116a   : > { %v6562_v42 = vrot.slane %v6545_v8, 3  ;;  %v6563_v56 = vrot.slane %v6545_v8, 4  ;;  %v6647_v45 = vsel %vm624_vm7, %v6646_v57, %v6645_v40  ;;  %v6590_v16 = vadd.f32 %v6559_v51, %v6519_v5  ;;  %v6718_v51 = vld [vmem:[%s10437_s0 + $0x2c] sm:$0x4]  ;;  %v6719_v22 = vld [vmem:[%s10437_s0 + $0x3c] sm:$0x4] }
0x116b   : > { %9675 = vtanh.f32 %v6588_v2  ;;  %v6592_v19 = vadd.f32 %v6560_v1, %v6521_v21  ;;  %v6649_v48 = vsel %vm627_vm8, %v6648_v34, %v6647_v45  ;;  %v6593_v35 = vadd.f32 %v6561_v63, %v6522_v50  ;;  %v6723_v45 = vld [vmem:[%s10437_s0 + $0x7c] sm:$0x4] }
0x116c   : > { %9677 = vtanh.f32 %v6589_v20  ;;  %v6666_v25 = vsel %vm6618_vm9, %v6649_v48, 0.0  ;;  %v12426_v12 = vsel %vm6618_vm9, %v6649_v48, %v12388_v27  ;;  %v6594_v37 = vadd.f32 %v6562_v42, %v6523_v29 }
0x116d   : > { %9679 = vtanh.f32 %v6590_v16  ;;  %v6670_v18 = vrot.slane %v6666_v25, 1  ;;  %v6671_v15 = vrot.slane %v6666_v25, 2  ;;  %v6672_v9 = vrot.slane %v6666_v25, 3  ;;  %6698 = vst [vmem:[#allocation3 + $0x1b] sm:$0x1] %v6666_v25  ;;  %6764 = vmatmul.f32.vlgmr.msrb.gmra.mxu0 %v12426_v12 }
0x116e   : > { %v6595_v53 = vadd.f32 %v6563_v56, %v6524_v36  ;;  %v6673_v46 = vrot.slane %v6666_v25, 4  ;;  %9681 = vtanh.f32 %v6592_v19  ;;  %v6674_v0 = vrot.slane %v6666_v25, 5  ;;  %v6720_v16 = vld [vmem:[%s10437_s0 + $0x4c] sm:$0x4] }
0x116f   : > { %v9674_v54 = vpop.eup %9673  ;;  %6699 = vst [vmem:[#allocation3 + $0x3b] sm:$0x1] %v6670_v18  ;;  %9683 = vtanh.f32 %v6593_v35  ;;  %v6675_v39 = vrot.slane %v6666_v25, 6  ;;  %v6676_v3 = vrot.slane %v6666_v25, 7  ;;  %vm6619_vm10 = vcmp.eq.s32.totalorder %v6617_v32, 1 }
0x1170   : > { %6700 = vst [vmem:[#allocation3 + $0x5b] sm:$0x1] %v6671_v15  ;;  %9685 = vtanh.f32 %v6594_v37  ;;  %v6733_v34 = vunpack.c.l.bf16 %v6717_v49  ;;  %v6734_v1 = vunpack.c.l.bf16 %v6718_v51  ;;  %v6735_v20 = vunpack.c.l.bf16 %v6719_v22 }
0x1171   : > { %v9676_v14 = vpop.eup %9675  ;;  %6701 = vst [vmem:[#allocation3 + $0x7b] sm:$0x1] %v6672_v9  ;;  %9687 = vtanh.f32 %v6595_v53  ;;  %v6737_v60 = vunpack.c.l.bf16 %v6721_v62  ;;  %v6738_v19 = vunpack.c.l.bf16 %v6722_v41  ;;  %v6739_v15 = vunpack.c.l.bf16 %v6723_v45 }
0x1172   : > { %v9678_v27 = vpop.eup %9677  ;;  %v6650_v23 = vrot.slane %v9676_v14, 3  ;;  %6702 = vst [vmem:[#allocation3 + $0x9b] sm:$0x1] %v6673_v46 }
0x1173   : > { %v9680_v10 = vpop.eup %9679  ;;  %v6651_v52 = vrot.slane %v9678_v27, 2  ;;  %6703 = vst [vmem:[#allocation3 + $0xbb] sm:$0x1] %v6674_v0  ;;  %v6724_v27 = vld [vmem:[%s10437_s0 + $0x8c] sm:$0x4] }
0x1174   : > { %v6653_v59 = vrot.slane %v9680_v10, 1  ;;  %v9682_v61 = vpop.eup %9681  ;;  %6704 = vst [vmem:[#allocation3 + $0xdb] sm:$0x1] %v6675_v39  ;;  %v6726_v10 = vld [vmem:[%s10437_s0 + $0xac] sm:$0x4] }
0x1175   : > { %v6652_v26 = vsel %vm609_vm2, %v6651_v52, %v6650_v23  ;;  %v9684_v44 = vpop.eup %9683  ;;  %6705 = vst [vmem:[#allocation3 + $0xfb] sm:$0x1] %v6676_v3  ;;  %v6656_v6 = vrot.slane %v9682_v61, 7  ;;  %v6725_v3 = vld [vmem:[%s10437_s0 + $0x9c] sm:$0x4]  ;;  %v6742_v32 = vunpack.c.l.bf16 %v6726_v10 }
0x1176   : > { %v6654_v28 = vsel %vm612_vm3, %v6653_v59, %v6652_v26  ;;  %v9686_v43 = vpop.eup %9685  ;;  %v6658_v17 = vrot.slane %v9684_v44, 6  ;;  %v6727_v52 = vld [vmem:[%s10437_s0 + $0xbc] sm:$0x4]  ;;  %v6728_v59 = vld [vmem:[%s10437_s0 + $0xcc] sm:$0x4] }
0x1177   : > { %v6655_v47 = vsel %vm615_vm4, %v9674_v54, %v6654_v28  ;;  %v9688_v33 = vpop.eup %9687  ;;  %v6660_v5 = vrot.slane %v9686_v43, 5  ;;  %v6736_v54 = vunpack.c.l.bf16 %v6720_v16  ;;  %v6729_v44 = vld [vmem:[%s10437_s0 + $0xdc] sm:$0x4]  ;;  %v6730_v28 = vld [vmem:[%s10437_s0 + $0xec] sm:$0x4]  ;;  %v6740_v43 = vunpack.c.l.bf16 %v6724_v27 }
0x1178   : > { %v6657_v38 = vsel %vm618_vm5, %v6656_v6, %v6655_v47  ;;  %v6662_v55 = vrot.slane %v9688_v33, 4  ;;  %v6741_v33 = vunpack.c.l.bf16 %v6725_v3 }
0x1179   : > { %v6659_v7 = vsel %vm621_vm6, %v6658_v17, %v6657_v38  ;;  %v6744_v38 = vunpack.c.l.bf16 %v6728_v59 }
0x117a   : > { %v6661_v21 = vsel %vm624_vm7, %v6660_v5, %v6659_v7  ;;  %v6731_v7 = vld [vmem:[%s10437_s0 + $0xfc] sm:$0x4] }
0x117b   : > { %v6663_v50 = vsel %vm627_vm8, %v6662_v55, %v6661_v21  ;;  %v6743_v21 = vunpack.c.l.bf16 %v6727_v52  ;;  %v6747_v22 = vunpack.c.l.bf16 %v6731_v7 }
0x117c   : > { %v6667_v29 = vsel %vm6619_vm10, %v6663_v50, 0.0  ;;  %v12437_v11 = vsel %vm6619_vm10, %v6663_v50, %v12399_v4  ;;  %v6716_v4 = vld [vmem:[%s10437_s0 + $0xc] sm:$0x4] }
0x117d   : > { %v6677_v8 = vrot.slane %v6667_v29, 1  ;;  %v6678_v31 = vrot.slane %v6667_v29, 2  ;;  %v6679_v24 = vrot.slane %v6667_v29, 3  ;;  %6706 = vst [vmem:[#allocation3 + $0x11b] sm:$0x1] %v6667_v29  ;;  %6767 = vmatmul.f32.gmra.mxu0 %v12437_v11  ;;  %v6680_v30 = vrot.slane %v6667_v29, 4 }
0x117e   : > { %v6681_v36 = vrot.slane %v6667_v29, 5  ;;  %v6682_v13 = vrot.slane %v6667_v29, 6  ;;  %v6683_v58 = vrot.slane %v6667_v29, 7  ;;  %v6732_v57 = vunpack.c.l.bf16 %v6716_v4 }
0x117f   : > { %6707 = vst [vmem:[#allocation3 + $0x13b] sm:$0x1] %v6677_v8  ;;  %v6745_v8 = vunpack.c.l.bf16 %v6729_v44 }
0x1180   : > { %6708 = vst [vmem:[#allocation3 + $0x15b] sm:$0x1] %v6678_v31  ;;  %v6746_v31 = vunpack.c.l.bf16 %v6730_v28 }
0x1181   : > { %6709 = vst [vmem:[#allocation3 + $0x17b] sm:$0x1] %v6679_v24 }
0x1182   : > { %6710 = vst [vmem:[#allocation3 + $0x19b] sm:$0x1] %v6680_v30 }
0x1183   : > { %6711 = vst [vmem:[#allocation3 + $0x1bb] sm:$0x1] %v6681_v36 }
0x1184   : > { %6712 = vst [vmem:[#allocation3 + $0x1db] sm:$0x1] %v6682_v13 }
0x1185   : > { %6713 = vst [vmem:[#allocation3 + $0x1fb] sm:$0x1] %v6683_v58 }
0x11ea   : > { %v6765_v2 = vpop.f32.mrf.mxu0 }
0x11eb   : > { %v6773_v40 = vrot.slane %v6765_v2, 4  ;;  %v6774_v63 = vrot.slane %v6765_v2, 5  ;;  %v6775_v42 = vrot.slane %v6765_v2, 6  ;;  %v6776_v56 = vrot.slane %v6765_v2, 7 }
0x11ec   : > { %v6777_v48 = vrot.slane %v6765_v2, 1  ;;  %v6778_v35 = vrot.slane %v6765_v2, 2  ;;  %v6779_v9 = vrot.slane %v6765_v2, 3  ;;  %v6807_v39 = vadd.f32 %v6765_v2, %v6736_v54 }
0x11ed   : > { %v6803_v25 = vadd.f32 %v6773_v40, %v6732_v57  ;;  %v6804_v37 = vadd.f32 %v6774_v63, %v6733_v34  ;;  %v6805_v18 = vadd.f32 %v6775_v42, %v6734_v1  ;;  %v6806_v53 = vadd.f32 %v6776_v56, %v6735_v20  ;;  %v6837_v42 = vpop.permute.xlu2 %6836 }
0x11ee   : > { %v6808_v46 = vadd.f32 %v6777_v48, %v6737_v60  ;;  %v6809_v0 = vadd.f32 %v6778_v35, %v6738_v19  ;;  %v6810_v14 = vadd.f32 %v6779_v9, %v6739_v15  ;;  %vm6841_vm11 = vcmp.eq.s32.totalorder %v6837_v42, 1 }
0x11ef   : > { %9689 = vtanh.f32 %v6803_v25 }
0x11f0   : > { %9691 = vtanh.f32 %v6804_v37 }
0x11f1   : > { %9693 = vtanh.f32 %v6805_v18 }
0x11f2   : > { %9695 = vtanh.f32 %v6806_v53 }
0x11f3   : > { %9697 = vtanh.f32 %v6808_v46 }
0x11f4   : > { %9699 = vtanh.f32 %v6809_v0 }
0x11f5   : > { %v9690_v23 = vpop.eup %9689  ;;  %9701 = vtanh.f32 %v6810_v14 }
0x11f6   : > { %v9692_v61 = vpop.eup %9691  ;;  %v6859_v26 = vrot.slane %v9690_v23, 4  ;;  %9703 = vtanh.f32 %v6807_v39 }
0x11f7   : > { %v9694_v6 = vpop.eup %9693  ;;  %v6860_v47 = vrot.slane %v9692_v61, 3 }
0x11f8   : > { %v9696_v17 = vpop.eup %9695  ;;  %v6862_v5 = vrot.slane %v9694_v6, 2 }
0x11f9   : > { %v9698_v55 = vpop.eup %9697  ;;  %v6861_v29 = vsel %vm609_vm2, %v6860_v47, %v6859_v26  ;;  %v6864_v51 = vrot.slane %v9696_v17, 1 }
0x11fa   : > { %v6768_v50 = vpop.f32.mrf.mxu0  ;;  %v9700_v24 = vpop.eup %9699  ;;  %v6863_v49 = vsel %vm612_vm3, %v6862_v5, %v6861_v29  ;;  %v6867_v40 = vrot.slane %v9698_v55, 7 }
0x11fb   : > { %v6780_v30 = vrot.slane %v6768_v50, 4  ;;  %v6781_v36 = vrot.slane %v6768_v50, 5  ;;  %v6782_v13 = vrot.slane %v6768_v50, 6  ;;  %v6783_v58 = vrot.slane %v6768_v50, 7  ;;  %v9702_v62 = vpop.eup %9701  ;;  %v6840_v5 = vpop.permute.xlu1 %6839 }
0x11fc   : > { %v6784_v4 = vrot.slane %v6768_v50, 1  ;;  %v6815_v41 = vadd.f32 %v6768_v50, %v6744_v38  ;;  %v9704_v2 = vpop.eup %9703  ;;  %v6865_v60 = vsel %vm615_vm4, %v6864_v51, %v6863_v49  ;;  %v6869_v63 = vrot.slane %v9700_v24, 6 }
0x11fd   : > { %v6811_v57 = vadd.f32 %v6780_v30, %v6740_v43  ;;  %v6812_v34 = vadd.f32 %v6781_v36, %v6741_v33  ;;  %v6813_v1 = vadd.f32 %v6782_v13, %v6742_v32  ;;  %v6814_v20 = vadd.f32 %v6783_v58, %v6743_v21 }
0x11fe   : > { %v6866_v56 = vsel %vm618_vm5, %v9704_v2, %v6865_v60  ;;  %v6785_v45 = vrot.slane %v6768_v50, 2  ;;  %v6786_v16 = vrot.slane %v6768_v50, 3  ;;  %v6871_v48 = vrot.slane %v9702_v62, 5  ;;  %v6941_v62 = vld [vmem:[%s10437_s0 + $0x2c] sm:$0x4] }
0x11ff   : > { %9705 = vtanh.f32 %v6811_v57  ;;  %v6868_v19 = vsel %vm621_vm6, %v6867_v40, %v6866_v56  ;;  %v6816_v35 = vadd.f32 %v6784_v4, %v6745_v8  ;;  %vm6842_vm12 = vcmp.eq.s32.totalorder %v6840_v5, 1  ;;  %v6942_v57 = vld [vmem:[%s10437_s0 + $0x3c] sm:$0x4] }
0x1200   : > { %9707 = vtanh.f32 %v6812_v34  ;;  %v6870_v25 = vsel %vm624_vm7, %v6869_v63, %v6868_v19  ;;  %v6817_v37 = vadd.f32 %v6785_v45, %v6746_v31  ;;  %v6818_v15 = vadd.f32 %v6786_v16, %v6747_v22  ;;  %v6940_v22 = vld [vmem:[%s10437_s0 + $0x1c] sm:$0x4]  ;;  %v6943_v34 = vld [vmem:[%s10437_s0 + $0x4c] sm:$0x4] }
0x1201   : > { %9709 = vtanh.f32 %v6813_v1  ;;  %v6872_v18 = vsel %vm627_vm8, %v6871_v48, %v6870_v25  ;;  %v6957_v2 = vunpack.c.l.bf16 %v6941_v62  ;;  %v6958_v40 = vunpack.c.l.bf16 %v6942_v57  ;;  %v6946_v19 = vld [vmem:[%s10437_s0 + $0x7c] sm:$0x4] }
0x1202   : > { %9711 = vtanh.f32 %v6814_v20  ;;  %v6889_v9 = vsel %vm6841_vm11, %v6872_v18, 0.0  ;;  %v12464_v53 = vsel %vm6841_vm11, %v6872_v18, %v12426_v12  ;;  %v6945_v20 = vld [vmem:[%s10437_s0 + $0x6c] sm:$0x4]  ;;  %v6959_v63 = vunpack.c.l.bf16 %v6943_v34  ;;  %v6944_v48 = vld [vmem:[%s10437_s0 + $0x5c] sm:$0x4] }
0x1203   : > { %9713 = vtanh.f32 %v6816_v35  ;;  %v6893_v54 = vrot.slane %v6889_v9, 1  ;;  %v6894_v46 = vrot.slane %v6889_v9, 2  ;;  %v6895_v0 = vrot.slane %v6889_v9, 3  ;;  %6921 = vst [vmem:[#allocation3 + $0x1c] sm:$0x1] %v6889_v9  ;;  %6987 = vmatmul.f32.vlgmr.msrb.gmra.mxu1 %v12464_v53 }
0x1204   : > { %9715 = vtanh.f32 %v6815_v41  ;;  %v6896_v39 = vrot.slane %v6889_v9, 4  ;;  %v6897_v23 = vrot.slane %v6889_v9, 5  ;;  %v6898_v12 = vrot.slane %v6889_v9, 6 }
0x1205   : > { %v9706_v14 = vpop.eup %9705  ;;  %9717 = vtanh.f32 %v6817_v37  ;;  %6922 = vst [vmem:[#allocation3 + $0x3c] sm:$0x1] %v6893_v54  ;;  %v6899_v61 = vrot.slane %v6889_v9, 7  ;;  %v6956_v41 = vunpack.c.l.bf16 %v6940_v22  ;;  %v6961_v25 = vunpack.c.l.bf16 %v6945_v20 }
0x1206   : > { %v9708_v27 = vpop.eup %9707  ;;  %v6873_v3 = vrot.slane %v9706_v14, 4  ;;  %9719 = vtanh.f32 %v6818_v15  ;;  %6923 = vst [vmem:[#allocation3 + $0x5c] sm:$0x1] %v6894_v46  ;;  %v6962_v54 = vunpack.c.l.bf16 %v6946_v19  ;;  %v6960_v14 = vunpack.c.l.bf16 %v6944_v48  ;;  %v7060_v19 = vpop.permute.xlu2 %7059 }
0x1207   : > { %v9710_v10 = vpop.eup %9709  ;;  %v6874_v52 = vrot.slane %v9708_v27, 3  ;;  %6924 = vst [vmem:[#allocation3 + $0x7c] sm:$0x1] %v6895_v0  ;;  %vm7064_vm13 = vcmp.eq.s32.totalorder %v7060_v19, 1 }
0x1208   : > { %v9712_v59 = vpop.eup %9711  ;;  %v6876_v26 = vrot.slane %v9710_v10, 2  ;;  %6925 = vst [vmem:[#allocation3 + $0x9c] sm:$0x1] %v6896_v39  ;;  %v6952_v10 = vld [vmem:[%s10437_s0 + $0xdc] sm:$0x4] }
0x1209   : > { %v9714_v44 = vpop.eup %9713  ;;  %v6875_v28 = vsel %vm609_vm2, %v6874_v52, %v6873_v3  ;;  %v6878_v6 = vrot.slane %v9712_v59, 1  ;;  %6926 = vst [vmem:[#allocation3 + $0xbc] sm:$0x1] %v6897_v23  ;;  %v6947_v3 = vld [vmem:[%s10437_s0 + $0x8c] sm:$0x4] }
0x120a   : > { %v9716_v43 = vpop.eup %9715  ;;  %v6877_v47 = vsel %vm612_vm3, %v6876_v26, %v6875_v28  ;;  %6927 = vst [vmem:[#allocation3 + $0xdc] sm:$0x1] %v6898_v12  ;;  %v6881_v32 = vrot.slane %v9714_v44, 7  ;;  %v6948_v23 = vld [vmem:[%s10437_s0 + $0x9c] sm:$0x4] }
0x120b   : > { %v9718_v17 = vpop.eup %9717  ;;  %v6879_v33 = vsel %vm615_vm4, %v6878_v6, %v6877_v47  ;;  %6928 = vst [vmem:[#allocation3 + $0xfc] sm:$0x1] %v6899_v61  ;;  %v6949_v59 = vld [vmem:[%s10437_s0 + $0xac] sm:$0x4]  ;;  %v6950_v61 = vld [vmem:[%s10437_s0 + $0xbc] sm:$0x4]  ;;  %v6963_v6 = vunpack.c.l.bf16 %v6947_v3  ;;  %v6968_v47 = vunpack.c.l.bf16 %v6952_v10 }
0x120c   : > { %v9720_v38 = vpop.eup %9719  ;;  %v6880_v7 = vsel %vm618_vm5, %v9716_v43, %v6879_v33  ;;  %v6883_v55 = vrot.slane %v9718_v17, 6  ;;  %v6951_v26 = vld [vmem:[%s10437_s0 + $0xcc] sm:$0x4]  ;;  %v6964_v43 = vunpack.c.l.bf16 %v6948_v23  ;;  %v6965_v33 = vunpack.c.l.bf16 %v6949_v59 }
0x120d   : > { %v6882_v21 = vsel %vm621_vm6, %v6881_v32, %v6880_v7  ;;  %v6885_v50 = vrot.slane %v9720_v38, 5  ;;  %v6953_v44 = vld [vmem:[%s10437_s0 + $0xec] sm:$0x4]  ;;  %v6966_v32 = vunpack.c.l.bf16 %v6950_v61 }
0x120e   : > { %v6884_v29 = vsel %vm624_vm7, %v6883_v55, %v6882_v21  ;;  %v6954_v21 = vld [vmem:[%s10437_s0 + $0xfc] sm:$0x4] }
0x120f   : > { %v6886_v8 = vsel %vm627_vm8, %v6885_v50, %v6884_v29  ;;  %v6967_v50 = vunpack.c.l.bf16 %v6951_v26  ;;  %v6969_v29 = vunpack.c.l.bf16 %v6953_v44  ;;  %v6970_v34 = vunpack.c.l.bf16 %v6954_v21 }
0x1210   : > { %v6890_v31 = vsel %vm6842_vm12, %v6886_v8, 0.0  ;;  %v12475_v24 = vsel %vm6842_vm12, %v6886_v8, %v12437_v11  ;;  %v6939_v11 = vld [vmem:[%s10437_s0 + $0xc] sm:$0x4] }
0x1211   : > { %v6900_v30 = vrot.slane %v6890_v31, 1  ;;  %v6901_v36 = vrot.slane %v6890_v31, 2  ;;  %v6902_v13 = vrot.slane %v6890_v31, 3  ;;  %6929 = vst [vmem:[#allocation3 + $0x11c] sm:$0x1] %v6890_v31  ;;  %6990 = vmatmul.f32.gmra.mxu1 %v12475_v24  ;;  %v6903_v58 = vrot.slane %v6890_v31, 4 }
0x1212   : > { %v6904_v4 = vrot.slane %v6890_v31, 5  ;;  %v6905_v49 = vrot.slane %v6890_v31, 6  ;;  %v6906_v51 = vrot.slane %v6890_v31, 7  ;;  %v6955_v1 = vunpack.c.l.bf16 %v6939_v11 }
0x1213   : > { %6930 = vst [vmem:[#allocation3 + $0x13c] sm:$0x1] %v6900_v30 }
0x1214   : > { %6931 = vst [vmem:[#allocation3 + $0x15c] sm:$0x1] %v6901_v36 }
0x1215   : > { %6932 = vst [vmem:[#allocation3 + $0x17c] sm:$0x1] %v6902_v13 }
0x1216   : > { %6933 = vst [vmem:[#allocation3 + $0x19c] sm:$0x1] %v6903_v58 }
0x1217   : > { %6934 = vst [vmem:[#allocation3 + $0x1bc] sm:$0x1] %v6904_v4 }
0x1218   : > { %6935 = vst [vmem:[#allocation3 + $0x1dc] sm:$0x1] %v6905_v49 }
0x1219   : > { %6936 = vst [vmem:[#allocation3 + $0x1fc] sm:$0x1] %v6906_v51 }
0x1280   : > { %v6988_v60 = vpop.f32.mrf.mxu1 }
0x1281   : > { %v6996_v42 = vrot.slane %v6988_v60, 3  ;;  %v6997_v56 = vrot.slane %v6988_v60, 4  ;;  %v6998_v45 = vrot.slane %v6988_v60, 5  ;;  %v6999_v16 = vrot.slane %v6988_v60, 6 }
0x1282   : > { %v7000_v35 = vrot.slane %v6988_v60, 7  ;;  %v7001_v9 = vrot.slane %v6988_v60, 1  ;;  %v7002_v46 = vrot.slane %v6988_v60, 2  ;;  %v7031_v12 = vadd.f32 %v6988_v60, %v6960_v14 }
0x1283   : > { %v7026_v37 = vadd.f32 %v6996_v42, %v6955_v1  ;;  %v7027_v18 = vadd.f32 %v6997_v56, %v6956_v41  ;;  %v7028_v15 = vadd.f32 %v6998_v45, %v6957_v2  ;;  %v7029_v0 = vadd.f32 %v6999_v16, %v6958_v40 }
0x1284   : > { %v7030_v39 = vadd.f32 %v7000_v35, %v6959_v63  ;;  %v7032_v27 = vadd.f32 %v7001_v9, %v6961_v25  ;;  %v7033_v52 = vadd.f32 %v7002_v46, %v6962_v54 }
0x1285   : > { %9721 = vtanh.f32 %v7026_v37 }
0x1286   : > { %9723 = vtanh.f32 %v7027_v18 }
0x1287   : > { %9725 = vtanh.f32 %v7028_v15 }
0x1288   : > { %9727 = vtanh.f32 %v7029_v0 }
0x1289   : > { %9729 = vtanh.f32 %v7030_v39 }
0x128a   : > { %9731 = vtanh.f32 %v7032_v27 }
0x128b   : > { %v9722_v28 = vpop.eup %9721  ;;  %9733 = vtanh.f32 %v7033_v52 }
0x128c   : > { %v9724_v17 = vpop.eup %9723  ;;  %v7082_v38 = vrot.slane %v9722_v28, 5  ;;  %9735 = vtanh.f32 %v7031_v12 }
0x128d   : > { %v9726_v5 = vpop.eup %9725  ;;  %v7083_v55 = vrot.slane %v9724_v17, 4 }
0x128e   : > { %v6991_v7 = vpop.f32.mrf.mxu1  ;;  %v9728_v8 = vpop.eup %9727  ;;  %v7085_v11 = vrot.slane %v9726_v5, 3 }
0x128f   : > { %v7003_v31 = vrot.slane %v6991_v7, 3  ;;  %v7004_v30 = vrot.slane %v6991_v7, 4  ;;  %v7005_v36 = vrot.slane %v6991_v7, 5  ;;  %v7006_v13 = vrot.slane %v6991_v7, 6  ;;  %v9730_v58 = vpop.eup %9729 }
0x1290   : > { %v7007_v4 = vrot.slane %v6991_v7, 7  ;;  %v7039_v49 = vadd.f32 %v6991_v7, %v6968_v47  ;;  %v7084_v51 = vsel %vm609_vm2, %v7083_v55, %v7082_v38  ;;  %v9732_v1 = vpop.eup %9731  ;;  %v7087_v20 = vrot.slane %v9728_v8, 2  ;;  %v7063_v55 = vpop.permute.xlu0 %7062 }
0x1291   : > { %v7034_v22 = vadd.f32 %v7003_v31, %v6963_v6  ;;  %v7035_v62 = vadd.f32 %v7004_v30, %v6964_v43  ;;  %v7036_v57 = vadd.f32 %v7005_v36, %v6965_v33  ;;  %v7037_v41 = vadd.f32 %v7006_v13, %v6966_v32  ;;  %v9734_v60 = vpop.eup %9733 }
0x1292   : > { %9737 = vtanh.f32 %v7039_v49  ;;  %v7086_v2 = vsel %vm612_vm3, %v7085_v11, %v7084_v51  ;;  %v7089_v40 = vrot.slane %v9730_v58, 1  ;;  %v7008_v63 = vrot.slane %v6991_v7, 1  ;;  %v9736_v42 = vpop.eup %9735 }
0x1293   : > { %9739 = vtanh.f32 %v7034_v22  ;;  %v7088_v56 = vsel %vm615_vm4, %v7087_v20, %v7086_v2  ;;  %v7009_v45 = vrot.slane %v6991_v7, 2  ;;  %v7038_v16 = vadd.f32 %v7007_v4, %v6967_v50 }
0x1294   : > { %9741 = vtanh.f32 %v7035_v62  ;;  %v7090_v48 = vsel %vm618_vm5, %v7089_v40, %v7088_v56  ;;  %v7092_v35 = vrot.slane %v9732_v1, 7  ;;  %v7040_v25 = vadd.f32 %v7008_v63, %v6969_v29  ;;  %v7162_v62 = vld [vmem:[%s10437_s0 + $0xc] sm:$0x8]  ;;  %v7165_v1 = vld [vmem:[%s10437_s0 + $0x3c] sm:$0x8] }
0x1295   : > { %9743 = vtanh.f32 %v7036_v57  ;;  %v7091_v37 = vsel %vm621_vm6, %v9736_v42, %v7090_v48  ;;  %v7094_v18 = vrot.slane %v9734_v60, 6  ;;  %v7041_v15 = vadd.f32 %v7009_v45, %v6970_v34  ;;  %v7163_v57 = vld [vmem:[%s10437_s0 + $0x1c] sm:$0x8]  ;;  %v7164_v34 = vld [vmem:[%s10437_s0 + $0x2c] sm:$0x8] }
0x1296   : > { %9745 = vtanh.f32 %v7037_v41  ;;  %v7093_v9 = vsel %vm624_vm7, %v7092_v35, %v7091_v37  ;;  %vm7065_vm14 = vcmp.eq.s32.totalorder %v7063_v55, 1  ;;  %v7166_v41 = vld [vmem:[%s10437_s0 + $0x4c] sm:$0x8]  ;;  %v7178_v2 = vunpack.c.l.bf16 %v7162_v62  ;;  %v7167_v40 = vld [vmem:[%s10437_s0 + $0x5c] sm:$0x8] }
0x1297   : > { %9747 = vtanh.f32 %v7038_v16  ;;  %v7095_v46 = vsel %vm627_vm8, %v7094_v18, %v7093_v9  ;;  %v7179_v20 = vunpack.c.l.bf16 %v7163_v57  ;;  %v7180_v60 = vunpack.c.l.bf16 %v7164_v34  ;;  %v7169_v63 = vld [vmem:[%s10437_s0 + $0x7c] sm:$0x8]  ;;  %v7176_v62 = vld [vmem:[%s10437_s0 + $0xec] sm:$0x8] }
0x1298   : > { %v9738_v54 = vpop.eup %9737  ;;  %9749 = vtanh.f32 %v7040_v25  ;;  %v7112_v14 = vsel %vm7064_vm13, %v7095_v46, 0.0  ;;  %v12502_v39 = vsel %vm7064_vm13, %v7095_v46, %v12464_v53  ;;  %v7181_v56 = vunpack.c.l.bf16 %v7165_v1 }
0x1299   : > { %v9740_v0 = vpop.eup %9739  ;;  %9751 = vtanh.f32 %v7041_v15  ;;  %v7116_v23 = vrot.slane %v7112_v14, 1  ;;  %v7117_v10 = vrot.slane %v7112_v14, 2  ;;  %v7118_v52 = vrot.slane %v7112_v14, 3  ;;  %7144 = vst [vmem:[#allocation3 + $0x1d] sm:$0x1] %v7112_v14  ;;  %7210 = vmatmul.f32.vlgmr.msrb.gmra.mxu2 %v12502_v39 }
0x129a   : > { %v9742_v27 = vpop.eup %9741  ;;  %v7096_v3 = vrot.slane %v9740_v0, 5  ;;  %v7119_v61 = vrot.slane %v7112_v14, 4  ;;  %v7120_v44 = vrot.slane %v7112_v14, 5  ;;  %v7121_v43 = vrot.slane %v7112_v14, 6 }
0x129b   : > { %v9744_v12 = vpop.eup %9743  ;;  %v7097_v59 = vrot.slane %v9742_v27, 4  ;;  %7145 = vst [vmem:[#allocation3 + $0x3d] sm:$0x1] %v7116_v23  ;;  %v7122_v33 = vrot.slane %v7112_v14, 7  ;;  %v7182_v45 = vunpack.c.l.bf16 %v7166_v41  ;;  %v7183_v37 = vunpack.c.l.bf16 %v7167_v40  ;;  %v7168_v14 = vld [vmem:[%s10437_s0 + $0x6c] sm:$0x8] }
0x129c   : > { %v9746_v26 = vpop.eup %9745  ;;  %v7099_v28 = vrot.slane %v9744_v12, 3  ;;  %7146 = vst [vmem:[#allocation3 + $0x5d] sm:$0x1] %v7117_v10  ;;  %v7185_v18 = vunpack.c.l.bf16 %v7169_v63  ;;  %v7184_v10 = vunpack.c.l.bf16 %v7168_v14  ;;  %v7171_v12 = vld [vmem:[%s10437_s0 + $0x9c] sm:$0x8] }
0x129d   : > { %v9748_v6 = vpop.eup %9747  ;;  %v7098_v53 = vsel %vm609_vm2, %v7097_v59, %v7096_v3  ;;  %v7101_v47 = vrot.slane %v9746_v26, 2  ;;  %7147 = vst [vmem:[#allocation3 + $0x7d] sm:$0x1] %v7118_v52  ;;  %v7170_v52 = vld [vmem:[%s10437_s0 + $0x8c] sm:$0x8] }
0x129e   : > { %v9750_v17 = vpop.eup %9749  ;;  %v7100_v32 = vsel %vm612_vm3, %v7099_v28, %v7098_v53  ;;  %v7103_v38 = vrot.slane %v9748_v6, 1  ;;  %7148 = vst [vmem:[#allocation3 + $0x9d] sm:$0x1] %v7119_v61  ;;  %v7172_v59 = vld [vmem:[%s10437_s0 + $0xac] sm:$0x8]  ;;  %v7186_v28 = vunpack.c.l.bf16 %v7170_v52  ;;  %v7187_v6 = vunpack.c.l.bf16 %v7171_v12 }
0x129f   : > { %v9752_v5 = vpop.eup %9751  ;;  %v7102_v7 = vsel %vm615_vm4, %v7101_v47, %v7100_v32  ;;  %7149 = vst [vmem:[#allocation3 + $0xbd] sm:$0x1] %v7120_v44  ;;  %v7106_v50 = vrot.slane %v9750_v17, 7  ;;  %v7173_v26 = vld [vmem:[%s10437_s0 + $0xbc] sm:$0x8] }
0x12a0   : > { %v7104_v21 = vsel %vm618_vm5, %v7103_v38, %v7102_v7  ;;  %7150 = vst [vmem:[#allocation3 + $0xdd] sm:$0x1] %v7121_v43  ;;  %v7108_v8 = vrot.slane %v9752_v5, 6  ;;  %v7174_v44 = vld [vmem:[%s10437_s0 + $0xcc] sm:$0x8]  ;;  %v7188_v43 = vunpack.c.l.bf16 %v7172_v59 }
0x12a1   : > { %v7105_v29 = vsel %vm621_vm6, %v9738_v54, %v7104_v21  ;;  %7151 = vst [vmem:[#allocation3 + $0xfd] sm:$0x1] %v7122_v33  ;;  %v7175_v53 = vld [vmem:[%s10437_s0 + $0xdc] sm:$0x8]  ;;  %v7189_v33 = vunpack.c.l.bf16 %v7173_v26  ;;  %v7190_v5 = vunpack.c.l.bf16 %v7174_v44 }
0x12a2   : > { %v7107_v31 = vsel %vm624_vm7, %v7106_v50, %v7105_v29  ;;  %v7177_v38 = vld [vmem:[%s10437_s0 + $0xfc] sm:$0x8] }
0x12a3   : > { %v7109_v30 = vsel %vm627_vm8, %v7108_v8, %v7107_v31 }
0x12a4   : > { %v7113_v36 = vsel %vm7065_vm14, %v7109_v30, 0.0  ;;  %v12513_v13 = vsel %vm7065_vm14, %v7109_v30, %v12475_v24 }
0x12a5   : > { %v7123_v58 = vrot.slane %v7113_v36, 1  ;;  %v7124_v4 = vrot.slane %v7113_v36, 2  ;;  %v7125_v49 = vrot.slane %v7113_v36, 3  ;;  %7152 = vst [vmem:[#allocation3 + $0x11d] sm:$0x1] %v7113_v36  ;;  %7213 = vmatmul.f32.gmra.mxu2 %v12513_v13  ;;  %v7126_v51 = vrot.slane %v7113_v36, 4 }
0x12a6   : > { %v7127_v11 = vrot.slane %v7113_v36, 5  ;;  %v7128_v22 = vrot.slane %v7113_v36, 6  ;;  %v7129_v24 = vrot.slane %v7113_v36, 7 }
0x12a7   : > { %7153 = vst [vmem:[#allocation3 + $0x13d] sm:$0x1] %v7123_v58  ;;  %v7191_v58 = vunpack.c.l.bf16 %v7175_v53 }
0x12a8   : > { %7154 = vst [vmem:[#allocation3 + $0x15d] sm:$0x1] %v7124_v4 }
0x12a9   : > { %7155 = vst [vmem:[#allocation3 + $0x17d] sm:$0x1] %v7125_v49 }
0x12aa   : > { %7156 = vst [vmem:[#allocation3 + $0x19d] sm:$0x1] %v7126_v51 }
0x12ab   : > { %7157 = vst [vmem:[#allocation3 + $0x1bd] sm:$0x1] %v7127_v11 }
0x12ac   : > { %7158 = vst [vmem:[#allocation3 + $0x1dd] sm:$0x1] %v7128_v22  ;;  %v7193_v22 = vunpack.c.l.bf16 %v7177_v38 }
0x12ad   : > { %7159 = vst [vmem:[#allocation3 + $0x1fd] sm:$0x1] %v7129_v24 }
0x131c   : > { %v7211_v42 = vpop.f32.mrf.mxu2 }
0x131d   : > { %v7219_v16 = vrot.slane %v7211_v42, 2  ;;  %v7220_v19 = vrot.slane %v7211_v42, 3  ;;  %v7221_v48 = vrot.slane %v7211_v42, 4  ;;  %v7222_v35 = vrot.slane %v7211_v42, 5 }
0x131e   : > { %v7223_v25 = vrot.slane %v7211_v42, 6  ;;  %v7224_v15 = vrot.slane %v7211_v42, 7  ;;  %v7225_v0 = vrot.slane %v7211_v42, 1  ;;  %v7255_v17 = vadd.f32 %v7211_v42, %v7184_v10 }
0x131f   : > { %v7249_v9 = vadd.f32 %v7219_v16, %v7178_v2  ;;  %v7250_v54 = vadd.f32 %v7220_v19, %v7179_v20  ;;  %v7251_v46 = vadd.f32 %v7221_v48, %v7180_v60  ;;  %v7252_v27 = vadd.f32 %v7222_v35, %v7181_v56 }
0x1320   : > { %v7253_v3 = vadd.f32 %v7223_v25, %v7182_v45  ;;  %v7254_v23 = vadd.f32 %v7224_v15, %v7183_v37  ;;  %v7256_v61 = vadd.f32 %v7225_v0, %v7185_v18  ;;  %v7192_v56 = vunpack.c.l.bf16 %v7176_v62  ;;  %v7283_v25 = vpop.permute.xlu1 %7282 }
0x1321   : > { %9753 = vtanh.f32 %v7249_v9  ;;  %vm7287_vm15 = vcmp.eq.s32.totalorder %v7283_v25, 1 }
0x1322   : > { %9755 = vtanh.f32 %v7250_v54 }
0x1323   : > { %9757 = vtanh.f32 %v7251_v46 }
0x1324   : > { %9759 = vtanh.f32 %v7252_v27 }
0x1325   : > { %9761 = vtanh.f32 %v7253_v3 }
0x1326   : > { %9763 = vtanh.f32 %v7254_v23 }
0x1327   : > { %v9754_v47 = vpop.eup %9753  ;;  %9765 = vtanh.f32 %v7256_v61 }
0x1328   : > { %v7214_v32 = vpop.f32.mrf.mxu2  ;;  %v9756_v7 = vpop.eup %9755  ;;  %v7305_v36 = vrot.slane %v9754_v47, 6  ;;  %9767 = vtanh.f32 %v7255_v17 }
0x1329   : > { %v7226_v55 = vrot.slane %v7214_v32, 2  ;;  %v7227_v21 = vrot.slane %v7214_v32, 3  ;;  %v7228_v50 = vrot.slane %v7214_v32, 4  ;;  %v7229_v29 = vrot.slane %v7214_v32, 5  ;;  %v9758_v8 = vpop.eup %9757 }
0x132a   : > { %v7230_v31 = vrot.slane %v7214_v32, 6  ;;  %v7231_v30 = vrot.slane %v7214_v32, 7  ;;  %v9760_v4 = vpop.eup %9759  ;;  %v7306_v34 = vrot.slane %v9756_v7, 5  ;;  %v7308_v1 = vrot.slane %v9758_v8, 4 }
0x132b   : > { %v7257_v49 = vadd.f32 %v7226_v55, %v7186_v28  ;;  %v7258_v51 = vadd.f32 %v7227_v21, %v7187_v6  ;;  %v7259_v11 = vadd.f32 %v7228_v50, %v7188_v43  ;;  %v9762_v24 = vpop.eup %9761  ;;  %v7260_v57 = vadd.f32 %v7229_v29, %v7189_v33  ;;  %v7286_v50 = vpop.permute.xlu2 %7285 }
0x132c   : > { %v9764_v41 = vpop.eup %9763  ;;  %v7232_v2 = vrot.slane %v7214_v32, 1  ;;  %v7261_v20 = vadd.f32 %v7230_v31, %v7190_v5  ;;  %v7307_v40 = vsel %vm609_vm2, %v7306_v34, %v7305_v36  ;;  %v7310_v63 = vrot.slane %v9760_v4, 3  ;;  %v7385_v34 = vld [vmem:[%s10437_s0 + $0xc] sm:$0x8] }
0x132d   : > { %9769 = vtanh.f32 %v7257_v49  ;;  %v9766_v60 = vpop.eup %9765  ;;  %v7262_v42 = vadd.f32 %v7231_v30, %v7191_v58  ;;  %v7309_v45 = vsel %vm612_vm3, %v7308_v1, %v7307_v40  ;;  %v7312_v16 = vrot.slane %v9762_v24, 2  ;;  %v7386_v1 = vld [vmem:[%s10437_s0 + $0x1c] sm:$0x8]  ;;  %v7391_v40 = vld [vmem:[%s10437_s0 + $0x6c] sm:$0x8] }
0x132e   : > { %9771 = vtanh.f32 %v7258_v51  ;;  %v7311_v19 = vsel %vm615_vm4, %v7310_v63, %v7309_v45  ;;  %v7314_v48 = vrot.slane %v9764_v41, 1  ;;  %v7264_v35 = vadd.f32 %v7232_v2, %v7193_v22  ;;  %v9768_v18 = vpop.eup %9767  ;;  %v7387_v41 = vld [vmem:[%s10437_s0 + $0x2c] sm:$0x8]  ;;  %v7388_v2 = vld [vmem:[%s10437_s0 + $0x3c] sm:$0x8] }
0x132f   : > { %9773 = vtanh.f32 %v7259_v11  ;;  %v7313_v37 = vsel %vm618_vm5, %v7312_v16, %v7311_v19  ;;  %v7317_v9 = vrot.slane %v9766_v60, 7  ;;  %v7263_v46 = vadd.f32 %v7214_v32, %v7192_v56  ;;  %v7390_v60 = vld [vmem:[%s10437_s0 + $0x5c] sm:$0x8] }
0x1330   : > { %9775 = vtanh.f32 %v7260_v57  ;;  %v7315_v15 = vsel %vm621_vm6, %v7314_v48, %v7313_v37  ;;  %vm7288_vm0 = vcmp.eq.s32.totalorder %v7286_v50, 1  ;;  %v7401_v63 = vunpack.c.l.bf16 %v7385_v34 }
0x1331   : > { %9777 = vtanh.f32 %v7261_v20  ;;  %v7316_v0 = vsel %vm624_vm7, %v9768_v18, %v7315_v15  ;;  %v7389_v20 = vld [vmem:[%s10437_s0 + $0x4c] sm:$0x8]  ;;  %v7403_v56 = vunpack.c.l.bf16 %v7387_v41  ;;  %v7404_v45 = vunpack.c.l.bf16 %v7388_v2 }
0x1332   : > { %9779 = vtanh.f32 %v7262_v42  ;;  %v7318_v3 = vsel %vm627_vm8, %v7317_v9, %v7316_v0  ;;  %v7402_v42 = vunpack.c.l.bf16 %v7386_v1  ;;  %v7405_v16 = vunpack.c.l.bf16 %v7389_v20 }
0x1333   : > { %v9770_v54 = vpop.eup %9769  ;;  %9781 = vtanh.f32 %v7264_v35  ;;  %v7335_v52 = vsel %vm7287_vm15, %v7318_v3, 0.0  ;;  %v12540_v12 = vsel %vm7287_vm15, %v7318_v3, %v12502_v39  ;;  %v7406_v18 = vunpack.c.l.bf16 %v7390_v60 }
0x1334   : > { %v9772_v14 = vpop.eup %9771  ;;  %v7319_v27 = vrot.slane %v9770_v54, 6  ;;  %v7339_v61 = vrot.slane %v7335_v52, 1  ;;  %v7340_v26 = vrot.slane %v7335_v52, 2  ;;  %v7341_v44 = vrot.slane %v7335_v52, 3  ;;  %7367 = vst [vmem:[#allocation3 + $0x1e] sm:$0x1] %v7335_v52  ;;  %7433 = vmatmul.f32.vlgmr.msrb.gmra.mxu3 %v12540_v12 }
0x1335   : > { %v9774_v23 = vpop.eup %9773  ;;  %v7320_v10 = vrot.slane %v9772_v14, 5  ;;  %9783 = vtanh.f32 %v7263_v46  ;;  %v7342_v6 = vrot.slane %v7335_v52, 4  ;;  %v7343_v47 = vrot.slane %v7335_v52, 5  ;;  %v7392_v46 = vld [vmem:[%s10437_s0 + $0x7c] sm:$0x8] }
0x1336   : > { %v9776_v59 = vpop.eup %9775  ;;  %7368 = vst [vmem:[#allocation3 + $0x3e] sm:$0x1] %v7339_v61  ;;  %v7322_v17 = vrot.slane %v9774_v23, 4  ;;  %v7344_v33 = vrot.slane %v7335_v52, 6  ;;  %v7345_v38 = vrot.slane %v7335_v52, 7  ;;  %v7407_v15 = vunpack.c.l.bf16 %v7391_v40 }
0x1337   : > { %v9778_v28 = vpop.eup %9777  ;;  %v7321_v43 = vsel %vm609_vm2, %v7320_v10, %v7319_v27  ;;  %7369 = vst [vmem:[#allocation3 + $0x5e] sm:$0x1] %v7340_v26  ;;  %v7324_v39 = vrot.slane %v9776_v59, 3  ;;  %v7408_v52 = vunpack.c.l.bf16 %v7392_v46  ;;  %v7393_v26 = vld [vmem:[%s10437_s0 + $0x8c] sm:$0x8] }
0x1338   : > { %v9780_v53 = vpop.eup %9779  ;;  %7370 = vst [vmem:[#allocation3 + $0x7e] sm:$0x1] %v7341_v44  ;;  %v7323_v5 = vsel %vm612_vm3, %v7322_v17, %v7321_v43  ;;  %v7326_v7 = vrot.slane %v9778_v28, 2  ;;  %v7394_v44 = vld [vmem:[%s10437_s0 + $0x9c] sm:$0x8]  ;;  %v7409_v17 = vunpack.c.l.bf16 %v7393_v26 }
0x1339   : > { %v9782_v32 = vpop.eup %9781  ;;  %7371 = vst [vmem:[#allocation3 + $0x9e] sm:$0x1] %v7342_v6  ;;  %v7325_v55 = vsel %vm615_vm4, %v7324_v39, %v7323_v5  ;;  %v7328_v21 = vrot.slane %v9780_v53, 1  ;;  %v7395_v28 = vld [vmem:[%s10437_s0 + $0xac] sm:$0x8]  ;;  %v7410_v39 = vunpack.c.l.bf16 %v7394_v44 }
0x133a   : > { %7372 = vst [vmem:[#allocation3 + $0xbe] sm:$0x1] %v7343_v47  ;;  %v7327_v29 = vsel %vm618_vm5, %v7326_v7, %v7325_v55  ;;  %v7331_v30 = vrot.slane %v9782_v32, 7  ;;  %v7396_v6 = vld [vmem:[%s10437_s0 + $0xbc] sm:$0x8]  ;;  %v7411_v32 = vunpack.c.l.bf16 %v7395_v28 }
0x133b   : > { %v9784_v8 = vpop.eup %9783  ;;  %7373 = vst [vmem:[#allocation3 + $0xde] sm:$0x1] %v7344_v33  ;;  %v7329_v31 = vsel %vm621_vm6, %v7328_v21, %v7327_v29  ;;  %v7397_v53 = vld [vmem:[%s10437_s0 + $0xcc] sm:$0x8]  ;;  %v7398_v47 = vld [vmem:[%s10437_s0 + $0xdc] sm:$0x8] }
0x133c   : > { %7374 = vst [vmem:[#allocation3 + $0xfe] sm:$0x1] %v7345_v38  ;;  %v7330_v36 = vsel %vm624_vm7, %v9784_v8, %v7329_v31  ;;  %v7412_v38 = vunpack.c.l.bf16 %v7396_v6  ;;  %v7399_v21 = vld [vmem:[%s10437_s0 + $0xec] sm:$0x8] }
0x133d   : > { %v7332_v58 = vsel %vm627_vm8, %v7331_v30, %v7330_v36  ;;  %v7413_v36 = vunpack.c.l.bf16 %v7397_v53  ;;  %v7415_v34 = vunpack.c.l.bf16 %v7399_v21 }
0x133e   : > { %v7336_v4 = vsel %vm7288_vm0, %v7332_v58, 0.0  ;;  %v12551_v49 = vsel %vm7288_vm0, %v7332_v58, %v12513_v13  ;;  %v7414_v58 = vunpack.c.l.bf16 %v7398_v47 }
0x133f   : > { %v7346_v51 = vrot.slane %v7336_v4, 1  ;;  %v7347_v11 = vrot.slane %v7336_v4, 2  ;;  %v7348_v22 = vrot.slane %v7336_v4, 3  ;;  %7375 = vst [vmem:[#allocation3 + $0x11e] sm:$0x1] %v7336_v4  ;;  %7436 = vmatmul.f32.gmra.mxu3 %v12551_v49  ;;  %v7349_v24 = vrot.slane %v7336_v4, 4 }
0x1340   : > { %v7350_v62 = vrot.slane %v7336_v4, 5  ;;  %v7351_v57 = vrot.slane %v7336_v4, 6  ;;  %v7352_v13 = vrot.slane %v7336_v4, 7 }
0x1341   : > { %7376 = vst [vmem:[#allocation3 + $0x13e] sm:$0x1] %v7346_v51 }
0x1342   : > { %7377 = vst [vmem:[#allocation3 + $0x15e] sm:$0x1] %v7347_v11 }
0x1343   : > { %7378 = vst [vmem:[#allocation3 + $0x17e] sm:$0x1] %v7348_v22 }
0x1344   : > { %7379 = vst [vmem:[#allocation3 + $0x19e] sm:$0x1] %v7349_v24 }
0x1345   : > { %7380 = vst [vmem:[#allocation3 + $0x1be] sm:$0x1] %v7350_v62 }
0x1346   : > { %7381 = vst [vmem:[#allocation3 + $0x1de] sm:$0x1] %v7351_v57 }
0x1347   : > { %7382 = vst [vmem:[#allocation3 + $0x1fe] sm:$0x1] %v7352_v13 }
0x13b7   : > { %v7434_v19 = vpop.f32.mrf.mxu3 }
0x13b8   : > { %v7442_v48 = vrot.slane %v7434_v19, 1  ;;  %v7443_v35 = vrot.slane %v7434_v19, 2  ;;  %v7444_v25 = vrot.slane %v7434_v19, 3  ;;  %v7445_v37 = vrot.slane %v7434_v19, 4 }
0x13b9   : > { %v7446_v9 = vrot.slane %v7434_v19, 5  ;;  %v7447_v54 = vrot.slane %v7434_v19, 6  ;;  %v7448_v0 = vrot.slane %v7434_v19, 7  ;;  %v7479_v43 = vadd.f32 %v7434_v19, %v7408_v52 }
0x13ba   : > { %v7472_v14 = vadd.f32 %v7442_v48, %v7401_v63  ;;  %v7473_v27 = vadd.f32 %v7443_v35, %v7402_v42  ;;  %v7474_v3 = vadd.f32 %v7444_v25, %v7403_v56  ;;  %v7475_v23 = vadd.f32 %v7445_v37, %v7404_v45  ;;  %v7400_v45 = vld [vmem:[%s10437_s0 + $0xfc] sm:$0x8]  ;;  %v7506_v48 = vpop.permute.xlu1 %7505 }
0x13bb   : > { %v7476_v10 = vadd.f32 %v7446_v9, %v7405_v16  ;;  %v7477_v59 = vadd.f32 %v7447_v54, %v7406_v18  ;;  %v7478_v61 = vadd.f32 %v7448_v0, %v7407_v15  ;;  %v7416_v54 = vunpack.c.l.bf16 %v7400_v45 }
0x13bc   : > { %9785 = vtanh.f32 %v7472_v14  ;;  %vm7510_vm1 = vcmp.eq.s32.totalorder %v7506_v48, 1 }
0x13bd   : > { %9787 = vtanh.f32 %v7473_v27 }
0x13be   : > { %9789 = vtanh.f32 %v7474_v3 }
0x13bf   : > { %9791 = vtanh.f32 %v7475_v23 }
0x13c0   : > { %9793 = vtanh.f32 %v7476_v10 }
0x13c1   : > { %9795 = vtanh.f32 %v7477_v59 }
0x13c2   : > { %v9786_v33 = vpop.eup %9785  ;;  %9797 = vtanh.f32 %v7478_v61  ;;  %v7437_v5 = vpop.f32.mrf.mxu3 }
0x13c3   : > { %v9788_v7 = vpop.eup %9787  ;;  %v7528_v55 = vrot.slane %v9786_v33, 7  ;;  %v7449_v50 = vrot.slane %v7437_v5, 1  ;;  %v7450_v29 = vrot.slane %v7437_v5, 2  ;;  %v7451_v8 = vrot.slane %v7437_v5, 3 }
0x13c4   : > { %v9790_v31 = vpop.eup %9789  ;;  %v7529_v30 = vrot.slane %v9788_v7, 6  ;;  %v7452_v4 = vrot.slane %v7437_v5, 4  ;;  %9799 = vtanh.f32 %v7479_v43  ;;  %v7453_v22 = vrot.slane %v7437_v5, 5 }
0x13c5   : > { %v9792_v51 = vpop.eup %9791  ;;  %v7531_v11 = vrot.slane %v9790_v31, 5  ;;  %v7480_v24 = vadd.f32 %v7449_v50, %v7409_v17  ;;  %v7481_v1 = vadd.f32 %v7450_v29, %v7410_v39  ;;  %v7454_v60 = vrot.slane %v7437_v5, 6  ;;  %v7509_v31 = vpop.permute.xlu2 %7508 }
0x13c6   : > { %v9794_v62 = vpop.eup %9793  ;;  %v7530_v57 = vsel %vm609_vm2, %v7529_v30, %v7528_v55  ;;  %v7533_v13 = vrot.slane %v9792_v51, 4  ;;  %v7482_v40 = vadd.f32 %v7451_v8, %v7411_v32  ;;  %v7455_v16 = vrot.slane %v7437_v5, 7 }
0x13c7   : > { %v9796_v41 = vpop.eup %9795  ;;  %v7532_v2 = vsel %vm612_vm3, %v7531_v11, %v7530_v57  ;;  %v7535_v20 = vrot.slane %v9794_v62, 3  ;;  %v7483_v19 = vadd.f32 %v7452_v4, %v7412_v38  ;;  %v7484_v37 = vadd.f32 %v7453_v22, %v7413_v36 }
0x13c8   : > { %v9798_v63 = vpop.eup %9797  ;;  %v7534_v42 = vsel %vm615_vm4, %v7533_v13, %v7532_v2  ;;  %v7537_v56 = vrot.slane %v9796_v41, 2  ;;  %9801 = vtanh.f32 %v7480_v24  ;;  %v7485_v46 = vadd.f32 %v7454_v60, %v7414_v58 }
0x13c9   : > { %v7536_v35 = vsel %vm618_vm5, %v7535_v20, %v7534_v42  ;;  %v7539_v25 = vrot.slane %v9798_v63, 1  ;;  %9803 = vtanh.f32 %v7481_v1  ;;  %v7486_v14 = vadd.f32 %v7455_v16, %v7415_v34 }
0x13ca   : > { %v7538_v18 = vsel %vm621_vm6, %v7537_v56, %v7536_v35  ;;  %v9800_v15 = vpop.eup %9799  ;;  %9805 = vtanh.f32 %v7482_v40  ;;  %v7487_v26 = vadd.f32 %v7437_v5, %v7416_v54 }
0x13cb   : > { %v7540_v9 = vsel %vm624_vm7, %v7539_v25, %v7538_v18  ;;  %9807 = vtanh.f32 %v7483_v19 }
0x13cc   : > { %v7541_v0 = vsel %vm627_vm8, %v9800_v15, %v7540_v9  ;;  %9809 = vtanh.f32 %v7484_v37 }
0x13cd   : > { %v7558_v27 = vsel %vm7510_vm1, %v7541_v0, 0.0  ;;  %v7606_v3 = vsel %vm7510_vm1, %v7541_v0, %v12540_v12  ;;  %9811 = vtanh.f32 %v7485_v46 }
0x13ce   : > { %v7562_v23 = vrot.slane %v7558_v27, 1  ;;  %v7563_v10 = vrot.slane %v7558_v27, 2  ;;  %v7564_v52 = vrot.slane %v7558_v27, 3  ;;  %7590 = vst [vmem:[#allocation3 + $0x1f] sm:$0x1] %v7558_v27  ;;  %v9802_v59 = vpop.eup %9801  ;;  %v7565_v61 = vrot.slane %v7558_v27, 4 }
0x13cf   : > { %7608 = vst [vmem:[#allocation2] sm:$0xff] %v7606_v3  ;;  %v9804_v44 = vpop.eup %9803  ;;  %v7566_v28 = vrot.slane %v7558_v27, 5  ;;  %9813 = vtanh.f32 %v7486_v14  ;;  %v7542_v6 = vrot.slane %v9802_v59, 7  ;;  %v7567_v53 = vrot.slane %v7558_v27, 6 }
0x13d0   : > { %7591 = vst [vmem:[#allocation3 + $0x3f] sm:$0x1] %v7562_v23  ;;  %v9806_v43 = vpop.eup %9805  ;;  %v7543_v47 = vrot.slane %v9804_v44, 6  ;;  %v7568_v17 = vrot.slane %v7558_v27, 7  ;;  %9815 = vtanh.f32 %v7487_v26 }
0x13d1   : > { %7592 = vst [vmem:[#allocation3 + $0x5f] sm:$0x1] %v7563_v10  ;;  %v9808_v12 = vpop.eup %9807  ;;  %v7545_v33 = vrot.slane %v9806_v43, 5 }
0x13d2   : > { %7593 = vst [vmem:[#allocation3 + $0x7f] sm:$0x1] %v7564_v52  ;;  %v9810_v39 = vpop.eup %9809  ;;  %v7544_v32 = vsel %vm609_vm2, %v7543_v47, %v7542_v6  ;;  %v7547_v38 = vrot.slane %v9808_v12, 4  ;;  %vm7511_vm2 = vcmp.eq.s32.totalorder %v7509_v31, 1 }
0x13d3   : > { %7594 = vst [vmem:[#allocation3 + $0x9f] sm:$0x1] %v7565_v61  ;;  %v7546_v5 = vsel %vm612_vm3, %v7545_v33, %v7544_v32  ;;  %v7549_v7 = vrot.slane %v9810_v39, 3  ;;  %v9812_v55 = vpop.eup %9811 }
0x13d4   : > { %7595 = vst [vmem:[#allocation3 + $0xbf] sm:$0x1] %v7566_v28  ;;  %v7548_v21 = vsel %vm615_vm4, %v7547_v38, %v7546_v5  ;;  %v7551_v8 = vrot.slane %v9812_v55, 2 }
0x13d5   : > { %7596 = vst [vmem:[#allocation3 + $0xdf] sm:$0x1] %v7567_v53  ;;  %v9814_v50 = vpop.eup %9813  ;;  %v7550_v29 = vsel %vm618_vm5, %v7549_v7, %v7548_v21 }
0x13d6   : > { %7597 = vst [vmem:[#allocation3 + $0xff] sm:$0x1] %v7568_v17  ;;  %v7553_v30 = vrot.slane %v9814_v50, 1  ;;  %v7552_v36 = vsel %vm621_vm6, %v7551_v8, %v7550_v29  ;;  %v9816_v58 = vpop.eup %9815 }
0x13d8   : > { %v7554_v4 = vsel %vm624_vm7, %v7553_v30, %v7552_v36 }
0x13d9   : > { %v7555_v51 = vsel %vm627_vm8, %v9816_v58, %v7554_v4 }
0x13da   : > { %v7559_v11 = vsel %vm7511_vm2, %v7555_v51, 0.0  ;;  %v7607_v22 = vsel %vm7511_vm2, %v7555_v51, %v12551_v49 }
0x13db   : > { %v7569_v24 = vrot.slane %v7559_v11, 1  ;;  %v7570_v62 = vrot.slane %v7559_v11, 2  ;;  %v7571_v57 = vrot.slane %v7559_v11, 3  ;;  %7598 = vst [vmem:[#allocation3 + $0x11f] sm:$0x1] %v7559_v11  ;;  %v7572_v13 = vrot.slane %v7559_v11, 4 }
0x13dc   : > { %7609 = vst [vmem:[#allocation2 + $0x8] sm:$0xff] %v7607_v22  ;;  %v7573_v34 = vrot.slane %v7559_v11, 5  ;;  %v7574_v1 = vrot.slane %v7559_v11, 6  ;;  %v7575_v41 = vrot.slane %v7559_v11, 7 }
0x13dd   : > { %7599 = vst [vmem:[#allocation3 + $0x13f] sm:$0x1] %v7569_v24 }
0x13de   : > { %7600 = vst [vmem:[#allocation3 + $0x15f] sm:$0x1] %v7570_v62 }
0x13df   : > { %7601 = vst [vmem:[#allocation3 + $0x17f] sm:$0x1] %v7571_v57 }
0x13e0   : > { %7602 = vst [vmem:[#allocation3 + $0x19f] sm:$0x1] %v7572_v13 }
0x13e1   : > { %7603 = vst [vmem:[#allocation3 + $0x1bf] sm:$0x1] %v7573_v34 }
0x13e2   : > { %7604 = vst [vmem:[#allocation3 + $0x1df] sm:$0x1] %v7574_v1 }
0x13e3   : > { %7605 = vst [vmem:[#allocation3 + $0x1ff] sm:$0x1] %v7575_v41 }
0x13e4 PF: > { %v7704_v49 = vld [vmem:[%s10448_s8 + $0xf0] sm:$0xff]  ;;  %v7705_v2 = vld [vmem:[%s10448_s8 + $0xf8] sm:$0xff]  ;;  %v7702_v20 = vld [vmem:[%s10448_s8 + $0xe0] sm:$0xff]  ;;  %s8259_s1 = scalar_lea.sflag [#allocation6], %s403_s7 }
0x13e5   : > { %8497 = vmatpush.msra.mxu2 %v7704_v49  ;;  %8513 = vmatpush.msra.mxu3 %v7705_v2  ;;  %v7703_v60 = vld [vmem:[%s10448_s8 + $0xe8] sm:$0xff]  ;;  %v7700_v40 = vld [vmem:[%s10448_s8 + $0xd0] sm:$0xff]  ;;  %v7701_v63 = vld [vmem:[%s10448_s8 + $0xd8] sm:$0xff] }
0x13e6   : > { %7712 = vmatpush.msra.mxu0 %v7704_v49  ;;  %7921 = vmatpush.msra.mxu1 %v7705_v2  ;;  %v7698_v42 = vld [vmem:[%s10448_s8 + $0xc0] sm:$0xff]  ;;  %v7699_v56 = vld [vmem:[%s10448_s8 + $0xc8] sm:$0xff]  ;;  %v7696_v45 = vld [vmem:[%s10448_s8 + $0xb0] sm:$0xff] }
0x13e7   : > { %8498 = vmatpush.msra.mxu2 %v7702_v20  ;;  %8514 = vmatpush.msra.mxu3 %v7703_v60  ;;  %v7697_v16 = vld [vmem:[%s10448_s8 + $0xb8] sm:$0xff]  ;;  %v7694_v19 = vld [vmem:[%s10448_s8 + $0xa0] sm:$0xff]  ;;  %v7695_v48 = vld [vmem:[%s10448_s8 + $0xa8] sm:$0xff] }
0x13e8   : > { %7713 = vmatpush.msra.mxu0 %v7702_v20  ;;  %7922 = vmatpush.msra.mxu1 %v7703_v60  ;;  %v7692_v35 = vld [vmem:[%s10448_s8 + $0x90] sm:$0xff]  ;;  %v7693_v25 = vld [vmem:[%s10448_s8 + $0x98] sm:$0xff]  ;;  %v7690_v37 = vld [vmem:[%s10448_s8 + $0x80] sm:$0xff] }
0x13e9   : > { %8499 = vmatpush.msra.mxu2 %v7700_v40  ;;  %8515 = vmatpush.msra.mxu3 %v7701_v63  ;;  %v7691_v18 = vld [vmem:[%s10448_s8 + $0x88] sm:$0xff]  ;;  %v7688_v15 = vld [vmem:[%s10448_s8 + $0x70] sm:$0xff]  ;;  %v7689_v9 = vld [vmem:[%s10448_s8 + $0x78] sm:$0xff] }
0x13ea   : > { %7714 = vmatpush.msra.mxu0 %v7700_v40  ;;  %7923 = vmatpush.msra.mxu1 %v7701_v63  ;;  %v7686_v54 = vld [vmem:[%s10448_s8 + $0x60] sm:$0xff]  ;;  %v7687_v46 = vld [vmem:[%s10448_s8 + $0x68] sm:$0xff]  ;;  %v7684_v0 = vld [vmem:[%s10448_s8 + $0x50] sm:$0xff] }
0x13eb   : > { %8500 = vmatpush.msra.mxu2 %v7698_v42  ;;  %8516 = vmatpush.msra.mxu3 %v7699_v56  ;;  %v7685_v14 = vld [vmem:[%s10448_s8 + $0x58] sm:$0xff]  ;;  %v7682_v27 = vld [vmem:[%s10448_s8 + $0x40] sm:$0xff]  ;;  %v7683_v3 = vld [vmem:[%s10448_s8 + $0x48] sm:$0xff] }
0x13ec   : > { %7715 = vmatpush.msra.mxu0 %v7698_v42  ;;  %7924 = vmatpush.msra.mxu1 %v7699_v56  ;;  %v7680_v23 = vld [vmem:[%s10448_s8 + $0x30] sm:$0xff]  ;;  %v7681_v10 = vld [vmem:[%s10448_s8 + $0x38] sm:$0xff]  ;;  %v7678_v52 = vld [vmem:[%s10448_s8 + $0x20] sm:$0xff] }
0x13ed   : > { %8501 = vmatpush.msra.mxu2 %v7696_v45  ;;  %8517 = vmatpush.msra.mxu3 %v7697_v16  ;;  %v7679_v59 = vld [vmem:[%s10448_s8 + $0x28] sm:$0xff]  ;;  %v7676_v61 = vld [vmem:[%s10448_s8 + $0x10] sm:$0xff]  ;;  %v7677_v26 = vld [vmem:[%s10448_s8 + $0x18] sm:$0xff] }
0x13ee   : > { %7716 = vmatpush.msra.mxu0 %v7696_v45  ;;  %7925 = vmatpush.msra.mxu1 %v7697_v16  ;;  %v7674_v44 = vld [vmem:[%s10448_s8] sm:$0xff]  ;;  %v7675_v28 = vld [vmem:[%s10448_s8 + $0x8] sm:$0xff]  ;;  %v7644_v12 = vld [vmem:[#allocation3 + $0x110] sm:$0xff] }
0x13ef   : > { %8502 = vmatpush.msra.mxu2 %v7694_v19  ;;  %8518 = vmatpush.msra.mxu3 %v7695_v48  ;;  %v7642_v6 = vld [vmem:[#allocation3 + $0x100] sm:$0xff]  ;;  %v7643_v53 = vld [vmem:[#allocation3 + $0x108] sm:$0xff]  ;;  %v7612_v17 = vld [vmem:[#allocation3 + $0x10] sm:$0xff] }
0x13f0   : > { %7717 = vmatpush.msra.mxu0 %v7694_v19  ;;  %7926 = vmatpush.msra.mxu1 %v7695_v48  ;;  %v7610_v43 = vld [vmem:[#allocation3] sm:$0xff]  ;;  %v7611_v47 = vld [vmem:[#allocation3 + $0x8] sm:$0xff]  ;;  %v7645_v33 = vld [vmem:[#allocation3 + $0x118] sm:$0xff] }
0x13f1   : > { %8503 = vmatpush.msra.mxu2 %v7692_v35  ;;  %8519 = vmatpush.msra.mxu3 %v7693_v25  ;;  %v7613_v39 = vld [vmem:[#allocation3 + $0x18] sm:$0xff]  ;;  %v7646_v32 = vld [vmem:[#allocation3 + $0x120] sm:$0xff]  ;;  %v7647_v5 = vld [vmem:[#allocation3 + $0x128] sm:$0xff] }
0x13f2   : > { %7718 = vmatpush.msra.mxu0 %v7692_v35  ;;  %7927 = vmatpush.msra.mxu1 %v7693_v25  ;;  %v7614_v38 = vld [vmem:[#allocation3 + $0x20] sm:$0xff]  ;;  %v7615_v7 = vld [vmem:[#allocation3 + $0x28] sm:$0xff]  ;;  %v7648_v55 = vld [vmem:[#allocation3 + $0x130] sm:$0xff] }
0x13f3   : > { %8504 = vmatpush.msra.mxu2 %v7690_v37  ;;  %8520 = vmatpush.msra.mxu3 %v7691_v18  ;;  %v7616_v21 = vld [vmem:[#allocation3 + $0x30] sm:$0xff]  ;;  %v7649_v50 = vld [vmem:[#allocation3 + $0x138] sm:$0xff]  ;;  %v7650_v8 = vld [vmem:[#allocation3 + $0x140] sm:$0xff] }
0x13f4   : > { %7719 = vmatpush.msra.mxu0 %v7690_v37  ;;  %7928 = vmatpush.msra.mxu1 %v7691_v18  ;;  %v7617_v29 = vld [vmem:[#allocation3 + $0x38] sm:$0xff]  ;;  %v7618_v31 = vld [vmem:[#allocation3 + $0x40] sm:$0xff]  ;;  %v7651_v30 = vld [vmem:[#allocation3 + $0x148] sm:$0xff] }
0x13f5   : > { %8505 = vmatpush.msra.mxu2 %v7688_v15  ;;  %8521 = vmatpush.msra.mxu3 %v7689_v9  ;;  %v7619_v36 = vld [vmem:[#allocation3 + $0x48] sm:$0xff]  ;;  %v7652_v58 = vld [vmem:[#allocation3 + $0x150] sm:$0xff]  ;;  %v7653_v51 = vld [vmem:[#allocation3 + $0x158] sm:$0xff] }
0x13f6   : > { %7720 = vmatpush.msra.mxu0 %v7688_v15  ;;  %7929 = vmatpush.msra.mxu1 %v7689_v9  ;;  %v7620_v4 = vld [vmem:[#allocation3 + $0x50] sm:$0xff]  ;;  %v7621_v11 = vld [vmem:[#allocation3 + $0x58] sm:$0xff]  ;;  %v7654_v22 = vld [vmem:[#allocation3 + $0x160] sm:$0xff] }
0x13f7   : > { %8506 = vmatpush.msra.mxu2 %v7686_v54  ;;  %8522 = vmatpush.msra.mxu3 %v7687_v46  ;;  %v7622_v24 = vld [vmem:[#allocation3 + $0x60] sm:$0xff]  ;;  %v7655_v62 = vld [vmem:[#allocation3 + $0x168] sm:$0xff]  ;;  %v7656_v13 = vld [vmem:[#allocation3 + $0x170] sm:$0xff] }
0x13f8   : > { %7721 = vmatpush.msra.mxu0 %v7686_v54  ;;  %7930 = vmatpush.msra.mxu1 %v7687_v46  ;;  %v7623_v57 = vld [vmem:[#allocation3 + $0x68] sm:$0xff]  ;;  %v7624_v34 = vld [vmem:[#allocation3 + $0x70] sm:$0xff]  ;;  %v7657_v1 = vld [vmem:[#allocation3 + $0x178] sm:$0xff] }
0x13f9   : > { %8507 = vmatpush.msra.mxu2 %v7684_v0  ;;  %8523 = vmatpush.msra.mxu3 %v7685_v14  ;;  %v7625_v41 = vld [vmem:[#allocation3 + $0x78] sm:$0xff]  ;;  %v7706_v49 = vld [vmem:[%s363_s2] sm:$0x3]  ;;  %v7659_v25 = vld [vmem:[#allocation3 + $0x188] sm:$0xff] }
0x13fa   : > { %7722 = vmatpush.msra.mxu0 %v7684_v0  ;;  %7931 = vmatpush.msra.mxu1 %v7685_v14  ;;  %v12620_v2 = vperm.slane %v7706_v49, 0  ;;  %v12622_v20 = vperm.slane %v7706_v49, 1  ;;  %v7658_v60 = vld [vmem:[#allocation3 + $0x180] sm:$0xff]  ;;  %v7627_v15 = vld [vmem:[#allocation3 + $0x88] sm:$0xff] }
0x13fb   : > { %8508 = vmatpush.msra.mxu2 %v7682_v27  ;;  %8524 = vmatpush.msra.mxu3 %v7683_v3  ;;  %v7626_v42 = vld [vmem:[#allocation3 + $0x80] sm:$0xff] }
0x13fc   : > { %7723 = vmatpush.msra.mxu0 %v7682_v27  ;;  %7932 = vmatpush.msra.mxu1 %v7683_v3  ;;  %v7660_v3 = vld [vmem:[#allocation3 + $0x190] sm:$0xff] }
0x13fd   : > { %8509 = vmatpush.msra.mxu2 %v7680_v23  ;;  %8525 = vmatpush.msra.mxu3 %v7681_v10 }
0x13fe   : > { %7724 = vmatpush.msra.mxu0 %v7680_v23  ;;  %7933 = vmatpush.msra.mxu1 %v7681_v10 }
0x13ff   : > { %8510 = vmatpush.msra.mxu2 %v7678_v52  ;;  %8526 = vmatpush.msra.mxu3 %v7679_v59 }
0x1400   : > { %7725 = vmatpush.msra.mxu0 %v7678_v52  ;;  %7934 = vmatpush.msra.mxu1 %v7679_v59  ;;  %v7628_v52 = vld [vmem:[#allocation3 + $0x90] sm:$0xff] }
0x1401   : > { %8511 = vmatpush.msra.mxu2 %v7676_v61  ;;  %8527 = vmatpush.msra.mxu3 %v7677_v26 }
0x1402   : > { %7726 = vmatpush.msra.mxu0 %v7676_v61  ;;  %7935 = vmatpush.msra.mxu1 %v7677_v26 }
0x1403   : > { %8512 = vmatpush.msra.mxu2 %v7674_v44  ;;  %8528 = vmatpush.msra.mxu3 %v7675_v28 }
0x1404   : > { %7824 = vmatmul.f32.vlgmr.msra.gmra.mxu2 %v7642_v6  ;;  %8033 = vmatmul.f32.vlgmr.msra.gmra.mxu3 %v7642_v6 }
0x1405   : > { %7727 = vmatpush.msra.mxu0 %v7674_v44  ;;  %7936 = vmatpush.msra.mxu1 %v7675_v28 }
0x1406   : > { %7728 = vmatmul.f32.vlgmr.msra.gmra.mxu0 %v7610_v43  ;;  %7937 = vmatmul.f32.vlgmr.msra.gmra.mxu1 %v7610_v43  ;;  %v7661_v43 = vld [vmem:[#allocation3 + $0x198] sm:$0xff] }
0x140c   : > { %7827 = vmatmul.f32.gmra.mxu2 %v7643_v53  ;;  %8036 = vmatmul.f32.gmra.mxu3 %v7643_v53 }
0x140e   : > { %7731 = vmatmul.f32.gmra.mxu0 %v7611_v47  ;;  %7940 = vmatmul.f32.gmra.mxu1 %v7611_v47 }
0x1414   : > { %7830 = vmatmul.f32.gmra.mxu2 %v7644_v12  ;;  %8039 = vmatmul.f32.gmra.mxu3 %v7644_v12  ;;  %v7629_v12 = vld [vmem:[#allocation3 + $0x98] sm:$0xff] }
0x1416   : > { %7734 = vmatmul.f32.gmra.mxu0 %v7612_v17  ;;  %7943 = vmatmul.f32.gmra.mxu1 %v7612_v17 }
0x141c   : > { %7833 = vmatmul.f32.gmra.mxu2 %v7645_v33  ;;  %8042 = vmatmul.f32.gmra.mxu3 %v7645_v33 }
0x141e   : > { %7737 = vmatmul.f32.gmra.mxu0 %v7613_v39  ;;  %7946 = vmatmul.f32.gmra.mxu1 %v7613_v39 }
0x1424   : > { %7836 = vmatmul.f32.gmra.mxu2 %v7646_v32  ;;  %8045 = vmatmul.f32.gmra.mxu3 %v7646_v32 }
0x1426   : > { %7740 = vmatmul.f32.gmra.mxu0 %v7614_v38  ;;  %7949 = vmatmul.f32.gmra.mxu1 %v7614_v38 }
0x142c   : > { %7839 = vmatmul.f32.gmra.mxu2 %v7647_v5  ;;  %8048 = vmatmul.f32.gmra.mxu3 %v7647_v5 }
0x142e   : > { %7743 = vmatmul.f32.gmra.mxu0 %v7615_v7  ;;  %7952 = vmatmul.f32.gmra.mxu1 %v7615_v7  ;;  %v7662_v7 = vld [vmem:[#allocation3 + $0x1a0] sm:$0xff] }
0x1434   : > { %7842 = vmatmul.f32.gmra.mxu2 %v7648_v55  ;;  %8051 = vmatmul.f32.gmra.mxu3 %v7648_v55 }
0x1436   : > { %7746 = vmatmul.f32.gmra.mxu0 %v7616_v21  ;;  %7955 = vmatmul.f32.gmra.mxu1 %v7616_v21 }
0x143c   : > { %7845 = vmatmul.f32.gmra.mxu2 %v7649_v50  ;;  %8054 = vmatmul.f32.gmra.mxu3 %v7649_v50  ;;  %v7630_v50 = vld [vmem:[#allocation3 + $0xa0] sm:$0xff] }
0x143e   : > { %7749 = vmatmul.f32.gmra.mxu0 %v7617_v29  ;;  %7958 = vmatmul.f32.gmra.mxu1 %v7617_v29 }
0x1444   : > { %7848 = vmatmul.f32.gmra.mxu2 %v7650_v8  ;;  %8057 = vmatmul.f32.gmra.mxu3 %v7650_v8 }
0x1446   : > { %7752 = vmatmul.f32.gmra.mxu0 %v7618_v31  ;;  %7961 = vmatmul.f32.gmra.mxu1 %v7618_v31 }
0x144c   : > { %7851 = vmatmul.f32.gmra.mxu2 %v7651_v30  ;;  %8060 = vmatmul.f32.gmra.mxu3 %v7651_v30 }
0x144e   : > { %7755 = vmatmul.f32.gmra.mxu0 %v7619_v36  ;;  %7964 = vmatmul.f32.gmra.mxu1 %v7619_v36 }
0x1454   : > { %7854 = vmatmul.f32.gmra.mxu2 %v7652_v58  ;;  %8063 = vmatmul.f32.gmra.mxu3 %v7652_v58 }
0x1456   : > { %7758 = vmatmul.f32.gmra.mxu0 %v7620_v4  ;;  %7967 = vmatmul.f32.gmra.mxu1 %v7620_v4  ;;  %v7663_v4 = vld [vmem:[#allocation3 + $0x1a8] sm:$0xff] }
0x145c   : > { %7857 = vmatmul.f32.gmra.mxu2 %v7653_v51  ;;  %8066 = vmatmul.f32.gmra.mxu3 %v7653_v51 }
0x145e   : > { %7761 = vmatmul.f32.gmra.mxu0 %v7621_v11  ;;  %7970 = vmatmul.f32.gmra.mxu1 %v7621_v11 }
0x1464   : > { %7860 = vmatmul.f32.gmra.mxu2 %v7654_v22  ;;  %8069 = vmatmul.f32.gmra.mxu3 %v7654_v22  ;;  %v7631_v22 = vld [vmem:[#allocation3 + $0xa8] sm:$0xff] }
0x1466   : > { %7764 = vmatmul.f32.gmra.mxu0 %v7622_v24  ;;  %7973 = vmatmul.f32.gmra.mxu1 %v7622_v24 }
0x146c   : > { %7863 = vmatmul.f32.gmra.mxu2 %v7655_v62  ;;  %8072 = vmatmul.f32.gmra.mxu3 %v7655_v62 }
0x146e   : > { %7767 = vmatmul.f32.gmra.mxu0 %v7623_v57  ;;  %7976 = vmatmul.f32.gmra.mxu1 %v7623_v57 }
0x1474   : > { %7866 = vmatmul.f32.gmra.mxu2 %v7656_v13  ;;  %8075 = vmatmul.f32.gmra.mxu3 %v7656_v13 }
0x1476   : > { %7770 = vmatmul.f32.gmra.mxu0 %v7624_v34  ;;  %7979 = vmatmul.f32.gmra.mxu1 %v7624_v34 }
0x147c   : > { %7869 = vmatmul.f32.gmra.mxu2 %v7657_v1  ;;  %8078 = vmatmul.f32.gmra.mxu3 %v7657_v1 }
0x147e   : > { %7773 = vmatmul.f32.gmra.mxu0 %v7625_v41  ;;  %7982 = vmatmul.f32.gmra.mxu1 %v7625_v41  ;;  %v7664_v41 = vld [vmem:[#allocation3 + $0x1b0] sm:$0xff] }
0x1483   : > { %v7729_v40 = vpop.f32.mrf.mxu0  ;;  %v7938_v63 = vpop.f32.mrf.mxu1 }
0x1484   : > { %7872 = vmatmul.f32.gmra.mxu2 %v7658_v60  ;;  %8081 = vmatmul.f32.gmra.mxu3 %v7658_v60  ;;  %v7730_v56 = vadd.f32 %v7729_v40, %v12620_v2  ;;  %v7939_v45 = vadd.f32 %v7938_v63, %v12622_v20  ;;  %v7632_v40 = vld [vmem:[#allocation3 + $0xb0] sm:$0xff] }
0x1486   : > { %8130 = vst [vmem:[%s10462_s18] sm:$0xff] %v7730_v56  ;;  %7776 = vmatmul.f32.gmra.mxu0 %v7626_v42  ;;  %7985 = vmatmul.f32.gmra.mxu1 %v7626_v42 }
0x1487   : > { %v7825_v16 = vpop.f32.mrf.mxu2  ;;  %8131 = vst [vmem:[%s10462_s18 + $0x8] sm:$0xff] %v7939_v45  ;;  %v8034_v19 = vpop.f32.mrf.mxu3 }
0x1488   : > { %v7826_v48 = vadd.f32 %v7825_v16, %v12620_v2  ;;  %v8035_v35 = vadd.f32 %v8034_v19, %v12622_v20 }
0x148a   : > { %8194 = vst [vmem:[%s10462_s18 + $0x200] sm:$0xff] %v7826_v48  ;;  %v7665_v48 = vld [vmem:[#allocation3 + $0x1b8] sm:$0xff] }
0x148b   : > { %8195 = vst [vmem:[%s10462_s18 + $0x208] sm:$0xff] %v8035_v35  ;;  %v7732_v37 = vpop.f32.mrf.mxu0  ;;  %v7941_v18 = vpop.f32.mrf.mxu1 }
0x148c   : > { %7875 = vmatmul.f32.gmra.mxu2 %v7659_v25  ;;  %8084 = vmatmul.f32.gmra.mxu3 %v7659_v25  ;;  %v7733_v9 = vadd.f32 %v7732_v37, %v12620_v2  ;;  %v7942_v54 = vadd.f32 %v7941_v18, %v12622_v20  ;;  %v7633_v37 = vld [vmem:[#allocation3 + $0xb8] sm:$0xff] }
0x148e   : > { %8132 = vst [vmem:[%s10462_s18 + $0x10] sm:$0xff] %v7733_v9  ;;  %7779 = vmatmul.f32.gmra.mxu0 %v7627_v15  ;;  %7988 = vmatmul.f32.gmra.mxu1 %v7627_v15 }
0x148f   : > { %v7828_v46 = vpop.f32.mrf.mxu2  ;;  %8133 = vst [vmem:[%s10462_s18 + $0x18] sm:$0xff] %v7942_v54  ;;  %v8037_v0 = vpop.f32.mrf.mxu3 }
0x1490   : > { %v7829_v14 = vadd.f32 %v7828_v46, %v12620_v2  ;;  %v8038_v27 = vadd.f32 %v8037_v0, %v12622_v20 }
0x1492   : > { %8196 = vst [vmem:[%s10462_s18 + $0x210] sm:$0xff] %v7829_v14  ;;  %v7666_v14 = vld [vmem:[#allocation3 + $0x1c0] sm:$0xff] }
0x1493   : > { %8197 = vst [vmem:[%s10462_s18 + $0x218] sm:$0xff] %v8038_v27  ;;  %v7735_v23 = vpop.f32.mrf.mxu0  ;;  %v7944_v10 = vpop.f32.mrf.mxu1 }
0x1494   : > { %7878 = vmatmul.f32.gmra.mxu2 %v7660_v3  ;;  %8087 = vmatmul.f32.gmra.mxu3 %v7660_v3  ;;  %v7736_v59 = vadd.f32 %v7735_v23, %v12620_v2  ;;  %v7945_v61 = vadd.f32 %v7944_v10, %v12622_v20  ;;  %v7634_v23 = vld [vmem:[#allocation3 + $0xc0] sm:$0xff] }
0x1496   : > { %8134 = vst [vmem:[%s10462_s18 + $0x20] sm:$0xff] %v7736_v59  ;;  %7782 = vmatmul.f32.gmra.mxu0 %v7628_v52  ;;  %7991 = vmatmul.f32.gmra.mxu1 %v7628_v52 }
0x1497   : > { %v7831_v26 = vpop.f32.mrf.mxu2  ;;  %8135 = vst [vmem:[%s10462_s18 + $0x28] sm:$0xff] %v7945_v61  ;;  %v8040_v44 = vpop.f32.mrf.mxu3 }
0x1498   : > { %v7832_v28 = vadd.f32 %v7831_v26, %v12620_v2  ;;  %v8041_v6 = vadd.f32 %v8040_v44, %v12622_v20 }
0x149a   : > { %8198 = vst [vmem:[%s10462_s18 + $0x220] sm:$0xff] %v7832_v28  ;;  %v7667_v28 = vld [vmem:[#allocation3 + $0x1c8] sm:$0xff] }
0x149b   : > { %8199 = vst [vmem:[%s10462_s18 + $0x228] sm:$0xff] %v8041_v6  ;;  %v7738_v53 = vpop.f32.mrf.mxu0  ;;  %v7947_v47 = vpop.f32.mrf.mxu1 }
0x149c   : > { %7881 = vmatmul.f32.gmra.mxu2 %v7661_v43  ;;  %8090 = vmatmul.f32.gmra.mxu3 %v7661_v43  ;;  %v7739_v17 = vadd.f32 %v7738_v53, %v12620_v2  ;;  %v7948_v33 = vadd.f32 %v7947_v47, %v12622_v20  ;;  %v7635_v53 = vld [vmem:[#allocation3 + $0xc8] sm:$0xff] }
0x149e   : > { %8136 = vst [vmem:[%s10462_s18 + $0x30] sm:$0xff] %v7739_v17  ;;  %7785 = vmatmul.f32.gmra.mxu0 %v7629_v12  ;;  %7994 = vmatmul.f32.gmra.mxu1 %v7629_v12 }
0x149f   : > { %v7834_v39 = vpop.f32.mrf.mxu2  ;;  %8137 = vst [vmem:[%s10462_s18 + $0x38] sm:$0xff] %v7948_v33  ;;  %v8043_v32 = vpop.f32.mrf.mxu3 }
0x14a0   : > { %v7835_v38 = vadd.f32 %v7834_v39, %v12620_v2  ;;  %v8044_v5 = vadd.f32 %v8043_v32, %v12622_v20 }
0x14a2   : > { %8200 = vst [vmem:[%s10462_s18 + $0x230] sm:$0xff] %v7835_v38  ;;  %v7668_v38 = vld [vmem:[#allocation3 + $0x1d0] sm:$0xff] }
0x14a3   : > { %8201 = vst [vmem:[%s10462_s18 + $0x238] sm:$0xff] %v8044_v5  ;;  %v7741_v55 = vpop.f32.mrf.mxu0  ;;  %v7950_v21 = vpop.f32.mrf.mxu1 }
0x14a4   : > { %7884 = vmatmul.f32.gmra.mxu2 %v7662_v7  ;;  %8093 = vmatmul.f32.gmra.mxu3 %v7662_v7  ;;  %v7742_v29 = vadd.f32 %v7741_v55, %v12620_v2  ;;  %v7951_v8 = vadd.f32 %v7950_v21, %v12622_v20  ;;  %v7636_v55 = vld [vmem:[#allocation3 + $0xd0] sm:$0xff] }
0x14a6   : > { %8138 = vst [vmem:[%s10462_s18 + $0x40] sm:$0xff] %v7742_v29  ;;  %7788 = vmatmul.f32.gmra.mxu0 %v7630_v50  ;;  %7997 = vmatmul.f32.gmra.mxu1 %v7630_v50 }
0x14a7   : > { %v7837_v31 = vpop.f32.mrf.mxu2  ;;  %8139 = vst [vmem:[%s10462_s18 + $0x48] sm:$0xff] %v7951_v8  ;;  %v8046_v30 = vpop.f32.mrf.mxu3 }
0x14a8   : > { %v7838_v36 = vadd.f32 %v7837_v31, %v12620_v2  ;;  %v8047_v58 = vadd.f32 %v8046_v30, %v12622_v20 }
0x14aa   : > { %8202 = vst [vmem:[%s10462_s18 + $0x240] sm:$0xff] %v7838_v36  ;;  %v7669_v36 = vld [vmem:[#allocation3 + $0x1d8] sm:$0xff] }
0x14ab   : > { %8203 = vst [vmem:[%s10462_s18 + $0x248] sm:$0xff] %v8047_v58  ;;  %v7744_v51 = vpop.f32.mrf.mxu0  ;;  %v7953_v11 = vpop.f32.mrf.mxu1 }
0x14ac   : > { %7887 = vmatmul.f32.gmra.mxu2 %v7663_v4  ;;  %8096 = vmatmul.f32.gmra.mxu3 %v7663_v4  ;;  %v7745_v24 = vadd.f32 %v7744_v51, %v12620_v2  ;;  %v7954_v62 = vadd.f32 %v7953_v11, %v12622_v20  ;;  %v7637_v51 = vld [vmem:[#allocation3 + $0xd8] sm:$0xff] }
0x14ae   : > { %8140 = vst [vmem:[%s10462_s18 + $0x50] sm:$0xff] %v7745_v24  ;;  %7791 = vmatmul.f32.gmra.mxu0 %v7631_v22  ;;  %8000 = vmatmul.f32.gmra.mxu1 %v7631_v22 }
0x14af   : > { %v7840_v57 = vpop.f32.mrf.mxu2  ;;  %8141 = vst [vmem:[%s10462_s18 + $0x58] sm:$0xff] %v7954_v62  ;;  %v8049_v13 = vpop.f32.mrf.mxu3 }
0x14b0   : > { %v7841_v34 = vadd.f32 %v7840_v57, %v12620_v2  ;;  %v8050_v1 = vadd.f32 %v8049_v13, %v12622_v20 }
0x14b2   : > { %8204 = vst [vmem:[%s10462_s18 + $0x250] sm:$0xff] %v7841_v34  ;;  %v7670_v34 = vld [vmem:[#allocation3 + $0x1e0] sm:$0xff] }
0x14b3   : > { %8205 = vst [vmem:[%s10462_s18 + $0x258] sm:$0xff] %v8050_v1  ;;  %v7747_v49 = vpop.f32.mrf.mxu0  ;;  %v7956_v60 = vpop.f32.mrf.mxu1 }
0x14b4   : > { %7890 = vmatmul.f32.gmra.mxu2 %v7664_v41  ;;  %8099 = vmatmul.f32.gmra.mxu3 %v7664_v41  ;;  %v7748_v63 = vadd.f32 %v7747_v49, %v12620_v2  ;;  %v7957_v42 = vadd.f32 %v7956_v60, %v12622_v20  ;;  %v7638_v49 = vld [vmem:[#allocation3 + $0xe0] sm:$0xff] }
0x14b6   : > { %8142 = vst [vmem:[%s10462_s18 + $0x60] sm:$0xff] %v7748_v63  ;;  %7794 = vmatmul.f32.gmra.mxu0 %v7632_v40  ;;  %8003 = vmatmul.f32.gmra.mxu1 %v7632_v40 }
0x14b7   : > { %v7843_v56 = vpop.f32.mrf.mxu2  ;;  %8143 = vst [vmem:[%s10462_s18 + $0x68] sm:$0xff] %v7957_v42  ;;  %v8052_v45 = vpop.f32.mrf.mxu3 }
0x14b8   : > { %v7844_v16 = vadd.f32 %v7843_v56, %v12620_v2  ;;  %v8053_v19 = vadd.f32 %v8052_v45, %v12622_v20 }
0x14ba   : > { %8206 = vst [vmem:[%s10462_s18 + $0x260] sm:$0xff] %v7844_v16  ;;  %v7671_v16 = vld [vmem:[#allocation3 + $0x1e8] sm:$0xff] }
0x14bb   : > { %8207 = vst [vmem:[%s10462_s18 + $0x268] sm:$0xff] %v8053_v19  ;;  %v7750_v35 = vpop.f32.mrf.mxu0  ;;  %v7959_v25 = vpop.f32.mrf.mxu1 }
0x14bc   : > { %7893 = vmatmul.f32.gmra.mxu2 %v7665_v48  ;;  %8102 = vmatmul.f32.gmra.mxu3 %v7665_v48  ;;  %v7751_v18 = vadd.f32 %v7750_v35, %v12620_v2  ;;  %v7960_v15 = vadd.f32 %v7959_v25, %v12622_v20  ;;  %v7639_v35 = vld [vmem:[#allocation3 + $0xe8] sm:$0xff] }
0x14be   : > { %8144 = vst [vmem:[%s10462_s18 + $0x70] sm:$0xff] %v7751_v18  ;;  %7797 = vmatmul.f32.gmra.mxu0 %v7633_v37  ;;  %8006 = vmatmul.f32.gmra.mxu1 %v7633_v37 }
0x14bf   : > { %v7846_v9 = vpop.f32.mrf.mxu2  ;;  %8145 = vst [vmem:[%s10462_s18 + $0x78] sm:$0xff] %v7960_v15  ;;  %v8055_v54 = vpop.f32.mrf.mxu3 }
0x14c0   : > { %v7847_v46 = vadd.f32 %v7846_v9, %v12620_v2  ;;  %v8056_v0 = vadd.f32 %v8055_v54, %v12622_v20 }
0x14c2   : > { %8208 = vst [vmem:[%s10462_s18 + $0x270] sm:$0xff] %v7847_v46  ;;  %v7672_v46 = vld [vmem:[#allocation3 + $0x1f0] sm:$0xff] }
0x14c3   : > { %8209 = vst [vmem:[%s10462_s18 + $0x278] sm:$0xff] %v8056_v0  ;;  %v7753_v27 = vpop.f32.mrf.mxu0  ;;  %v7962_v3 = vpop.f32.mrf.mxu1 }
0x14c4   : > { %7896 = vmatmul.f32.gmra.mxu2 %v7666_v14  ;;  %8105 = vmatmul.f32.gmra.mxu3 %v7666_v14  ;;  %v7754_v10 = vadd.f32 %v7753_v27, %v12620_v2  ;;  %v7963_v52 = vadd.f32 %v7962_v3, %v12622_v20  ;;  %v7640_v27 = vld [vmem:[#allocation3 + $0xf0] sm:$0xff] }
0x14c6   : > { %8146 = vst [vmem:[%s10462_s18 + $0x80] sm:$0xff] %v7754_v10  ;;  %7800 = vmatmul.f32.gmra.mxu0 %v7634_v23  ;;  %8009 = vmatmul.f32.gmra.mxu1 %v7634_v23 }
0x14c7   : > { %v7849_v59 = vpop.f32.mrf.mxu2  ;;  %8147 = vst [vmem:[%s10462_s18 + $0x88] sm:$0xff] %v7963_v52  ;;  %v8058_v61 = vpop.f32.mrf.mxu3 }
0x14c8   : > { %v7850_v26 = vadd.f32 %v7849_v59, %v12620_v2  ;;  %v8059_v44 = vadd.f32 %v8058_v61, %v12622_v20 }
0x14ca   : > { %8210 = vst [vmem:[%s10462_s18 + $0x280] sm:$0xff] %v7850_v26  ;;  %v7673_v26 = vld [vmem:[#allocation3 + $0x1f8] sm:$0xff] }
0x14cb   : > { %8211 = vst [vmem:[%s10462_s18 + $0x288] sm:$0xff] %v8059_v44  ;;  %v7756_v6 = vpop.f32.mrf.mxu0  ;;  %v7965_v43 = vpop.f32.mrf.mxu1 }
0x14cc   : > { %7899 = vmatmul.f32.gmra.mxu2 %v7667_v28  ;;  %8108 = vmatmul.f32.gmra.mxu3 %v7667_v28  ;;  %v7757_v47 = vadd.f32 %v7756_v6, %v12620_v2  ;;  %v7966_v12 = vadd.f32 %v7965_v43, %v12622_v20  ;;  %v7641_v6 = vld [vmem:[#allocation3 + $0xf8] sm:$0xff] }
0x14ce   : > { %8148 = vst [vmem:[%s10462_s18 + $0x90] sm:$0xff] %v7757_v47  ;;  %7803 = vmatmul.f32.gmra.mxu0 %v7635_v53  ;;  %8012 = vmatmul.f32.gmra.mxu1 %v7635_v53 }
0x14cf   : > { %v7852_v17 = vpop.f32.mrf.mxu2  ;;  %8149 = vst [vmem:[%s10462_s18 + $0x98] sm:$0xff] %v7966_v12  ;;  %v8061_v33 = vpop.f32.mrf.mxu3 }
0x14d0   : > { %v7853_v39 = vadd.f32 %v7852_v17, %v12620_v2  ;;  %v8062_v32 = vadd.f32 %v8061_v33, %v12622_v20 }
0x14d2   : > { %8212 = vst [vmem:[%s10462_s18 + $0x290] sm:$0xff] %v7853_v39 }
0x14d3   : > { %8213 = vst [vmem:[%s10462_s18 + $0x298] sm:$0xff] %v8062_v32  ;;  %v7759_v5 = vpop.f32.mrf.mxu0  ;;  %v7968_v7 = vpop.f32.mrf.mxu1 }
0x14d4   : > { %7902 = vmatmul.f32.gmra.mxu2 %v7668_v38  ;;  %8111 = vmatmul.f32.gmra.mxu3 %v7668_v38  ;;  %v7760_v21 = vadd.f32 %v7759_v5, %v12620_v2  ;;  %v7969_v50 = vadd.f32 %v7968_v7, %v12622_v20 }
0x14d6   : > { %8150 = vst [vmem:[%s10462_s18 + $0xa0] sm:$0xff] %v7760_v21  ;;  %7806 = vmatmul.f32.gmra.mxu0 %v7636_v55  ;;  %8015 = vmatmul.f32.gmra.mxu1 %v7636_v55 }
0x14d7   : > { %v7855_v29 = vpop.f32.mrf.mxu2  ;;  %8151 = vst [vmem:[%s10462_s18 + $0xa8] sm:$0xff] %v7969_v50  ;;  %v8064_v8 = vpop.f32.mrf.mxu3 }
0x14d8   : > { %v7856_v31 = vadd.f32 %v7855_v29, %v12620_v2  ;;  %v8065_v30 = vadd.f32 %v8064_v8, %v12622_v20 }
0x14da   : > { %8214 = vst [vmem:[%s10462_s18 + $0x2a0] sm:$0xff] %v7856_v31 }
0x14db   : > { %8215 = vst [vmem:[%s10462_s18 + $0x2a8] sm:$0xff] %v8065_v30  ;;  %v7762_v58 = vpop.f32.mrf.mxu0  ;;  %v7971_v4 = vpop.f32.mrf.mxu1 }
0x14dc   : > { %7905 = vmatmul.f32.gmra.mxu2 %v7669_v36  ;;  %8114 = vmatmul.f32.gmra.mxu3 %v7669_v36  ;;  %v7763_v11 = vadd.f32 %v7762_v58, %v12620_v2  ;;  %v7972_v22 = vadd.f32 %v7971_v4, %v12622_v20 }
0x14de   : > { %8152 = vst [vmem:[%s10462_s18 + $0xb0] sm:$0xff] %v7763_v11  ;;  %7809 = vmatmul.f32.gmra.mxu0 %v7637_v51  ;;  %8018 = vmatmul.f32.gmra.mxu1 %v7637_v51 }
0x14df   : > { %v7858_v24 = vpop.f32.mrf.mxu2  ;;  %8153 = vst [vmem:[%s10462_s18 + $0xb8] sm:$0xff] %v7972_v22  ;;  %v8067_v62 = vpop.f32.mrf.mxu3 }
0x14e0   : > { %v7859_v57 = vadd.f32 %v7858_v24, %v12620_v2  ;;  %v8068_v13 = vadd.f32 %v8067_v62, %v12622_v20 }
0x14e2   : > { %8216 = vst [vmem:[%s10462_s18 + $0x2b0] sm:$0xff] %v7859_v57 }
0x14e3   : > { %8217 = vst [vmem:[%s10462_s18 + $0x2b8] sm:$0xff] %v8068_v13  ;;  %v7765_v1 = vpop.f32.mrf.mxu0  ;;  %v7974_v41 = vpop.f32.mrf.mxu1 }
0x14e4   : > { %7908 = vmatmul.f32.gmra.mxu2 %v7670_v34  ;;  %8117 = vmatmul.f32.gmra.mxu3 %v7670_v34  ;;  %v7766_v60 = vadd.f32 %v7765_v1, %v12620_v2  ;;  %v7975_v40 = vadd.f32 %v7974_v41, %v12622_v20 }
0x14e6   : > { %8154 = vst [vmem:[%s10462_s18 + $0xc0] sm:$0xff] %v7766_v60  ;;  %7812 = vmatmul.f32.gmra.mxu0 %v7638_v49  ;;  %8021 = vmatmul.f32.gmra.mxu1 %v7638_v49 }
0x14e7   : > { %v7861_v63 = vpop.f32.mrf.mxu2  ;;  %8155 = vst [vmem:[%s10462_s18 + $0xc8] sm:$0xff] %v7975_v40  ;;  %v8070_v42 = vpop.f32.mrf.mxu3 }
0x14e8   : > { %v7862_v56 = vadd.f32 %v7861_v63, %v12620_v2  ;;  %v8071_v45 = vadd.f32 %v8070_v42, %v12622_v20 }
0x14ea   : > { %8218 = vst [vmem:[%s10462_s18 + $0x2c0] sm:$0xff] %v7862_v56 }
0x14eb   : > { %8219 = vst [vmem:[%s10462_s18 + $0x2c8] sm:$0xff] %v8071_v45  ;;  %v7768_v19 = vpop.f32.mrf.mxu0  ;;  %v7977_v48 = vpop.f32.mrf.mxu1 }
0x14ec   : > { %7911 = vmatmul.f32.gmra.mxu2 %v7671_v16  ;;  %8120 = vmatmul.f32.gmra.mxu3 %v7671_v16  ;;  %v7769_v25 = vadd.f32 %v7768_v19, %v12620_v2  ;;  %v7978_v37 = vadd.f32 %v7977_v48, %v12622_v20 }
0x14ee   : > { %8156 = vst [vmem:[%s10462_s18 + $0xd0] sm:$0xff] %v7769_v25  ;;  %7815 = vmatmul.f32.gmra.mxu0 %v7639_v35  ;;  %8024 = vmatmul.f32.gmra.mxu1 %v7639_v35 }
0x14ef   : > { %v7864_v18 = vpop.f32.mrf.mxu2  ;;  %8157 = vst [vmem:[%s10462_s18 + $0xd8] sm:$0xff] %v7978_v37  ;;  %v8073_v15 = vpop.f32.mrf.mxu3 }
0x14f0   : > { %v7865_v9 = vadd.f32 %v7864_v18, %v12620_v2  ;;  %v8074_v54 = vadd.f32 %v8073_v15, %v12622_v20 }
0x14f2   : > { %8220 = vst [vmem:[%s10462_s18 + $0x2d0] sm:$0xff] %v7865_v9 }
0x14f3   : > { %8221 = vst [vmem:[%s10462_s18 + $0x2d8] sm:$0xff] %v8074_v54  ;;  %v7771_v0 = vpop.f32.mrf.mxu0  ;;  %v7980_v14 = vpop.f32.mrf.mxu1 }
0x14f4   : > { %7914 = vmatmul.f32.gmra.mxu2 %v7672_v46  ;;  %8123 = vmatmul.f32.gmra.mxu3 %v7672_v46  ;;  %v7772_v3 = vadd.f32 %v7771_v0, %v12620_v2  ;;  %v7981_v23 = vadd.f32 %v7980_v14, %v12622_v20 }
0x14f6   : > { %8158 = vst [vmem:[%s10462_s18 + $0xe0] sm:$0xff] %v7772_v3  ;;  %7818 = vmatmul.f32.gmra.mxu0 %v7640_v27  ;;  %8027 = vmatmul.f32.gmra.mxu1 %v7640_v27 }
0x14f7   : > { %v7867_v10 = vpop.f32.mrf.mxu2  ;;  %8159 = vst [vmem:[%s10462_s18 + $0xe8] sm:$0xff] %v7981_v23  ;;  %v8076_v52 = vpop.f32.mrf.mxu3 }
0x14f8   : > { %v7868_v59 = vadd.f32 %v7867_v10, %v12620_v2  ;;  %v8077_v61 = vadd.f32 %v8076_v52, %v12622_v20 }
0x14fa   : > { %8222 = vst [vmem:[%s10462_s18 + $0x2e0] sm:$0xff] %v7868_v59 }
0x14fb   : > { %8223 = vst [vmem:[%s10462_s18 + $0x2e8] sm:$0xff] %v8077_v61  ;;  %v7774_v44 = vpop.f32.mrf.mxu0  ;;  %v7983_v28 = vpop.f32.mrf.mxu1 }
0x14fc   : > { %7917 = vmatmul.f32.gmra.mxu2 %v7673_v26  ;;  %8126 = vmatmul.f32.gmra.mxu3 %v7673_v26  ;;  %v7775_v43 = vadd.f32 %v7774_v44, %v12620_v2  ;;  %v7984_v53 = vadd.f32 %v7983_v28, %v12622_v20 }
0x14fe   : > { %8160 = vst [vmem:[%s10462_s18 + $0xf0] sm:$0xff] %v7775_v43  ;;  %7821 = vmatmul.f32.gmra.mxu0 %v7641_v6  ;;  %8030 = vmatmul.f32.gmra.mxu1 %v7641_v6 }
0x14ff   : > { %v7870_v47 = vpop.f32.mrf.mxu2  ;;  %8161 = vst [vmem:[%s10462_s18 + $0xf8] sm:$0xff] %v7984_v53  ;;  %v8079_v12 = vpop.f32.mrf.mxu3 }
0x1500   : > { %v7871_v17 = vadd.f32 %v7870_v47, %v12620_v2  ;;  %v8080_v33 = vadd.f32 %v8079_v12, %v12622_v20 }
0x1502   : > { %8224 = vst [vmem:[%s10462_s18 + $0x2f0] sm:$0xff] %v7871_v17 }
0x1503   : > { %8225 = vst [vmem:[%s10462_s18 + $0x2f8] sm:$0xff] %v8080_v33  ;;  %v7777_v39 = vpop.f32.mrf.mxu0  ;;  %v7986_v32 = vpop.f32.mrf.mxu1 }
0x1504   : > { %v7778_v38 = vadd.f32 %v7777_v39, %v12620_v2  ;;  %v7987_v5 = vadd.f32 %v7986_v32, %v12622_v20 }
0x1506   : > { %8162 = vst [vmem:[%s10462_s18 + $0x100] sm:$0xff] %v7778_v38 }
0x1507   : > { %v7873_v7 = vpop.f32.mrf.mxu2  ;;  %8163 = vst [vmem:[%s10462_s18 + $0x108] sm:$0xff] %v7987_v5  ;;  %v8082_v55 = vpop.f32.mrf.mxu3 }
0x1508   : > { %v7874_v21 = vadd.f32 %v7873_v7, %v12620_v2  ;;  %v8083_v50 = vadd.f32 %v8082_v55, %v12622_v20 }
0x150a   : > { %8226 = vst [vmem:[%s10462_s18 + $0x300] sm:$0xff] %v7874_v21 }
0x150b   : > { %8227 = vst [vmem:[%s10462_s18 + $0x308] sm:$0xff] %v8083_v50  ;;  %v7780_v29 = vpop.f32.mrf.mxu0  ;;  %v7989_v8 = vpop.f32.mrf.mxu1 }
0x150c   : > { %v7781_v31 = vadd.f32 %v7780_v29, %v12620_v2  ;;  %v7990_v30 = vadd.f32 %v7989_v8, %v12622_v20 }
0x150e   : > { %8164 = vst [vmem:[%s10462_s18 + $0x110] sm:$0xff] %v7781_v31 }
0x150f   : > { %v7876_v36 = vpop.f32.mrf.mxu2  ;;  %8165 = vst [vmem:[%s10462_s18 + $0x118] sm:$0xff] %v7990_v30  ;;  %v8085_v58 = vpop.f32.mrf.mxu3 }
0x1510   : > { %v7877_v4 = vadd.f32 %v7876_v36, %v12620_v2  ;;  %v8086_v51 = vadd.f32 %v8085_v58, %v12622_v20 }
0x1512   : > { %8228 = vst [vmem:[%s10462_s18 + $0x310] sm:$0xff] %v7877_v4 }
0x1513   : > { %8229 = vst [vmem:[%s10462_s18 + $0x318] sm:$0xff] %v8086_v51  ;;  %v7783_v11 = vpop.f32.mrf.mxu0  ;;  %v7992_v22 = vpop.f32.mrf.mxu1 }
0x1514   : > { %v7784_v24 = vadd.f32 %v7783_v11, %v12620_v2  ;;  %v7993_v62 = vadd.f32 %v7992_v22, %v12622_v20 }
0x1516   : > { %8166 = vst [vmem:[%s10462_s18 + $0x120] sm:$0xff] %v7784_v24 }
0x1517   : > { %v7879_v57 = vpop.f32.mrf.mxu2  ;;  %8167 = vst [vmem:[%s10462_s18 + $0x128] sm:$0xff] %v7993_v62  ;;  %v8088_v13 = vpop.f32.mrf.mxu3 }
0x1518   : > { %v7880_v34 = vadd.f32 %v7879_v57, %v12620_v2  ;;  %v8089_v1 = vadd.f32 %v8088_v13, %v12622_v20 }
0x151a   : > { %8230 = vst [vmem:[%s10462_s18 + $0x320] sm:$0xff] %v7880_v34 }
0x151b   : > { %8231 = vst [vmem:[%s10462_s18 + $0x328] sm:$0xff] %v8089_v1  ;;  %v7786_v41 = vpop.f32.mrf.mxu0  ;;  %v7995_v49 = vpop.f32.mrf.mxu1 }
0x151c   : > { %v7787_v60 = vadd.f32 %v7786_v41, %v12620_v2  ;;  %v7996_v40 = vadd.f32 %v7995_v49, %v12622_v20 }
0x151e   : > { %8168 = vst [vmem:[%s10462_s18 + $0x130] sm:$0xff] %v7787_v60 }
0x151f   : > { %v7882_v63 = vpop.f32.mrf.mxu2  ;;  %8169 = vst [vmem:[%s10462_s18 + $0x138] sm:$0xff] %v7996_v40  ;;  %v8091_v42 = vpop.f32.mrf.mxu3 }
0x1520   : > { %v7883_v56 = vadd.f32 %v7882_v63, %v12620_v2  ;;  %v8092_v45 = vadd.f32 %v8091_v42, %v12622_v20 }
0x1522   : > { %8232 = vst [vmem:[%s10462_s18 + $0x330] sm:$0xff] %v7883_v56 }
0x1523   : > { %8233 = vst [vmem:[%s10462_s18 + $0x338] sm:$0xff] %v8092_v45  ;;  %v7789_v16 = vpop.f32.mrf.mxu0  ;;  %v7998_v19 = vpop.f32.mrf.mxu1 }
0x1524   : > { %v7790_v48 = vadd.f32 %v7789_v16, %v12620_v2  ;;  %v7999_v35 = vadd.f32 %v7998_v19, %v12622_v20 }
0x1526   : > { %8170 = vst [vmem:[%s10462_s18 + $0x140] sm:$0xff] %v7790_v48 }
0x1527   : > { %v7885_v25 = vpop.f32.mrf.mxu2  ;;  %8171 = vst [vmem:[%s10462_s18 + $0x148] sm:$0xff] %v7999_v35  ;;  %v8094_v37 = vpop.f32.mrf.mxu3 }
0x1528   : > { %v7886_v18 = vadd.f32 %v7885_v25, %v12620_v2  ;;  %v8095_v15 = vadd.f32 %v8094_v37, %v12622_v20 }
0x152a   : > { %8234 = vst [vmem:[%s10462_s18 + $0x340] sm:$0xff] %v7886_v18 }
0x152b   : > { %8235 = vst [vmem:[%s10462_s18 + $0x348] sm:$0xff] %v8095_v15  ;;  %v7792_v9 = vpop.f32.mrf.mxu0  ;;  %v8001_v54 = vpop.f32.mrf.mxu1 }
0x152c   : > { %v7793_v46 = vadd.f32 %v7792_v9, %v12620_v2  ;;  %v8002_v0 = vadd.f32 %v8001_v54, %v12622_v20 }
0x152e   : > { %8172 = vst [vmem:[%s10462_s18 + $0x150] sm:$0xff] %v7793_v46 }
0x152f   : > { %v7888_v14 = vpop.f32.mrf.mxu2  ;;  %8173 = vst [vmem:[%s10462_s18 + $0x158] sm:$0xff] %v8002_v0  ;;  %v8097_v27 = vpop.f32.mrf.mxu3 }
0x1530   : > { %v7889_v3 = vadd.f32 %v7888_v14, %v12620_v2  ;;  %v8098_v23 = vadd.f32 %v8097_v27, %v12622_v20 }
0x1532   : > { %8236 = vst [vmem:[%s10462_s18 + $0x350] sm:$0xff] %v7889_v3 }
0x1533   : > { %8237 = vst [vmem:[%s10462_s18 + $0x358] sm:$0xff] %v8098_v23  ;;  %v7795_v10 = vpop.f32.mrf.mxu0  ;;  %v8004_v52 = vpop.f32.mrf.mxu1 }
0x1534   : > { %v7796_v59 = vadd.f32 %v7795_v10, %v12620_v2  ;;  %v8005_v61 = vadd.f32 %v8004_v52, %v12622_v20 }
0x1536   : > { %8174 = vst [vmem:[%s10462_s18 + $0x160] sm:$0xff] %v7796_v59 }
0x1537   : > { %v7891_v26 = vpop.f32.mrf.mxu2  ;;  %8175 = vst [vmem:[%s10462_s18 + $0x168] sm:$0xff] %v8005_v61  ;;  %v8100_v44 = vpop.f32.mrf.mxu3 }
0x1538   : > { %v7892_v28 = vadd.f32 %v7891_v26, %v12620_v2  ;;  %v8101_v6 = vadd.f32 %v8100_v44, %v12622_v20 }
0x153a   : > { %8238 = vst [vmem:[%s10462_s18 + $0x360] sm:$0xff] %v7892_v28 }
0x153b   : > { %8239 = vst [vmem:[%s10462_s18 + $0x368] sm:$0xff] %v8101_v6  ;;  %v7798_v43 = vpop.f32.mrf.mxu0  ;;  %v8007_v53 = vpop.f32.mrf.mxu1 }
0x153c   : > { %v7799_v47 = vadd.f32 %v7798_v43, %v12620_v2  ;;  %v8008_v12 = vadd.f32 %v8007_v53, %v12622_v20 }
0x153e   : > { %8176 = vst [vmem:[%s10462_s18 + $0x170] sm:$0xff] %v7799_v47 }
0x153f   : > { %v7894_v17 = vpop.f32.mrf.mxu2  ;;  %8177 = vst [vmem:[%s10462_s18 + $0x178] sm:$0xff] %v8008_v12  ;;  %v8103_v33 = vpop.f32.mrf.mxu3 }
0x1540   : > { %v7895_v39 = vadd.f32 %v7894_v17, %v12620_v2  ;;  %v8104_v32 = vadd.f32 %v8103_v33, %v12622_v20 }
0x1542   : > { %8240 = vst [vmem:[%s10462_s18 + $0x370] sm:$0xff] %v7895_v39 }
0x1543   : > { %8241 = vst [vmem:[%s10462_s18 + $0x378] sm:$0xff] %v8104_v32  ;;  %v7801_v38 = vpop.f32.mrf.mxu0  ;;  %v8010_v5 = vpop.f32.mrf.mxu1 }
0x1544   : > { %v7802_v7 = vadd.f32 %v7801_v38, %v12620_v2  ;;  %v8011_v55 = vadd.f32 %v8010_v5, %v12622_v20 }
0x1546   : > { %8178 = vst [vmem:[%s10462_s18 + $0x180] sm:$0xff] %v7802_v7 }
0x1547   : > { %v7897_v21 = vpop.f32.mrf.mxu2  ;;  %8179 = vst [vmem:[%s10462_s18 + $0x188] sm:$0xff] %v8011_v55  ;;  %v8106_v50 = vpop.f32.mrf.mxu3 }
0x1548   : > { %v7898_v29 = vadd.f32 %v7897_v21, %v12620_v2  ;;  %v8107_v8 = vadd.f32 %v8106_v50, %v12622_v20 }
0x154a   : > { %8242 = vst [vmem:[%s10462_s18 + $0x380] sm:$0xff] %v7898_v29 }
0x154b   : > { %8243 = vst [vmem:[%s10462_s18 + $0x388] sm:$0xff] %v8107_v8  ;;  %v7804_v31 = vpop.f32.mrf.mxu0  ;;  %v8013_v30 = vpop.f32.mrf.mxu1 }
0x154c   : > { %v7805_v36 = vadd.f32 %v7804_v31, %v12620_v2  ;;  %v8014_v58 = vadd.f32 %v8013_v30, %v12622_v20 }
0x154e   : > { %8180 = vst [vmem:[%s10462_s18 + $0x190] sm:$0xff] %v7805_v36 }
0x154f   : > { %v7900_v4 = vpop.f32.mrf.mxu2  ;;  %8181 = vst [vmem:[%s10462_s18 + $0x198] sm:$0xff] %v8014_v58  ;;  %v8109_v51 = vpop.f32.mrf.mxu3 }
0x1550   : > { %v7901_v11 = vadd.f32 %v7900_v4, %v12620_v2  ;;  %v8110_v22 = vadd.f32 %v8109_v51, %v12622_v20 }
0x1552   : > { %8244 = vst [vmem:[%s10462_s18 + $0x390] sm:$0xff] %v7901_v11 }
0x1553   : > { %8245 = vst [vmem:[%s10462_s18 + $0x398] sm:$0xff] %v8110_v22  ;;  %v7807_v24 = vpop.f32.mrf.mxu0  ;;  %v8016_v62 = vpop.f32.mrf.mxu1 }
0x1554   : > { %v7808_v57 = vadd.f32 %v7807_v24, %v12620_v2  ;;  %v8017_v13 = vadd.f32 %v8016_v62, %v12622_v20 }
0x1556   : > { %8182 = vst [vmem:[%s10462_s18 + $0x1a0] sm:$0xff] %v7808_v57 }
0x1557   : > { %v7903_v34 = vpop.f32.mrf.mxu2  ;;  %8183 = vst [vmem:[%s10462_s18 + $0x1a8] sm:$0xff] %v8017_v13  ;;  %v8112_v1 = vpop.f32.mrf.mxu3 }
0x1558   : > { %v7904_v41 = vadd.f32 %v7903_v34, %v12620_v2  ;;  %v8113_v49 = vadd.f32 %v8112_v1, %v12622_v20 }
0x155a   : > { %8246 = vst [vmem:[%s10462_s18 + $0x3a0] sm:$0xff] %v7904_v41 }
0x155b   : > { %8247 = vst [vmem:[%s10462_s18 + $0x3a8] sm:$0xff] %v8113_v49  ;;  %v7810_v60 = vpop.f32.mrf.mxu0  ;;  %v8019_v40 = vpop.f32.mrf.mxu1 }
0x155c   : > { %v7811_v63 = vadd.f32 %v7810_v60, %v12620_v2  ;;  %v8020_v42 = vadd.f32 %v8019_v40, %v12622_v20 }
0x155e   : > { %8184 = vst [vmem:[%s10462_s18 + $0x1b0] sm:$0xff] %v7811_v63 }
0x155f   : > { %v7906_v56 = vpop.f32.mrf.mxu2  ;;  %8185 = vst [vmem:[%s10462_s18 + $0x1b8] sm:$0xff] %v8020_v42  ;;  %v8115_v45 = vpop.f32.mrf.mxu3 }
0x1560   : > { %v7907_v16 = vadd.f32 %v7906_v56, %v12620_v2  ;;  %v8116_v19 = vadd.f32 %v8115_v45, %v12622_v20 }
0x1562   : > { %8248 = vst [vmem:[%s10462_s18 + $0x3b0] sm:$0xff] %v7907_v16 }
0x1563   : > { %8249 = vst [vmem:[%s10462_s18 + $0x3b8] sm:$0xff] %v8116_v19  ;;  %v7813_v48 = vpop.f32.mrf.mxu0  ;;  %v8022_v35 = vpop.f32.mrf.mxu1 }
0x1564   : > { %v7814_v25 = vadd.f32 %v7813_v48, %v12620_v2  ;;  %v8023_v37 = vadd.f32 %v8022_v35, %v12622_v20 }
0x1566   : > { %8186 = vst [vmem:[%s10462_s18 + $0x1c0] sm:$0xff] %v7814_v25 }
0x1567   : > { %v7909_v18 = vpop.f32.mrf.mxu2  ;;  %8187 = vst [vmem:[%s10462_s18 + $0x1c8] sm:$0xff] %v8023_v37  ;;  %v8118_v15 = vpop.f32.mrf.mxu3 }
0x1568   : > { %v7910_v9 = vadd.f32 %v7909_v18, %v12620_v2  ;;  %v8119_v54 = vadd.f32 %v8118_v15, %v12622_v20 }
0x156a   : > { %8250 = vst [vmem:[%s10462_s18 + $0x3c0] sm:$0xff] %v7910_v9 }
0x156b   : > { %8251 = vst [vmem:[%s10462_s18 + $0x3c8] sm:$0xff] %v8119_v54  ;;  %v7816_v46 = vpop.f32.mrf.mxu0  ;;  %v8025_v0 = vpop.f32.mrf.mxu1 }
0x156c   : > { %v7817_v14 = vadd.f32 %v7816_v46, %v12620_v2  ;;  %v8026_v27 = vadd.f32 %v8025_v0, %v12622_v20 }
0x156e   : > { %8188 = vst [vmem:[%s10462_s18 + $0x1d0] sm:$0xff] %v7817_v14 }
0x156f   : > { %v7912_v3 = vpop.f32.mrf.mxu2  ;;  %8189 = vst [vmem:[%s10462_s18 + $0x1d8] sm:$0xff] %v8026_v27  ;;  %v8121_v23 = vpop.f32.mrf.mxu3 }
0x1570   : > { %v7913_v10 = vadd.f32 %v7912_v3, %v12620_v2  ;;  %v8122_v52 = vadd.f32 %v8121_v23, %v12622_v20 }
0x1572   : > { %8252 = vst [vmem:[%s10462_s18 + $0x3d0] sm:$0xff] %v7913_v10 }
0x1573   : > { %8253 = vst [vmem:[%s10462_s18 + $0x3d8] sm:$0xff] %v8122_v52  ;;  %v7819_v59 = vpop.f32.mrf.mxu0  ;;  %v8028_v61 = vpop.f32.mrf.mxu1 }
0x1574   : > { %v7820_v26 = vadd.f32 %v7819_v59, %v12620_v2  ;;  %v8029_v44 = vadd.f32 %v8028_v61, %v12622_v20 }
0x1576   : > { %8190 = vst [vmem:[%s10462_s18 + $0x1e0] sm:$0xff] %v7820_v26 }
0x1577   : > { %v7915_v28 = vpop.f32.mrf.mxu2  ;;  %8191 = vst [vmem:[%s10462_s18 + $0x1e8] sm:$0xff] %v8029_v44  ;;  %v8124_v6 = vpop.f32.mrf.mxu3 }
0x1578   : > { %v7916_v43 = vadd.f32 %v7915_v28, %v12620_v2  ;;  %v8125_v53 = vadd.f32 %v8124_v6, %v12622_v20 }
0x157a   : > { %8254 = vst [vmem:[%s10462_s18 + $0x3e0] sm:$0xff] %v7916_v43 }
0x157b   : > { %8255 = vst [vmem:[%s10462_s18 + $0x3e8] sm:$0xff] %v8125_v53  ;;  %v7822_v47 = vpop.f32.mrf.mxu0  ;;  %v8031_v12 = vpop.f32.mrf.mxu1 }
0x157c   : > { %v7823_v17 = vadd.f32 %v7822_v47, %v12620_v2  ;;  %v8032_v33 = vadd.f32 %v8031_v12, %v12622_v20 }
0x157e   : > { %8192 = vst [vmem:[%s10462_s18 + $0x1f0] sm:$0xff] %v7823_v17 }
0x157f   : > { %v7918_v39 = vpop.f32.mrf.mxu2  ;;  %8193 = vst [vmem:[%s10462_s18 + $0x1f8] sm:$0xff] %v8032_v33  ;;  %v8127_v32 = vpop.f32.mrf.mxu3 }
0x1580   : > { %v7919_v38 = vadd.f32 %v7918_v39, %v12620_v2  ;;  %v8128_v5 = vadd.f32 %v8127_v32, %v12622_v20 }
0x1582   : > { %8256 = vst [vmem:[%s10462_s18 + $0x3f0] sm:$0xff] %v7919_v38 }
0x1583   : > { %8257 = vst [vmem:[%s10462_s18 + $0x3f8] sm:$0xff] %v8128_v5 }
0x1584   : > { %s13009_s30 = sld [smem:[#allocation25_spill]]  ;;  %s8496_s5 = sshll.u32 %s10145_s28, 4 }
0x1585   : > { %s8287_s0 = sshll.u32 %s10462_s18, 4  ;;  %s13011_s15 = sld [smem:[#allocation38_spill]]  ;;  %s8288_s0 = int_to_ptr.vmem [resolvable:$true] %s8287_s0 }
0x1586   : > { %s10203_s17 = smov 1024   ;;  %s10204_s2 = smov 4096  }
0x1587   : > { %8546 = sst [smem:[#allocation15]] (%p10374_p8), %s10203_s17  ;;  %s10205_s28 = smov 4  }
0x1588   : > { %8547 = sst [smem:[#allocation15 + $0x1]] (%p10374_p8), %s10204_s2  ;;  %s10206_s18 = smov 256  }
0x1589   : > { %8548 = sst [smem:[#allocation15 + $0x2]] (%p10374_p8), %s10205_s28  ;;  %s10207_s9 = smov 512  }
0x158a   : > { %s8489_s26 = sshll.u32 %s13009_s30, 1  ;;  %8549 = sst [smem:[#allocation15 + $0x3]] (%p10374_p8), %s10206_s18 }
0x158b   : > { %s8272_s13 = sadd.s32 %s8496_s5, %s8489_s26  ;;  %8550 = sst [smem:[#allocation15 + $0x4]] (%p10374_p8), %s10207_s9 }
0x158c   : > { %s8491_s23 = sshll.u32 %s8272_s13, 3  ;;  %s10208_s16 = smov 16  }
0x158d   : > { %s8276_s10 = scalar_lea.hbm %s13011_s15, %s8491_s23  ;;  %8551 = sst [smem:[#allocation15 + $0x5]] (%p10374_p8), %s10208_s16 }
0x158e   : > { %s8289_s7 = sshll.u32 %s8276_s10, 4  ;;  %s10209_s12 = smov [#allocation14]   ;;  %s8290_s7 = int_to_ptr.hbm [resolvable:$true] %s8289_s7 }
0x158f   : > { %s10210_s21 = smov 0  }
0x1590   : > { %8552 = dma.general (%p10374_p8), %s8288_s0, 16384, %s8290_s7, %s8259_s1, %s10209_s12, [#allocation15], %s10210_s21, 0  }
0x1591 PF: > { %s13012_s24 = sld [smem:[#allocation27_spill]] }
0x1592   : > { %s13013_s11 = sld [smem:[#allocation21_spill]] }
0x1597   : > { %p8564_p9 = scmp.ge.s32.totalorder %s13012_s24, 2 }
0x1598   : > { %s8317_s30 = sand.u32 1, %s13013_s11  }
0x1599   : > { %p8559_p10 = pnand %p8564_p9, %p10382_p11  ;;  %s8318_s26 = scalar_lea.sflag [#allocation6], %s8317_s30 }
0x159b   : > { %p8560_p0 = pneg %p8559_p10 }
0x159d   : > { %10100 = dma.done.wait (%p8560_p0), %s8318_s26, 16384  }
0x159e   : > { %10102 = vsyncadd (%p8560_p0), %s8318_s26, 4294950912  ;;  %s22_s6 = sadd.s32 1, %s13012_s24   ;;  %s13016_s1 = sld [smem:[#allocation22_spill]] }
0x159f   : > { %p12907_p1 = scmp.ge.s32.totalorder %s22_s6, 6   ;;  %s13017_s20 = sld [smem:[#allocation32_spill]] }
0x15a0   : > { %s13018_s13 = sld [smem:[#allocation23_spill]]  ;;  %s13025_s18 = smov %s10109_s19 }
0x15a1   : > { %s13019_s23 = sld [smem:[#allocation30_spill]]  ;;  %s13027_s21 = smov %s10121_s22 }
0x15a2   : > { %s13020_s0 = sld [smem:[#allocation24_spill]]  ;;  %s13029_s24 = smov %s10133_s25 }
0x15a3   : > { %s13021_s26 = sld [smem:[#allocation31_spill]]  ;;  %s13031_s27 = smov %s10149_s29 }
0x15a4   : > { %s13022_s28 = sld [smem:[#allocation26_spill]]  ;;  %s13026_s19 = smov %s13016_s1 }
0x15a5   : > { %s13023_s8 = sld [smem:[#allocation28_spill]] }
0x15a6   : > { %s13024_s30 = sld [smem:[#allocation29_spill]]  ;;  %s13028_s22 = smov %s13018_s13 }
0x15a7   :  { %21 = sbr.rel (!%p12907_p1) target bundleno = 16 (0x10), region = 132 }
0x15a8   : > { %s13030_s25 = smov %s13020_s0 }
0x15ab   : > { %s13032_s29 = smov %s13023_s8 }
0x15ac   :  { %8324 = vsyncpa [#allocation5], 1 }
0x15ad   :  { %8326 = vsyncpa [#allocation5 + $0x1], 1 }
0x15ae   :  { %8327 = vsyncpa [#allocation8], 1 }
0x15af   :  { %8328 = vsyncpa [#allocation6], 1 }
0x15b0   :  { %8330 = vsyncpa [#allocation6 + $0x1], 1 }

</bundles_post_ra>
